<compile_context>
chip_gen: v6e
topology: v6e:2x2x1
jax: 0.10.0
libtpu: 0.0.40
codegen_flags: <defaults>
</compile_context>

<pallas_src>
import functools

import jax
import jax.numpy as jnp
from jax.experimental import pallas as pl
from jax.experimental.pallas import tpu as pltpu


# ----------------------------------------------------------------------------
# Fused kernel: one grid step == one batch element through all layers.
# ----------------------------------------------------------------------------
def _fused_style_block_kernel(x_ref, w_ref, lrb_ref, g_ref, be_ref, o_ref,
                              pad_ref):
    # x_ref  : (1, H, W, C)     unpadded NHWC input for this batch element
    # w_ref  : (nb+1, 9*C, C)   conv weights, rows ordered (kh, kw, cin);
    #                           slot nb is lr_conv
    # lrb_ref: (1, C)           lr_conv bias (rrdb biases cancel under IN)
    # g_ref  : (1, nb, C)       gamma per layer for this batch element
    # be_ref : (1, nb, C)       beta  per layer
    # o_ref  : (1, H, W, C)
    # pad_ref: VMEM (H+2, W+2, C) f32 scratch (halo-padded activation)
    _, H, W, C = o_ref.shape
    nb = g_ref.shape[1]
    HW = H * W

    gam = g_ref[0]                       # (nb, C)
    bet = be_ref[0]                      # (nb, C)

    # Zero halo once, then fill the interior with the input activation.
    pad_ref[...] = jnp.zeros_like(pad_ref)
    pad_ref[1:H + 1, 1:W + 1, :] = x_ref[0].astype(jnp.float32)

    def tap_matrix():
        # im2col built in-register from static slices of the VMEM scratch:
        # (H*W, 9*C), column order (kh, kw, cin) matching w_ref rows.
        taps = []
        for kh in range(3):
            for kw in range(3):
                taps.append(pad_ref[kh:kh + H, kw:kw + W, :].reshape(HW, C))
        return jnp.concatenate(taps, axis=-1)

    for layer in range(nb):
        # Single deep-K MXU matmul (conv3x3, bias omitted - cancels in IN).
        acc = jnp.dot(tap_matrix(), w_ref[layer],
                      preferred_element_type=jnp.float32)        # (HW, C)

        # InstanceNorm2d stats (biased variance, eps=1e-5), single pass, f32.
        mean = jnp.mean(acc, axis=0, keepdims=True)              # (1, C)
        msq = jnp.mean(acc * acc, axis=0, keepdims=True)         # (1, C)
        var = jnp.maximum(msq - mean * mean, 0.0)

        # Fold norm + style modulation into one FMA:
        #   y = (1+g) * (acc - mean) * rsqrt(var+eps) + beta
        scale = (1.0 + gam[layer:layer + 1, :]) * jax.lax.rsqrt(var + 1e-5)
        shift = bet[layer:layer + 1, :] - mean * scale
        y = acc * scale + shift                                  # (HW, C)

        # Next layer's input: rewrite the interior (halo stays zero).
        pad_ref[1:H + 1, 1:W + 1, :] = y.reshape(H, W, C)

    # Final lr_conv (with its bias).
    out = jnp.dot(tap_matrix(), w_ref[nb],
                  preferred_element_type=jnp.float32) + lrb_ref[...]
    o_ref[...] = out.reshape(1, H, W, C).astype(o_ref.dtype)


def _conv_weight_to_mat(w_oihw):
    # OIHW (Cout, Cin, 3, 3) -> (9*Cin, Cout), rows ordered (kh, kw, cin).
    cout = w_oihw.shape[0]
    return jnp.transpose(w_oihw, (2, 3, 1, 0)).reshape(-1, cout)


# ----------------------------------------------------------------------------
# StyleBlock forward (public API keeps PyTorch NCHW layout)
# ----------------------------------------------------------------------------
@functools.partial(jax.jit, static_argnames=("nb",))
def style_block_forward(x, x_feat, params, nb):
    B, C, H, W = x.shape
    h = jnp.transpose(x, (0, 2, 3, 1))                      # NCHW -> NHWC once

    # Tiny style Linears for all layers at once (hoisted out of the kernel).
    tran = (jnp.einsum("bf,nfk->bnk", x_feat, params["trans_w"])
            + params["trans_b"][None])                      # (B, nb, 2C)
    gamma = tran[:, :, :C]                                   # (B, nb, C)
    beta = tran[:, :, C:2 * C]                               # (B, nb, C)

    # Stack all conv weights as (nb+1, 9*C, C); last slot is lr_conv.
    w_rrdb = jnp.transpose(params["rrdb_w"], (0, 3, 4, 2, 1)).reshape(
        nb, 9 * C, C)
    w_lr = _conv_weight_to_mat(params["lr_w"])[None]         # (1, 9C, C)
    w_all = jnp.concatenate([w_rrdb, w_lr], axis=0)          # (nb+1, 9C, C)
    lrb = params["lr_b"].reshape(1, C)
    # NOTE: rrdb conv biases are intentionally dropped (exact no-op under IN).

    n_layers = nb + 1
    flops = 2 * B * H * W * 9 * C * C * n_layers
    bytes_accessed = 4 * (2 * B * H * W * C + n_layers * 9 * C * C
                          + 2 * B * nb * C + C)
    # Rough live-VMEM estimate: in/out blocks (double-buffered) + pad scratch
    # + weights + tap/acc temps, with 2x headroom, clamped to v7x-safe 64 MiB.
    vmem_est = 4 * (4 * H * W * C + (H + 2) * (W + 2) * C
                    + n_layers * 9 * C * C + 16 * H * W * C)
    vmem_limit = int(min(max(2 * vmem_est, 4 * 1024 * 1024), 64 * 1024 * 1024))

    out = pl.pallas_call(
        _fused_style_block_kernel,
        out_shape=jax.ShapeDtypeStruct((B, H, W, C), jnp.float32),
        grid=(B,),
        in_specs=[
            pl.BlockSpec((1, H, W, C), lambda b: (b, 0, 0, 0)),
            pl.BlockSpec((n_layers, 9 * C, C), lambda b: (0, 0, 0)),
            pl.BlockSpec((1, C), lambda b: (0, 0)),
            pl.BlockSpec((1, nb, C), lambda b: (b, 0, 0)),
            pl.BlockSpec((1, nb, C), lambda b: (b, 0, 0)),
        ],
        out_specs=pl.BlockSpec((1, H, W, C), lambda b: (b, 0, 0, 0)),
        scratch_shapes=[pltpu.VMEM((H + 2, W + 2, C), jnp.float32)],
        compiler_params=pltpu.CompilerParams(
            dimension_semantics=("parallel",),
            vmem_limit_bytes=vmem_limit),
        cost_estimate=pl.CostEstimate(
            flops=flops,
            transcendentals=B * nb * C,
            bytes_accessed=bytes_accessed),
    )(h, w_all, lrb, gamma, beta)

    return jnp.transpose(out, (0, 3, 1, 2))                  # NHWC -> NCHW once


# ----------------------------------------------------------------------------
# Pure-JAX reference (correctness check only).
# ----------------------------------------------------------------------------
def ref_forward(x, x_feat, params, nb):
    def conv(x, w, b):
        y = jax.lax.conv_general_dilated(
            x, w, (1, 1), "SAME",
            dimension_numbers=("NCHW", "OIHW", "NCHW"))
        return y + b[None, :, None, None]

    for i in range(nb):
        r = conv(x, params["rrdb_w"][i], params["rrdb_b"][i])
        t = x_feat @ params["trans_w"][i] + params["trans_b"][i]
        C = r.shape[1]
        mean = r.mean(axis=(2, 3), keepdims=True)
        var = ((r - mean) ** 2).mean(axis=(2, 3), keepdims=True)
        xn = (r - mean) / jnp.sqrt(var + 1e-5)
        gamma = t[:, :C][:, :, None, None]
        beta = t[:, C:2 * C][:, :, None, None]
        x = (1.0 + gamma) * xn + beta
    return conv(x, params["lr_w"], params["lr_b"])


if __name__ == "__main__":
    B, C, H, W = 2, 4, 16, 16          # x: NCHW
    F = 8                              # style feature dim
    NB = 2                             # number of RRDB / transform pairs

    key = jax.random.PRNGKey(0)
    keys = jax.random.split(key, 8)

    params = {
        "rrdb_w": 0.1 * jax.random.normal(keys[0], (NB, C, C, 3, 3), jnp.float32),
        "rrdb_b": 0.1 * jax.random.normal(keys[1], (NB, C), jnp.float32),
        "trans_w": 0.1 * jax.random.normal(keys[2], (NB, F, 2 * C), jnp.float32),
        "trans_b": 0.1 * jax.random.normal(keys[3], (NB, 2 * C), jnp.float32),
        "lr_w": 0.1 * jax.random.normal(keys[4], (C, C, 3, 3), jnp.float32),
        "lr_b": 0.1 * jax.random.normal(keys[5], (C,), jnp.float32),
    }
    x = jax.random.normal(keys[6], (B, C, H, W), jnp.float32)
    x_feat = jax.random.normal(keys[7], (B, F), jnp.float32)

    out = style_block_forward(x, x_feat, params, NB)
    out = jax.block_until_ready(out)

    ref = jax.block_until_ready(ref_forward(x, x_feat, params, NB))
    assert out.shape == (B, C, H, W)
    assert jnp.allclose(out, ref, rtol=2e-3, atol=2e-3)

    print("KERNEL_OK")
</pallas_src>

<mosaic_0001>
module attributes {stable_mosaic.version = 11 : i64} {
  func.func @_fused_style_block_kernel(%arg0: i32, %arg1: memref<1x16x16x4xf32, #tpu.memory_space<vmem>>, %arg2: memref<3x36x4xf32, #tpu.memory_space<vmem>>, %arg3: memref<1x4xf32, #tpu.memory_space<vmem>>, %arg4: memref<1x2x4xf32, #tpu.memory_space<vmem>>, %arg5: memref<1x2x4xf32, #tpu.memory_space<vmem>>, %arg6: memref<1x16x16x4xf32, #tpu.memory_space<vmem>>, %arg7: memref<18x18x4xf32, #tpu.memory_space<vmem>>) attributes {dimension_semantics = [#tpu.dimension_semantics<parallel>], iteration_bounds = array<i64: 2>, scalar_prefetch = 0 : i64, scratch_operands = 1 : i64, tpu.core_type = #tpu.core_type<tc>, window_params = [{transform_indices = @transform_0, window_bounds = array<i64: 1, 16, 16, 4>}, {pipeline_mode = #tpu.pipeline_mode<synchronous>, transform_indices = @transform_1, window_bounds = array<i64: 3, 36, 4>}, {pipeline_mode = #tpu.pipeline_mode<synchronous>, transform_indices = @transform_2, window_bounds = array<i64: 1, 4>}, {transform_indices = @transform_3, window_bounds = array<i64: 1, 2, 4>}, {transform_indices = @transform_4, window_bounds = array<i64: 1, 2, 4>}, {transform_indices = @transform_5, window_bounds = array<i64: 1, 16, 16, 4>}]} {
    %c0 = arith.constant 0 : index
    %c0_0 = arith.constant 0 : index
    %c0_1 = arith.constant 0 : index
    %0 = vector.load %arg4[%c0, %c0_0, %c0_1] : memref<1x2x4xf32, #tpu.memory_space<vmem>>, vector<1x2x4xf32>
    %1 = vector.shape_cast %0 : vector<1x2x4xf32> to vector<2x4xf32>
    %c0_2 = arith.constant 0 : index
    %c0_3 = arith.constant 0 : index
    %c0_4 = arith.constant 0 : index
    %2 = vector.load %arg5[%c0_2, %c0_3, %c0_4] : memref<1x2x4xf32, #tpu.memory_space<vmem>>, vector<1x2x4xf32>
    %3 = vector.shape_cast %2 : vector<1x2x4xf32> to vector<2x4xf32>
    %cst = arith.constant 0.000000e+00 : f32
    %4 = vector.broadcast %cst : f32 to vector<18x18x4xf32>
    %c0_5 = arith.constant 0 : index
    %c0_6 = arith.constant 0 : index
    %c0_7 = arith.constant 0 : index
    %5 = vector.load %arg7[%c0_5, %c0_6, %c0_7] : memref<18x18x4xf32, #tpu.memory_space<vmem>>, vector<18x18x4xf32>
    tpu.vector_store %arg7[%c0_5, %c0_6, %c0_7], %4 {strides = array<i32>} : memref<18x18x4xf32, #tpu.memory_space<vmem>>, vector<18x18x4xf32>,
    %c0_8 = arith.constant 0 : index
    %c0_9 = arith.constant 0 : index
    %c0_10 = arith.constant 0 : index
    %c0_11 = arith.constant 0 : index
    %6 = vector.load %arg1[%c0_8, %c0_9, %c0_10, %c0_11] : memref<1x16x16x4xf32, #tpu.memory_space<vmem>>, vector<1x16x16x4xf32>
    %7 = vector.shape_cast %6 : vector<1x16x16x4xf32> to vector<16x16x4xf32>
    %c1 = arith.constant 1 : index
    %c1_12 = arith.constant 1 : index
    %c0_13 = arith.constant 0 : index
    %8 = vector.load %arg7[%c1, %c1_12, %c0_13] : memref<18x18x4xf32, #tpu.memory_space<vmem>>, vector<16x16x4xf32>
    tpu.vector_store %arg7[%c1, %c1_12, %c0_13], %7 {strides = array<i32>} : memref<18x18x4xf32, #tpu.memory_space<vmem>>, vector<16x16x4xf32>,
    %c0_14 = arith.constant 0 : index
    %c0_15 = arith.constant 0 : index
    %c0_16 = arith.constant 0 : index
    %9 = vector.load %arg7[%c0_14, %c0_15, %c0_16] : memref<18x18x4xf32, #tpu.memory_space<vmem>>, vector<16x16x4xf32>
    %10 = vector.shape_cast %9 : vector<16x16x4xf32> to vector<256x4xf32>
    %c0_17 = arith.constant 0 : index
    %c1_18 = arith.constant 1 : index
    %c0_19 = arith.constant 0 : index
    %11 = vector.load %arg7[%c0_17, %c1_18, %c0_19] : memref<18x18x4xf32, #tpu.memory_space<vmem>>, vector<16x16x4xf32>
    %12 = vector.shape_cast %11 : vector<16x16x4xf32> to vector<256x4xf32>
    %c0_20 = arith.constant 0 : index
    %c2 = arith.constant 2 : index
    %c0_21 = arith.constant 0 : index
    %13 = vector.load %arg7[%c0_20, %c2, %c0_21] : memref<18x18x4xf32, #tpu.memory_space<vmem>>, vector<16x16x4xf32>
    %14 = vector.shape_cast %13 : vector<16x16x4xf32> to vector<256x4xf32>
    %c1_22 = arith.constant 1 : index
    %c0_23 = arith.constant 0 : index
    %c0_24 = arith.constant 0 : index
    %15 = vector.load %arg7[%c1_22, %c0_23, %c0_24] : memref<18x18x4xf32, #tpu.memory_space<vmem>>, vector<16x16x4xf32>
    %16 = vector.shape_cast %15 : vector<16x16x4xf32> to vector<256x4xf32>
    %c1_25 = arith.constant 1 : index
    %c1_26 = arith.constant 1 : index
    %c0_27 = arith.constant 0 : index
    %17 = vector.load %arg7[%c1_25, %c1_26, %c0_27] : memref<18x18x4xf32, #tpu.memory_space<vmem>>, vector<16x16x4xf32>
    %18 = vector.shape_cast %17 : vector<16x16x4xf32> to vector<256x4xf32>
    %c1_28 = arith.constant 1 : index
    %c2_29 = arith.constant 2 : index
    %c0_30 = arith.constant 0 : index
    %19 = vector.load %arg7[%c1_28, %c2_29, %c0_30] : memref<18x18x4xf32, #tpu.memory_space<vmem>>, vector<16x16x4xf32>
    %20 = vector.shape_cast %19 : vector<16x16x4xf32> to vector<256x4xf32>
    %c2_31 = arith.constant 2 : index
    %c0_32 = arith.constant 0 : index
    %c0_33 = arith.constant 0 : index
    %21 = vector.load %arg7[%c2_31, %c0_32, %c0_33] : memref<18x18x4xf32, #tpu.memory_space<vmem>>, vector<16x16x4xf32>
    %22 = vector.shape_cast %21 : vector<16x16x4xf32> to vector<256x4xf32>
    %c2_34 = arith.constant 2 : index
    %c1_35 = arith.constant 1 : index
    %c0_36 = arith.constant 0 : index
    %23 = vector.load %arg7[%c2_34, %c1_35, %c0_36] : memref<18x18x4xf32, #tpu.memory_space<vmem>>, vector<16x16x4xf32>
    %24 = vector.shape_cast %23 : vector<16x16x4xf32> to vector<256x4xf32>
    %c2_37 = arith.constant 2 : index
    %c2_38 = arith.constant 2 : index
    %c0_39 = arith.constant 0 : index
    %25 = vector.load %arg7[%c2_37, %c2_38, %c0_39] : memref<18x18x4xf32, #tpu.memory_space<vmem>>, vector<16x16x4xf32>
    %26 = vector.shape_cast %25 : vector<16x16x4xf32> to vector<256x4xf32>
    %27 = tpu.concatenate %10, %12, %14, %16, %18, %20, %22, %24, %26 in 1 : vector<256x4xf32>, vector<256x4xf32>, vector<256x4xf32>, vector<256x4xf32>, vector<256x4xf32>, vector<256x4xf32>, vector<256x4xf32>, vector<256x4xf32>, vector<256x4xf32> -> vector<256x36xf32>
    %c0_40 = arith.constant 0 : index
    %c0_41 = arith.constant 0 : index
    %c0_42 = arith.constant 0 : index
    %28 = vector.load %arg2[%c0_40, %c0_41, %c0_42] : memref<3x36x4xf32, #tpu.memory_space<vmem>>, vector<1x36x4xf32>
    %29 = vector.shape_cast %28 : vector<1x36x4xf32> to vector<36x4xf32>
    %cst_43 = arith.constant dense<0.000000e+00> : vector<256x4xf32>
    %30 = tpu.matmul %27, %29, %cst_43 {dimension_numbers = #tpu.dot_dimension_numbers<[1], [0], [0], [1], [0, 0, 1, 1], [], []>} : vector<256x36xf32>, vector<36x4xf32>, vector<256x4xf32> -> vector<256x4xf32>
    %cst_44 = arith.constant dense<0.000000e+00> : vector<4xf32>
    %31 = vector.multi_reduction <add>, %30, %cst_44 [0] : vector<256x4xf32> to vector<4xf32>
    %32 = vector.shape_cast %31 : vector<4xf32> to vector<1x4xf32>
    %cst_45 = arith.constant 2.560000e+02 : f32
    %33 = vector.broadcast %cst_45 : f32 to vector<1x4xf32>
    %34 = arith.divf %32, %33 : vector<1x4xf32>
    %35 = arith.mulf %30, %30 : vector<256x4xf32>
    %cst_46 = arith.constant dense<0.000000e+00> : vector<4xf32>
    %36 = vector.multi_reduction <add>, %35, %cst_46 [0] : vector<256x4xf32> to vector<4xf32>
    %37 = vector.shape_cast %36 : vector<4xf32> to vector<1x4xf32>
    %cst_47 = arith.constant 2.560000e+02 : f32
    %38 = vector.broadcast %cst_47 : f32 to vector<1x4xf32>
    %39 = arith.divf %37, %38 : vector<1x4xf32>
    %40 = arith.mulf %34, %34 : vector<1x4xf32>
    %41 = arith.subf %39, %40 : vector<1x4xf32>
    %cst_48 = arith.constant 0.000000e+00 : f32
    %42 = vector.broadcast %cst_48 : f32 to vector<1x4xf32>
    %43 = arith.maximumf %41, %42 : vector<1x4xf32>
    %44 = vector.extract_strided_slice %1 {offsets = [0, 0], sizes = [1, 4], strides = [1, 1]} : vector<2x4xf32> to vector<1x4xf32>
    %cst_49 = arith.constant 1.000000e+00 : f32
    %45 = vector.broadcast %cst_49 : f32 to vector<1x4xf32>
    %46 = arith.addf %45, %44 : vector<1x4xf32>
    %cst_50 = arith.constant 9.99999974E-6 : f32
    %47 = vector.broadcast %cst_50 : f32 to vector<1x4xf32>
    %48 = arith.addf %43, %47 : vector<1x4xf32>
    %49 = math.rsqrt %48 : vector<1x4xf32>
    %50 = arith.mulf %46, %49 : vector<1x4xf32>
    %51 = vector.extract_strided_slice %3 {offsets = [0, 0], sizes = [1, 4], strides = [1, 1]} : vector<2x4xf32> to vector<1x4xf32>
    %52 = arith.mulf %34, %50 : vector<1x4xf32>
    %53 = arith.subf %51, %52 : vector<1x4xf32>
    %54 = vector.broadcast %50 : vector<1x4xf32> to vector<256x4xf32>
    %55 = arith.mulf %30, %54 : vector<256x4xf32>
    %56 = vector.broadcast %53 : vector<1x4xf32> to vector<256x4xf32>
    %57 = arith.addf %55, %56 : vector<256x4xf32>
    %58 = vector.shape_cast %57 : vector<256x4xf32> to vector<16x16x4xf32>
    %c1_51 = arith.constant 1 : index
    %c1_52 = arith.constant 1 : index
    %c0_53 = arith.constant 0 : index
    %59 = vector.load %arg7[%c1_51, %c1_52, %c0_53] : memref<18x18x4xf32, #tpu.memory_space<vmem>>, vector<16x16x4xf32>
    tpu.vector_store %arg7[%c1_51, %c1_52, %c0_53], %58 {strides = array<i32>} : memref<18x18x4xf32, #tpu.memory_space<vmem>>, vector<16x16x4xf32>,
    %c0_54 = arith.constant 0 : index
    %c0_55 = arith.constant 0 : index
    %c0_56 = arith.constant 0 : index
    %60 = vector.load %arg7[%c0_54, %c0_55, %c0_56] : memref<18x18x4xf32, #tpu.memory_space<vmem>>, vector<16x16x4xf32>
    %61 = vector.shape_cast %60 : vector<16x16x4xf32> to vector<256x4xf32>
    %c0_57 = arith.constant 0 : index
    %c1_58 = arith.constant 1 : index
    %c0_59 = arith.constant 0 : index
    %62 = vector.load %arg7[%c0_57, %c1_58, %c0_59] : memref<18x18x4xf32, #tpu.memory_space<vmem>>, vector<16x16x4xf32>
    %63 = vector.shape_cast %62 : vector<16x16x4xf32> to vector<256x4xf32>
    %c0_60 = arith.constant 0 : index
    %c2_61 = arith.constant 2 : index
    %c0_62 = arith.constant 0 : index
    %64 = vector.load %arg7[%c0_60, %c2_61, %c0_62] : memref<18x18x4xf32, #tpu.memory_space<vmem>>, vector<16x16x4xf32>
    %65 = vector.shape_cast %64 : vector<16x16x4xf32> to vector<256x4xf32>
    %c1_63 = arith.constant 1 : index
    %c0_64 = arith.constant 0 : index
    %c0_65 = arith.constant 0 : index
    %66 = vector.load %arg7[%c1_63, %c0_64, %c0_65] : memref<18x18x4xf32, #tpu.memory_space<vmem>>, vector<16x16x4xf32>
    %67 = vector.shape_cast %66 : vector<16x16x4xf32> to vector<256x4xf32>
    %c1_66 = arith.constant 1 : index
    %c1_67 = arith.constant 1 : index
    %c0_68 = arith.constant 0 : index
    %68 = vector.load %arg7[%c1_66, %c1_67, %c0_68] : memref<18x18x4xf32, #tpu.memory_space<vmem>>, vector<16x16x4xf32>
    %69 = vector.shape_cast %68 : vector<16x16x4xf32> to vector<256x4xf32>
    %c1_69 = arith.constant 1 : index
    %c2_70 = arith.constant 2 : index
    %c0_71 = arith.constant 0 : index
    %70 = vector.load %arg7[%c1_69, %c2_70, %c0_71] : memref<18x18x4xf32, #tpu.memory_space<vmem>>, vector<16x16x4xf32>
    %71 = vector.shape_cast %70 : vector<16x16x4xf32> to vector<256x4xf32>
    %c2_72 = arith.constant 2 : index
    %c0_73 = arith.constant 0 : index
    %c0_74 = arith.constant 0 : index
    %72 = vector.load %arg7[%c2_72, %c0_73, %c0_74] : memref<18x18x4xf32, #tpu.memory_space<vmem>>, vector<16x16x4xf32>
    %73 = vector.shape_cast %72 : vector<16x16x4xf32> to vector<256x4xf32>
    %c2_75 = arith.constant 2 : index
    %c1_76 = arith.constant 1 : index
    %c0_77 = arith.constant 0 : index
    %74 = vector.load %arg7[%c2_75, %c1_76, %c0_77] : memref<18x18x4xf32, #tpu.memory_space<vmem>>, vector<16x16x4xf32>
    %75 = vector.shape_cast %74 : vector<16x16x4xf32> to vector<256x4xf32>
    %c2_78 = arith.constant 2 : index
    %c2_79 = arith.constant 2 : index
    %c0_80 = arith.constant 0 : index
    %76 = vector.load %arg7[%c2_78, %c2_79, %c0_80] : memref<18x18x4xf32, #tpu.memory_space<vmem>>, vector<16x16x4xf32>
    %77 = vector.shape_cast %76 : vector<16x16x4xf32> to vector<256x4xf32>
    %78 = tpu.concatenate %61, %63, %65, %67, %69, %71, %73, %75, %77 in 1 : vector<256x4xf32>, vector<256x4xf32>, vector<256x4xf32>, vector<256x4xf32>, vector<256x4xf32>, vector<256x4xf32>, vector<256x4xf32>, vector<256x4xf32>, vector<256x4xf32> -> vector<256x36xf32>
    %c1_81 = arith.constant 1 : index
    %c0_82 = arith.constant 0 : index
    %c0_83 = arith.constant 0 : index
    %79 = vector.load %arg2[%c1_81, %c0_82, %c0_83] : memref<3x36x4xf32, #tpu.memory_space<vmem>>, vector<1x36x4xf32>
    %80 = vector.shape_cast %79 : vector<1x36x4xf32> to vector<36x4xf32>
    %cst_84 = arith.constant dense<0.000000e+00> : vector<256x4xf32>
    %81 = tpu.matmul %78, %80, %cst_84 {dimension_numbers = #tpu.dot_dimension_numbers<[1], [0], [0], [1], [0, 0, 1, 1], [], []>} : vector<256x36xf32>, vector<36x4xf32>, vector<256x4xf32> -> vector<256x4xf32>
    %cst_85 = arith.constant dense<0.000000e+00> : vector<4xf32>
    %82 = vector.multi_reduction <add>, %81, %cst_85 [0] : vector<256x4xf32> to vector<4xf32>
    %83 = vector.shape_cast %82 : vector<4xf32> to vector<1x4xf32>
    %cst_86 = arith.constant 2.560000e+02 : f32
    %84 = vector.broadcast %cst_86 : f32 to vector<1x4xf32>
    %85 = arith.divf %83, %84 : vector<1x4xf32>
    %86 = arith.mulf %81, %81 : vector<256x4xf32>
    %cst_87 = arith.constant dense<0.000000e+00> : vector<4xf32>
    %87 = vector.multi_reduction <add>, %86, %cst_87 [0] : vector<256x4xf32> to vector<4xf32>
    %88 = vector.shape_cast %87 : vector<4xf32> to vector<1x4xf32>
    %cst_88 = arith.constant 2.560000e+02 : f32
    %89 = vector.broadcast %cst_88 : f32 to vector<1x4xf32>
    %90 = arith.divf %88, %89 : vector<1x4xf32>
    %91 = arith.mulf %85, %85 : vector<1x4xf32>
    %92 = arith.subf %90, %91 : vector<1x4xf32>
    %cst_89 = arith.constant 0.000000e+00 : f32
    %93 = vector.broadcast %cst_89 : f32 to vector<1x4xf32>
    %94 = arith.maximumf %92, %93 : vector<1x4xf32>
    %95 = vector.extract_strided_slice %1 {offsets = [1, 0], sizes = [1, 4], strides = [1, 1]} : vector<2x4xf32> to vector<1x4xf32>
    %cst_90 = arith.constant 1.000000e+00 : f32
    %96 = vector.broadcast %cst_90 : f32 to vector<1x4xf32>
    %97 = arith.addf %96, %95 : vector<1x4xf32>
    %cst_91 = arith.constant 9.99999974E-6 : f32
    %98 = vector.broadcast %cst_91 : f32 to vector<1x4xf32>
    %99 = arith.addf %94, %98 : vector<1x4xf32>
    %100 = math.rsqrt %99 : vector<1x4xf32>
    %101 = arith.mulf %97, %100 : vector<1x4xf32>
    %102 = vector.extract_strided_slice %3 {offsets = [1, 0], sizes = [1, 4], strides = [1, 1]} : vector<2x4xf32> to vector<1x4xf32>
    %103 = arith.mulf %85, %101 : vector<1x4xf32>
    %104 = arith.subf %102, %103 : vector<1x4xf32>
    %105 = vector.broadcast %101 : vector<1x4xf32> to vector<256x4xf32>
    %106 = arith.mulf %81, %105 : vector<256x4xf32>
    %107 = vector.broadcast %104 : vector<1x4xf32> to vector<256x4xf32>
    %108 = arith.addf %106, %107 : vector<256x4xf32>
    %109 = vector.shape_cast %108 : vector<256x4xf32> to vector<16x16x4xf32>
    %c1_92 = arith.constant 1 : index
    %c1_93 = arith.constant 1 : index
    %c0_94 = arith.constant 0 : index
    %110 = vector.load %arg7[%c1_92, %c1_93, %c0_94] : memref<18x18x4xf32, #tpu.memory_space<vmem>>, vector<16x16x4xf32>
    tpu.vector_store %arg7[%c1_92, %c1_93, %c0_94], %109 {strides = array<i32>} : memref<18x18x4xf32, #tpu.memory_space<vmem>>, vector<16x16x4xf32>,
    %c0_95 = arith.constant 0 : index
    %c0_96 = arith.constant 0 : index
    %c0_97 = arith.constant 0 : index
    %111 = vector.load %arg7[%c0_95, %c0_96, %c0_97] : memref<18x18x4xf32, #tpu.memory_space<vmem>>, vector<16x16x4xf32>
    %112 = vector.shape_cast %111 : vector<16x16x4xf32> to vector<256x4xf32>
    %c0_98 = arith.constant 0 : index
    %c1_99 = arith.constant 1 : index
    %c0_100 = arith.constant 0 : index
    %113 = vector.load %arg7[%c0_98, %c1_99, %c0_100] : memref<18x18x4xf32, #tpu.memory_space<vmem>>, vector<16x16x4xf32>
    %114 = vector.shape_cast %113 : vector<16x16x4xf32> to vector<256x4xf32>
    %c0_101 = arith.constant 0 : index
    %c2_102 = arith.constant 2 : index
    %c0_103 = arith.constant 0 : index
    %115 = vector.load %arg7[%c0_101, %c2_102, %c0_103] : memref<18x18x4xf32, #tpu.memory_space<vmem>>, vector<16x16x4xf32>
    %116 = vector.shape_cast %115 : vector<16x16x4xf32> to vector<256x4xf32>
    %c1_104 = arith.constant 1 : index
    %c0_105 = arith.constant 0 : index
    %c0_106 = arith.constant 0 : index
    %117 = vector.load %arg7[%c1_104, %c0_105, %c0_106] : memref<18x18x4xf32, #tpu.memory_space<vmem>>, vector<16x16x4xf32>
    %118 = vector.shape_cast %117 : vector<16x16x4xf32> to vector<256x4xf32>
    %c1_107 = arith.constant 1 : index
    %c1_108 = arith.constant 1 : index
    %c0_109 = arith.constant 0 : index
    %119 = vector.load %arg7[%c1_107, %c1_108, %c0_109] : memref<18x18x4xf32, #tpu.memory_space<vmem>>, vector<16x16x4xf32>
    %120 = vector.shape_cast %119 : vector<16x16x4xf32> to vector<256x4xf32>
    %c1_110 = arith.constant 1 : index
    %c2_111 = arith.constant 2 : index
    %c0_112 = arith.constant 0 : index
    %121 = vector.load %arg7[%c1_110, %c2_111, %c0_112] : memref<18x18x4xf32, #tpu.memory_space<vmem>>, vector<16x16x4xf32>
    %122 = vector.shape_cast %121 : vector<16x16x4xf32> to vector<256x4xf32>
    %c2_113 = arith.constant 2 : index
    %c0_114 = arith.constant 0 : index
    %c0_115 = arith.constant 0 : index
    %123 = vector.load %arg7[%c2_113, %c0_114, %c0_115] : memref<18x18x4xf32, #tpu.memory_space<vmem>>, vector<16x16x4xf32>
    %124 = vector.shape_cast %123 : vector<16x16x4xf32> to vector<256x4xf32>
    %c2_116 = arith.constant 2 : index
    %c1_117 = arith.constant 1 : index
    %c0_118 = arith.constant 0 : index
    %125 = vector.load %arg7[%c2_116, %c1_117, %c0_118] : memref<18x18x4xf32, #tpu.memory_space<vmem>>, vector<16x16x4xf32>
    %126 = vector.shape_cast %125 : vector<16x16x4xf32> to vector<256x4xf32>
    %c2_119 = arith.constant 2 : index
    %c2_120 = arith.constant 2 : index
    %c0_121 = arith.constant 0 : index
    %127 = vector.load %arg7[%c2_119, %c2_120, %c0_121] : memref<18x18x4xf32, #tpu.memory_space<vmem>>, vector<16x16x4xf32>
    %128 = vector.shape_cast %127 : vector<16x16x4xf32> to vector<256x4xf32>
    %129 = tpu.concatenate %112, %114, %116, %118, %120, %122, %124, %126, %128 in 1 : vector<256x4xf32>, vector<256x4xf32>, vector<256x4xf32>, vector<256x4xf32>, vector<256x4xf32>, vector<256x4xf32>, vector<256x4xf32>, vector<256x4xf32>, vector<256x4xf32> -> vector<256x36xf32>
    %c2_122 = arith.constant 2 : index
    %c0_123 = arith.constant 0 : index
    %c0_124 = arith.constant 0 : index
    %130 = vector.load %arg2[%c2_122, %c0_123, %c0_124] : memref<3x36x4xf32, #tpu.memory_space<vmem>>, vector<1x36x4xf32>
    %131 = vector.shape_cast %130 : vector<1x36x4xf32> to vector<36x4xf32>
    %cst_125 = arith.constant dense<0.000000e+00> : vector<256x4xf32>
    %132 = tpu.matmul %129, %131, %cst_125 {dimension_numbers = #tpu.dot_dimension_numbers<[1], [0], [0], [1], [0, 0, 1, 1], [], []>} : vector<256x36xf32>, vector<36x4xf32>, vector<256x4xf32> -> vector<256x4xf32>
    %c0_126 = arith.constant 0 : index
    %c0_127 = arith.constant 0 : index
    %133 = vector.load %arg3[%c0_126, %c0_127] : memref<1x4xf32, #tpu.memory_space<vmem>>, vector<1x4xf32>
    %134 = vector.broadcast %133 : vector<1x4xf32> to vector<256x4xf32>
    %135 = arith.addf %132, %134 : vector<256x4xf32>
    %136 = vector.shape_cast %135 : vector<256x4xf32> to vector<1x16x16x4xf32>
    %c0_128 = arith.constant 0 : index
    %c0_129 = arith.constant 0 : index
    %c0_130 = arith.constant 0 : index
    %c0_131 = arith.constant 0 : index
    %137 = vector.load %arg6[%c0_128, %c0_129, %c0_130, %c0_131] : memref<1x16x16x4xf32, #tpu.memory_space<vmem>>, vector<1x16x16x4xf32>
    tpu.vector_store %arg6[%c0_128, %c0_129, %c0_130, %c0_131], %136 {strides = array<i32>} : memref<1x16x16x4xf32, #tpu.memory_space<vmem>>, vector<1x16x16x4xf32>,
    return
  }
  func.func @transform_0(%arg0: i32) -> (i32, i32, i32, i32) {
    %c0_i32 = arith.constant 0 : i32
    %c0_i32_0 = arith.constant 0 : i32
    %c0_i32_1 = arith.constant 0 : i32
    %c0_i32_2 = arith.constant 0 : i32
    return %arg0, %c0_i32, %c0_i32_0, %c0_i32_1 : i32, i32, i32, i32
  }
  func.func @transform_1(%arg0: i32) -> (i32, i32, i32) {
    %c0_i32 = arith.constant 0 : i32
    %c0_i32_0 = arith.constant 0 : i32
    %c0_i32_1 = arith.constant 0 : i32
    %c0_i32_2 = arith.constant 0 : i32
    return %c0_i32, %c0_i32_0, %c0_i32_1 : i32, i32, i32
  }
  func.func @transform_2(%arg0: i32) -> (i32, i32) {
    %c0_i32 = arith.constant 0 : i32
    %c0_i32_0 = arith.constant 0 : i32
    %c0_i32_1 = arith.constant 0 : i32
    return %c0_i32, %c0_i32_0 : i32, i32
  }
  func.func @transform_3(%arg0: i32) -> (i32, i32, i32) {
    %c0_i32 = arith.constant 0 : i32
    %c0_i32_0 = arith.constant 0 : i32
    %c0_i32_1 = arith.constant 0 : i32
    return %arg0, %c0_i32, %c0_i32_0 : i32, i32, i32
  }
  func.func @transform_4(%arg0: i32) -> (i32, i32, i32) {
    %c0_i32 = arith.constant 0 : i32
    %c0_i32_0 = arith.constant 0 : i32
    %c0_i32_1 = arith.constant 0 : i32
    return %arg0, %c0_i32, %c0_i32_0 : i32, i32, i32
  }
  func.func @transform_5(%arg0: i32) -> (i32, i32, i32, i32) {
    %c0_i32 = arith.constant 0 : i32
    %c0_i32_0 = arith.constant 0 : i32
    %c0_i32_1 = arith.constant 0 : i32
    %c0_i32_2 = arith.constant 0 : i32
    return %arg0, %c0_i32, %c0_i32_0, %c0_i32_1 : i32, i32, i32, i32
  }
}

</mosaic_0001>

<bundles_post_ra>
// kernel: style_block_forward.1
= control target key start
LH: loop header
LB: loop body
LE: loop exit
PB: predicated region body
PF: predicated region fallthrough
CT: control target
= control target key end

     0   :  { %s7333_s18 = smov 0   ;;  %s12312_s0 = inlined_call_operand.vmem [shape: f32[2,16,16,4], index: 0, kind: input, shape index: {}]   ;;  %s12313_s1 = inlined_call_operand.vmem [shape: f32[3,36,4], index: 1, kind: input, shape index: {}]   ;;  %s12314_s2 = inlined_call_operand.vmem [shape: f32[1,4], index: 2, kind: input, shape index: {}]   ;;  %s12315_s3 = inlined_call_operand.vmem [shape: f32[2,2,4], index: 3, kind: input, shape index: {}]   ;;  %s12316_s4 = inlined_call_operand.vmem [shape: f32[2,2,4], index: 4, kind: input, shape index: {}]   ;;  %s12317_s5 = inlined_call_operand.vmem [shape: f32[2,16,16,4], index: 5, kind: output, shape index: {}]  }
   0x1 LB: > { %s6773_s19 = sadd.s32 4294967295, %s7292_s18   ;;  %p6777_p0 = scmp.ge.s32.totalorder %s7292_s18, 1  ;;  %s7292_s18 = sphi %s7333_s18, %s15_s18  }
   0x2   : > { %p205_p1 = scmp.lt.s32.totalorder %s7292_s18, 3 }
   0x4   : > { %p206_p2 = pnand %p6777_p0, %p205_p1 }
   0x6   : > { %209 = sbr.rel (%p206_p2) target bundleno = 2631 (0xa47), region = 40 }
   0xb   : > { %vm261_vm0 = vcmask 31744   ;;  %vm264_vm1 = vcmask 25600   ;;  %p7343_p3 = scmp.lt.s32.totalorder %s6773_s19, 1  ;;  %v7294_v0 = vmov 0.0   ;;  %s7295_s25 = smov 4   ;;  %vm2060_vm2 = vcmask 1043456  }
   0xc   : > { %262 = vst.msk [vmem:[#allocation2] sm:$0xff] %vm261_vm0, %v7294_v0  ;;  %263 = vst.msk [vmem:[#allocation2 + $0x8] sm:$0xff] %vm261_vm0, %v7294_v0  ;;  %s7296_s26 = smov 8   ;;  %s7297_s27 = smov 12   ;;  %vm1727_vm3 = vcmask 64512   ;;  %vm1760_vm4 = vcmask 97280  }
   0xd   : > { %266 = vst.msk [vmem:[#allocation2 + $0x18] sm:$0xff] %vm261_vm0, %v7294_v0  ;;  %267 = vst.msk [vmem:[#allocation2 + $0x20] sm:$0xff] %vm261_vm0, %v7294_v0  ;;  %s13223_s19 = smov (!%p7343_p3, %s6773_s19), 1  ;;  %s7298_s28 = smov 16   ;;  %vm1793_vm5 = vcmask 130048   ;;  %vm1826_vm6 = vcmask 162816  }
   0xe   : > { %269 = vst.msk [vmem:[#allocation2 + $0x30] sm:$0xff] %vm261_vm0, %v7294_v0  ;;  %270 = vst.msk [vmem:[#allocation2 + $0x38] sm:$0xff] %vm261_vm0, %v7294_v0  ;;  %s6896_s21 = sshll.u32 %s13223_s19, 8  ;;  %s7299_s29 = smov 20   ;;  %vm1859_vm7 = vcmask 195584   ;;  %vm1892_vm8 = vcmask 228352  }
   0xf   : > { %272 = vst.msk [vmem:[#allocation2 + $0x48] sm:$0xff] %vm261_vm0, %v7294_v0  ;;  %273 = vst.msk [vmem:[#allocation2 + $0x50] sm:$0xff] %vm261_vm0, %v7294_v0  ;;  %s7413_s24 = scalar_lea.vmem %s12312_s0, %s6896_s21  ;;  %s7300_s30 = smov 24   ;;  %vm1925_vm9 = vcmask 261120   ;;  %vm1963_vm10 = vcmask 293888  }
  0x10   : > { %275 = vst.msk [vmem:[#allocation2 + $0x60] sm:$0xff] %vm261_vm0, %v7294_v0  ;;  %276 = vst.msk [vmem:[#allocation2 + $0x68] sm:$0xff] %vm261_vm0, %v7294_v0  ;;  %v317_v1 = vld [vmem:[%s7413_s24] sm:$0xff]  ;;  %v319_v2 = vld [vmem:[%s7413_s24 + $0x10] sm:$0xff]  ;;  %s7301_s6 = smov 28   ;;  %s7302_s17 = smov 32  }
  0x11   : > { %278 = vst.msk [vmem:[#allocation2 + $0x78] sm:$0xff] %vm261_vm0, %v7294_v0  ;;  %279 = vst.msk [vmem:[#allocation2 + $0x80] sm:$0xff] %vm261_vm0, %v7294_v0  ;;  %v318_v3 = vld [vmem:[%s7413_s24 + $0x8] sm:$0xff]  ;;  %v321_v4 = vld [vmem:[%s7413_s24 + $0x20] sm:$0xff]  ;;  %s6780_s20 = sshll.u32 %s13223_s19, 1 }
  0x12   : > { %281 = vst.msk [vmem:[#allocation2 + $0x90] sm:$0xff] %vm261_vm0, %v7294_v0  ;;  %282 = vst.msk [vmem:[#allocation2 + $0x98] sm:$0xff] %vm261_vm0, %v7294_v0  ;;  %v320_v5 = vld [vmem:[%s7413_s24 + $0x18] sm:$0xff]  ;;  %v323_v6 = vld [vmem:[%s7413_s24 + $0x30] sm:$0xff]  ;;  %s9319_s9 = scalar_lea.vmem %s12316_s4, %s6780_s20 }
  0x13   : > { %284 = vst.msk [vmem:[#allocation2 + $0xa8] sm:$0xff] %vm261_vm0, %v7294_v0  ;;  %285 = vst.msk [vmem:[#allocation2 + $0xb0] sm:$0xff] %vm261_vm0, %v7294_v0  ;;  %v414_v7 = vld [vmem:[#allocation2 + $0x1] sm:$0xff]  ;;  %v324_v11 = vld [vmem:[%s7413_s24 + $0x38] sm:$0xff] }
  0x14   : > { %287 = vst.msk [vmem:[#allocation2 + $0xc0] sm:$0xff] %vm261_vm0, %v7294_v0  ;;  %288 = vst.msk [vmem:[#allocation2 + $0xc8] sm:$0xff] %vm261_vm0, %v7294_v0  ;;  %v322_v9 = vld [vmem:[%s7413_s24 + $0x28] sm:$0xff]  ;;  %703 = vrot.lane.b32.xlu0 %v414_v7, %s7295_s25  ;;  %v325_v10 = vld [vmem:[%s7413_s24 + $0x40] sm:$0xff] }
  0x15   : > { %290 = vst.msk [vmem:[#allocation2 + $0xd8] sm:$0xff] %vm261_vm0, %v7294_v0  ;;  %291 = vst.msk [vmem:[#allocation2 + $0xe0] sm:$0xff] %vm261_vm0, %v7294_v0  ;;  %v327_v12 = vld [vmem:[%s7413_s24 + $0x50] sm:$0xff]  ;;  %v326_v13 = vld [vmem:[%s7413_s24 + $0x48] sm:$0xff] }
  0x16   : > { %293 = vst.msk [vmem:[#allocation2 + $0xf0] sm:$0xff] %vm261_vm0, %v7294_v0  ;;  %294 = vst.msk [vmem:[#allocation2 + $0xf8] sm:$0xff] %vm261_vm0, %v7294_v0  ;;  %v329_v14 = vld [vmem:[%s7413_s24 + $0x60] sm:$0xff]  ;;  %v328_v15 = vld [vmem:[%s7413_s24 + $0x58] sm:$0xff] }
  0x17   : > { %296 = vst.msk [vmem:[#allocation2 + $0x108] sm:$0xff] %vm261_vm0, %v7294_v0  ;;  %297 = vst.msk [vmem:[#allocation2 + $0x110] sm:$0xff] %vm261_vm0, %v7294_v0  ;;  %v331_v16 = vld [vmem:[%s7413_s24 + $0x70] sm:$0xff]  ;;  %v330_v17 = vld [vmem:[%s7413_s24 + $0x68] sm:$0xff] }
  0x18   : > { %299 = vst.msk [vmem:[#allocation2 + $0x120] sm:$0xff] %vm261_vm0, %v7294_v0  ;;  %300 = vst.msk [vmem:[#allocation2 + $0x128] sm:$0xff] %vm261_vm0, %v7294_v0  ;;  %v333_v18 = vld [vmem:[%s7413_s24 + $0x80] sm:$0xff]  ;;  %v332_v19 = vld [vmem:[%s7413_s24 + $0x78] sm:$0xff] }
  0x19   : > { %302 = vst.msk [vmem:[#allocation2 + $0x138] sm:$0xff] %vm261_vm0, %v7294_v0  ;;  %303 = vst.msk [vmem:[#allocation2 + $0x140] sm:$0xff] %vm261_vm0, %v7294_v0  ;;  %v335_v20 = vld [vmem:[%s7413_s24 + $0x90] sm:$0xff]  ;;  %v334_v21 = vld [vmem:[%s7413_s24 + $0x88] sm:$0xff] }
  0x1a   : > { %305 = vst.msk [vmem:[#allocation2 + $0x150] sm:$0xff] %vm261_vm0, %v7294_v0  ;;  %306 = vst.msk [vmem:[#allocation2 + $0x158] sm:$0xff] %vm261_vm0, %v7294_v0  ;;  %v337_v22 = vld [vmem:[%s7413_s24 + $0xa0] sm:$0xff]  ;;  %v336_v23 = vld [vmem:[%s7413_s24 + $0x98] sm:$0xff] }
  0x1b   : > { %308 = vst.msk [vmem:[#allocation2 + $0x168] sm:$0xff] %vm261_vm0, %v7294_v0  ;;  %309 = vst.msk [vmem:[#allocation2 + $0x170] sm:$0xff] %vm261_vm0, %v7294_v0  ;;  %v339_v24 = vld [vmem:[%s7413_s24 + $0xb0] sm:$0xff]  ;;  %v338_v28 = vld [vmem:[%s7413_s24 + $0xa8] sm:$0xff] }
  0x1c   : > { %311 = vst.msk [vmem:[#allocation2 + $0x180] sm:$0xff] %vm261_vm0, %v7294_v0  ;;  %312 = vst.msk [vmem:[#allocation2 + $0x188] sm:$0xff] %vm261_vm0, %v7294_v0  ;;  %v341_v29 = vld [vmem:[%s7413_s24 + $0xc0] sm:$0xff]  ;;  %v340_v33 = vld [vmem:[%s7413_s24 + $0xb8] sm:$0xff] }
  0x1d   : > { %314 = vst.msk [vmem:[#allocation2 + $0x198] sm:$0xff] %vm261_vm0, %v7294_v0  ;;  %315 = vst.msk [vmem:[#allocation2 + $0x1a0] sm:$0xff] %vm261_vm0, %v7294_v0  ;;  %v343_v34 = vld [vmem:[%s7413_s24 + $0xd0] sm:$0xff]  ;;  %v342_v35 = vld [vmem:[%s7413_s24 + $0xc8] sm:$0xff] }
  0x1e   : > { %265 = vst.msk [vmem:[#allocation2 + $0x10] sm:$0x3] %vm264_vm1, %v7294_v0  ;;  %268 = vst.msk [vmem:[#allocation2 + $0x28] sm:$0x3] %vm264_vm1, %v7294_v0  ;;  %v345_v36 = vld [vmem:[%s7413_s24 + $0xe0] sm:$0xff]  ;;  %v344_v37 = vld [vmem:[%s7413_s24 + $0xd8] sm:$0xff] }
  0x1f   : > { %271 = vst.msk [vmem:[#allocation2 + $0x40] sm:$0x3] %vm264_vm1, %v7294_v0  ;;  %274 = vst.msk [vmem:[#allocation2 + $0x58] sm:$0x3] %vm264_vm1, %v7294_v0  ;;  %v346_v39 = vld [vmem:[%s7413_s24 + $0xe8] sm:$0xff]  ;;  %v347_v58 = vld [vmem:[%s7413_s24 + $0xf0] sm:$0xff] }
  0x20   : > { %277 = vst.msk [vmem:[#allocation2 + $0x70] sm:$0x3] %vm264_vm1, %v7294_v0  ;;  %280 = vst.msk [vmem:[#allocation2 + $0x88] sm:$0x3] %vm264_vm1, %v7294_v0  ;;  %v348_v62 = vld [vmem:[%s7413_s24 + $0xf8] sm:$0xff]  ;;  %s249_s24 = scalar_lea.vmem %s12315_s3, %s6780_s20 }
  0x21   : > { %283 = vst.msk [vmem:[#allocation2 + $0xa0] sm:$0x3] %vm264_vm1, %v7294_v0  ;;  %286 = vst.msk [vmem:[#allocation2 + $0xb8] sm:$0x3] %vm264_vm1, %v7294_v0 }
  0x22   : > { %289 = vst.msk [vmem:[#allocation2 + $0xd0] sm:$0x3] %vm264_vm1, %v7294_v0  ;;  %292 = vst.msk [vmem:[#allocation2 + $0xe8] sm:$0x3] %vm264_vm1, %v7294_v0 }
  0x23   : > { %295 = vst.msk [vmem:[#allocation2 + $0x100] sm:$0x3] %vm264_vm1, %v7294_v0  ;;  %298 = vst.msk [vmem:[#allocation2 + $0x118] sm:$0x3] %vm264_vm1, %v7294_v0 }
  0x24   : > { %301 = vst.msk [vmem:[#allocation2 + $0x130] sm:$0x3] %vm264_vm1, %v7294_v0  ;;  %304 = vst.msk [vmem:[#allocation2 + $0x148] sm:$0x3] %vm264_vm1, %v7294_v0 }
  0x25   : > { %307 = vst.msk [vmem:[#allocation2 + $0x160] sm:$0x3] %vm264_vm1, %v7294_v0  ;;  %310 = vst.msk [vmem:[#allocation2 + $0x178] sm:$0x3] %vm264_vm1, %v7294_v0  ;;  %v415_v8 = vld [vmem:[#allocation2 + $0x9] sm:$0xff] }
  0x26   : > { %313 = vst.msk [vmem:[#allocation2 + $0x190] sm:$0x3] %vm264_vm1, %v7294_v0  ;;  %316 = vst.msk [vmem:[#allocation2 + $0x1a8] sm:$0x3] %vm264_vm1, %v7294_v0  ;;  %705 = vrot.lane.b32.xlu0 %v415_v8, %s7295_s25  ;;  %v446_v0 = vld [vmem:[#allocation2 + $0x2] sm:$0xff] }
  0x27   : > { %350 = vst.msk [vmem:[#allocation2 + $0x19] sm:$0xff] %vm261_vm0, %v317_v1  ;;  %352 = vst.msk [vmem:[#allocation2 + $0x31] sm:$0xff] %vm261_vm0, %v319_v2 }
  0x28   : > { %351 = vst.msk [vmem:[#allocation2 + $0x21] sm:$0xff] %vm261_vm0, %v318_v3  ;;  %354 = vst.msk [vmem:[#allocation2 + $0x49] sm:$0xff] %vm261_vm0, %v321_v4  ;;  %v447_v3 = vld [vmem:[#allocation2 + $0xa] sm:$0xff] }
  0x29   : > { %353 = vst.msk [vmem:[#allocation2 + $0x39] sm:$0xff] %vm261_vm0, %v320_v5  ;;  %356 = vst.msk [vmem:[#allocation2 + $0x61] sm:$0xff] %vm261_vm0, %v323_v6 }
  0x2a   : > { %355 = vst.msk [vmem:[#allocation2 + $0x51] sm:$0xff] %vm261_vm0, %v322_v9  ;;  %358 = vst.msk [vmem:[#allocation2 + $0x79] sm:$0xff] %vm261_vm0, %v325_v10 }
  0x2b   : > { %357 = vst.msk [vmem:[#allocation2 + $0x69] sm:$0xff] %vm261_vm0, %v324_v11  ;;  %360 = vst.msk [vmem:[#allocation2 + $0x91] sm:$0xff] %vm261_vm0, %v327_v12 }
  0x2c   : > { %359 = vst.msk [vmem:[#allocation2 + $0x81] sm:$0xff] %vm261_vm0, %v326_v13  ;;  %362 = vst.msk [vmem:[#allocation2 + $0xa9] sm:$0xff] %vm261_vm0, %v329_v14 }
  0x2d   : > { %361 = vst.msk [vmem:[#allocation2 + $0x99] sm:$0xff] %vm261_vm0, %v328_v15  ;;  %364 = vst.msk [vmem:[#allocation2 + $0xc1] sm:$0xff] %vm261_vm0, %v331_v16 }
  0x2e   : > { %363 = vst.msk [vmem:[#allocation2 + $0xb1] sm:$0xff] %vm261_vm0, %v330_v17  ;;  %366 = vst.msk [vmem:[#allocation2 + $0xd9] sm:$0xff] %vm261_vm0, %v333_v18  ;;  %v7458_v25 = vld [vmem:[#allocation2 + $0x19] sm:$0xff]  ;;  %v7460_v26 = vld [vmem:[#allocation2 + $0x31] sm:$0xff] }
  0x2f   : > { %365 = vst.msk [vmem:[#allocation2 + $0xc9] sm:$0xff] %vm261_vm0, %v332_v19  ;;  %368 = vst.msk [vmem:[#allocation2 + $0xf1] sm:$0xff] %vm261_vm0, %v335_v20  ;;  %707 = vrot.lane.b32.xlu1 %v7458_v25, %s7295_s25  ;;  %v7467_v27 = vld [vmem:[#allocation2 + $0x21] sm:$0xff]  ;;  %711 = vrot.lane.b32.xlu0 %v7460_v26, %s7295_s25  ;;  %v7475_v30 = vld [vmem:[#allocation2 + $0x49] sm:$0xff] }
  0x30   : > { %367 = vst.msk [vmem:[#allocation2 + $0xe1] sm:$0xff] %vm261_vm0, %v334_v21  ;;  %370 = vst.msk [vmem:[#allocation2 + $0x109] sm:$0xff] %vm261_vm0, %v337_v22  ;;  %v7479_v31 = vld [vmem:[#allocation2 + $0x39] sm:$0xff]  ;;  %v7483_v32 = vld [vmem:[#allocation2 + $0x61] sm:$0xff] }
  0x31   : > { %369 = vst.msk [vmem:[#allocation2 + $0xf9] sm:$0xff] %vm261_vm0, %v336_v23  ;;  %372 = vst.msk [vmem:[#allocation2 + $0x121] sm:$0xff] %vm261_vm0, %v339_v24  ;;  %v7495_v38 = vld [vmem:[#allocation2 + $0x51] sm:$0xff]  ;;  %v7503_v40 = vld [vmem:[#allocation2 + $0x79] sm:$0xff] }
  0x32   : > { %371 = vst.msk [vmem:[#allocation2 + $0x111] sm:$0xff] %vm261_vm0, %v338_v28  ;;  %374 = vst.msk [vmem:[#allocation2 + $0x139] sm:$0xff] %vm261_vm0, %v341_v29  ;;  %v7507_v41 = vld [vmem:[#allocation2 + $0x69] sm:$0xff]  ;;  %v7511_v42 = vld [vmem:[#allocation2 + $0x91] sm:$0xff] }
  0x33   : > { %709 = vrot.lane.b32.xlu1 %v7467_v27, %s7295_s25  ;;  %715 = vrot.lane.b32.xlu0 %v7475_v30, %s7295_s25  ;;  %373 = vst.msk [vmem:[#allocation2 + $0x129] sm:$0xff] %vm261_vm0, %v340_v33  ;;  %376 = vst.msk [vmem:[#allocation2 + $0x151] sm:$0xff] %vm261_vm0, %v343_v34  ;;  %v7515_v43 = vld [vmem:[#allocation2 + $0x81] sm:$0xff]  ;;  %v7519_v44 = vld [vmem:[#allocation2 + $0xa9] sm:$0xff] }
  0x34   : > { %375 = vst.msk [vmem:[#allocation2 + $0x141] sm:$0xff] %vm261_vm0, %v342_v35  ;;  %378 = vst.msk [vmem:[#allocation2 + $0x169] sm:$0xff] %vm261_vm0, %v345_v36  ;;  %v7523_v45 = vld [vmem:[#allocation2 + $0x99] sm:$0xff]  ;;  %v7527_v46 = vld [vmem:[#allocation2 + $0xc1] sm:$0xff] }
  0x35   : > { %377 = vst.msk [vmem:[#allocation2 + $0x159] sm:$0xff] %vm261_vm0, %v344_v37  ;;  %379 = vst.msk [vmem:[#allocation2 + $0x171] sm:$0xff] %vm261_vm0, %v346_v39  ;;  %v7531_v47 = vld [vmem:[#allocation2 + $0xb1] sm:$0xff]  ;;  %v7535_v48 = vld [vmem:[#allocation2 + $0xd9] sm:$0xff] }
  0x36   : > { %v7539_v49 = vld [vmem:[#allocation2 + $0xc9] sm:$0xff]  ;;  %v7543_v50 = vld [vmem:[#allocation2 + $0xf1] sm:$0xff]  ;;  %380 = vst.msk [vmem:[#allocation2 + $0x181] sm:$0xff] %vm261_vm0, %v347_v58  ;;  %381 = vst.msk [vmem:[#allocation2 + $0x189] sm:$0xff] %vm261_vm0, %v348_v62 }
  0x37   : > { %713 = vrot.lane.b32.xlu1 %v7479_v31, %s7295_s25  ;;  %719 = vrot.lane.b32.xlu0 %v7483_v32, %s7295_s25  ;;  %v7547_v51 = vld [vmem:[#allocation2 + $0xe1] sm:$0xff]  ;;  %v7551_v52 = vld [vmem:[#allocation2 + $0x109] sm:$0xff]  ;;  %v7606_v4 = vld [vmem:[#allocation2 + $0x32] sm:$0xff] }
  0x38   : > { %v7555_v53 = vld [vmem:[#allocation2 + $0xf9] sm:$0xff]  ;;  %v7559_v54 = vld [vmem:[#allocation2 + $0x121] sm:$0xff]  ;;  %v7613_v6 = vld [vmem:[#allocation2 + $0x4a] sm:$0xff] }
  0x39   : > { %v7563_v55 = vld [vmem:[#allocation2 + $0x111] sm:$0xff]  ;;  %v7567_v56 = vld [vmem:[#allocation2 + $0x139] sm:$0xff]  ;;  %v7609_v5 = vld [vmem:[#allocation2 + $0x22] sm:$0xff] }
  0x3a   : > { %v7571_v57 = vld [vmem:[#allocation2 + $0x129] sm:$0xff]  ;;  %v7577_v59 = vld [vmem:[#allocation2 + $0x151] sm:$0xff]  ;;  %v7600_v2 = vld [vmem:[#allocation2 + $0x1a] sm:$0xff] }
  0x3b   : > { %717 = vrot.lane.b32.xlu1 %v7495_v38, %s7295_s25  ;;  %723 = vrot.lane.b32.xlu0 %v7503_v40, %s7295_s25  ;;  %v7581_v60 = vld [vmem:[#allocation2 + $0x141] sm:$0xff]  ;;  %v7585_v61 = vld [vmem:[#allocation2 + $0x169] sm:$0xff]  ;;  %v7625_v9 = vld [vmem:[#allocation2 + $0x52] sm:$0xff] }
  0x3c   : > { %v7591_v63 = vld [vmem:[#allocation2 + $0x159] sm:$0xff]  ;;  %v7597_v1 = vld [vmem:[#allocation2 + $0x171] sm:$0xff]  ;;  %v7621_v8 = vld [vmem:[#allocation2 + $0x62] sm:$0xff] }
  0x3d   : > { %v7617_v7 = vld [vmem:[#allocation2 + $0x3a] sm:$0xff]  ;;  %v7633_v11 = vld [vmem:[#allocation2 + $0x6a] sm:$0xff]  ;;  %v7637_v12 = vld [vmem:[#allocation2 + $0x92] sm:$0xff] }
  0x3e   : > { %v7629_v10 = vld [vmem:[#allocation2 + $0x7a] sm:$0xff]  ;;  %v7641_v13 = vld [vmem:[#allocation2 + $0x82] sm:$0xff]  ;;  %v7645_v14 = vld [vmem:[#allocation2 + $0xaa] sm:$0xff] }
  0x3f   : > { %721 = vrot.lane.b32.xlu1 %v7507_v41, %s7295_s25  ;;  %727 = vrot.lane.b32.xlu0 %v7511_v42, %s7295_s25  ;;  %v7649_v15 = vld [vmem:[#allocation2 + $0x9a] sm:$0xff]  ;;  %v7653_v16 = vld [vmem:[#allocation2 + $0xc2] sm:$0xff]  ;;  %v7657_v17 = vld [vmem:[#allocation2 + $0xb2] sm:$0xff] }
  0x40   : > { %v7661_v18 = vld [vmem:[#allocation2 + $0xda] sm:$0xff]  ;;  %v7665_v19 = vld [vmem:[#allocation2 + $0xca] sm:$0xff]  ;;  %v7669_v20 = vld [vmem:[#allocation2 + $0xf2] sm:$0xff] }
  0x41   : > { %v7673_v21 = vld [vmem:[#allocation2 + $0xe2] sm:$0xff]  ;;  %v7677_v22 = vld [vmem:[#allocation2 + $0x10a] sm:$0xff]  ;;  %v7681_v23 = vld [vmem:[#allocation2 + $0xfa] sm:$0xff] }
  0x42   : > { %v7685_v24 = vld [vmem:[#allocation2 + $0x122] sm:$0xff]  ;;  %v7689_v28 = vld [vmem:[#allocation2 + $0x112] sm:$0xff]  ;;  %v7693_v29 = vld [vmem:[#allocation2 + $0x13a] sm:$0xff] }
  0x43   : > { %725 = vrot.lane.b32.xlu1 %v7515_v43, %s7295_s25  ;;  %731 = vrot.lane.b32.xlu0 %v7519_v44, %s7295_s25  ;;  %v7699_v34 = vld [vmem:[#allocation2 + $0x12a] sm:$0xff]  ;;  %v7703_v35 = vld [vmem:[#allocation2 + $0x152] sm:$0xff]  ;;  %v7709_v37 = vld [vmem:[#allocation2 + $0x142] sm:$0xff] }
  0x44   : > { %12386 = vst [vmem:[#allocation5_spill] sm:$0xff] %v7709_v37  ;;  %v7715_v58 = vld [vmem:[#allocation2 + $0x16a] sm:$0xff] }
  0x45   : > { %12388 = vst [vmem:[#allocation7_spill] sm:$0xff] %v7715_v58 }
  0x47   : > { %729 = vrot.lane.b32.xlu1 %v7523_v45, %s7295_s25  ;;  %735 = vrot.lane.b32.xlu0 %v7527_v46, %s7295_s25 }
  0x4b   : > { %733 = vrot.lane.b32.xlu1 %v7531_v47, %s7295_s25  ;;  %739 = vrot.lane.b32.xlu0 %v7535_v48, %s7295_s25 }
  0x4f   : > { %737 = vrot.lane.b32.xlu1 %v7539_v49, %s7295_s25  ;;  %743 = vrot.lane.b32.xlu0 %v7543_v50, %s7295_s25 }
  0x53   : > { %741 = vrot.lane.b32.xlu1 %v7547_v51, %s7295_s25  ;;  %747 = vrot.lane.b32.xlu0 %v7551_v52, %s7295_s25 }
  0x57   : > { %745 = vrot.lane.b32.xlu1 %v7555_v53, %s7295_s25  ;;  %751 = vrot.lane.b32.xlu0 %v7559_v54, %s7295_s25 }
  0x5b   : > { %749 = vrot.lane.b32.xlu1 %v7563_v55, %s7295_s25  ;;  %755 = vrot.lane.b32.xlu0 %v7567_v56, %s7295_s25 }
  0x5f   : > { %753 = vrot.lane.b32.xlu1 %v7571_v57, %s7295_s25  ;;  %759 = vrot.lane.b32.xlu0 %v7577_v59, %s7295_s25 }
  0x63   : > { %757 = vrot.lane.b32.xlu1 %v7581_v60, %s7295_s25  ;;  %763 = vrot.lane.b32.xlu0 %v7585_v61, %s7295_s25 }
  0x67   : > { %761 = vrot.lane.b32.xlu1 %v7591_v63, %s7295_s25  ;;  %831 = vrot.lane.b32.xlu0 %v446_v0, %s7296_s26  ;;  %v7721_v0 = vld [vmem:[#allocation2 + $0x15a] sm:$0xff] }
  0x68   : > { %12390 = vst [vmem:[#allocation9_spill] sm:$0xff] %v7721_v0 }
  0x6b   : > { %765 = vrot.lane.b32.xlu1 %v7597_v1, %s7295_s25  ;;  %835 = vrot.lane.b32.xlu0 %v7600_v2, %s7296_s26 }
  0x6f   : > { %833 = vrot.lane.b32.xlu1 %v447_v3, %s7296_s26  ;;  %839 = vrot.lane.b32.xlu0 %v7606_v4, %s7296_s26 }
  0x73   : > { %837 = vrot.lane.b32.xlu1 %v7609_v5, %s7296_s26  ;;  %843 = vrot.lane.b32.xlu0 %v7613_v6, %s7296_s26 }
  0x77   : > { %841 = vrot.lane.b32.xlu1 %v7617_v7, %s7296_s26  ;;  %847 = vrot.lane.b32.xlu0 %v7621_v8, %s7296_s26 }
  0x7b   : > { %845 = vrot.lane.b32.xlu1 %v7625_v9, %s7296_s26  ;;  %851 = vrot.lane.b32.xlu0 %v7629_v10, %s7296_s26 }
  0x7f   : > { %849 = vrot.lane.b32.xlu1 %v7633_v11, %s7296_s26  ;;  %855 = vrot.lane.b32.xlu0 %v7637_v12, %s7296_s26 }
  0x83   : > { %853 = vrot.lane.b32.xlu1 %v7641_v13, %s7296_s26  ;;  %859 = vrot.lane.b32.xlu0 %v7645_v14, %s7296_s26 }
  0x86   : > { %v7695_v33 = vpop.permute.xlu0 %703 }
  0x87   : > { %857 = vrot.lane.b32.xlu1 %v7649_v15, %s7296_s26  ;;  %863 = vrot.lane.b32.xlu0 %v7653_v16, %s7296_s26  ;;  %12384 = vst [vmem:[#allocation3_spill] sm:$0xff] %v7695_v33  ;;  %v7731_v33 = vld [vmem:[#allocation2 + $0x172] sm:$0xff] }
  0x88   : > { %12393 = vst [vmem:[#allocation12_spill] sm:$0xff] %v7731_v33 }
  0x8b   : > { %861 = vrot.lane.b32.xlu1 %v7657_v17, %s7296_s26  ;;  %867 = vrot.lane.b32.xlu0 %v7661_v18, %s7296_s26 }
  0x8f   : > { %865 = vrot.lane.b32.xlu1 %v7665_v19, %s7296_s26  ;;  %871 = vrot.lane.b32.xlu0 %v7669_v20, %s7296_s26 }
  0x93   : > { %869 = vrot.lane.b32.xlu1 %v7673_v21, %s7296_s26  ;;  %875 = vrot.lane.b32.xlu0 %v7677_v22, %s7296_s26 }
  0x97   : > { %873 = vrot.lane.b32.xlu1 %v7681_v23, %s7296_s26  ;;  %879 = vrot.lane.b32.xlu0 %v7685_v24, %s7296_s26 }
  0x98   : > { %v7705_v36 = vpop.permute.xlu0 %705 }
  0x99   : > { %12385 = vst [vmem:[#allocation4_spill] sm:$0xff] %v7705_v36 }
  0x9b   : > { %877 = vrot.lane.b32.xlu1 %v7689_v28, %s7296_s26  ;;  %883 = vrot.lane.b32.xlu0 %v7693_v29, %s7296_s26 }
  0x9f   : > { %881 = vrot.lane.b32.xlu1 %v7699_v34, %s7296_s26  ;;  %887 = vrot.lane.b32.xlu0 %v7703_v35, %s7296_s26 }
  0xa1   : > { %v7713_v39 = vpop.permute.xlu1 %707  ;;  %v7717_v62 = vpop.permute.xlu0 %711 }
  0xa2   : > { %12387 = vst [vmem:[#allocation6_spill] sm:$0xff] %v7713_v39  ;;  %12389 = vst [vmem:[#allocation8_spill] sm:$0xff] %v7717_v62  ;;  %v384_v39 = vld [vmem:[#allocation2 + $0x18] sm:$0xff] }
  0xa3   : > { %885 = vrot.lane.b32.xlu1 %v7709_v37, %s7296_s26  ;;  %891 = vrot.lane.b32.xlu0 %v7715_v58, %s7296_s26  ;;  %v7740_v58 = vld [vmem:[#allocation2 + $0x30] sm:$0xff] }
  0xa4   : > { %12396 = vst [vmem:[#allocation15_spill] sm:$0xff] %v7740_v58 }
  0xa5   : > { %v7725_v3 = vpop.permute.xlu1 %709  ;;  %v7727_v36 = vpop.permute.xlu0 %715 }
  0xa6   : > { %12391 = vst [vmem:[#allocation10_spill] sm:$0xff] %v7725_v3  ;;  %12392 = vst [vmem:[#allocation11_spill] sm:$0xff] %v7727_v36  ;;  %v385_v3 = vld [vmem:[#allocation2 + $0x20] sm:$0xff] }
  0xa7   : > { %889 = vrot.lane.b32.xlu1 %v7721_v0, %s7296_s26  ;;  %959 = vrot.lane.b32.xlu0 %v384_v39, %s7297_s27  ;;  %v7749_v39 = vld [vmem:[#allocation2 + $0x48] sm:$0xff] }
  0xa8   : > { %12399 = vst [vmem:[#allocation18_spill] sm:$0xff] %v7749_v39 }
  0xa9   : > { %v7734_v62 = vpop.permute.xlu1 %713  ;;  %v7736_v37 = vpop.permute.xlu0 %719 }
  0xaa   : > { %12394 = vst [vmem:[#allocation13_spill] sm:$0xff] %v7734_v62  ;;  %12395 = vst [vmem:[#allocation14_spill] sm:$0xff] %v7736_v37  ;;  %v7755_v62 = vld [vmem:[#allocation2 + $0x38] sm:$0xff] }
  0xab   : > { %893 = vrot.lane.b32.xlu1 %v7731_v33, %s7296_s26  ;;  %963 = vrot.lane.b32.xlu0 %v7740_v58, %s7297_s27  ;;  %12401 = vst [vmem:[#allocation20_spill] sm:$0xff] %v7755_v62 }
  0xad   : > { %v7744_v36 = vpop.permute.xlu1 %717  ;;  %v7746_v0 = vpop.permute.xlu0 %723 }
  0xae   : > { %12397 = vst [vmem:[#allocation16_spill] sm:$0xff] %v7744_v36  ;;  %12398 = vst [vmem:[#allocation17_spill] sm:$0xff] %v7746_v0  ;;  %v7761_v36 = vld [vmem:[#allocation2 + $0x60] sm:$0xff]  ;;  %v7767_v0 = vld [vmem:[#allocation2 + $0x50] sm:$0xff] }
  0xaf   : > { %961 = vrot.lane.b32.xlu1 %v385_v3, %s7297_s27  ;;  %967 = vrot.lane.b32.xlu0 %v7749_v39, %s7297_s27  ;;  %12403 = vst [vmem:[#allocation22_spill] sm:$0xff] %v7761_v36  ;;  %12405 = vst [vmem:[#allocation24_spill] sm:$0xff] %v7767_v0 }
  0xb1   : > { %v7753_v37 = vpop.permute.xlu1 %721  ;;  %v7757_v33 = vpop.permute.xlu0 %727 }
  0xb2   : > { %12400 = vst [vmem:[#allocation19_spill] sm:$0xff] %v7753_v37  ;;  %12402 = vst [vmem:[#allocation21_spill] sm:$0xff] %v7757_v33  ;;  %v7773_v37 = vld [vmem:[#allocation2 + $0x78] sm:$0xff] }
  0xb3   : > { %965 = vrot.lane.b32.xlu1 %v7755_v62, %s7297_s27  ;;  %971 = vrot.lane.b32.xlu0 %v7761_v36, %s7297_s27  ;;  %12407 = vst [vmem:[#allocation26_spill] sm:$0xff] %v7773_v37  ;;  %v7779_v62 = vld [vmem:[#allocation2 + $0x68] sm:$0xff] }
  0xb4   : > { %12409 = vst [vmem:[#allocation28_spill] sm:$0xff] %v7779_v62 }
  0xb5   : > { %v7765_v3 = vpop.permute.xlu1 %725  ;;  %v7769_v58 = vpop.permute.xlu0 %731 }
  0xb6   : > { %12404 = vst [vmem:[#allocation23_spill] sm:$0xff] %v7765_v3  ;;  %12406 = vst [vmem:[#allocation25_spill] sm:$0xff] %v7769_v58  ;;  %v7785_v3 = vld [vmem:[#allocation2 + $0x90] sm:$0xff] }
  0xb7   : > { %969 = vrot.lane.b32.xlu1 %v7767_v0, %s7297_s27  ;;  %975 = vrot.lane.b32.xlu0 %v7773_v37, %s7297_s27  ;;  %12411 = vst [vmem:[#allocation30_spill] sm:$0xff] %v7785_v3  ;;  %v7791_v0 = vld [vmem:[#allocation2 + $0x80] sm:$0xff] }
  0xb8   : > { %12413 = vst [vmem:[#allocation32_spill] sm:$0xff] %v7791_v0 }
  0xb9   : > { %v7777_v33 = vpop.permute.xlu1 %729  ;;  %v7781_v39 = vpop.permute.xlu0 %735 }
  0xba   : > { %12408 = vst [vmem:[#allocation27_spill] sm:$0xff] %v7777_v33  ;;  %12410 = vst [vmem:[#allocation29_spill] sm:$0xff] %v7781_v39  ;;  %v7797_v33 = vld [vmem:[#allocation2 + $0xa8] sm:$0xff] }
  0xbb   : > { %973 = vrot.lane.b32.xlu1 %v7779_v62, %s7297_s27  ;;  %979 = vrot.lane.b32.xlu0 %v7785_v3, %s7297_s27  ;;  %12415 = vst [vmem:[#allocation34_spill] sm:$0xff] %v7797_v33  ;;  %v7803_v62 = vld [vmem:[#allocation2 + $0x98] sm:$0xff] }
  0xbc   : > { %12417 = vst [vmem:[#allocation36_spill] sm:$0xff] %v7803_v62 }
  0xbd   : > { %v7789_v58 = vpop.permute.xlu1 %733  ;;  %v7793_v36 = vpop.permute.xlu0 %739 }
  0xbe   : > { %12412 = vst [vmem:[#allocation31_spill] sm:$0xff] %v7789_v58  ;;  %12414 = vst [vmem:[#allocation33_spill] sm:$0xff] %v7793_v36  ;;  %v7809_v58 = vld [vmem:[#allocation2 + $0xc0] sm:$0xff] }
  0xbf   : > { %977 = vrot.lane.b32.xlu1 %v7791_v0, %s7297_s27  ;;  %983 = vrot.lane.b32.xlu0 %v7797_v33, %s7297_s27  ;;  %12419 = vst [vmem:[#allocation38_spill] sm:$0xff] %v7809_v58  ;;  %v7815_v0 = vld [vmem:[#allocation2 + $0xb0] sm:$0xff] }
  0xc0   : > { %12421 = vst [vmem:[#allocation40_spill] sm:$0xff] %v7815_v0 }
  0xc1   : > { %v7801_v39 = vpop.permute.xlu1 %737  ;;  %v7805_v37 = vpop.permute.xlu0 %743 }
  0xc2   : > { %12416 = vst [vmem:[#allocation35_spill] sm:$0xff] %v7801_v39  ;;  %12418 = vst [vmem:[#allocation37_spill] sm:$0xff] %v7805_v37  ;;  %v7821_v39 = vld [vmem:[#allocation2 + $0xd8] sm:$0xff] }
  0xc3   : > { %981 = vrot.lane.b32.xlu1 %v7803_v62, %s7297_s27  ;;  %987 = vrot.lane.b32.xlu0 %v7809_v58, %s7297_s27  ;;  %12423 = vst [vmem:[#allocation42_spill] sm:$0xff] %v7821_v39  ;;  %v7827_v62 = vld [vmem:[#allocation2 + $0xc8] sm:$0xff] }
  0xc4   : > { %12425 = vst [vmem:[#allocation44_spill] sm:$0xff] %v7827_v62 }
  0xc5   : > { %v7813_v36 = vpop.permute.xlu1 %741  ;;  %v7817_v3 = vpop.permute.xlu0 %747 }
  0xc6   : > { %12420 = vst [vmem:[#allocation39_spill] sm:$0xff] %v7813_v36  ;;  %12422 = vst [vmem:[#allocation41_spill] sm:$0xff] %v7817_v3  ;;  %v7833_v36 = vld [vmem:[#allocation2 + $0xf0] sm:$0xff] }
  0xc7   : > { %985 = vrot.lane.b32.xlu1 %v7815_v0, %s7297_s27  ;;  %991 = vrot.lane.b32.xlu0 %v7821_v39, %s7297_s27  ;;  %12427 = vst [vmem:[#allocation46_spill] sm:$0xff] %v7833_v36  ;;  %v7839_v0 = vld [vmem:[#allocation2 + $0xe0] sm:$0xff] }
  0xc8   : > { %12429 = vst [vmem:[#allocation48_spill] sm:$0xff] %v7839_v0 }
  0xc9   : > { %v7825_v37 = vpop.permute.xlu1 %745  ;;  %v7829_v33 = vpop.permute.xlu0 %751 }
  0xca   : > { %12424 = vst [vmem:[#allocation43_spill] sm:$0xff] %v7825_v37  ;;  %12426 = vst [vmem:[#allocation45_spill] sm:$0xff] %v7829_v33  ;;  %v7845_v37 = vld [vmem:[#allocation2 + $0x108] sm:$0xff] }
  0xcb   : > { %989 = vrot.lane.b32.xlu1 %v7827_v62, %s7297_s27  ;;  %995 = vrot.lane.b32.xlu0 %v7833_v36, %s7297_s27  ;;  %12431 = vst [vmem:[#allocation50_spill] sm:$0xff] %v7845_v37  ;;  %v7851_v62 = vld [vmem:[#allocation2 + $0xf8] sm:$0xff] }
  0xcc   : > { %12433 = vst [vmem:[#allocation52_spill] sm:$0xff] %v7851_v62 }
  0xcd   : > { %v7837_v3 = vpop.permute.xlu1 %749  ;;  %v7841_v58 = vpop.permute.xlu0 %755 }
  0xce   : > { %12428 = vst [vmem:[#allocation47_spill] sm:$0xff] %v7837_v3  ;;  %12430 = vst [vmem:[#allocation49_spill] sm:$0xff] %v7841_v58  ;;  %v7857_v3 = vld [vmem:[#allocation2 + $0x120] sm:$0xff] }
  0xcf   : > { %993 = vrot.lane.b32.xlu1 %v7839_v0, %s7297_s27  ;;  %999 = vrot.lane.b32.xlu0 %v7845_v37, %s7297_s27  ;;  %12435 = vst [vmem:[#allocation54_spill] sm:$0xff] %v7857_v3  ;;  %v7863_v0 = vld [vmem:[#allocation2 + $0x110] sm:$0xff] }
  0xd0   : > { %12437 = vst [vmem:[#allocation56_spill] sm:$0xff] %v7863_v0 }
  0xd1   : > { %v7849_v33 = vpop.permute.xlu1 %753  ;;  %v7853_v39 = vpop.permute.xlu0 %759 }
  0xd2   : > { %12432 = vst [vmem:[#allocation51_spill] sm:$0xff] %v7849_v33  ;;  %12434 = vst [vmem:[#allocation53_spill] sm:$0xff] %v7853_v39  ;;  %v7869_v33 = vld [vmem:[#allocation2 + $0x138] sm:$0xff] }
  0xd3   : > { %997 = vrot.lane.b32.xlu1 %v7851_v62, %s7297_s27  ;;  %1003 = vrot.lane.b32.xlu0 %v7857_v3, %s7297_s27  ;;  %12439 = vst [vmem:[#allocation58_spill] sm:$0xff] %v7869_v33  ;;  %v7875_v62 = vld [vmem:[#allocation2 + $0x128] sm:$0xff] }
  0xd4   : > { %12441 = vst [vmem:[#allocation60_spill] sm:$0xff] %v7875_v62 }
  0xd5   : > { %v7861_v58 = vpop.permute.xlu1 %757  ;;  %v7865_v36 = vpop.permute.xlu0 %763 }
  0xd6   : > { %12436 = vst [vmem:[#allocation55_spill] sm:$0xff] %v7861_v58  ;;  %12438 = vst [vmem:[#allocation57_spill] sm:$0xff] %v7865_v36  ;;  %v7881_v58 = vld [vmem:[#allocation2 + $0x150] sm:$0xff] }
  0xd7   : > { %1001 = vrot.lane.b32.xlu1 %v7863_v0, %s7297_s27  ;;  %1007 = vrot.lane.b32.xlu0 %v7869_v33, %s7297_s27  ;;  %12443 = vst [vmem:[#allocation62_spill] sm:$0xff] %v7881_v58  ;;  %v7887_v0 = vld [vmem:[#allocation2 + $0x140] sm:$0xff] }
  0xd8   : > { %12445 = vst [vmem:[#allocation64_spill] sm:$0xff] %v7887_v0  ;;  %v7901_v33 = vld [vmem:[#allocation2 + $0x180] sm:$0xff] }
  0xd9   : > { %v7873_v39 = vpop.permute.xlu1 %761  ;;  %v7877_v37 = vpop.permute.xlu0 %831 }
  0xda   : > { %12440 = vst [vmem:[#allocation59_spill] sm:$0xff] %v7873_v39  ;;  %12442 = vst [vmem:[#allocation61_spill] sm:$0xff] %v7877_v37  ;;  %v7893_v39 = vld [vmem:[#allocation2 + $0x168] sm:$0xff] }
  0xdb   : > { %1005 = vrot.lane.b32.xlu1 %v7875_v62, %s7297_s27  ;;  %1011 = vrot.lane.b32.xlu0 %v7881_v58, %s7297_s27  ;;  %v7899_v62 = vld [vmem:[#allocation2 + $0x158] sm:$0xff] }
  0xdc   : > { %12448 = vst [vmem:[#allocation67_spill] sm:$0xff] %v7899_v62 }
  0xdd   : > { %v7885_v36 = vpop.permute.xlu1 %765  ;;  %v7889_v3 = vpop.permute.xlu0 %835 }
  0xde   : > { %12444 = vst [vmem:[#allocation63_spill] sm:$0xff] %v7885_v36  ;;  %12446 = vst [vmem:[#allocation65_spill] sm:$0xff] %v7889_v3  ;;  %v7911_v3 = vld [vmem:[#allocation2 + $0x170] sm:$0xff] }
  0xdf   : > { %1009 = vrot.lane.b32.xlu1 %v7887_v0, %s7297_s27  ;;  %1015 = vrot.lane.b32.xlu0 %v7893_v39, %s7297_s27 }
  0xe1   : > { %v7897_v37 = vpop.permute.xlu1 %833  ;;  %v7903_v58 = vpop.permute.xlu0 %839 }
  0xe2   : > { %12447 = vst [vmem:[#allocation66_spill] sm:$0xff] %v7897_v37  ;;  %12449 = vst [vmem:[#allocation68_spill] sm:$0xff] %v7903_v58  ;;  %v7917_v37 = vld [vmem:[#allocation2 + $0x188] sm:$0xff] }
  0xe3   : > { %1013 = vrot.lane.b32.xlu1 %v7899_v62, %s7297_s27  ;;  %1019 = vrot.lane.b32.xlu0 %v7901_v33, %s7297_s27 }
  0xe5   : > { %v7909_v36 = vpop.permute.xlu1 %837  ;;  %v7913_v0 = vpop.permute.xlu0 %843 }
  0xe6   : > { %12450 = vst [vmem:[#allocation69_spill] sm:$0xff] %v7909_v36  ;;  %12451 = vst [vmem:[#allocation70_spill] sm:$0xff] %v7913_v0 }
  0xe7   : > { %1017 = vrot.lane.b32.xlu1 %v7911_v3, %s7297_s27  ;;  %1087 = vrot.lane.b32.xlu0 %v7458_v25, %s7298_s28 }
  0xe9   : > { %v7921_v58 = vpop.permute.xlu1 %841  ;;  %v7923_v62 = vpop.permute.xlu0 %847 }
  0xea   : > { %12452 = vst [vmem:[#allocation71_spill] sm:$0xff] %v7921_v58  ;;  %12453 = vst [vmem:[#allocation72_spill] sm:$0xff] %v7923_v62 }
  0xeb   : > { %1021 = vrot.lane.b32.xlu1 %v7917_v37, %s7297_s27  ;;  %1091 = vrot.lane.b32.xlu0 %v7460_v26, %s7298_s28 }
  0xed   : > { %v7929_v0 = vpop.permute.xlu1 %845  ;;  %v7931_v36 = vpop.permute.xlu0 %851 }
  0xef   : > { %1089 = vrot.lane.b32.xlu1 %v7467_v27, %s7298_s28  ;;  %1095 = vrot.lane.b32.xlu0 %v7475_v30, %s7298_s28 }
  0xf1   : > { %v7937_v25 = vpop.permute.xlu1 %849  ;;  %v7939_v58 = vpop.permute.xlu0 %855 }
  0xf2   : > { %12454 = vst [vmem:[#allocation73_spill] sm:$0xff] %v7939_v58 }
  0xf3   : > { %1093 = vrot.lane.b32.xlu1 %v7479_v31, %s7298_s28  ;;  %1099 = vrot.lane.b32.xlu0 %v7483_v32, %s7298_s28 }
  0xf5   : > { %v7945_v26 = vpop.permute.xlu1 %853  ;;  %v7947_v62 = vpop.permute.xlu0 %859 }
  0xf6   : > { %12455 = vst [vmem:[#allocation74_spill] sm:$0xff] %v7945_v26  ;;  %12456 = vst [vmem:[#allocation75_spill] sm:$0xff] %v7947_v62  ;;  %v647_v62 = vld [vmem:[#allocation2 + $0x92] sm:$0xff] }
  0xf7   : > { %1097 = vrot.lane.b32.xlu1 %v7495_v38, %s7298_s28  ;;  %1103 = vrot.lane.b32.xlu0 %v7503_v40, %s7298_s28 }
  0xf9   : > { %v7953_v27 = vpop.permute.xlu1 %857  ;;  %v7955_v30 = vpop.permute.xlu0 %863 }
  0xfa   : > { %12457 = vst [vmem:[#allocation76_spill] sm:$0xff] %v7953_v27  ;;  %12458 = vst [vmem:[#allocation77_spill] sm:$0xff] %v7955_v30  ;;  %v643_v30 = vld [vmem:[#allocation2 + $0x62] sm:$0xff] }
  0xfb   : > { %1101 = vrot.lane.b32.xlu1 %v7507_v41, %s7298_s28  ;;  %1107 = vrot.lane.b32.xlu0 %v7511_v42, %s7298_s28 }
  0xfd   : > { %v7961_v31 = vpop.permute.xlu1 %861  ;;  %v7963_v32 = vpop.permute.xlu0 %867 }
  0xfe   : > { %12459 = vst [vmem:[#allocation78_spill] sm:$0xff] %v7961_v31  ;;  %12460 = vst [vmem:[#allocation79_spill] sm:$0xff] %v7963_v32  ;;  %v617_v31 = vld [vmem:[#allocation2 + $0xa9] sm:$0xff] }
  0xff   : > { %1105 = vrot.lane.b32.xlu1 %v7515_v43, %s7298_s28  ;;  %1111 = vrot.lane.b32.xlu0 %v7519_v44, %s7298_s28 }
 0x101   : > { %v7969_v38 = vpop.permute.xlu1 %865  ;;  %v7971_v40 = vpop.permute.xlu0 %871 }
 0x102   : > { %12461 = vst [vmem:[#allocation80_spill] sm:$0xff] %v7969_v38  ;;  %12462 = vst [vmem:[#allocation81_spill] sm:$0xff] %v7971_v40  ;;  %v12521_v40 = vld [vmem:[#allocation40_spill] sm:$0xff] }
 0x103   : > { %1109 = vrot.lane.b32.xlu1 %v7523_v45, %s7298_s28  ;;  %1115 = vrot.lane.b32.xlu0 %v7527_v46, %s7298_s28  ;;  %v613_v38 = vld [vmem:[#allocation2 + $0x79] sm:$0xff] }
 0x105   : > { %v7977_v41 = vpop.permute.xlu1 %869  ;;  %v7979_v42 = vpop.permute.xlu0 %875 }
 0x106   : > { %12463 = vst [vmem:[#allocation82_spill] sm:$0xff] %v7977_v41  ;;  %12464 = vst [vmem:[#allocation83_spill] sm:$0xff] %v7979_v42  ;;  %v12513_v42 = vld [vmem:[#allocation32_spill] sm:$0xff] }
 0x107   : > { %1113 = vrot.lane.b32.xlu1 %v7531_v47, %s7298_s28  ;;  %1119 = vrot.lane.b32.xlu0 %v7535_v48, %s7298_s28 }
 0x109   : > { %v7985_v43 = vpop.permute.xlu1 %873  ;;  %v7987_v44 = vpop.permute.xlu0 %879 }
 0x10a   : > { %12465 = vst [vmem:[#allocation84_spill] sm:$0xff] %v7985_v43  ;;  %12466 = vst [vmem:[#allocation85_spill] sm:$0xff] %v7987_v44  ;;  %v12506_v44 = vld [vmem:[#allocation26_spill] sm:$0xff] }
 0x10b   : > { %1117 = vrot.lane.b32.xlu1 %v7539_v49, %s7298_s28  ;;  %1123 = vrot.lane.b32.xlu0 %v7543_v50, %s7298_s28 }
 0x10d   : > { %v7993_v45 = vpop.permute.xlu1 %877  ;;  %v7995_v46 = vpop.permute.xlu0 %883 }
 0x10e   : > { %12467 = vst [vmem:[#allocation86_spill] sm:$0xff] %v7993_v45  ;;  %12468 = vst [vmem:[#allocation87_spill] sm:$0xff] %v7995_v46 }
 0x10f   : > { %1121 = vrot.lane.b32.xlu1 %v7547_v51, %s7298_s28  ;;  %1127 = vrot.lane.b32.xlu0 %v7551_v52, %s7298_s28 }
 0x111   : > { %v8001_v47 = vpop.permute.xlu1 %881  ;;  %v8003_v48 = vpop.permute.xlu0 %887 }
 0x112   : > { %12469 = vst [vmem:[#allocation88_spill] sm:$0xff] %v8001_v47  ;;  %12470 = vst [vmem:[#allocation89_spill] sm:$0xff] %v8003_v48  ;;  %v12503_v47 = vld [vmem:[#allocation22_spill] sm:$0xff] }
 0x113   : > { %1125 = vrot.lane.b32.xlu1 %v7555_v53, %s7298_s28  ;;  %1131 = vrot.lane.b32.xlu0 %v7559_v54, %s7298_s28 }
 0x115   : > { %v8009_v49 = vpop.permute.xlu1 %885  ;;  %v8011_v50 = vpop.permute.xlu0 %891 }
 0x116   : > { %12471 = vst [vmem:[#allocation90_spill] sm:$0xff] %v8009_v49  ;;  %12472 = vst [vmem:[#allocation91_spill] sm:$0xff] %v8011_v50 }
 0x117   : > { %1129 = vrot.lane.b32.xlu1 %v7563_v55, %s7298_s28  ;;  %1135 = vrot.lane.b32.xlu0 %v7567_v56, %s7298_s28  ;;  %v8035_v56 = vld [vmem:[#allocation2 + $0x181] sm:$0xff] }
 0x119   : > { %v8017_v51 = vpop.permute.xlu1 %889  ;;  %v8019_v52 = vpop.permute.xlu0 %959 }
 0x11a   : > { %12473 = vst [vmem:[#allocation92_spill] sm:$0xff] %v8017_v51 }
 0x11b   : > { %1133 = vrot.lane.b32.xlu1 %v7571_v57, %s7298_s28  ;;  %1139 = vrot.lane.b32.xlu0 %v7577_v59, %s7298_s28 }
 0x11d   : > { %v8025_v53 = vpop.permute.xlu1 %893  ;;  %v8027_v54 = vpop.permute.xlu0 %963 }
 0x11e   : > { %12474 = vst [vmem:[#allocation93_spill] sm:$0xff] %v8025_v53 }
 0x11f   : > { %1137 = vrot.lane.b32.xlu1 %v7581_v60, %s7298_s28  ;;  %1143 = vrot.lane.b32.xlu0 %v7585_v61, %s7298_s28  ;;  %v8049_v60 = vld [vmem:[#allocation2 + $0x189] sm:$0xff] }
 0x121   : > { %v8033_v55 = vpop.permute.xlu1 %961  ;;  %v8037_v50 = vpop.permute.xlu0 %967 }
 0x123   : > { %1141 = vrot.lane.b32.xlu1 %v7591_v63, %s7298_s28  ;;  %1147 = vrot.lane.b32.xlu0 %v8035_v56, %s7298_s28 }
 0x125   : > { %v8043_v57 = vpop.permute.xlu1 %965  ;;  %v8045_v59 = vpop.permute.xlu0 %971 }
 0x127   : > { %1145 = vrot.lane.b32.xlu1 %v7597_v1, %s7298_s28  ;;  %1215 = vrot.lane.b32.xlu0 %v7600_v2, %s7299_s29 }
 0x129   : > { %v8053_v61 = vpop.permute.xlu1 %969  ;;  %v8055_v53 = vpop.permute.xlu0 %975 }
 0x12b   : > { %1149 = vrot.lane.b32.xlu1 %v8049_v60, %s7298_s28  ;;  %1219 = vrot.lane.b32.xlu0 %v7606_v4, %s7299_s29 }
 0x12d   : > { %v8061_v63 = vpop.permute.xlu1 %973  ;;  %v8063_v51 = vpop.permute.xlu0 %979 }
 0x12f   : > { %1217 = vrot.lane.b32.xlu1 %v7609_v5, %s7299_s29  ;;  %1223 = vrot.lane.b32.xlu0 %v7613_v6, %s7299_s29 }
 0x131   : > { %v8069_v1 = vpop.permute.xlu1 %977  ;;  %v8071_v2 = vpop.permute.xlu0 %983 }
 0x132   : > { %12475 = vst [vmem:[#allocation94_spill] sm:$0xff] %v8071_v2 }
 0x133   : > { %1221 = vrot.lane.b32.xlu1 %v7617_v7, %s7299_s29  ;;  %1227 = vrot.lane.b32.xlu0 %v7621_v8, %s7299_s29 }
 0x135   : > { %v8077_v4 = vpop.permute.xlu1 %981  ;;  %v8079_v48 = vpop.permute.xlu0 %987 }
 0x136   : > { %12476 = vst [vmem:[#allocation95_spill] sm:$0xff] %v8077_v4  ;;  %12477 = vst [vmem:[#allocation96_spill] sm:$0xff] %v8079_v48  ;;  %v638_v48 = vld [vmem:[#allocation2 + $0x1a1] sm:$0xff] }
 0x137   : > { %1225 = vrot.lane.b32.xlu1 %v7625_v9, %s7299_s29  ;;  %1231 = vrot.lane.b32.xlu0 %v7629_v10, %s7299_s29 }
 0x139   : > { %v8085_v5 = vpop.permute.xlu1 %985  ;;  %v8087_v6 = vpop.permute.xlu0 %991 }
 0x13a   : > { %12478 = vst [vmem:[#allocation97_spill] sm:$0xff] %v8085_v5  ;;  %12479 = vst [vmem:[#allocation98_spill] sm:$0xff] %v8087_v6  ;;  %v619_v6 = vld [vmem:[#allocation2 + $0xc1] sm:$0xff] }
 0x13b   : > { %1229 = vrot.lane.b32.xlu1 %v7633_v11, %s7299_s29  ;;  %1235 = vrot.lane.b32.xlu0 %v7637_v12, %s7299_s29 }
 0x13d   : > { %v8093_v7 = vpop.permute.xlu1 %989  ;;  %v8095_v8 = vpop.permute.xlu0 %995 }
 0x13e   : > { %12480 = vst [vmem:[#allocation99_spill] sm:$0xff] %v8093_v7  ;;  %12481 = vst [vmem:[#allocation100_spill] sm:$0xff] %v8095_v8  ;;  %v615_v7 = vld [vmem:[#allocation2 + $0x91] sm:$0xff] }
 0x13f   : > { %1233 = vrot.lane.b32.xlu1 %v7641_v13, %s7299_s29  ;;  %1239 = vrot.lane.b32.xlu0 %v7645_v14, %s7299_s29 }
 0x141   : > { %v8101_v9 = vpop.permute.xlu1 %993  ;;  %v8103_v10 = vpop.permute.xlu0 %999 }
 0x142   : > { %12482 = vst [vmem:[#allocation101_spill] sm:$0xff] %v8101_v9  ;;  %12483 = vst [vmem:[#allocation102_spill] sm:$0xff] %v8103_v10  ;;  %v12517_v10 = vld [vmem:[#allocation36_spill] sm:$0xff]  ;;  %v611_v9 = vld [vmem:[#allocation2 + $0x61] sm:$0xff] }
 0x143   : > { %1237 = vrot.lane.b32.xlu1 %v7649_v15, %s7299_s29  ;;  %1243 = vrot.lane.b32.xlu0 %v7653_v16, %s7299_s29 }
 0x145   : > { %v8109_v11 = vpop.permute.xlu1 %997  ;;  %v8111_v12 = vpop.permute.xlu0 %1003 }
 0x146   : > { %12484 = vst [vmem:[#allocation103_spill] sm:$0xff] %v8109_v11  ;;  %12485 = vst [vmem:[#allocation104_spill] sm:$0xff] %v8111_v12  ;;  %v12509_v12 = vld [vmem:[#allocation28_spill] sm:$0xff] }
 0x147   : > { %1241 = vrot.lane.b32.xlu1 %v7657_v17, %s7299_s29  ;;  %1247 = vrot.lane.b32.xlu0 %v7661_v18, %s7299_s29 }
 0x149   : > { %v8117_v13 = vpop.permute.xlu1 %1001  ;;  %v8119_v14 = vpop.permute.xlu0 %1007 }
 0x14a   : > { %12486 = vst [vmem:[#allocation105_spill] sm:$0xff] %v8117_v13  ;;  %12487 = vst [vmem:[#allocation106_spill] sm:$0xff] %v8119_v14 }
 0x14b   : > { %1245 = vrot.lane.b32.xlu1 %v7665_v19, %s7299_s29  ;;  %1251 = vrot.lane.b32.xlu0 %v7669_v20, %s7299_s29 }
 0x14d   : > { %v8125_v15 = vpop.permute.xlu1 %1005  ;;  %v8127_v16 = vpop.permute.xlu0 %1011 }
 0x14e   : > { %12488 = vst [vmem:[#allocation107_spill] sm:$0xff] %v8125_v15  ;;  %12489 = vst [vmem:[#allocation108_spill] sm:$0xff] %v8127_v16  ;;  %v12505_v15 = vld [vmem:[#allocation24_spill] sm:$0xff] }
 0x14f   : > { %1249 = vrot.lane.b32.xlu1 %v7673_v21, %s7299_s29  ;;  %1255 = vrot.lane.b32.xlu0 %v7677_v22, %s7299_s29 }
 0x151   : > { %v8133_v17 = vpop.permute.xlu1 %1009  ;;  %v8135_v18 = vpop.permute.xlu0 %1015 }
 0x152   : > { %12490 = vst [vmem:[#allocation109_spill] sm:$0xff] %v8133_v17  ;;  %12491 = vst [vmem:[#allocation110_spill] sm:$0xff] %v8135_v18 }
 0x153   : > { %1253 = vrot.lane.b32.xlu1 %v7681_v23, %s7299_s29  ;;  %1259 = vrot.lane.b32.xlu0 %v7685_v24, %s7299_s29 }
 0x155   : > { %v8141_v19 = vpop.permute.xlu1 %1013  ;;  %v8143_v20 = vpop.permute.xlu0 %1019 }
 0x156   : > { %12492 = vst [vmem:[#allocation111_spill] sm:$0xff] %v8141_v19  ;;  %12493 = vst [vmem:[#allocation112_spill] sm:$0xff] %v8143_v20  ;;  %v12496_v20 = vld [vmem:[#allocation5_spill] sm:$0xff]  ;;  %v12500_v19 = vld [vmem:[#allocation15_spill] sm:$0xff] }
 0x157   : > { %1257 = vrot.lane.b32.xlu1 %v7689_v28, %s7299_s29  ;;  %1263 = vrot.lane.b32.xlu0 %v7693_v29, %s7299_s29  ;;  %v12497_v28 = vld [vmem:[#allocation7_spill] sm:$0xff] }
 0x159   : > { %v8149_v21 = vpop.permute.xlu1 %1017  ;;  %v8151_v22 = vpop.permute.xlu0 %1087 }
 0x15a   : > { %12494 = vst [vmem:[#allocation113_spill] sm:$0xff] %v8149_v21  ;;  %v8167_v21 = vld [vmem:[#allocation2 + $0x182] sm:$0xff] }
 0x15b   : > { %1261 = vrot.lane.b32.xlu1 %v7699_v34, %s7299_s29  ;;  %1267 = vrot.lane.b32.xlu0 %v7703_v35, %s7299_s29  ;;  %v12498_v34 = vld [vmem:[#allocation9_spill] sm:$0xff] }
 0x15d   : > { %v8157_v23 = vpop.permute.xlu1 %1021  ;;  %v8159_v24 = vpop.permute.xlu0 %1091 }
 0x15e   : > { %12495 = vst [vmem:[#allocation114_spill] sm:$0xff] %v8157_v23 }
 0x15f   : > { %1265 = vrot.lane.b32.xlu1 %v12496_v20, %s7299_s29  ;;  %1271 = vrot.lane.b32.xlu0 %v12497_v28, %s7299_s29  ;;  %v12499_v20 = vld [vmem:[#allocation12_spill] sm:$0xff]  ;;  %v8181_v28 = vld [vmem:[#allocation2 + $0x18a] sm:$0xff] }
 0x161   : > { %v8165_v29 = vpop.permute.xlu1 %1089  ;;  %v8169_v18 = vpop.permute.xlu0 %1095 }
 0x163   : > { %1269 = vrot.lane.b32.xlu1 %v12498_v34, %s7299_s29  ;;  %1275 = vrot.lane.b32.xlu0 %v8167_v21, %s7299_s29  ;;  %v12501_v34 = vld [vmem:[#allocation18_spill] sm:$0xff] }
 0x165   : > { %v8175_v35 = vpop.permute.xlu1 %1093  ;;  %v8177_v23 = vpop.permute.xlu0 %1099 }
 0x167   : > { %1273 = vrot.lane.b32.xlu1 %v12499_v20, %s7299_s29  ;;  %1343 = vrot.lane.b32.xlu0 %v12500_v19, %s7300_s30  ;;  %v12502_v20 = vld [vmem:[#allocation20_spill] sm:$0xff] }
 0x169   : > { %v8185_v49 = vpop.permute.xlu1 %1097  ;;  %v8187_v16 = vpop.permute.xlu0 %1103 }
 0x16b   : > { %1277 = vrot.lane.b32.xlu1 %v8181_v28, %s7299_s29  ;;  %1347 = vrot.lane.b32.xlu0 %v12501_v34, %s7300_s30 }
 0x16d   : > { %v8193_v17 = vpop.permute.xlu1 %1101  ;;  %v8195_v46 = vpop.permute.xlu0 %1107 }
 0x16f   : > { %1345 = vrot.lane.b32.xlu1 %v12502_v20, %s7300_s30  ;;  %1351 = vrot.lane.b32.xlu0 %v12503_v47, %s7300_s30  ;;  %v12510_v20 = vld [vmem:[#allocation30_spill] sm:$0xff] }
 0x171   : > { %v8201_v19 = vpop.permute.xlu1 %1105  ;;  %v8203_v14 = vpop.permute.xlu0 %1111 }
 0x172   : > { %12504 = vst [vmem:[#allocation5_spill] sm:$0xff] %v8203_v14  ;;  %v649_v14 = vld [vmem:[#allocation2 + $0xaa] sm:$0xff] }
 0x173   : > { %1349 = vrot.lane.b32.xlu1 %v12505_v15, %s7300_s30  ;;  %1355 = vrot.lane.b32.xlu0 %v12506_v44, %s7300_s30  ;;  %v12514_v15 = vld [vmem:[#allocation34_spill] sm:$0xff] }
 0x175   : > { %v8209_v34 = vpop.permute.xlu1 %1109  ;;  %v8211_v45 = vpop.permute.xlu0 %1115 }
 0x176   : > { %12507 = vst [vmem:[#allocation7_spill] sm:$0xff] %v8209_v34  ;;  %12508 = vst [vmem:[#allocation9_spill] sm:$0xff] %v8211_v45 }
 0x177   : > { %1353 = vrot.lane.b32.xlu1 %v12509_v12, %s7300_s30  ;;  %1359 = vrot.lane.b32.xlu0 %v12510_v20, %s7300_s30  ;;  %v12518_v12 = vld [vmem:[#allocation38_spill] sm:$0xff] }
 0x179   : > { %v8217_v47 = vpop.permute.xlu1 %1113  ;;  %v8219_v13 = vpop.permute.xlu0 %1119 }
 0x17a   : > { %12511 = vst [vmem:[#allocation12_spill] sm:$0xff] %v8217_v47  ;;  %12512 = vst [vmem:[#allocation15_spill] sm:$0xff] %v8219_v13 }
 0x17b   : > { %1357 = vrot.lane.b32.xlu1 %v12513_v42, %s7300_s30  ;;  %1363 = vrot.lane.b32.xlu0 %v12514_v15, %s7300_s30  ;;  %v12522_v42 = vld [vmem:[#allocation42_spill] sm:$0xff] }
 0x17d   : > { %v8225_v44 = vpop.permute.xlu1 %1117  ;;  %v8227_v43 = vpop.permute.xlu0 %1123 }
 0x17e   : > { %12515 = vst [vmem:[#allocation18_spill] sm:$0xff] %v8225_v44  ;;  %12516 = vst [vmem:[#allocation20_spill] sm:$0xff] %v8227_v43  ;;  %v12525_v43 = vld [vmem:[#allocation44_spill] sm:$0xff] }
 0x17f   : > { %1361 = vrot.lane.b32.xlu1 %v12517_v10, %s7300_s30  ;;  %1367 = vrot.lane.b32.xlu0 %v12518_v12, %s7300_s30  ;;  %v12526_v10 = vld [vmem:[#allocation46_spill] sm:$0xff] }
 0x181   : > { %v8233_v20 = vpop.permute.xlu1 %1121  ;;  %v8235_v11 = vpop.permute.xlu0 %1127 }
 0x182   : > { %12519 = vst [vmem:[#allocation22_spill] sm:$0xff] %v8233_v20  ;;  %12520 = vst [vmem:[#allocation24_spill] sm:$0xff] %v8235_v11  ;;  %v12529_v11 = vld [vmem:[#allocation48_spill] sm:$0xff] }
 0x183   : > { %1365 = vrot.lane.b32.xlu1 %v12521_v40, %s7300_s30  ;;  %1371 = vrot.lane.b32.xlu0 %v12522_v42, %s7300_s30  ;;  %v12530_v40 = vld [vmem:[#allocation50_spill] sm:$0xff] }
 0x185   : > { %v8241_v15 = vpop.permute.xlu1 %1125  ;;  %v8243_v41 = vpop.permute.xlu0 %1131 }
 0x186   : > { %12523 = vst [vmem:[#allocation26_spill] sm:$0xff] %v8241_v15  ;;  %12524 = vst [vmem:[#allocation28_spill] sm:$0xff] %v8243_v41  ;;  %v12533_v41 = vld [vmem:[#allocation52_spill] sm:$0xff] }
 0x187   : > { %1369 = vrot.lane.b32.xlu1 %v12525_v43, %s7300_s30  ;;  %1375 = vrot.lane.b32.xlu0 %v12526_v10, %s7300_s30  ;;  %v12534_v43 = vld [vmem:[#allocation54_spill] sm:$0xff] }
 0x189   : > { %v8249_v12 = vpop.permute.xlu1 %1129  ;;  %v8251_v20 = vpop.permute.xlu0 %1135 }
 0x18a   : > { %12527 = vst [vmem:[#allocation30_spill] sm:$0xff] %v8249_v12  ;;  %12528 = vst [vmem:[#allocation32_spill] sm:$0xff] %v8251_v20  ;;  %v12537_v20 = vld [vmem:[#allocation56_spill] sm:$0xff] }
 0x18b   : > { %1373 = vrot.lane.b32.xlu1 %v12529_v11, %s7300_s30  ;;  %1379 = vrot.lane.b32.xlu0 %v12530_v40, %s7300_s30  ;;  %v12538_v11 = vld [vmem:[#allocation58_spill] sm:$0xff] }
 0x18d   : > { %v8257_v42 = vpop.permute.xlu1 %1133  ;;  %v8259_v15 = vpop.permute.xlu0 %1139 }
 0x18e   : > { %12531 = vst [vmem:[#allocation34_spill] sm:$0xff] %v8257_v42  ;;  %12532 = vst [vmem:[#allocation36_spill] sm:$0xff] %v8259_v15  ;;  %v12541_v15 = vld [vmem:[#allocation60_spill] sm:$0xff] }
 0x18f   : > { %1377 = vrot.lane.b32.xlu1 %v12533_v41, %s7300_s30  ;;  %1383 = vrot.lane.b32.xlu0 %v12534_v43, %s7300_s30  ;;  %v12542_v41 = vld [vmem:[#allocation62_spill] sm:$0xff] }
 0x191   : > { %v8265_v10 = vpop.permute.xlu1 %1137  ;;  %v8267_v12 = vpop.permute.xlu0 %1143 }
 0x192   : > { %12535 = vst [vmem:[#allocation38_spill] sm:$0xff] %v8265_v10  ;;  %12536 = vst [vmem:[#allocation40_spill] sm:$0xff] %v8267_v12  ;;  %v12544_v12 = vld [vmem:[#allocation64_spill] sm:$0xff] }
 0x193   : > { %1381 = vrot.lane.b32.xlu1 %v12537_v20, %s7300_s30  ;;  %1387 = vrot.lane.b32.xlu0 %v12538_v11, %s7300_s30 }
 0x195   : > { %v8273_v40 = vpop.permute.xlu1 %1141  ;;  %v8275_v42 = vpop.permute.xlu0 %1147 }
 0x196   : > { %12539 = vst [vmem:[#allocation42_spill] sm:$0xff] %v8273_v40  ;;  %12540 = vst [vmem:[#allocation44_spill] sm:$0xff] %v8275_v42  ;;  %v12546_v42 = vld [vmem:[#allocation67_spill] sm:$0xff] }
 0x197   : > { %1385 = vrot.lane.b32.xlu1 %v12541_v15, %s7300_s30  ;;  %1391 = vrot.lane.b32.xlu0 %v12542_v41, %s7300_s30  ;;  %v605_v41 = vld [vmem:[#allocation2 + $0x198] sm:$0xff]  ;;  %v609_v40 = vld [vmem:[#allocation2 + $0x49] sm:$0xff] }
 0x199   : > { %v8281_v43 = vpop.permute.xlu1 %1145  ;;  %v8283_v10 = vpop.permute.xlu0 %1215 }
 0x19a   : > { %12543 = vst [vmem:[#allocation46_spill] sm:$0xff] %v8281_v43 }
 0x19b   : > { %1389 = vrot.lane.b32.xlu1 %v12544_v12, %s7300_s30  ;;  %1395 = vrot.lane.b32.xlu0 %v7893_v39, %s7300_s30  ;;  %v607_v12 = vld [vmem:[#allocation2 + $0x31] sm:$0xff] }
 0x19d   : > { %v8289_v20 = vpop.permute.xlu1 %1149  ;;  %v8291_v11 = vpop.permute.xlu0 %1219 }
 0x19e   : > { %12545 = vst [vmem:[#allocation48_spill] sm:$0xff] %v8289_v20 }
 0x19f   : > { %1393 = vrot.lane.b32.xlu1 %v12546_v42, %s7300_s30  ;;  %1399 = vrot.lane.b32.xlu0 %v7901_v33, %s7300_s30  ;;  %v606_v42 = vld [vmem:[#allocation2 + $0x1a0] sm:$0xff] }
 0x1a1   : > { %v8297_v15 = vpop.permute.xlu1 %1217  ;;  %v8299_v43 = vpop.permute.xlu0 %1223 }
 0x1a3   : > { %1397 = vrot.lane.b32.xlu1 %v7911_v3, %s7300_s30  ;;  %1403 = vrot.lane.b32.xlu0 %v605_v41, %s7300_s30  ;;  %v608_v3 = vld [vmem:[#allocation2 + $0x39] sm:$0xff] }
 0x1a5   : > { %v8304_v39 = vpop.permute.xlu1 %1221  ;;  %v8306_v20 = vpop.permute.xlu0 %1227 }
 0x1a7   : > { %1401 = vrot.lane.b32.xlu1 %v7917_v37, %s7300_s30  ;;  %1471 = vrot.lane.b32.xlu0 %v607_v12, %s7301_s6  ;;  %v610_v37 = vld [vmem:[#allocation2 + $0x51] sm:$0xff] }
 0x1a9   : > { %v8311_v33 = vpop.permute.xlu1 %1225  ;;  %v8313_v8 = vpop.permute.xlu0 %1231 }
 0x1ab   : > { %1405 = vrot.lane.b32.xlu1 %v606_v42, %s7300_s30  ;;  %1475 = vrot.lane.b32.xlu0 %v609_v40, %s7301_s6  ;;  %v612_v42 = vld [vmem:[#allocation2 + $0x69] sm:$0xff] }
 0x1ad   : > { %v8317_v41 = vpop.permute.xlu1 %1229  ;;  %v8319_v32 = vpop.permute.xlu0 %1235 }
 0x1ae   : > { %12547 = vst [vmem:[#allocation50_spill] sm:$0xff] %v8319_v32 }
 0x1af   : > { %1473 = vrot.lane.b32.xlu1 %v608_v3, %s7301_s6  ;;  %1479 = vrot.lane.b32.xlu0 %v611_v9, %s7301_s6  ;;  %v614_v3 = vld [vmem:[#allocation2 + $0x81] sm:$0xff] }
 0x1b1   : > { %v8323_v12 = vpop.permute.xlu1 %1233  ;;  %v8325_v44 = vpop.permute.xlu0 %1239 }
 0x1b2   : > { %12548 = vst [vmem:[#allocation52_spill] sm:$0xff] %v8323_v12  ;;  %12549 = vst [vmem:[#allocation54_spill] sm:$0xff] %v8325_v44 }
 0x1b3   : > { %1477 = vrot.lane.b32.xlu1 %v610_v37, %s7301_s6  ;;  %1483 = vrot.lane.b32.xlu0 %v613_v38, %s7301_s6  ;;  %v616_v37 = vld [vmem:[#allocation2 + $0x99] sm:$0xff] }
 0x1b5   : > { %v8329_v40 = vpop.permute.xlu1 %1237  ;;  %v8331_v13 = vpop.permute.xlu0 %1243 }
 0x1b6   : > { %12550 = vst [vmem:[#allocation56_spill] sm:$0xff] %v8329_v40  ;;  %12551 = vst [vmem:[#allocation58_spill] sm:$0xff] %v8331_v13  ;;  %v621_v13 = vld [vmem:[#allocation2 + $0xd9] sm:$0xff] }
 0x1b7   : > { %1481 = vrot.lane.b32.xlu1 %v612_v42, %s7301_s6  ;;  %1487 = vrot.lane.b32.xlu0 %v615_v7, %s7301_s6  ;;  %v618_v42 = vld [vmem:[#allocation2 + $0xb1] sm:$0xff] }
 0x1b9   : > { %v8335_v9 = vpop.permute.xlu1 %1241  ;;  %v8337_v45 = vpop.permute.xlu0 %1247 }
 0x1ba   : > { %12552 = vst [vmem:[#allocation60_spill] sm:$0xff] %v8335_v9  ;;  %12553 = vst [vmem:[#allocation62_spill] sm:$0xff] %v8337_v45 }
 0x1bb   : > { %1485 = vrot.lane.b32.xlu1 %v614_v3, %s7301_s6  ;;  %1491 = vrot.lane.b32.xlu0 %v617_v31, %s7301_s6  ;;  %v620_v3 = vld [vmem:[#allocation2 + $0xc9] sm:$0xff] }
 0x1bd   : > { %v8341_v38 = vpop.permute.xlu1 %1245  ;;  %v8343_v47 = vpop.permute.xlu0 %1251 }
 0x1be   : > { %12554 = vst [vmem:[#allocation64_spill] sm:$0xff] %v8341_v38  ;;  %12555 = vst [vmem:[#allocation67_spill] sm:$0xff] %v8343_v47  ;;  %v623_v38 = vld [vmem:[#allocation2 + $0xf1] sm:$0xff]  ;;  %v625_v47 = vld [vmem:[#allocation2 + $0x109] sm:$0xff] }
 0x1bf   : > { %1489 = vrot.lane.b32.xlu1 %v616_v37, %s7301_s6  ;;  %1495 = vrot.lane.b32.xlu0 %v619_v6, %s7301_s6  ;;  %v622_v37 = vld [vmem:[#allocation2 + $0xe1] sm:$0xff] }
 0x1c1   : > { %v8347_v7 = vpop.permute.xlu1 %1249  ;;  %v8349_v9 = vpop.permute.xlu0 %1255 }
 0x1c2   : > { %12556 = vst [vmem:[#allocation115_spill] sm:$0xff] %v8347_v7  ;;  %12557 = vst [vmem:[#allocation116_spill] sm:$0xff] %v8349_v9  ;;  %v627_v9 = vld [vmem:[#allocation2 + $0x121] sm:$0xff] }
 0x1c3   : > { %1493 = vrot.lane.b32.xlu1 %v618_v42, %s7301_s6  ;;  %1499 = vrot.lane.b32.xlu0 %v621_v13, %s7301_s6  ;;  %v624_v42 = vld [vmem:[#allocation2 + $0xf9] sm:$0xff] }
 0x1c5   : > { %v8353_v31 = vpop.permute.xlu1 %1253  ;;  %v8355_v45 = vpop.permute.xlu0 %1259 }
 0x1c6   : > { %12558 = vst [vmem:[#allocation117_spill] sm:$0xff] %v8353_v31  ;;  %12559 = vst [vmem:[#allocation118_spill] sm:$0xff] %v8355_v45  ;;  %v629_v45 = vld [vmem:[#allocation2 + $0x139] sm:$0xff] }
 0x1c7   : > { %1497 = vrot.lane.b32.xlu1 %v620_v3, %s7301_s6  ;;  %1503 = vrot.lane.b32.xlu0 %v623_v38, %s7301_s6  ;;  %v626_v3 = vld [vmem:[#allocation2 + $0x111] sm:$0xff] }
 0x1c9   : > { %v8359_v6 = vpop.permute.xlu1 %1257  ;;  %v8361_v7 = vpop.permute.xlu0 %1263 }
 0x1ca   : > { %12560 = vst [vmem:[#allocation119_spill] sm:$0xff] %v8359_v6  ;;  %12561 = vst [vmem:[#allocation120_spill] sm:$0xff] %v8361_v7  ;;  %v631_v7 = vld [vmem:[#allocation2 + $0x151] sm:$0xff] }
 0x1cb   : > { %1501 = vrot.lane.b32.xlu1 %v622_v37, %s7301_s6  ;;  %1507 = vrot.lane.b32.xlu0 %v625_v47, %s7301_s6  ;;  %v628_v37 = vld [vmem:[#allocation2 + $0x129] sm:$0xff] }
 0x1cd   : > { %v8365_v13 = vpop.permute.xlu1 %1261  ;;  %v8367_v31 = vpop.permute.xlu0 %1267 }
 0x1ce   : > { %12562 = vst [vmem:[#allocation121_spill] sm:$0xff] %v8365_v13  ;;  %12563 = vst [vmem:[#allocation122_spill] sm:$0xff] %v8367_v31  ;;  %v634_v31 = vld [vmem:[#allocation2 + $0x171] sm:$0xff] }
 0x1cf   : > { %1505 = vrot.lane.b32.xlu1 %v624_v42, %s7301_s6  ;;  %1511 = vrot.lane.b32.xlu0 %v627_v9, %s7301_s6  ;;  %v630_v42 = vld [vmem:[#allocation2 + $0x141] sm:$0xff] }
 0x1d0   : > { %v1962_v9 = vld [vmem:[%s12313_s1 + $0x20] sm:$0xf] }
 0x1d1   : > { %v8371_v38 = vpop.permute.xlu1 %1265  ;;  %v8373_v6 = vpop.permute.xlu0 %1271  ;;  %7009 = vmatprep.subr.msk.mxu0 %vm2060_vm2, %v1962_v9  ;;  %7183 = vmatprep.subr.msk.mxu1 %vm2060_vm2, %v1962_v9 }
 0x1d2   : > { %12564 = vst [vmem:[#allocation123_spill] sm:$0xff] %v8371_v38  ;;  %12565 = vst [vmem:[#allocation124_spill] sm:$0xff] %v8373_v6  ;;  %7010 = vmatpush3.msk.msra.mxu0 %vm2060_vm2, %v1962_v9  ;;  %7188 = vmatpush3.msk.msra.mxu1 %vm2060_vm2, %v1962_v9  ;;  %v1958_v9 = vld [vmem:[%s12313_s1] sm:$0xff] }
 0x1d3   : > { %1509 = vrot.lane.b32.xlu1 %v626_v3, %s7301_s6  ;;  %1515 = vrot.lane.b32.xlu0 %v629_v45, %s7301_s6  ;;  %v633_v45 = vld [vmem:[#allocation2 + $0x169] sm:$0xff]  ;;  %v1961_v3 = vld [vmem:[%s12313_s1 + $0x18] sm:$0xff] }
 0x1d4   : > { %7011 = vmatprep.subr.mxu0 %v1961_v3  ;;  %7184 = vmatprep.subr.mxu1 %v1961_v3 }
 0x1d5   : > { %v8377_v47 = vpop.permute.xlu1 %1269  ;;  %v8379_v13 = vpop.permute.xlu0 %1275  ;;  %7012 = vmatpush3.msra.mxu0 %v1961_v3  ;;  %7189 = vmatpush3.msra.mxu1 %v1961_v3  ;;  %v639_v3 = vld [vmem:[#allocation2 + $0x32] sm:$0xff] }
 0x1d6   : > { %12566 = vst [vmem:[#allocation125_spill] sm:$0xff] %v8377_v47  ;;  %12567 = vst [vmem:[#allocation126_spill] sm:$0xff] %v8379_v13  ;;  %v632_v13 = vld [vmem:[#allocation2 + $0x159] sm:$0xff]  ;;  %v1959_v47 = vld [vmem:[%s12313_s1 + $0x8] sm:$0xff] }
 0x1d7   : > { %1513 = vrot.lane.b32.xlu1 %v628_v37, %s7301_s6  ;;  %1519 = vrot.lane.b32.xlu0 %v631_v7, %s7301_s6  ;;  %v1960_v7 = vld [vmem:[%s12313_s1 + $0x10] sm:$0xff] }
 0x1d8   : > { %7013 = vmatprep.subr.mxu0 %v1960_v7  ;;  %7185 = vmatprep.subr.mxu1 %v1960_v7 }
 0x1d9   : > { %v8386_v6 = vpop.permute.xlu1 %1273  ;;  %v8394_v37 = vpop.permute.xlu0 %1343  ;;  %7014 = vmatpush3.msra.mxu0 %v1960_v7  ;;  %7190 = vmatpush3.msra.mxu1 %v1960_v7  ;;  %v641_v7 = vld [vmem:[#allocation2 + $0x4a] sm:$0xff] }
 0x1da   : > { %12568 = vst [vmem:[#allocation127_spill] sm:$0xff] %v8386_v6  ;;  %7015 = vmatprep.subr.mxu0 %v1959_v47  ;;  %7186 = vmatprep.subr.mxu1 %v1959_v47 }
 0x1db   : > { %1517 = vrot.lane.b32.xlu1 %v630_v42, %s7301_s6  ;;  %1523 = vrot.lane.b32.xlu0 %v633_v45, %s7301_s6 }
 0x1dc   : > { %7016 = vmatpush3.msra.mxu0 %v1959_v47  ;;  %7191 = vmatpush3.msra.mxu1 %v1959_v47 }
 0x1dd   : > { %v8402_v6 = vpop.permute.xlu1 %1277  ;;  %v8407_v42 = vpop.permute.xlu0 %1347  ;;  %7017 = vmatprep.subr.mxu0 %v1958_v9  ;;  %7187 = vmatprep.subr.mxu1 %v1958_v9 }
 0x1de   : > { %12569 = vst [vmem:[#allocation128_spill] sm:$0xff] %v8402_v6  ;;  %v637_v6 = vld [vmem:[#allocation2 + $0x199] sm:$0xff]  ;;  %7018 = vmatpush3.msra.mxu0 %v1958_v9  ;;  %7192 = vmatpush3.msra.mxu1 %v1958_v9 }
 0x1df   : > { %1521 = vrot.lane.b32.xlu1 %v632_v13, %s7301_s6  ;;  %1527 = vrot.lane.b32.xlu0 %v8035_v56, %s7301_s6 }
 0x1e1   : > { %v8415_v45 = vpop.permute.xlu1 %1345  ;;  %v8417_v38 = vpop.permute.xlu0 %1351 }
 0x1e3   : > { %1525 = vrot.lane.b32.xlu1 %v634_v31, %s7301_s6  ;;  %1531 = vrot.lane.b32.xlu0 %v637_v6, %s7301_s6  ;;  %v640_v6 = vld [vmem:[#allocation2 + $0x3a] sm:$0xff] }
 0x1e5   : > { %v8421_v13 = vpop.permute.xlu1 %1349  ;;  %v8423_v56 = vpop.permute.xlu0 %1355 }
 0x1e7   : > { %1529 = vrot.lane.b32.xlu1 %v8049_v60, %s7301_s6  ;;  %1599 = vrot.lane.b32.xlu0 %v639_v3, %s7302_s17  ;;  %v642_v60 = vld [vmem:[#allocation2 + $0x52] sm:$0xff]  ;;  %v645_v3 = vld [vmem:[#allocation2 + $0x7a] sm:$0xff] }
 0x1e9   : > { %v8428_v31 = vpop.permute.xlu1 %1353  ;;  %v8430_v5 = vpop.permute.xlu0 %1359 }
 0x1eb   : > { %1533 = vrot.lane.b32.xlu1 %v638_v48, %s7301_s6  ;;  %1603 = vrot.lane.b32.xlu0 %v641_v7, %s7302_s17  ;;  %v644_v48 = vld [vmem:[#allocation2 + $0x6a] sm:$0xff] }
 0x1ed   : > { %v8434_v47 = vpop.permute.xlu1 %1357  ;;  %v8436_v44 = vpop.permute.xlu0 %1363 }
 0x1ee   : > { %12570 = vst [vmem:[#allocation129_spill] sm:$0xff] %v8436_v44 }
 0x1ef   : > { %1601 = vrot.lane.b32.xlu1 %v640_v6, %s7302_s17  ;;  %1607 = vrot.lane.b32.xlu0 %v643_v30, %s7302_s17  ;;  %v646_v6 = vld [vmem:[#allocation2 + $0x82] sm:$0xff] }
 0x1f1   : > { %v8440_v9 = vpop.permute.xlu1 %1361  ;;  %v8442_v27 = vpop.permute.xlu0 %1367 }
 0x1f2   : > { %12571 = vst [vmem:[#allocation130_spill] sm:$0xff] %v8440_v9  ;;  %12572 = vst [vmem:[#allocation131_spill] sm:$0xff] %v8442_v27  ;;  %v651_v27 = vld [vmem:[#allocation2 + $0xc2] sm:$0xff] }
 0x1f3   : > { %1605 = vrot.lane.b32.xlu1 %v642_v60, %s7302_s17  ;;  %1611 = vrot.lane.b32.xlu0 %v645_v3, %s7302_s17  ;;  %v648_v60 = vld [vmem:[#allocation2 + $0x9a] sm:$0xff] }
 0x1f5   : > { %v8446_v7 = vpop.permute.xlu1 %1365  ;;  %v8448_v40 = vpop.permute.xlu0 %1371 }
 0x1f6   : > { %12573 = vst [vmem:[#allocation132_spill] sm:$0xff] %v8446_v7  ;;  %12574 = vst [vmem:[#allocation133_spill] sm:$0xff] %v8448_v40  ;;  %v653_v40 = vld [vmem:[#allocation2 + $0xda] sm:$0xff] }
 0x1f7   : > { %1609 = vrot.lane.b32.xlu1 %v644_v48, %s7302_s17  ;;  %1615 = vrot.lane.b32.xlu0 %v647_v62, %s7302_s17  ;;  %v650_v48 = vld [vmem:[#allocation2 + $0xb2] sm:$0xff] }
 0x1f9   : > { %v8452_v30 = vpop.permute.xlu1 %1369  ;;  %v8454_v34 = vpop.permute.xlu0 %1375 }
 0x1fa   : > { %12575 = vst [vmem:[#allocation134_spill] sm:$0xff] %v8452_v30  ;;  %12576 = vst [vmem:[#allocation135_spill] sm:$0xff] %v8454_v34 }
 0x1fb   : > { %1613 = vrot.lane.b32.xlu1 %v646_v6, %s7302_s17  ;;  %1619 = vrot.lane.b32.xlu0 %v649_v14, %s7302_s17  ;;  %v652_v6 = vld [vmem:[#allocation2 + $0xca] sm:$0xff] }
 0x1fd   : > { %v8458_v3 = vpop.permute.xlu1 %1373  ;;  %v8460_v7 = vpop.permute.xlu0 %1379 }
 0x1fe   : > { %12577 = vst [vmem:[#allocation136_spill] sm:$0xff] %v8458_v3  ;;  %12578 = vst [vmem:[#allocation137_spill] sm:$0xff] %v8460_v7  ;;  %v655_v3 = vld [vmem:[#allocation2 + $0xf2] sm:$0xff]  ;;  %v657_v7 = vld [vmem:[#allocation2 + $0x10a] sm:$0xff] }
 0x1ff   : > { %1617 = vrot.lane.b32.xlu1 %v648_v60, %s7302_s17  ;;  %1623 = vrot.lane.b32.xlu0 %v651_v27, %s7302_s17  ;;  %v654_v60 = vld [vmem:[#allocation2 + $0xe2] sm:$0xff] }
 0x201   : > { %v8464_v62 = vpop.permute.xlu1 %1377  ;;  %v8466_v30 = vpop.permute.xlu0 %1383 }
 0x202   : > { %12579 = vst [vmem:[#allocation138_spill] sm:$0xff] %v8464_v62  ;;  %12580 = vst [vmem:[#allocation139_spill] sm:$0xff] %v8466_v30  ;;  %v659_v30 = vld [vmem:[#allocation2 + $0x122] sm:$0xff] }
 0x203   : > { %1621 = vrot.lane.b32.xlu1 %v650_v48, %s7302_s17  ;;  %1627 = vrot.lane.b32.xlu0 %v653_v40, %s7302_s17  ;;  %v656_v48 = vld [vmem:[#allocation2 + $0xfa] sm:$0xff] }
 0x205   : > { %v8470_v14 = vpop.permute.xlu1 %1381  ;;  %v8472_v34 = vpop.permute.xlu0 %1387 }
 0x206   : > { %12581 = vst [vmem:[#allocation140_spill] sm:$0xff] %v8470_v14  ;;  %12582 = vst [vmem:[#allocation141_spill] sm:$0xff] %v8472_v34  ;;  %v661_v34 = vld [vmem:[#allocation2 + $0x13a] sm:$0xff] }
 0x207   : > { %1625 = vrot.lane.b32.xlu1 %v652_v6, %s7302_s17  ;;  %1631 = vrot.lane.b32.xlu0 %v655_v3, %s7302_s17  ;;  %v658_v6 = vld [vmem:[#allocation2 + $0x112] sm:$0xff] }
 0x209   : > { %v8476_v27 = vpop.permute.xlu1 %1385  ;;  %v8478_v62 = vpop.permute.xlu0 %1391 }
 0x20a   : > { %12583 = vst [vmem:[#allocation142_spill] sm:$0xff] %v8476_v27  ;;  %12584 = vst [vmem:[#allocation143_spill] sm:$0xff] %v8478_v62  ;;  %v663_v62 = vld [vmem:[#allocation2 + $0x152] sm:$0xff] }
 0x20b   : > { %1629 = vrot.lane.b32.xlu1 %v654_v60, %s7302_s17  ;;  %1635 = vrot.lane.b32.xlu0 %v657_v7, %s7302_s17  ;;  %v660_v60 = vld [vmem:[#allocation2 + $0x12a] sm:$0xff] }
 0x20d   : > { %v8482_v40 = vpop.permute.xlu1 %1389  ;;  %v8484_v14 = vpop.permute.xlu0 %1395 }
 0x20e   : > { %12585 = vst [vmem:[#allocation144_spill] sm:$0xff] %v8482_v40  ;;  %12586 = vst [vmem:[#allocation145_spill] sm:$0xff] %v8484_v14  ;;  %v665_v14 = vld [vmem:[#allocation2 + $0x16a] sm:$0xff] }
 0x20f   : > { %1633 = vrot.lane.b32.xlu1 %v656_v48, %s7302_s17  ;;  %1639 = vrot.lane.b32.xlu0 %v659_v30, %s7302_s17  ;;  %v662_v48 = vld [vmem:[#allocation2 + $0x142] sm:$0xff] }
 0x211   : > { %v8488_v3 = vpop.permute.xlu1 %1393  ;;  %v8490_v27 = vpop.permute.xlu0 %1399 }
 0x212   : > { %12587 = vst [vmem:[#allocation146_spill] sm:$0xff] %v8488_v3  ;;  %12588 = vst [vmem:[#allocation147_spill] sm:$0xff] %v8490_v27 }
 0x213   : > { %1637 = vrot.lane.b32.xlu1 %v658_v6, %s7302_s17  ;;  %1643 = vrot.lane.b32.xlu0 %v661_v34, %s7302_s17  ;;  %v664_v6 = vld [vmem:[#allocation2 + $0x15a] sm:$0xff] }
 0x215   : > { %v8494_v7 = vpop.permute.xlu1 %1397  ;;  %v8496_v40 = vpop.permute.xlu0 %1403 }
 0x216   : > { %12589 = vst [vmem:[#allocation148_spill] sm:$0xff] %v8494_v7  ;;  %12590 = vst [vmem:[#allocation149_spill] sm:$0xff] %v8496_v40  ;;  %v666_v40 = vld [vmem:[#allocation2 + $0x172] sm:$0xff] }
 0x217   : > { %1641 = vrot.lane.b32.xlu1 %v660_v60, %s7302_s17  ;;  %1647 = vrot.lane.b32.xlu0 %v663_v62, %s7302_s17  ;;  %v669_v60 = vld [vmem:[#allocation2 + $0x19a] sm:$0xff] }
 0x219   : > { %v8500_v30 = vpop.permute.xlu1 %1401  ;;  %v1472_v3 = vpop.permute.xlu0 %1471 }
 0x21a   : > { %12591 = vst [vmem:[#allocation150_spill] sm:$0xff] %v8500_v30 }
 0x21b   : > { %1645 = vrot.lane.b32.xlu1 %v662_v48, %s7302_s17  ;;  %1651 = vrot.lane.b32.xlu0 %v665_v14, %s7302_s17 }
 0x21d   : > { %v8504_v34 = vpop.permute.xlu1 %1405  ;;  %v8506_v27 = vpop.permute.xlu0 %1475 }
 0x21e   : > { %12592 = vst [vmem:[#allocation151_spill] sm:$0xff] %v8504_v34 }
 0x21f   : > { %1649 = vrot.lane.b32.xlu1 %v664_v6, %s7302_s17  ;;  %1655 = vrot.lane.b32.xlu0 %v8167_v21, %s7302_s17  ;;  %v670_v6 = vld [vmem:[#allocation2 + $0x1a2] sm:$0xff] }
 0x221   : > { %v8511_v62 = vpop.permute.xlu1 %1473  ;;  %v8513_v30 = vpop.permute.xlu0 %1479 }
 0x223   : > { %1653 = vrot.lane.b32.xlu1 %v666_v40, %s7302_s17  ;;  %1659 = vrot.lane.b32.xlu0 %v669_v60, %s7302_s17 }
 0x225   : > { %v8517_v14 = vpop.permute.xlu1 %1477  ;;  %v8519_v48 = vpop.permute.xlu0 %1483 }
 0x227   : > { %1657 = vrot.lane.b32.xlu1 %v8181_v28, %s7302_s17 }
 0x229   : > { %v8523_v34 = vpop.permute.xlu1 %1481  ;;  %v8525_v21 = vpop.permute.xlu0 %1487 }
 0x22b   : > { %1661 = vrot.lane.b32.xlu1 %v670_v6, %s7302_s17 }
 0x22d   : > { %v8528_v7 = vpop.permute.xlu1 %1485  ;;  %v8530_v2 = vpop.permute.xlu0 %1491 }
 0x22e   : > { %12593 = vst [vmem:[#allocation152_spill] sm:$0xff] %v8530_v2 }
 0x231   : > { %v8532_v40 = vpop.permute.xlu1 %1489  ;;  %v8534_v60 = vpop.permute.xlu0 %1495 }
 0x232   : > { %12594 = vst [vmem:[#allocation153_spill] sm:$0xff] %v8532_v40  ;;  %12595 = vst [vmem:[#allocation154_spill] sm:$0xff] %v8534_v60 }
 0x235   : > { %v8536_v44 = vpop.permute.xlu1 %1493  ;;  %v8538_v4 = vpop.permute.xlu0 %1499 }
 0x236   : > { %12596 = vst [vmem:[#allocation155_spill] sm:$0xff] %v8536_v44  ;;  %12597 = vst [vmem:[#allocation156_spill] sm:$0xff] %v8538_v4 }
 0x239   : > { %v8540_v28 = vpop.permute.xlu1 %1497  ;;  %v8542_v58 = vpop.permute.xlu0 %1503 }
 0x23a   : > { %12598 = vst [vmem:[#allocation157_spill] sm:$0xff] %v8540_v28  ;;  %12599 = vst [vmem:[#allocation158_spill] sm:$0xff] %v8542_v58 }
 0x23d   : > { %v8544_v9 = vpop.permute.xlu1 %1501  ;;  %v8546_v32 = vpop.permute.xlu0 %1507 }
 0x23e   : > { %12600 = vst [vmem:[#allocation159_spill] sm:$0xff] %v8544_v9  ;;  %12601 = vst [vmem:[#allocation160_spill] sm:$0xff] %v8546_v32  ;;  %v382_v9 = vld [vmem:[#allocation2] sm:$0xff] }
 0x241   : > { %v8548_v6 = vpop.permute.xlu1 %1505  ;;  %v8550_v26 = vpop.permute.xlu0 %1511 }
 0x242   : > { %12602 = vst [vmem:[#allocation161_spill] sm:$0xff] %v8548_v6  ;;  %12603 = vst [vmem:[#allocation162_spill] sm:$0xff] %v8550_v26  ;;  %v12612_v26 = vld [vmem:[#allocation3_spill] sm:$0xff]  ;;  %v12618_v6 = vld [vmem:[#allocation6_spill] sm:$0xff] }
 0x245   : > { %v8552_v2 = vpop.permute.xlu1 %1509  ;;  %v8554_v40 = vpop.permute.xlu0 %1515 }
 0x246   : > { %12604 = vst [vmem:[#allocation163_spill] sm:$0xff] %v8552_v2  ;;  %12605 = vst [vmem:[#allocation164_spill] sm:$0xff] %v8554_v40  ;;  %v1695_v2 = vsel %vm261_vm0, %v382_v9, %v12612_v26 }
 0x249   : > { %v8556_v60 = vpop.permute.xlu1 %1513  ;;  %v8558_v44 = vpop.permute.xlu0 %1519 }
 0x24a   : > { %12606 = vst [vmem:[#allocation165_spill] sm:$0xff] %v8556_v60  ;;  %12607 = vst [vmem:[#allocation166_spill] sm:$0xff] %v8558_v44  ;;  %v12614_v60 = vld [vmem:[#allocation61_spill] sm:$0xff] }
 0x24b   : > { %v1728_v44 = vsel %vm1727_vm3, %v1695_v2, %v12614_v60  ;;  %v12617_v60 = vld [vmem:[#allocation4_spill] sm:$0xff] }
 0x24d   : > { %v8560_v4 = vpop.permute.xlu1 %1517  ;;  %v8562_v28 = vpop.permute.xlu0 %1523 }
 0x24e   : > { %12608 = vst [vmem:[#allocation167_spill] sm:$0xff] %v8560_v4  ;;  %12609 = vst [vmem:[#allocation168_spill] sm:$0xff] %v8562_v28  ;;  %v1761_v28 = vsel %vm1760_vm4, %v1728_v44, %v8019_v52  ;;  %v383_v4 = vld [vmem:[#allocation2 + $0x8] sm:$0xff] }
 0x24f   : > { %v1696_v52 = vsel %vm261_vm0, %v383_v4, %v12617_v60 }
 0x251   : > { %v8564_v58 = vpop.permute.xlu1 %1521  ;;  %v8566_v32 = vpop.permute.xlu0 %1527 }
 0x252   : > { %12610 = vst [vmem:[#allocation169_spill] sm:$0xff] %v8564_v58  ;;  %12611 = vst [vmem:[#allocation170_spill] sm:$0xff] %v8566_v32  ;;  %v1794_v32 = vsel %vm1793_vm5, %v1761_v28, %v8151_v22  ;;  %v12619_v28 = vld [vmem:[#allocation66_spill] sm:$0xff] }
 0x253   : > { %v1827_v26 = vsel %vm1826_vm6, %v1794_v32, %v8283_v10  ;;  %v1729_v32 = vsel %vm1727_vm3, %v1696_v52, %v12619_v28  ;;  %v7217_v52 = vld [vmem:[#allocation2 + $0x48] sm:$0xff]  ;;  %v12624_v28 = vld [vmem:[#allocation13_spill] sm:$0xff] }
 0x254   : > { %v1860_v2 = vsel %vm1859_vm7, %v1827_v26, %v8394_v37  ;;  %v1762_v37 = vsel %vm1760_vm4, %v1729_v32, %v8033_v55  ;;  %v12621_v26 = vld [vmem:[#allocation8_spill] sm:$0xff]  ;;  %v12623_v55 = vld [vmem:[#allocation11_spill] sm:$0xff] }
 0x255   : > { %v8570_v40 = vpop.permute.xlu1 %1525  ;;  %v8576_v58 = vpop.permute.xlu0 %1531  ;;  %v1893_v44 = vsel %vm1892_vm8, %v1860_v2, %v1472_v3  ;;  %v7215_v3 = vld [vmem:[#allocation2 + $0x30] sm:$0xff] }
 0x256   : > { %12613 = vst [vmem:[#allocation3_spill] sm:$0xff] %v8570_v40  ;;  %12615 = vst [vmem:[#allocation61_spill] sm:$0xff] %v8576_v58  ;;  %v7214_v40 = vld [vmem:[#allocation2 + $0x18] sm:$0xff]  ;;  %v1699_v2 = vsel %vm261_vm0, %v7215_v3, %v12621_v26 }
 0x257   : > { %v1697_v22 = vsel %vm261_vm0, %v7214_v40, %v12618_v6  ;;  %v7216_v40 = vld [vmem:[#allocation2 + $0x20] sm:$0xff]  ;;  %v12622_v6 = vld [vmem:[#allocation10_spill] sm:$0xff] }
 0x258   : > { %v1698_v60 = vsel %vm261_vm0, %v7216_v40, %v12622_v6  ;;  %v7219_v40 = vld [vmem:[#allocation2 + $0x60] sm:$0xff] }
 0x259   : > { %v8582_v9 = vpop.permute.xlu1 %1529  ;;  %v1600_v58 = vpop.permute.xlu0 %1599 }
 0x25a   : > { %12616 = vst [vmem:[#allocation171_spill] sm:$0xff] %v8582_v9  ;;  %v1926_v10 = vsel %vm1925_vm9, %v1893_v44, %v1600_v58  ;;  %v12620_v9 = vld [vmem:[#allocation65_spill] sm:$0xff]  ;;  %v1701_v44 = vsel %vm261_vm0, %v7217_v52, %v12623_v55  ;;  %v12627_v55 = vld [vmem:[#allocation68_spill] sm:$0xff] }
 0x25b   : > { %v1730_v12 = vsel %vm1727_vm3, %v1697_v22, %v12620_v9  ;;  %7019 = vmatprep.mubr.msk.f32.mxu0 %vm1963_vm10, %v1926_v10  ;;  %v1795_v9 = vsel %vm1793_vm5, %v1762_v37, %v8165_v29  ;;  %v7218_v22 = vld [vmem:[#allocation2 + $0x38] sm:$0xff]  ;;  %v12626_v29 = vld [vmem:[#allocation69_spill] sm:$0xff] }
 0x25c   : > { %v1763_v58 = vsel %vm1760_vm4, %v1730_v12, %v8027_v54  ;;  %v1700_v32 = vsel %vm261_vm0, %v7218_v22, %v12624_v28  ;;  %v1828_v3 = vsel %vm1826_vm6, %v1795_v9, %v8297_v15  ;;  %v12625_v54 = vld [vmem:[#allocation14_spill] sm:$0xff]  ;;  %v1731_v37 = vsel %vm1727_vm3, %v1698_v60, %v12626_v29  ;;  %v7220_v28 = vld [vmem:[#allocation2 + $0x50] sm:$0xff] }
 0x25d   : > { %v8599_v4 = vpop.permute.xlu1 %1533  ;;  %v1796_v10 = vsel %vm1793_vm5, %v1763_v58, %v8159_v24  ;;  %v1604_v26 = vpop.permute.xlu0 %1603  ;;  %v1703_v12 = vsel %vm261_vm0, %v7219_v40, %v12625_v54  ;;  %v1861_v52 = vsel %vm1859_vm7, %v1828_v3, %v8415_v45  ;;  %v1732_v24 = vsel %vm1727_vm3, %v1699_v2, %v12627_v55  ;;  %v12629_v40 = vld [vmem:[#allocation17_spill] sm:$0xff]  ;;  %v12630_v54 = vld [vmem:[#allocation71_spill] sm:$0xff] }
 0x25e   : > { %v1829_v6 = vsel %vm1826_vm6, %v1796_v10, %v8291_v11  ;;  %v1764_v15 = vsel %vm1760_vm4, %v1731_v37, %v8043_v57  ;;  %v1894_v9 = vsel %vm1892_vm8, %v1861_v52, %v8511_v62  ;;  %v1765_v60 = vsel %vm1760_vm4, %v1732_v24, %v8037_v50  ;;  %v12628_v57 = vld [vmem:[#allocation16_spill] sm:$0xff] }
 0x25f   : > { %v1862_v58 = vsel %vm1859_vm7, %v1829_v6, %v8407_v42  ;;  %v1797_v11 = vsel %vm1793_vm5, %v1764_v15, %v8175_v35  ;;  %v1702_v10 = vsel %vm261_vm0, %v7220_v28, %v12628_v57  ;;  %v1798_v42 = vsel %vm1793_vm5, %v1765_v60, %v8169_v18  ;;  %v7221_v35 = vld [vmem:[#allocation2 + $0x78] sm:$0xff]  ;;  %v7222_v15 = vld [vmem:[#allocation2 + $0x68] sm:$0xff] }
 0x260   : > { %v1895_v45 = vsel %vm1892_vm8, %v1862_v58, %v8506_v27  ;;  %v1830_v62 = vsel %vm1826_vm6, %v1797_v11, %v8304_v39  ;;  %v1705_v27 = vsel %vm261_vm0, %v7221_v35, %v12629_v40  ;;  %v1733_v29 = vsel %vm1727_vm3, %v1700_v32, %v12630_v54  ;;  %v12631_v39 = vld [vmem:[#allocation70_spill] sm:$0xff] }
 0x261   : > { %v1602_v22 = vpop.permute.xlu1 %1601  ;;  %v1928_v50 = vsel %vm1925_vm9, %v1895_v45, %v1604_v26  ;;  %v1608_v3 = vpop.permute.xlu0 %1607  ;;  %v1831_v37 = vsel %vm1826_vm6, %v1798_v42, %v8299_v43  ;;  %v1863_v18 = vsel %vm1859_vm7, %v1830_v62, %v8421_v13  ;;  %v1734_v26 = vsel %vm1727_vm3, %v1701_v44, %v12631_v39  ;;  %v7224_v42 = vld [vmem:[#allocation2 + $0x80] sm:$0xff] }
 0x262   : > { %v1927_v2 = vsel %vm1925_vm9, %v1894_v9, %v1602_v22  ;;  %v1766_v6 = vsel %vm1760_vm4, %v1733_v29, %v8053_v61  ;;  %v1864_v52 = vsel %vm1859_vm7, %v1831_v37, %v8417_v38  ;;  %v1896_v32 = vsel %vm1892_vm8, %v1863_v18, %v8517_v14  ;;  %v12632_v61 = vld [vmem:[#allocation19_spill] sm:$0xff]  ;;  %v12633_v22 = vld [vmem:[#allocation21_spill] sm:$0xff] }
 0x263   : > { %7020 = vmatmul.mubr.msk.f32.vlgmr.msra.gmra.mxu0 %vm1963_vm10, %v1927_v2  ;;  %v1767_v43 = vsel %vm1760_vm4, %v1734_v26, %v8045_v59  ;;  %v1799_v13 = vsel %vm1793_vm5, %v1766_v6, %v8185_v49  ;;  %v1897_v24 = vsel %vm1892_vm8, %v1864_v52, %v8513_v30  ;;  %v1704_v58 = vsel %vm261_vm0, %v7222_v15, %v12632_v61  ;;  %v7223_v49 = vld [vmem:[#allocation2 + $0x90] sm:$0xff]  ;;  %v12639_v52 = vld [vmem:[#allocation29_spill] sm:$0xff] }
 0x264   : > { %7022 = vmatprep.mubr.msk.f32.mxu0 %vm1963_vm10, %v1928_v50  ;;  %v1800_v38 = vsel %vm1793_vm5, %v1767_v43, %v8177_v23  ;;  %v1832_v14 = vsel %vm1826_vm6, %v1799_v13, %v8311_v33  ;;  %v1930_v59 = vsel %vm1925_vm9, %v1897_v24, %v1608_v3  ;;  %v1707_v30 = vsel %vm261_vm0, %v7223_v49, %v12633_v22  ;;  %v12634_v33 = vld [vmem:[#allocation72_spill] sm:$0xff]  ;;  %v12636_v3 = vld [vmem:[#allocation25_spill] sm:$0xff]  ;;  %v12641_v43 = vld [vmem:[#allocation50_spill] sm:$0xff] }
 0x265   : > { %v1606_v55 = vpop.permute.xlu1 %1605  ;;  %v1612_v9 = vpop.permute.xlu0 %1611  ;;  %v1735_v60 = vsel %vm1727_vm3, %v1702_v10, %v7929_v0  ;;  %v1833_v11 = vsel %vm1826_vm6, %v1800_v38, %v8306_v20  ;;  %v1865_v23 = vsel %vm1859_vm7, %v1832_v14, %v8428_v31  ;;  %v1736_v45 = vsel %vm1727_vm3, %v1703_v12, %v12634_v33  ;;  %v12642_v24 = vld [vmem:[#allocation130_spill] sm:$0xff]  ;;  %v12644_v61 = vld [vmem:[#allocation95_spill] sm:$0xff]  ;;  %v12645_v38 = vld [vmem:[#allocation129_spill] sm:$0xff] }
 0x266   : > { %v1929_v44 = vsel %vm1925_vm9, %v1896_v32, %v1606_v55  ;;  %v1768_v2 = vsel %vm1760_vm4, %v1735_v60, %v8061_v63  ;;  %v1866_v28 = vsel %vm1859_vm7, %v1833_v11, %v8423_v56  ;;  %v1898_v0 = vsel %vm1892_vm8, %v1865_v23, %v8523_v34  ;;  %v12635_v63 = vld [vmem:[#allocation23_spill] sm:$0xff]  ;;  %v12640_v32 = vld [vmem:[#allocation74_spill] sm:$0xff]  ;;  %v12649_v33 = vld [vmem:[#allocation152_spill] sm:$0xff] }
 0x267   : > { %7023 = vmatmul.mubr.msk.f32.gmra.mxu0 %vm1963_vm10, %v1929_v44  ;;  %v1769_v20 = vsel %vm1760_vm4, %v1736_v45, %v8055_v53  ;;  %v1801_v31 = vsel %vm1793_vm5, %v1768_v2, %v8193_v17  ;;  %v1899_v10 = vsel %vm1892_vm8, %v1866_v28, %v8519_v48  ;;  %v1706_v62 = vsel %vm261_vm0, %v7224_v42, %v12635_v63  ;;  %v7225_v17 = vld [vmem:[#allocation2 + $0xa8] sm:$0xff]  ;;  %v12643_v44 = vld [vmem:[#allocation73_spill] sm:$0xff]  ;;  %v12648_v11 = vld [vmem:[#allocation7_spill] sm:$0xff] }
 0x268   : > { %7025 = vmatprep.mubr.msk.f32.mxu0 %vm1963_vm10, %v1930_v59  ;;  %v1802_v56 = vsel %vm1793_vm5, %v1769_v20, %v8187_v16  ;;  %v1834_v34 = vsel %vm1826_vm6, %v1801_v31, %v8317_v41  ;;  %v1932_v53 = vsel %vm1925_vm9, %v1899_v10, %v1612_v9  ;;  %v1709_v48 = vsel %vm261_vm0, %v7225_v17, %v12636_v3  ;;  %v12646_v59 = vld [vmem:[#allocation153_spill] sm:$0xff]  ;;  %v12647_v22 = vld [vmem:[#allocation94_spill] sm:$0xff]  ;;  %v7228_v2 = vld [vmem:[#allocation2 + $0xb0] sm:$0xff] }
 0x269   : > { %v1610_v57 = vpop.permute.xlu1 %1609  ;;  %v1616_v50 = vpop.permute.xlu0 %1615  ;;  %v1737_v35 = vsel %vm1727_vm3, %v1704_v58, %v7937_v25  ;;  %v1835_v40 = vsel %vm1826_vm6, %v1802_v56, %v8313_v8  ;;  %v1867_v16 = vsel %vm1859_vm7, %v1834_v34, %v8434_v47  ;;  %v1738_v41 = vsel %vm1727_vm3, %v1705_v27, %v7931_v36  ;;  %v7226_v27 = vld [vmem:[#allocation2 + $0x98] sm:$0xff]  ;;  %v12650_v28 = vld [vmem:[#allocation31_spill] sm:$0xff] }
 0x26a   : > { %v1931_v12 = vsel %vm1925_vm9, %v1898_v0, %v1610_v57  ;;  %v1770_v54 = vsel %vm1760_vm4, %v1737_v35, %v8069_v1  ;;  %v1868_v29 = vsel %vm1859_vm7, %v1835_v40, %v8430_v5  ;;  %v1900_v25 = vsel %vm1892_vm8, %v1867_v16, %v8528_v7  ;;  %v12637_v1 = vld [vmem:[#allocation27_spill] sm:$0xff]  ;;  %v12638_v7 = vld [vmem:[#allocation52_spill] sm:$0xff]  ;;  %v12651_v57 = vld [vmem:[#allocation5_spill] sm:$0xff] }
 0x26b   : > { %7026 = vmatmul.mubr.msk.f32.gmra.mxu0 %vm1963_vm10, %v1931_v12  ;;  %v1771_v8 = vsel %vm1760_vm4, %v1738_v41, %v8063_v51  ;;  %v1803_v47 = vsel %vm1793_vm5, %v1770_v54, %v8201_v19  ;;  %v1901_v18 = vsel %vm1892_vm8, %v1868_v29, %v8525_v21  ;;  %v1708_v39 = vsel %vm261_vm0, %v7226_v27, %v12637_v1  ;;  %v7227_v19 = vld [vmem:[#allocation2 + $0xc0] sm:$0xff]  ;;  %v12652_v31 = vld [vmem:[#allocation56_spill] sm:$0xff]  ;;  %v12653_v63 = vld [vmem:[#allocation75_spill] sm:$0xff] }
 0x26c   : > { %7028 = vmatprep.mubr.msk.f32.mxu0 %vm1963_vm10, %v1932_v53  ;;  %v1804_v5 = vsel %vm1793_vm5, %v1771_v8, %v8195_v46  ;;  %v1836_v26 = vsel %vm1826_vm6, %v1803_v47, %v12638_v7  ;;  %v1934_v51 = vsel %vm1925_vm9, %v1901_v18, %v1616_v50  ;;  %v1711_v21 = vsel %vm261_vm0, %v7227_v19, %v12639_v52  ;;  %v12654_v56 = vld [vmem:[#allocation76_spill] sm:$0xff]  ;;  %v12655_v53 = vld [vmem:[#allocation54_spill] sm:$0xff]  ;;  %v12657_v35 = vld [vmem:[#allocation77_spill] sm:$0xff] }
 0x26d   : > { %v1614_v37 = vpop.permute.xlu1 %1613  ;;  %v1620_v6 = vpop.permute.xlu0 %1619  ;;  %v1739_v55 = vsel %vm1727_vm3, %v1706_v62, %v12640_v32  ;;  %v1837_v13 = vsel %vm1826_vm6, %v1804_v5, %v12641_v43  ;;  %v1869_v46 = vsel %vm1859_vm7, %v1836_v26, %v12642_v24  ;;  %v1740_v15 = vsel %vm1727_vm3, %v1707_v30, %v12643_v44  ;;  %v12656_v17 = vld [vmem:[#allocation132_spill] sm:$0xff]  ;;  %v12658_v16 = vld [vmem:[#allocation97_spill] sm:$0xff]  ;;  %v12659_v54 = vld [vmem:[#allocation131_spill] sm:$0xff] }
 0x26e   : > { %v1933_v36 = vsel %vm1925_vm9, %v1900_v25, %v1614_v37  ;;  %v1772_v58 = vsel %vm1760_vm4, %v1739_v55, %v12644_v61  ;;  %v1870_v14 = vsel %vm1859_vm7, %v1837_v13, %v12645_v38  ;;  %v1902_v9 = vsel %vm1892_vm8, %v1869_v46, %v12646_v59  ;;  %v12660_v29 = vld [vmem:[#allocation155_spill] sm:$0xff]  ;;  %v12661_v8 = vld [vmem:[#allocation96_spill] sm:$0xff]  ;;  %v12663_v27 = vld [vmem:[#allocation154_spill] sm:$0xff] }
 0x26f   : > { %7029 = vmatmul.mubr.msk.f32.gmra.mxu0 %vm1963_vm10, %v1933_v36  ;;  %v1773_v60 = vsel %vm1760_vm4, %v1740_v15, %v12647_v22  ;;  %v1805_v23 = vsel %vm1793_vm5, %v1772_v58, %v12648_v11  ;;  %v1903_v45 = vsel %vm1892_vm8, %v1870_v14, %v12649_v33  ;;  %v1710_v0 = vsel %vm261_vm0, %v7228_v2, %v12650_v28  ;;  %v12662_v18 = vld [vmem:[#allocation12_spill] sm:$0xff]  ;;  %v12664_v5 = vld [vmem:[#allocation98_spill] sm:$0xff]  ;;  %v12665_v26 = vld [vmem:[#allocation9_spill] sm:$0xff] }
 0x270   : > { %7031 = vmatprep.mubr.msk.f32.mxu0 %vm1963_vm10, %v1934_v51  ;;  %v1806_v20 = vsel %vm1793_vm5, %v1773_v60, %v12651_v57  ;;  %v1838_v10 = vsel %vm1826_vm6, %v1805_v23, %v12652_v31  ;;  %v1936_v12 = vsel %vm1925_vm9, %v1903_v45, %v1620_v6  ;;  %v1742_v62 = vsel %vm1727_vm3, %v1709_v48, %v12653_v63  ;;  %v12666_v6 = vld [vmem:[#allocation60_spill] sm:$0xff]  ;;  %v12667_v32 = vld [vmem:[#allocation78_spill] sm:$0xff]  ;;  %v12668_v43 = vld [vmem:[#allocation15_spill] sm:$0xff] }
 0x271   : > { %v1618_v49 = vpop.permute.xlu1 %1617  ;;  %v1624_v42 = vpop.permute.xlu0 %1623  ;;  %v1741_v34 = vsel %vm1727_vm3, %v1708_v39, %v12654_v56  ;;  %v1839_v50 = vsel %vm1826_vm6, %v1806_v20, %v12655_v53  ;;  %v1871_v3 = vsel %vm1859_vm7, %v1838_v10, %v12656_v17  ;;  %v1744_v40 = vsel %vm1727_vm3, %v1711_v21, %v12657_v35  ;;  %v12669_v24 = vld [vmem:[#allocation58_spill] sm:$0xff]  ;;  %v12671_v61 = vld [vmem:[#allocation99_spill] sm:$0xff]  ;;  %v12673_v59 = vld [vmem:[#allocation133_spill] sm:$0xff] }
 0x272   : > { %v1935_v30 = vsel %vm1925_vm9, %v1902_v9, %v1618_v49  ;;  %v1774_v41 = vsel %vm1760_vm4, %v1741_v34, %v12658_v16  ;;  %v1872_v48 = vsel %vm1859_vm7, %v1839_v50, %v12659_v54  ;;  %v1904_v25 = vsel %vm1892_vm8, %v1871_v3, %v12660_v29  ;;  %v12670_v44 = vld [vmem:[#allocation134_spill] sm:$0xff]  ;;  %v12674_v49 = vld [vmem:[#allocation157_spill] sm:$0xff]  ;;  %v12676_v33 = vld [vmem:[#allocation135_spill] sm:$0xff] }
 0x273   : > { %7032 = vmatmul.mubr.msk.f32.gmra.mxu0 %vm1963_vm10, %v1935_v30  ;;  %v1775_v47 = vsel %vm1760_vm4, %v1742_v62, %v12661_v8  ;;  %v1807_v36 = vsel %vm1793_vm5, %v1774_v41, %v12662_v18  ;;  %v1905_v1 = vsel %vm1892_vm8, %v1872_v48, %v12663_v27  ;;  %v1777_v7 = vsel %vm1760_vm4, %v1744_v40, %v12664_v5  ;;  %v12672_v38 = vld [vmem:[#allocation62_spill] sm:$0xff]  ;;  %v12677_v30 = vld [vmem:[#allocation156_spill] sm:$0xff]  ;;  %v12678_v57 = vld [vmem:[#allocation35_spill] sm:$0xff] }
 0x274   : > { %7034 = vmatprep.mubr.msk.f32.mxu0 %vm1963_vm10, %v1936_v12  ;;  %v1808_v51 = vsel %vm1793_vm5, %v1775_v47, %v12665_v26  ;;  %v1840_v19 = vsel %vm1826_vm6, %v1807_v36, %v12666_v6  ;;  %v1938_v52 = vsel %vm1925_vm9, %v1905_v1, %v1624_v42  ;;  %v1743_v55 = vsel %vm1727_vm3, %v1710_v0, %v12667_v32  ;;  %v12675_v11 = vld [vmem:[#allocation18_spill] sm:$0xff]  ;;  %v12679_v31 = vld [vmem:[#allocation64_spill] sm:$0xff]  ;;  %v12681_v34 = vld [vmem:[#allocation33_spill] sm:$0xff] }
 0x275   : > { %v1622_v37 = vpop.permute.xlu1 %1621  ;;  %v1628_v21 = vpop.permute.xlu0 %1627  ;;  %v1810_v13 = vsel %vm1793_vm5, %v1777_v7, %v12668_v43  ;;  %v1841_v46 = vsel %vm1826_vm6, %v1808_v51, %v12669_v24  ;;  %v1873_v15 = vsel %vm1859_vm7, %v1840_v19, %v12670_v44  ;;  %v1776_v58 = vsel %vm1760_vm4, %v1743_v55, %v12671_v61  ;;  %v7229_v0 = vld [vmem:[#allocation2 + $0xc8] sm:$0xff]  ;;  %v7230_v56 = vld [vmem:[#allocation2 + $0xd8] sm:$0xff]  ;;  %v12684_v16 = vld [vmem:[#allocation79_spill] sm:$0xff] }
 0x276   : > { %v1937_v39 = vsel %vm1925_vm9, %v1904_v25, %v1622_v37  ;;  %v1843_v14 = vsel %vm1826_vm6, %v1810_v13, %v12672_v38  ;;  %v1874_v9 = vsel %vm1859_vm7, %v1841_v46, %v12673_v59  ;;  %v1906_v22 = vsel %vm1892_vm8, %v1873_v15, %v12674_v49  ;;  %v12680_v12 = vld [vmem:[#allocation158_spill] sm:$0xff]  ;;  %v12682_v50 = vld [vmem:[#allocation80_spill] sm:$0xff]  ;;  %v12685_v54 = vld [vmem:[#allocation101_spill] sm:$0xff] }
 0x277   : > { %7035 = vmatmul.mubr.msk.f32.gmra.mxu0 %vm1963_vm10, %v1937_v39  ;;  %v1809_v23 = vsel %vm1793_vm5, %v1776_v58, %v12675_v11  ;;  %v1876_v45 = vsel %vm1859_vm7, %v1843_v14, %v12676_v33  ;;  %v1907_v2 = vsel %vm1892_vm8, %v1874_v9, %v12677_v30  ;;  %v1712_v20 = vsel %vm261_vm0, %v7229_v0, %v12678_v57  ;;  %v12683_v3 = vld [vmem:[#allocation136_spill] sm:$0xff]  ;;  %v12686_v29 = vld [vmem:[#allocation159_spill] sm:$0xff]  ;;  %v12688_v18 = vld [vmem:[#allocation22_spill] sm:$0xff] }
 0x278   : > { %7037 = vmatprep.mubr.msk.f32.mxu0 %vm1963_vm10, %v1938_v52  ;;  %v1842_v10 = vsel %vm1826_vm6, %v1809_v23, %v12679_v31  ;;  %v1909_v42 = vsel %vm1892_vm8, %v1876_v45, %v12680_v12  ;;  %v1940_v63 = vsel %vm1925_vm9, %v1907_v2, %v1628_v21  ;;  %v1713_v53 = vsel %vm261_vm0, %v7230_v56, %v12681_v34  ;;  %v12687_v8 = vld [vmem:[#allocation100_spill] sm:$0xff]  ;;  %v7231_v1 = vld [vmem:[#allocation2 + $0xe0] sm:$0xff]  ;;  %v12689_v39 = vld [vmem:[#allocation39_spill] sm:$0xff] }
 0x279   : > { %v1626_v60 = vpop.permute.xlu1 %1625  ;;  %v1632_v62 = vpop.permute.xlu0 %1631  ;;  %v1745_v17 = vsel %vm1727_vm3, %v1712_v20, %v12682_v50  ;;  %v1875_v35 = vsel %vm1859_vm7, %v1842_v10, %v12683_v3  ;;  %v1746_v41 = vsel %vm1727_vm3, %v1713_v53, %v12684_v16  ;;  %v1714_v5 = vsel %vm261_vm0, %v7231_v1, %v12689_v39  ;;  %v12690_v7 = vld [vmem:[#allocation20_spill] sm:$0xff]  ;;  %v12691_v51 = vld [vmem:[#allocation115_spill] sm:$0xff]  ;;  %v12692_v21 = vld [vmem:[#allocation37_spill] sm:$0xff] }
 0x27a   : > { %v1939_v28 = vsel %vm1925_vm9, %v1906_v22, %v1626_v60  ;;  %v1942_v40 = vsel %vm1925_vm9, %v1909_v42, %v1632_v62  ;;  %v1778_v48 = vsel %vm1760_vm4, %v1745_v17, %v12685_v54  ;;  %v1908_v25 = vsel %vm1892_vm8, %v1875_v35, %v12686_v29  ;;  %v7232_v52 = vld [vmem:[#allocation2 + $0xf0] sm:$0xff]  ;;  %v12693_v55 = vld [vmem:[#allocation82_spill] sm:$0xff]  ;;  %v12696_v15 = vld [vmem:[#allocation81_spill] sm:$0xff] }
 0x27b   : > { %7038 = vmatmul.mubr.msk.f32.gmra.mxu0 %vm1963_vm10, %v1939_v28  ;;  %7043 = vmatprep.mubr.msk.f32.mxu1 %vm1963_vm10, %v1942_v40  ;;  %v1779_v47 = vsel %vm1760_vm4, %v1746_v41, %v12687_v8  ;;  %v1811_v36 = vsel %vm1793_vm5, %v1778_v48, %v12688_v18  ;;  %v1715_v32 = vsel %vm261_vm0, %v7232_v52, %v12692_v21  ;;  %v12694_v13 = vld [vmem:[#allocation67_spill] sm:$0xff]  ;;  %v12695_v46 = vld [vmem:[#allocation138_spill] sm:$0xff]  ;;  %v12698_v14 = vld [vmem:[#allocation137_spill] sm:$0xff] }
 0x27c   : > { %7040 = vmatprep.mubr.msk.f32.mxu0 %vm1963_vm10, %v1940_v63  ;;  %v1812_v26 = vsel %vm1793_vm5, %v1779_v47, %v12690_v7  ;;  %v1844_v6 = vsel %vm1826_vm6, %v1811_v36, %v12691_v51  ;;  %v1747_v43 = vsel %vm1727_vm3, %v1714_v5, %v12693_v55  ;;  %v1748_v61 = vsel %vm1727_vm3, %v1715_v32, %v12696_v15  ;;  %v12697_v58 = vld [vmem:[#allocation103_spill] sm:$0xff]  ;;  %v12699_v9 = vld [vmem:[#allocation161_spill] sm:$0xff]  ;;  %v12700_v60 = vld [vmem:[#allocation102_spill] sm:$0xff] }
 0x27d   : > { %v1630_v37 = vpop.permute.xlu1 %1629  ;;  %v1636_v19 = vpop.permute.xlu0 %1635  ;;  %v1845_v24 = vsel %vm1826_vm6, %v1812_v26, %v12694_v13  ;;  %v1877_v44 = vsel %vm1859_vm7, %v1844_v6, %v12695_v46  ;;  %v1780_v38 = vsel %vm1760_vm4, %v1747_v43, %v12697_v58  ;;  %v1781_v11 = vsel %vm1760_vm4, %v1748_v61, %v12700_v60  ;;  %v12701_v23 = vld [vmem:[#allocation26_spill] sm:$0xff]  ;;  %v12702_v45 = vld [vmem:[#allocation160_spill] sm:$0xff]  ;;  %v12703_v0 = vld [vmem:[#allocation43_spill] sm:$0xff] }
 0x27e   : > { %v1941_v27 = vsel %vm1925_vm9, %v1908_v25, %v1630_v37  ;;  %v1878_v59 = vsel %vm1859_vm7, %v1845_v24, %v12698_v14  ;;  %v1910_v49 = vsel %vm1892_vm8, %v1877_v44, %v12699_v9  ;;  %v1813_v33 = vsel %vm1793_vm5, %v1780_v38, %v12701_v23  ;;  %v7233_v28 = vld [vmem:[#allocation2 + $0xf8] sm:$0xff]  ;;  %v12705_v10 = vld [vmem:[#allocation117_spill] sm:$0xff]  ;;  %v7234_v62 = vld [vmem:[#allocation2 + $0x108] sm:$0xff] }
 0x27f   : > { %7041 = vmatmul.mubr.msk.f32.gmra.mxu0 %vm1963_vm10, %v1941_v27  ;;  %v1911_v30 = vsel %vm1892_vm8, %v1878_v59, %v12702_v45  ;;  %v1716_v57 = vsel %vm261_vm0, %v7233_v28, %v12703_v0  ;;  %v12704_v20 = vld [vmem:[#allocation24_spill] sm:$0xff]  ;;  %v1846_v12 = vsel %vm1826_vm6, %v1813_v33, %v12705_v10  ;;  %v12706_v56 = vld [vmem:[#allocation41_spill] sm:$0xff]  ;;  %v12710_v16 = vld [vmem:[#allocation83_spill] sm:$0xff] }
 0x280   : > { %v1814_v31 = vsel %vm1793_vm5, %v1781_v11, %v12704_v20  ;;  %v1944_v42 = vsel %vm1925_vm9, %v1911_v30, %v1636_v19  ;;  %v1717_v34 = vsel %vm261_vm0, %v7234_v62, %v12706_v56  ;;  %v12707_v53 = vld [vmem:[#allocation84_spill] sm:$0xff]  ;;  %v12711_v54 = vld [vmem:[#allocation105_spill] sm:$0xff]  ;;  %v12712_v29 = vld [vmem:[#allocation139_spill] sm:$0xff] }
 0x281   : > { %v1634_v22 = vpop.permute.xlu1 %1633  ;;  %v1640_v63 = vpop.permute.xlu0 %1639  ;;  %v1749_v50 = vsel %vm1727_vm3, %v1716_v57, %v12707_v53  ;;  %v12708_v17 = vld [vmem:[#allocation116_spill] sm:$0xff]  ;;  %v1750_v41 = vsel %vm1727_vm3, %v1717_v34, %v12710_v16  ;;  %v12713_v37 = vld [vmem:[#allocation163_spill] sm:$0xff]  ;;  %v12715_v27 = vld [vmem:[#allocation30_spill] sm:$0xff] }
 0x282   : > { %v1943_v2 = vsel %vm1925_vm9, %v1910_v49, %v1634_v22  ;;  %v1847_v3 = vsel %vm1826_vm6, %v1814_v31, %v12708_v17  ;;  %v12709_v35 = vld [vmem:[#allocation140_spill] sm:$0xff]  ;;  %v1782_v48 = vsel %vm1760_vm4, %v1749_v50, %v12711_v54  ;;  %v12716_v39 = vld [vmem:[#allocation162_spill] sm:$0xff]  ;;  %v7235_v26 = vld [vmem:[#allocation2 + $0x110] sm:$0xff] }
 0x283   : > { %7044 = vmatmul.mubr.msk.f32.vlgmr.msra.gmra.mxu1 %vm1963_vm10, %v1943_v2  ;;  %v1879_v40 = vsel %vm1859_vm7, %v1846_v12, %v12709_v35  ;;  %v1880_v25 = vsel %vm1859_vm7, %v1847_v3, %v12712_v29  ;;  %v12714_v18 = vld [vmem:[#allocation104_spill] sm:$0xff]  ;;  %v1815_v1 = vsel %vm1793_vm5, %v1782_v48, %v12715_v27  ;;  %v12717_v51 = vld [vmem:[#allocation47_spill] sm:$0xff]  ;;  %v7236_v13 = vld [vmem:[#allocation2 + $0x120] sm:$0xff] }
 0x284   : > { %7046 = vmatprep.mubr.msk.f32.mxu1 %vm1963_vm10, %v1944_v42  ;;  %v1912_v8 = vsel %vm1892_vm8, %v1879_v40, %v12713_v37  ;;  %v1783_v36 = vsel %vm1760_vm4, %v1750_v41, %v12714_v18  ;;  %v1913_v5 = vsel %vm1892_vm8, %v1880_v25, %v12716_v39  ;;  %v1718_v6 = vsel %vm261_vm0, %v7235_v26, %v12717_v51  ;;  %v12718_v19 = vld [vmem:[#allocation28_spill] sm:$0xff]  ;;  %v12719_v21 = vld [vmem:[#allocation119_spill] sm:$0xff]  ;;  %v12720_v24 = vld [vmem:[#allocation45_spill] sm:$0xff] }
 0x285   : > { %v1638_v47 = vpop.permute.xlu1 %1637  ;;  %v1816_v52 = vsel %vm1793_vm5, %v1783_v36, %v12718_v19  ;;  %v1848_v32 = vsel %vm1826_vm6, %v1815_v1, %v12719_v21  ;;  %v1946_v55 = vsel %vm1925_vm9, %v1913_v5, %v1640_v63  ;;  %v1644_v43 = vpop.permute.xlu0 %1643  ;;  %v1719_v46 = vsel %vm261_vm0, %v7236_v13, %v12720_v24  ;;  %v12721_v44 = vld [vmem:[#allocation86_spill] sm:$0xff]  ;;  %v12724_v59 = vld [vmem:[#allocation85_spill] sm:$0xff]  ;;  %v12725_v49 = vld [vmem:[#allocation107_spill] sm:$0xff] }
 0x286   : > { %v1945_v7 = vsel %vm1925_vm9, %v1912_v8, %v1638_v47  ;;  %v1751_v15 = vsel %vm1727_vm3, %v1718_v6, %v12721_v44  ;;  %v12722_v61 = vld [vmem:[#allocation118_spill] sm:$0xff]  ;;  %v1752_v9 = vsel %vm1727_vm3, %v1719_v46, %v12724_v59  ;;  %v12726_v60 = vld [vmem:[#allocation141_spill] sm:$0xff]  ;;  %v12730_v57 = vld [vmem:[#allocation164_spill] sm:$0xff] }
 0x287   : > { %7047 = vmatmul.mubr.msk.f32.gmra.mxu1 %vm1963_vm10, %v1945_v7  ;;  %v1849_v58 = vsel %vm1826_vm6, %v1816_v52, %v12722_v61  ;;  %v12723_v38 = vld [vmem:[#allocation142_spill] sm:$0xff]  ;;  %v1784_v22 = vsel %vm1760_vm4, %v1751_v15, %v12725_v49  ;;  %v12727_v23 = vld [vmem:[#allocation165_spill] sm:$0xff]  ;;  %v12731_v12 = vld [vmem:[#allocation51_spill] sm:$0xff] }
 0x288   : > { %v1881_v14 = vsel %vm1859_vm7, %v1848_v32, %v12723_v38  ;;  %7049 = vmatprep.mubr.msk.f32.mxu1 %vm1963_vm10, %v1946_v55  ;;  %v1882_v11 = vsel %vm1859_vm7, %v1849_v58, %v12726_v60  ;;  %v12728_v30 = vld [vmem:[#allocation106_spill] sm:$0xff]  ;;  %v12732_v63 = vld [vmem:[#allocation32_spill] sm:$0xff]  ;;  %v12733_v56 = vld [vmem:[#allocation121_spill] sm:$0xff] }
 0x289   : > { %v1914_v33 = vsel %vm1892_vm8, %v1881_v14, %v12727_v23  ;;  %v1642_v45 = vpop.permute.xlu1 %1641  ;;  %v1785_v2 = vsel %vm1760_vm4, %v1752_v9, %v12728_v30  ;;  %v12729_v28 = vld [vmem:[#allocation34_spill] sm:$0xff]  ;;  %v1915_v20 = vsel %vm1892_vm8, %v1882_v11, %v12730_v57  ;;  %v1648_v50 = vpop.permute.xlu0 %1647  ;;  %v7238_v17 = vld [vmem:[#allocation2 + $0x138] sm:$0xff]  ;;  %v12734_v3 = vld [vmem:[#allocation49_spill] sm:$0xff] }
 0x28a   : > { %v1817_v0 = vsel %vm1793_vm5, %v1784_v22, %v12729_v28  ;;  %v1947_v31 = vsel %vm1925_vm9, %v1914_v33, %v1642_v45  ;;  %v7237_v10 = vld [vmem:[#allocation2 + $0x128] sm:$0xff]  ;;  %v1818_v62 = vsel %vm1793_vm5, %v1785_v2, %v12732_v63  ;;  %v1948_v53 = vsel %vm1925_vm9, %v1915_v20, %v1644_v43  ;;  %v12735_v40 = vld [vmem:[#allocation88_spill] sm:$0xff]  ;;  %v12738_v25 = vld [vmem:[#allocation87_spill] sm:$0xff] }
 0x28b   : > { %v1720_v42 = vsel %vm261_vm0, %v7237_v10, %v12731_v12  ;;  %v1850_v34 = vsel %vm1826_vm6, %v1817_v0, %v12733_v56  ;;  %7050 = vmatmul.mubr.msk.f32.gmra.mxu1 %vm1963_vm10, %v1947_v31  ;;  %v1721_v35 = vsel %vm261_vm0, %v7238_v17, %v12734_v3  ;;  %v12736_v41 = vld [vmem:[#allocation120_spill] sm:$0xff]  ;;  %v12739_v8 = vld [vmem:[#allocation109_spill] sm:$0xff]  ;;  %v12740_v18 = vld [vmem:[#allocation143_spill] sm:$0xff] }
 0x28c   : > { %v1753_v16 = vsel %vm1727_vm3, %v1720_v42, %v12735_v40  ;;  %v1851_v54 = vsel %vm1826_vm6, %v1818_v62, %v12736_v41  ;;  %v12737_v48 = vld [vmem:[#allocation144_spill] sm:$0xff]  ;;  %7052 = vmatprep.mubr.msk.f32.mxu1 %vm1963_vm10, %v1948_v53  ;;  %v1754_v37 = vsel %vm1727_vm3, %v1721_v35, %v12738_v25  ;;  %v12741_v27 = vld [vmem:[#allocation167_spill] sm:$0xff]  ;;  %v12743_v26 = vld [vmem:[#allocation38_spill] sm:$0xff] }
 0x28d   : > { %v1883_v29 = vsel %vm1859_vm7, %v1850_v34, %v12737_v48  ;;  %v1786_v47 = vsel %vm1760_vm4, %v1753_v16, %v12739_v8  ;;  %v1884_v36 = vsel %vm1859_vm7, %v1851_v54, %v12740_v18  ;;  %v1646_v39 = vpop.permute.xlu1 %1645  ;;  %v12742_v5 = vld [vmem:[#allocation108_spill] sm:$0xff]  ;;  %v12744_v6 = vld [vmem:[#allocation166_spill] sm:$0xff]  ;;  %v7239_v21 = vld [vmem:[#allocation2 + $0x140] sm:$0xff]  ;;  %v1652_v15 = vpop.permute.xlu0 %1651 }
 0x28e   : > { %v1916_v1 = vsel %vm1892_vm8, %v1883_v29, %v12741_v27  ;;  %v1787_v7 = vsel %vm1760_vm4, %v1754_v37, %v12742_v5  ;;  %v1819_v51 = vsel %vm1793_vm5, %v1786_v47, %v12743_v26  ;;  %v1917_v19 = vsel %vm1892_vm8, %v1884_v36, %v12744_v6  ;;  %v12745_v32 = vld [vmem:[#allocation55_spill] sm:$0xff]  ;;  %v12746_v43 = vld [vmem:[#allocation36_spill] sm:$0xff]  ;;  %v12748_v58 = vld [vmem:[#allocation53_spill] sm:$0xff] }
 0x28f   : > { %v1949_v52 = vsel %vm1925_vm9, %v1916_v1, %v1646_v39  ;;  %v1722_v55 = vsel %vm261_vm0, %v7239_v21, %v12745_v32  ;;  %v1820_v13 = vsel %vm1793_vm5, %v1787_v7, %v12746_v43  ;;  %v12747_v24 = vld [vmem:[#allocation123_spill] sm:$0xff]  ;;  %v1950_v44 = vsel %vm1925_vm9, %v1917_v19, %v1648_v50  ;;  %v12749_v14 = vld [vmem:[#allocation90_spill] sm:$0xff]  ;;  %v12752_v11 = vld [vmem:[#allocation89_spill] sm:$0xff] }
 0x290   : > { %v1852_v46 = vsel %vm1826_vm6, %v1819_v51, %v12747_v24  ;;  %7053 = vmatmul.mubr.msk.f32.gmra.mxu1 %vm1963_vm10, %v1949_v52  ;;  %v7240_v61 = vld [vmem:[#allocation2 + $0x150] sm:$0xff]  ;;  %v1755_v59 = vsel %vm1727_vm3, %v1722_v55, %v12749_v14  ;;  %v12750_v9 = vld [vmem:[#allocation122_spill] sm:$0xff]  ;;  %v12754_v30 = vld [vmem:[#allocation145_spill] sm:$0xff] }
 0x291   : > { %v1723_v38 = vsel %vm261_vm0, %v7240_v61, %v12748_v58  ;;  %v1853_v49 = vsel %vm1826_vm6, %v1820_v13, %v12750_v9  ;;  %v12751_v22 = vld [vmem:[#allocation146_spill] sm:$0xff]  ;;  %7055 = vmatprep.mubr.msk.f32.mxu1 %vm1963_vm10, %v1950_v44  ;;  %v12753_v33 = vld [vmem:[#allocation111_spill] sm:$0xff]  ;;  %v12755_v28 = vld [vmem:[#allocation169_spill] sm:$0xff]  ;;  %v1650_v57 = vpop.permute.xlu1 %1649  ;;  %v1656_v16 = vpop.permute.xlu0 %1655 }
 0x292   : > { %v1885_v60 = vsel %vm1859_vm7, %v1852_v46, %v12751_v22  ;;  %v1756_v23 = vsel %vm1727_vm3, %v1723_v38, %v12752_v11  ;;  %v1788_v45 = vsel %vm1760_vm4, %v1755_v59, %v12753_v33  ;;  %v1886_v2 = vsel %vm1859_vm7, %v1853_v49, %v12754_v30  ;;  %v12756_v20 = vld [vmem:[#allocation110_spill] sm:$0xff]  ;;  %v12758_v42 = vld [vmem:[#allocation168_spill] sm:$0xff]  ;;  %v12759_v34 = vld [vmem:[#allocation59_spill] sm:$0xff] }
 0x293   : > { %v1918_v0 = vsel %vm1892_vm8, %v1885_v60, %v12755_v28  ;;  %v1789_v31 = vsel %vm1760_vm4, %v1756_v23, %v12756_v20  ;;  %v12757_v10 = vld [vmem:[#allocation42_spill] sm:$0xff]  ;;  %v1919_v63 = vsel %vm1892_vm8, %v1886_v2, %v12758_v42  ;;  %v7241_v56 = vld [vmem:[#allocation2 + $0x158] sm:$0xff]  ;;  %v12761_v3 = vld [vmem:[#allocation125_spill] sm:$0xff] }
 0x294   : > { %v1821_v12 = vsel %vm1793_vm5, %v1788_v45, %v12757_v10  ;;  %v1951_v62 = vsel %vm1925_vm9, %v1918_v0, %v1650_v57  ;;  %v1724_v53 = vsel %vm261_vm0, %v7241_v56, %v12759_v34  ;;  %v12760_v50 = vld [vmem:[#allocation40_spill] sm:$0xff]  ;;  %v1952_v40 = vsel %vm1925_vm9, %v1919_v63, %v1652_v15  ;;  %v7242_v41 = vld [vmem:[#allocation2 + $0x168] sm:$0xff]  ;;  %v12762_v54 = vld [vmem:[#allocation57_spill] sm:$0xff] }
 0x295   : > { %v1822_v17 = vsel %vm1793_vm5, %v1789_v31, %v12760_v50  ;;  %v1854_v35 = vsel %vm1826_vm6, %v1821_v12, %v12761_v3  ;;  %7056 = vmatmul.mubr.msk.f32.gmra.mxu1 %vm1963_vm10, %v1951_v62  ;;  %v1725_v48 = vsel %vm261_vm0, %v7242_v41, %v12762_v54  ;;  %v12763_v29 = vld [vmem:[#allocation92_spill] sm:$0xff]  ;;  %v12766_v36 = vld [vmem:[#allocation91_spill] sm:$0xff]  ;;  %v12767_v1 = vld [vmem:[#allocation113_spill] sm:$0xff]  ;;  %v1654_v6 = vpop.permute.xlu1 %1653  ;;  %v1660_v23 = vpop.permute.xlu0 %1659 }
 0x296   : > { %v1757_v25 = vsel %vm1727_vm3, %v1724_v53, %v12763_v29  ;;  %v12764_v37 = vld [vmem:[#allocation124_spill] sm:$0xff]  ;;  %7058 = vmatprep.mubr.msk.f32.mxu1 %vm1963_vm10, %v1952_v40  ;;  %v1758_v27 = vsel %vm1727_vm3, %v1725_v48, %v12766_v36  ;;  %v12768_v5 = vld [vmem:[#allocation147_spill] sm:$0xff]  ;;  %v12771_v21 = vld [vmem:[#allocation46_spill] sm:$0xff] }
 0x297   : > { %v1855_v8 = vsel %vm1826_vm6, %v1822_v17, %v12764_v37  ;;  %v12765_v47 = vld [vmem:[#allocation148_spill] sm:$0xff]  ;;  %v1790_v39 = vsel %vm1760_vm4, %v1757_v25, %v12767_v1  ;;  %v12769_v26 = vld [vmem:[#allocation3_spill] sm:$0xff]  ;;  %v12772_v55 = vld [vmem:[#allocation170_spill] sm:$0xff] }
 0x298   : > { %v1887_v18 = vsel %vm1859_vm7, %v1854_v35, %v12765_v47  ;;  %v1888_v7 = vsel %vm1859_vm7, %v1855_v8, %v12768_v5  ;;  %v12770_v19 = vld [vmem:[#allocation112_spill] sm:$0xff]  ;;  %v1823_v32 = vsel %vm1793_vm5, %v1790_v39, %v12771_v21  ;;  %v7243_v24 = vld [vmem:[#allocation2 + $0x170] sm:$0xff]  ;;  %v12776_v59 = vld [vmem:[#allocation93_spill] sm:$0xff] }
 0x299   : > { %v1920_v51 = vsel %vm1892_vm8, %v1887_v18, %v12769_v26  ;;  %v1791_v52 = vsel %vm1760_vm4, %v1758_v27, %v12770_v19  ;;  %v1921_v43 = vsel %vm1892_vm8, %v1888_v7, %v12772_v55  ;;  %v12773_v46 = vld [vmem:[#allocation63_spill] sm:$0xff]  ;;  %v12774_v15 = vld [vmem:[#allocation44_spill] sm:$0xff]  ;;  %v12777_v49 = vld [vmem:[#allocation126_spill] sm:$0xff]  ;;  %v1658_v57 = vpop.permute.xlu1 %1657 }
 0x29a   : > { %v1953_v13 = vsel %vm1925_vm9, %v1920_v51, %v1654_v6  ;;  %v1726_v44 = vsel %vm261_vm0, %v7243_v24, %v12773_v46  ;;  %v1824_v61 = vsel %vm1793_vm5, %v1791_v52, %v12774_v15  ;;  %v12775_v58 = vld [vmem:[#allocation127_spill] sm:$0xff]  ;;  %v1954_v14 = vsel %vm1925_vm9, %v1921_v43, %v1656_v16  ;;  %v12778_v60 = vld [vmem:[#allocation150_spill] sm:$0xff]  ;;  %v12780_v30 = vld [vmem:[#allocation149_spill] sm:$0xff] }
 0x29b   : > { %v1856_v38 = vsel %vm1826_vm6, %v1823_v32, %v12775_v58  ;;  %7059 = vmatmul.mubr.msk.f32.gmra.mxu1 %vm1963_vm10, %v1953_v13  ;;  %v1759_v9 = vsel %vm1727_vm3, %v1726_v44, %v12776_v59  ;;  %v1857_v22 = vsel %vm1826_vm6, %v1824_v61, %v12777_v49  ;;  %v12779_v33 = vld [vmem:[#allocation114_spill] sm:$0xff]  ;;  %v12781_v28 = vld [vmem:[#allocation171_spill] sm:$0xff]  ;;  %v12782_v20 = vld [vmem:[#allocation48_spill] sm:$0xff] }
 0x29c   : > { %v1889_v11 = vsel %vm1859_vm7, %v1856_v38, %v12778_v60  ;;  %7061 = vmatprep.mubr.msk.f32.mxu1 %vm1963_vm10, %v1954_v14  ;;  %v1792_v45 = vsel %vm1760_vm4, %v1759_v9, %v12779_v33  ;;  %v1890_v2 = vsel %vm1859_vm7, %v1857_v22, %v12780_v30  ;;  %v12783_v10 = vld [vmem:[#allocation61_spill] sm:$0xff]  ;;  %v12784_v63 = vld [vmem:[#allocation128_spill] sm:$0xff]  ;;  %v12785_v34 = vld [vmem:[#allocation151_spill] sm:$0xff] }
 0x29d   : > { %v1922_v0 = vsel %vm1892_vm8, %v1889_v11, %v12781_v28  ;;  %v1825_v31 = vsel %vm1793_vm5, %v1792_v45, %v12782_v20  ;;  %v1923_v12 = vsel %vm1892_vm8, %v1890_v2, %v12783_v10  ;;  %v1662_v17 = vpop.permute.xlu1 %1661  ;;  %v2607_v35 = vld [vmem:[#allocation2 + $0x1] sm:$0xff]  ;;  %v2608_v40 = vld [vmem:[#allocation2 + $0x9] sm:$0xff] }
 0x29e   : > { %v1955_v42 = vsel %vm1925_vm9, %v1922_v0, %v1658_v57  ;;  %v1858_v62 = vsel %vm1826_vm6, %v1825_v31, %v12784_v63  ;;  %v1956_v56 = vsel %vm1925_vm9, %v1923_v12, %v1660_v23  ;;  %2895 = vrot.lane.b32.xlu0 %v2607_v35, %s7295_s25  ;;  %2897 = vrot.lane.b32.xlu1 %v2608_v40, %s7295_s25 }
 0x29f   : > { %7062 = vmatmul.mubr.msk.f32.gmra.mxu1 %vm1963_vm10, %v1955_v42  ;;  %v1891_v53 = vsel %vm1859_vm7, %v1858_v62, %v12785_v34 }
 0x2a0   : > { %7064 = vmatprep.mubr.msk.f32.mxu1 %vm1963_vm10, %v1956_v56  ;;  %v1924_v50 = vsel %vm1892_vm8, %v1891_v53, %v8599_v4 }
 0x2a1   : > { %v1957_v3 = vsel %vm1925_vm9, %v1924_v50, %v1662_v17 }
 0x2a3   : > { %7065 = vmatmul.mubr.msk.f32.gmra.mxu1 %vm1963_vm10, %v1957_v3 }
 0x323   : > { %v9089_v16 = vpop.f32.mrf.mxu0 }
 0x324   : > { %v2361_v54 = vmul.f32 %v9089_v16, %v9089_v16  ;;  %v2290_v25 = vsel %vm261_vm0, %v9089_v16, 0.0 }
 0x325   : > { %v9091_v41 = vpop.f32.mrf.mxu0 }
 0x326   : > { %v2289_v4 = vsel %vm261_vm0, %v9091_v41, 0.0  ;;  %v2360_v48 = vmul.f32 %v9091_v41, %v9091_v41  ;;  %v2393_v18 = vsel %vm261_vm0, %v2361_v54, 0.0 }
 0x327   : > { %v9099_v29 = vpop.f32.mrf.mxu0  ;;  %v2291_v8 = vadd.f32 %v2290_v25, %v2289_v4 }
 0x328   : > { %v2392_v37 = vsel %vm261_vm0, %v2360_v48, 0.0  ;;  %v2363_v36 = vmul.f32 %v9099_v29, %v9099_v29  ;;  %v2294_v26 = vsel %vm261_vm0, %v9099_v29, 0.0 }
 0x329   : > { %v9104_v47 = vpop.f32.mrf.mxu0  ;;  %v2394_v39 = vadd.f32 %v2393_v18, %v2392_v37 }
 0x32a   : > { %v2292_v27 = vsel %vm261_vm0, %v9104_v47, 0.0  ;;  %v2362_v1 = vmul.f32 %v9104_v47, %v9104_v47  ;;  %v2397_v21 = vsel %vm261_vm0, %v2363_v36, 0.0 }
 0x32b   : > { %v2293_v5 = vadd.f32 %v2292_v27, %v2291_v8  ;;  %v9113_v7 = vpop.f32.mrf.mxu0 }
 0x32c   : > { %v2395_v51 = vsel %vm261_vm0, %v2362_v1, 0.0  ;;  %v2365_v32 = vmul.f32 %v9113_v7, %v9113_v7  ;;  %v2298_v44 = vsel %vm261_vm0, %v9113_v7, 0.0 }
 0x32d   : > { %v2396_v6 = vadd.f32 %v2395_v51, %v2394_v39  ;;  %v9118_v19 = vpop.f32.mrf.mxu0  ;;  %v2295_v52 = vadd.f32 %v2294_v26, %v2293_v5 }
 0x32e   : > { %v2296_v55 = vsel %vm261_vm0, %v9118_v19, 0.0  ;;  %v2364_v43 = vmul.f32 %v9118_v19, %v9118_v19  ;;  %v2401_v14 = vsel %vm261_vm0, %v2365_v32, 0.0 }
 0x32f   : > { %v2297_v13 = vadd.f32 %v2296_v55, %v2295_v52  ;;  %v2398_v24 = vadd.f32 %v2397_v21, %v2396_v6  ;;  %v9127_v46 = vpop.f32.mrf.mxu0 }
 0x330   : > { %v2399_v15 = vsel %vm261_vm0, %v2364_v43, 0.0  ;;  %v2367_v59 = vmul.f32 %v9127_v46, %v9127_v46  ;;  %v2302_v23 = vsel %vm261_vm0, %v9127_v46, 0.0 }
 0x331   : > { %v2400_v61 = vadd.f32 %v2399_v15, %v2398_v24  ;;  %v9132_v58 = vpop.f32.mrf.mxu0  ;;  %v2299_v38 = vadd.f32 %v2298_v44, %v2297_v13 }
 0x332   : > { %v2300_v9 = vsel %vm261_vm0, %v9132_v58, 0.0  ;;  %v2366_v49 = vmul.f32 %v9132_v58, %v9132_v58  ;;  %v2405_v28 = vsel %vm261_vm0, %v2367_v59, 0.0 }
 0x333   : > { %v2301_v22 = vadd.f32 %v2300_v9, %v2299_v38  ;;  %v2402_v60 = vadd.f32 %v2401_v14, %v2400_v61  ;;  %v9141_v11 = vpop.f32.mrf.mxu0 }
 0x334   : > { %v2403_v33 = vsel %vm261_vm0, %v2366_v49, 0.0  ;;  %v2369_v0 = vmul.f32 %v9141_v11, %v9141_v11  ;;  %v2306_v42 = vsel %vm261_vm0, %v9141_v11, 0.0 }
 0x335   : > { %v2404_v45 = vadd.f32 %v2403_v33, %v2402_v60  ;;  %v9146_v30 = vpop.f32.mrf.mxu0  ;;  %v2303_v2 = vadd.f32 %v2302_v23, %v2301_v22 }
 0x336   : > { %v2304_v57 = vsel %vm261_vm0, %v9146_v30, 0.0  ;;  %v2368_v20 = vmul.f32 %v9146_v30, %v9146_v30  ;;  %v2409_v53 = vsel %vm261_vm0, %v2369_v0, 0.0 }
 0x337   : > { %v2305_v31 = vadd.f32 %v2304_v57, %v2303_v2  ;;  %v2406_v10 = vadd.f32 %v2405_v28, %v2404_v45  ;;  %v9155_v12 = vpop.f32.mrf.mxu0 }
 0x338   : > { %v2407_v63 = vsel %vm261_vm0, %v2368_v20, 0.0  ;;  %v2371_v50 = vmul.f32 %v9155_v12, %v9155_v12  ;;  %v2310_v4 = vsel %vm261_vm0, %v9155_v12, 0.0 }
 0x339   : > { %v2408_v62 = vadd.f32 %v2407_v63, %v2406_v10  ;;  %v9160_v56 = vpop.f32.mrf.mxu0  ;;  %v2307_v34 = vadd.f32 %v2306_v42, %v2305_v31 }
 0x33a   : > { %v2308_v17 = vsel %vm261_vm0, %v9160_v56, 0.0  ;;  %v2370_v3 = vmul.f32 %v9160_v56, %v9160_v56  ;;  %v2413_v18 = vsel %vm261_vm0, %v2371_v50, 0.0 }
 0x33b   : > { %v2309_v35 = vadd.f32 %v2308_v17, %v2307_v34  ;;  %v2410_v40 = vadd.f32 %v2409_v53, %v2408_v62  ;;  %v9169_v54 = vpop.f32.mrf.mxu0 }
 0x33c   : > { %v2411_v48 = vsel %vm261_vm0, %v2370_v3, 0.0  ;;  %v2373_v36 = vmul.f32 %v9169_v54, %v9169_v54  ;;  %v2314_v51 = vsel %vm261_vm0, %v9169_v54, 0.0 }
 0x33d   : > { %v2412_v25 = vadd.f32 %v2411_v48, %v2410_v40  ;;  %v9174_v37 = vpop.f32.mrf.mxu0  ;;  %v2311_v8 = vadd.f32 %v2310_v4, %v2309_v35 }
 0x33e   : > { %v2312_v27 = vsel %vm261_vm0, %v9174_v37, 0.0  ;;  %v2372_v1 = vmul.f32 %v9174_v37, %v9174_v37  ;;  %v2417_v55 = vsel %vm261_vm0, %v2373_v36, 0.0 }
 0x33f   : > { %v2313_v39 = vadd.f32 %v2312_v27, %v2311_v8  ;;  %v2414_v5 = vadd.f32 %v2413_v18, %v2412_v25  ;;  %v9183_v26 = vpop.f32.mrf.mxu0 }
 0x340   : > { %v2415_v6 = vsel %vm261_vm0, %v2372_v1, 0.0  ;;  %v2375_v43 = vmul.f32 %v9183_v26, %v9183_v26  ;;  %v2318_v38 = vsel %vm261_vm0, %v9183_v26, 0.0 }
 0x341   : > { %v2416_v52 = vadd.f32 %v2415_v6, %v2414_v5  ;;  %v9188_v21 = vpop.f32.mrf.mxu0  ;;  %v2315_v32 = vadd.f32 %v2314_v51, %v2313_v39 }
 0x342   : > { %v2316_v13 = vsel %vm261_vm0, %v9188_v21, 0.0  ;;  %v2374_v24 = vmul.f32 %v9188_v21, %v9188_v21  ;;  %v2421_v22 = vsel %vm261_vm0, %v2375_v43, 0.0 }
 0x343   : > { %v2317_v44 = vadd.f32 %v2316_v13, %v2315_v32  ;;  %v2418_v15 = vadd.f32 %v2417_v55, %v2416_v52  ;;  %v9197_v61 = vpop.f32.mrf.mxu1 }
 0x344   : > { %v2419_v14 = vsel %vm261_vm0, %v2374_v24, 0.0  ;;  %v2377_v60 = vmul.f32 %v9197_v61, %v9197_v61  ;;  %v2322_v0 = vsel %vm261_vm0, %v9197_v61, 0.0 }
 0x345   : > { %v2420_v59 = vadd.f32 %v2419_v14, %v2418_v15  ;;  %v9202_v9 = vpop.f32.mrf.mxu1  ;;  %v2319_v49 = vadd.f32 %v2318_v38, %v2317_v44 }
 0x346   : > { %v2320_v23 = vsel %vm261_vm0, %v9202_v9, 0.0  ;;  %v2376_v33 = vmul.f32 %v9202_v9, %v9202_v9  ;;  %v2425_v42 = vsel %vm261_vm0, %v2377_v60, 0.0 }
 0x347   : > { %v2321_v45 = vadd.f32 %v2320_v23, %v2319_v49  ;;  %v2422_v2 = vadd.f32 %v2421_v22, %v2420_v59  ;;  %v9211_v28 = vpop.f32.mrf.mxu1 }
 0x348   : > { %v2423_v57 = vsel %vm261_vm0, %v2376_v33, 0.0  ;;  %v2379_v63 = vmul.f32 %v9211_v28, %v9211_v28  ;;  %v2326_v3 = vsel %vm261_vm0, %v9211_v28, 0.0 }
 0x349   : > { %v2424_v20 = vadd.f32 %v2423_v57, %v2422_v2  ;;  %v9216_v31 = vpop.f32.mrf.mxu1  ;;  %v2323_v10 = vadd.f32 %v2322_v0, %v2321_v45 }
 0x34a   : > { %v2324_v62 = vsel %vm261_vm0, %v9216_v31, 0.0  ;;  %v2378_v34 = vmul.f32 %v9216_v31, %v9216_v31  ;;  %v2429_v25 = vsel %vm261_vm0, %v2379_v63, 0.0 }
 0x34b   : > { %v2325_v53 = vadd.f32 %v2324_v62, %v2323_v10  ;;  %v2426_v50 = vadd.f32 %v2425_v42, %v2424_v20  ;;  %v9225_v17 = vpop.f32.mrf.mxu1 }
 0x34c   : > { %v2427_v35 = vsel %vm261_vm0, %v2378_v34, 0.0  ;;  %v2381_v8 = vmul.f32 %v9225_v17, %v9225_v17  ;;  %v2330_v5 = vsel %vm261_vm0, %v9225_v17, 0.0 }
 0x34d   : > { %v2428_v40 = vadd.f32 %v2427_v35, %v2426_v50  ;;  %v9230_v4 = vpop.f32.mrf.mxu1  ;;  %v2327_v48 = vadd.f32 %v2326_v3, %v2325_v53 }
 0x34e   : > { %v2328_v18 = vsel %vm261_vm0, %v9230_v4, 0.0  ;;  %v2380_v36 = vmul.f32 %v9230_v4, %v9230_v4  ;;  %v2433_v55 = vsel %vm261_vm0, %v2381_v8, 0.0 }
 0x34f   : > { %v2329_v27 = vadd.f32 %v2328_v18, %v2327_v48  ;;  %v2430_v1 = vadd.f32 %v2429_v25, %v2428_v40 }
 0x350   : > { %v9239_v39 = vpop.f32.mrf.mxu1  ;;  %v2431_v51 = vsel %vm261_vm0, %v2380_v36, 0.0 }
 0x351   : > { %v2432_v6 = vadd.f32 %v2431_v51, %v2430_v1  ;;  %v2331_v32 = vadd.f32 %v2330_v5, %v2329_v27  ;;  %v2383_v43 = vmul.f32 %v9239_v39, %v9239_v39  ;;  %v2334_v14 = vsel %vm261_vm0, %v9239_v39, 0.0 }
 0x352   : > { %v9244_v52 = vpop.f32.mrf.mxu1 }
 0x353   : > { %v2332_v13 = vsel %vm261_vm0, %v9244_v52, 0.0  ;;  %v2382_v24 = vmul.f32 %v9244_v52, %v9244_v52  ;;  %v2434_v15 = vadd.f32 %v2433_v55, %v2432_v6  ;;  %v2437_v23 = vsel %vm261_vm0, %v2383_v43, 0.0 }
 0x354   : > { %v2333_v44 = vadd.f32 %v2332_v13, %v2331_v32 }
 0x355   : > { %v9253_v38 = vpop.f32.mrf.mxu1  ;;  %v2435_v59 = vsel %vm261_vm0, %v2382_v24, 0.0 }
 0x356   : > { %v2436_v49 = vadd.f32 %v2435_v59, %v2434_v15  ;;  %v2335_v60 = vadd.f32 %v2334_v14, %v2333_v44  ;;  %v2385_v33 = vmul.f32 %v9253_v38, %v9253_v38  ;;  %v2338_v10 = vsel %vm261_vm0, %v9253_v38, 0.0 }
 0x357   : > { %v9258_v22 = vpop.f32.mrf.mxu1 }
 0x358   : > { %v2336_v45 = vsel %vm261_vm0, %v9258_v22, 0.0  ;;  %v2384_v2 = vmul.f32 %v9258_v22, %v9258_v22  ;;  %v2438_v57 = vadd.f32 %v2437_v23, %v2436_v49  ;;  %v2441_v53 = vsel %vm261_vm0, %v2385_v33, 0.0 }
 0x359   : > { %v2337_v0 = vadd.f32 %v2336_v45, %v2335_v60 }
 0x35a   : > { %v2439_v42 = vsel %vm261_vm0, %v2384_v2, 0.0 }
 0x35b   : > { %v9267_v20 = vpop.f32.mrf.mxu1  ;;  %v2440_v63 = vadd.f32 %v2439_v42, %v2438_v57  ;;  %v2339_v34 = vadd.f32 %v2338_v10, %v2337_v0 }
 0x35c   : > { %v2387_v50 = vmul.f32 %v9267_v20, %v9267_v20  ;;  %v2342_v8 = vsel %vm261_vm0, %v9267_v20, 0.0 }
 0x35d   : > { %v9272_v62 = vpop.f32.mrf.mxu1  ;;  %v2442_v48 = vadd.f32 %v2441_v53, %v2440_v63 }
 0x35e   : > { %v2340_v3 = vsel %vm261_vm0, %v9272_v62, 0.0  ;;  %v2386_v35 = vmul.f32 %v9272_v62, %v9272_v62  ;;  %v2445_v5 = vsel %vm261_vm0, %v2387_v50, 0.0 }
 0x35f   : > { %v2341_v40 = vadd.f32 %v2340_v3, %v2339_v34  ;;  %v9281_v25 = vpop.f32.mrf.mxu1 }
 0x360   : > { %v2443_v18 = vsel %vm261_vm0, %v2386_v35, 0.0  ;;  %v2389_v51 = vmul.f32 %v9281_v25, %v9281_v25  ;;  %v2346_v24 = vsel %vm261_vm0, %v9281_v25, 0.0 }
 0x361   : > { %v2444_v36 = vadd.f32 %v2443_v18, %v2442_v48  ;;  %v9286_v27 = vpop.f32.mrf.mxu1  ;;  %v2343_v1 = vadd.f32 %v2342_v8, %v2341_v40 }
 0x362   : > { %v2344_v6 = vsel %vm261_vm0, %v9286_v27, 0.0  ;;  %v2388_v32 = vmul.f32 %v9286_v27, %v9286_v27  ;;  %v2449_v49 = vsel %vm261_vm0, %v2389_v51, 0.0 }
 0x363   : > { %v2345_v55 = vadd.f32 %v2344_v6, %v2343_v1  ;;  %v2446_v43 = vadd.f32 %v2445_v5, %v2444_v36  ;;  %v9295_v13 = vpop.f32.mrf.mxu1 }
 0x364   : > { %v2447_v44 = vsel %vm261_vm0, %v2388_v32, 0.0  ;;  %v2391_v60 = vmul.f32 %v9295_v13, %v9295_v13  ;;  %v2350_v0 = vsel %vm261_vm0, %v9295_v13, 0.0 }
 0x365   : > { %v2448_v15 = vadd.f32 %v2447_v44, %v2446_v43  ;;  %v2280_v14 = vpop.f32.mrf.mxu1  ;;  %v2347_v59 = vadd.f32 %v2346_v24, %v2345_v55 }
 0x366   : > { %v2348_v23 = vsel %vm261_vm0, %v2280_v14, 0.0  ;;  %v2390_v33 = vmul.f32 %v2280_v14, %v2280_v14  ;;  %v2453_v63 = vsel %vm261_vm0, %v2391_v60, 0.0 }
 0x367   : > { %v2349_v45 = vadd.f32 %v2348_v23, %v2347_v59  ;;  %v2450_v2 = vadd.f32 %v2449_v49, %v2448_v15  ;;  %v2471_v15 = vlaneseq  ;;  %v259_v59 = vld [vmem:[%s249_s24] sm:$0x3] }
 0x368   : > { %v2451_v57 = vsel %vm261_vm0, %v2390_v33, 0.0  ;;  %v9314_v60 = vadd.f32 1.0, %v259_v59 }
 0x369   : > { %v2351_v10 = vadd.f32 %v2350_v0, %v2349_v45  ;;  %v2452_v42 = vadd.f32 %v2451_v57, %v2450_v2  ;;  %v9312_v49 = vshrl.u32 %v2471_v15, 7  ;;  %v260_v2 = vld [vmem:[%s9319_s9] sm:$0x3] }
 0x36a   : > { %12787 = vst [vmem:[#allocation6_spill] sm:$0xff] %v9314_v60 }
 0x36b   : > { %v2352_v34 = vrot.slane %v2351_v10, 4  ;;  %v2454_v53 = vadd.f32 %v2453_v63, %v2452_v42  ;;  %12786 = vst [vmem:[#allocation4_spill] sm:$0xff] %v9312_v49  ;;  %v2473_v23 = vsub.s32 0, %v9312_v49 }
 0x36d   : > { %v2353_v50 = vadd.f32 %v2352_v34, %v2351_v10  ;;  %v2455_v3 = vrot.slane %v2454_v53, 4 }
 0x36f   : > { %v2354_v35 = vrot.slane %v2353_v50, 2  ;;  %v2456_v40 = vadd.f32 %v2455_v3, %v2454_v53 }
 0x371   : > { %v2355_v48 = vadd.f32 %v2354_v35, %v2353_v50  ;;  %v2457_v8 = vrot.slane %v2456_v40, 2 }
 0x373   : > { %v2356_v18 = vrot.slane %v2355_v48, 1  ;;  %v2458_v36 = vadd.f32 %v2457_v8, %v2456_v40 }
 0x375   : > { %v2357_v1 = vadd.f32 %v2356_v18, %v2355_v48  ;;  %v2459_v5 = vrot.slane %v2458_v36, 1 }
 0x377   : > { %v2359_v51 = vmul.f32 0.00390625, %v2357_v1  ;;  %v2460_v6 = vadd.f32 %v2459_v5, %v2458_v36 }
 0x379   : > { %v2461_v32 = vmul.f32 0.00390625, %v2460_v6  ;;  %v2462_v55 = vmul.f32 %v2359_v51, %v2359_v51 }
 0x37b   : > { %v2463_v43 = vsub.f32 %v2461_v32, %v2462_v55 }
 0x37d   : > { %v2464_v24 = vmax.f32 %v2463_v43, 0.0 }
 0x37f   : > { %v2466_v44 = vadd.f32 1e-05, %v2464_v24 }
 0x381   : > { %7210 = vrsqrt.f32 %v2466_v44 }
 0x38e   : > { %v7211_v33 = vpop.eup %7210 }
 0x38f   : > { %v2468_v45 = vmul.f32 %v7211_v33, %v9314_v60 }
 0x391   : > { %v2469_v0 = vmul.f32 %v2468_v45, %v2359_v51  ;;  %v2474_v57 = vrot.slane %v2468_v45, %v2473_v23 }
 0x393   : > { %v2470_v10 = vsub.f32 %v260_v2, %v2469_v0  ;;  %v2505_v42 = vmul.f32 %v2474_v57, %v2280_v14  ;;  %v2475_v63 = vmul.f32 %v2474_v57, %v9091_v41  ;;  %v2476_v34 = vmul.f32 %v9089_v16, %v2474_v57 }
 0x394   : > { %v2477_v53 = vmul.f32 %v2474_v57, %v9104_v47  ;;  %v2478_v50 = vmul.f32 %v9099_v29, %v2474_v57  ;;  %v2479_v3 = vmul.f32 %v2474_v57, %v9118_v19  ;;  %v2480_v35 = vmul.f32 %v9113_v7, %v2474_v57 }
 0x395   : > { %v9330_v40 = vrot.slane %v2470_v10, %v2473_v23  ;;  %v2481_v48 = vmul.f32 %v2474_v57, %v9132_v58  ;;  %v2482_v8 = vmul.f32 %v9127_v46, %v2474_v57  ;;  %v2483_v14 = vmul.f32 %v2474_v57, %v9146_v30 }
 0x396   : > { %v2484_v41 = vmul.f32 %v9141_v11, %v2474_v57  ;;  %v2485_v16 = vmul.f32 %v2474_v57, %v9160_v56  ;;  %v2486_v47 = vmul.f32 %v9155_v12, %v2474_v57  ;;  %v2487_v29 = vmul.f32 %v2474_v57, %v9174_v37 }
 0x397   : > { %v2541_v19 = vadd.f32 %v9330_v40, %v2505_v42  ;;  %v2488_v7 = vmul.f32 %v9169_v54, %v2474_v57  ;;  %v2489_v18 = vmul.f32 %v2474_v57, %v9188_v21  ;;  %v2490_v58 = vmul.f32 %v9183_v26, %v2474_v57 }
 0x398   : > { %v2491_v46 = vmul.f32 %v2474_v57, %v9202_v9  ;;  %v2492_v30 = vmul.f32 %v9197_v61, %v2474_v57  ;;  %v2493_v11 = vmul.f32 %v2474_v57, %v9216_v31  ;;  %v2494_v56 = vmul.f32 %v9211_v28, %v2474_v57 }
 0x399   : > { %v2495_v12 = vmul.f32 %v2474_v57, %v9230_v4  ;;  %v2496_v37 = vmul.f32 %v9225_v17, %v2474_v57  ;;  %v2497_v36 = vmul.f32 %v2474_v57, %v9244_v52  ;;  %v2498_v54 = vmul.f32 %v9239_v39, %v2474_v57  ;;  %2573 = vst.msk [vmem:[#allocation2 + $0x181] sm:$0xff] %vm261_vm0, %v2541_v19 }
 0x39a   : > { %v2499_v26 = vmul.f32 %v2474_v57, %v9258_v22  ;;  %v2500_v21 = vmul.f32 %v9253_v38, %v2474_v57  ;;  %v2501_v61 = vmul.f32 %v2474_v57, %v9272_v62  ;;  %v2502_v9 = vmul.f32 %v9267_v20, %v2474_v57 }
 0x39b   : > { %v2503_v28 = vmul.f32 %v2474_v57, %v9286_v27  ;;  %v2504_v31 = vmul.f32 %v9281_v25, %v2474_v57  ;;  %v2506_v17 = vmul.f32 %v9295_v13, %v2474_v57  ;;  %v2511_v4 = vadd.f32 %v9330_v40, %v2475_v63 }
 0x39c   : > { %v2512_v39 = vadd.f32 %v9330_v40, %v2476_v34  ;;  %v2513_v52 = vadd.f32 %v9330_v40, %v2477_v53  ;;  %v2514_v22 = vadd.f32 %v9330_v40, %v2478_v50  ;;  %v2515_v38 = vadd.f32 %v9330_v40, %v2479_v3 }
 0x39d   : > { %v2516_v62 = vadd.f32 %v9330_v40, %v2480_v35  ;;  %v2517_v20 = vadd.f32 %v9330_v40, %v2481_v48  ;;  %v2518_v27 = vadd.f32 %v9330_v40, %v2482_v8  ;;  %v2519_v25 = vadd.f32 %v9330_v40, %v2483_v14  ;;  %2543 = vst.msk [vmem:[#allocation2 + $0x19] sm:$0xff] %vm261_vm0, %v2511_v4  ;;  %v2640_v4 = vld [vmem:[#allocation2 + $0xa] sm:$0xff] }
 0x39e   : > { %v2520_v13 = vadd.f32 %v9330_v40, %v2484_v41  ;;  %v2521_v1 = vadd.f32 %v9330_v40, %v2485_v16  ;;  %v2522_v5 = vadd.f32 %v9330_v40, %v2486_v47  ;;  %v2523_v51 = vadd.f32 %v9330_v40, %v2487_v29  ;;  %2544 = vst.msk [vmem:[#allocation2 + $0x21] sm:$0xff] %vm261_vm0, %v2512_v39 }
 0x39f   : > { %2545 = vst.msk [vmem:[#allocation2 + $0x31] sm:$0xff] %vm261_vm0, %v2513_v52  ;;  %2546 = vst.msk [vmem:[#allocation2 + $0x39] sm:$0xff] %vm261_vm0, %v2514_v22  ;;  %v2524_v6 = vadd.f32 %v9330_v40, %v2488_v7  ;;  %v2525_v32 = vadd.f32 %v9330_v40, %v2489_v18  ;;  %v2526_v55 = vadd.f32 %v9330_v40, %v2490_v58 }
 0x3a0   : > { %2547 = vst.msk [vmem:[#allocation2 + $0x49] sm:$0xff] %vm261_vm0, %v2515_v38  ;;  %v2527_v43 = vadd.f32 %v9330_v40, %v2491_v46  ;;  %2548 = vst.msk [vmem:[#allocation2 + $0x51] sm:$0xff] %vm261_vm0, %v2516_v62  ;;  %v2528_v24 = vadd.f32 %v9330_v40, %v2492_v30  ;;  %v2529_v44 = vadd.f32 %v9330_v40, %v2493_v11 }
 0x3a1   : > { %2549 = vst.msk [vmem:[#allocation2 + $0x61] sm:$0xff] %vm261_vm0, %v2517_v20  ;;  %2550 = vst.msk [vmem:[#allocation2 + $0x69] sm:$0xff] %vm261_vm0, %v2518_v27  ;;  %v2530_v15 = vadd.f32 %v9330_v40, %v2494_v56  ;;  %v2531_v59 = vadd.f32 %v9330_v40, %v2495_v12  ;;  %v2532_v23 = vadd.f32 %v9330_v40, %v2496_v37 }
 0x3a2   : > { %2551 = vst.msk [vmem:[#allocation2 + $0x79] sm:$0xff] %vm261_vm0, %v2519_v25  ;;  %2552 = vst.msk [vmem:[#allocation2 + $0x81] sm:$0xff] %vm261_vm0, %v2520_v13  ;;  %v2533_v33 = vadd.f32 %v9330_v40, %v2497_v36  ;;  %v2534_v45 = vadd.f32 %v9330_v40, %v2498_v54  ;;  %v2535_v2 = vadd.f32 %v9330_v40, %v2499_v26 }
 0x3a3   : > { %2553 = vst.msk [vmem:[#allocation2 + $0x91] sm:$0xff] %vm261_vm0, %v2521_v1  ;;  %2554 = vst.msk [vmem:[#allocation2 + $0x99] sm:$0xff] %vm261_vm0, %v2522_v5  ;;  %v2536_v0 = vadd.f32 %v9330_v40, %v2500_v21  ;;  %v2537_v57 = vadd.f32 %v9330_v40, %v2501_v61  ;;  %v2538_v10 = vadd.f32 %v9330_v40, %v2502_v9 }
 0x3a4   : > { %2555 = vst.msk [vmem:[#allocation2 + $0xa9] sm:$0xff] %vm261_vm0, %v2523_v51  ;;  %2556 = vst.msk [vmem:[#allocation2 + $0xb1] sm:$0xff] %vm261_vm0, %v2524_v6  ;;  %v2539_v42 = vadd.f32 %v9330_v40, %v2503_v28  ;;  %v2540_v63 = vadd.f32 %v9330_v40, %v2504_v31  ;;  %v2542_v34 = vadd.f32 %v9330_v40, %v2506_v17  ;;  %v9419_v53 = vld [vmem:[#allocation2 + $0x19] sm:$0xff]  ;;  %v2639_v17 = vld [vmem:[#allocation2 + $0x2] sm:$0xff] }
 0x3a5   : > { %2557 = vst.msk [vmem:[#allocation2 + $0xc1] sm:$0xff] %vm261_vm0, %v2525_v32  ;;  %2558 = vst.msk [vmem:[#allocation2 + $0xc9] sm:$0xff] %vm261_vm0, %v2526_v55  ;;  %v9423_v50 = vld [vmem:[#allocation2 + $0x21] sm:$0xff]  ;;  %2899 = vrot.lane.b32.xlu0 %v9419_v53, %s7295_s25 }
 0x3a6   : > { %2559 = vst.msk [vmem:[#allocation2 + $0xd9] sm:$0xff] %vm261_vm0, %v2527_v43  ;;  %2560 = vst.msk [vmem:[#allocation2 + $0xe1] sm:$0xff] %vm261_vm0, %v2528_v24  ;;  %2901 = vrot.lane.b32.xlu1 %v9423_v50, %s7295_s25  ;;  %v9429_v3 = vld [vmem:[#allocation2 + $0x31] sm:$0xff]  ;;  %v9431_v35 = vld [vmem:[#allocation2 + $0x39] sm:$0xff] }
 0x3a7   : > { %2561 = vst.msk [vmem:[#allocation2 + $0xf1] sm:$0xff] %vm261_vm0, %v2529_v44  ;;  %2562 = vst.msk [vmem:[#allocation2 + $0xf9] sm:$0xff] %vm261_vm0, %v2530_v15  ;;  %v9437_v40 = vld [vmem:[#allocation2 + $0x49] sm:$0xff]  ;;  %v9439_v48 = vld [vmem:[#allocation2 + $0x51] sm:$0xff] }
 0x3a8   : > { %2563 = vst.msk [vmem:[#allocation2 + $0x109] sm:$0xff] %vm261_vm0, %v2531_v59  ;;  %2564 = vst.msk [vmem:[#allocation2 + $0x111] sm:$0xff] %vm261_vm0, %v2532_v23  ;;  %v9445_v8 = vld [vmem:[#allocation2 + $0x61] sm:$0xff]  ;;  %v9447_v14 = vld [vmem:[#allocation2 + $0x69] sm:$0xff] }
 0x3a9   : > { %2565 = vst.msk [vmem:[#allocation2 + $0x121] sm:$0xff] %vm261_vm0, %v2533_v33  ;;  %2566 = vst.msk [vmem:[#allocation2 + $0x129] sm:$0xff] %vm261_vm0, %v2534_v45  ;;  %2903 = vrot.lane.b32.xlu0 %v9429_v3, %s7295_s25  ;;  %v9453_v41 = vld [vmem:[#allocation2 + $0x79] sm:$0xff]  ;;  %v9455_v16 = vld [vmem:[#allocation2 + $0x81] sm:$0xff] }
 0x3aa   : > { %2567 = vst.msk [vmem:[#allocation2 + $0x139] sm:$0xff] %vm261_vm0, %v2535_v2  ;;  %2568 = vst.msk [vmem:[#allocation2 + $0x141] sm:$0xff] %vm261_vm0, %v2536_v0  ;;  %2905 = vrot.lane.b32.xlu1 %v9431_v35, %s7295_s25  ;;  %v9461_v47 = vld [vmem:[#allocation2 + $0x91] sm:$0xff]  ;;  %v9463_v29 = vld [vmem:[#allocation2 + $0x99] sm:$0xff]  ;;  %v9637_v0 = vpop.permute.xlu0 %2895 }
 0x3ab   : > { %2569 = vst.msk [vmem:[#allocation2 + $0x151] sm:$0xff] %vm261_vm0, %v2537_v57  ;;  %2570 = vst.msk [vmem:[#allocation2 + $0x159] sm:$0xff] %vm261_vm0, %v2538_v10  ;;  %v9469_v19 = vld [vmem:[#allocation2 + $0xa9] sm:$0xff]  ;;  %v9471_v7 = vld [vmem:[#allocation2 + $0xb1] sm:$0xff]  ;;  %v9641_v57 = vpop.permute.xlu1 %2897 }
 0x3ac   : > { %2571 = vst.msk [vmem:[#allocation2 + $0x169] sm:$0xff] %vm261_vm0, %v2539_v42  ;;  %2572 = vst.msk [vmem:[#allocation2 + $0x171] sm:$0xff] %vm261_vm0, %v2540_v63  ;;  %v9477_v18 = vld [vmem:[#allocation2 + $0xc1] sm:$0xff]  ;;  %v9479_v58 = vld [vmem:[#allocation2 + $0xc9] sm:$0xff] }
 0x3ad   : > { %2574 = vst.msk [vmem:[#allocation2 + $0x189] sm:$0xff] %vm261_vm0, %v2542_v34  ;;  %2907 = vrot.lane.b32.xlu0 %v9437_v40, %s7295_s25  ;;  %v9485_v46 = vld [vmem:[#allocation2 + $0xd9] sm:$0xff]  ;;  %v9487_v30 = vld [vmem:[#allocation2 + $0xe1] sm:$0xff]  ;;  %v9559_v62 = vld [vmem:[#allocation2 + $0x4a] sm:$0xff] }
 0x3ae   : > { %2909 = vrot.lane.b32.xlu1 %v9439_v48, %s7295_s25  ;;  %v9493_v11 = vld [vmem:[#allocation2 + $0xf1] sm:$0xff]  ;;  %v9495_v56 = vld [vmem:[#allocation2 + $0xf9] sm:$0xff]  ;;  %v9545_v52 = vld [vmem:[#allocation2 + $0x22] sm:$0xff]  ;;  %12788 = vst [vmem:[#allocation66_spill] sm:$0xff] %v9637_v0 }
 0x3af   : > { %v9501_v12 = vld [vmem:[#allocation2 + $0x109] sm:$0xff]  ;;  %v9503_v37 = vld [vmem:[#allocation2 + $0x111] sm:$0xff]  ;;  %v9543_v39 = vld [vmem:[#allocation2 + $0x1a] sm:$0xff]  ;;  %12789 = vst [vmem:[#allocation65_spill] sm:$0xff] %v9641_v57 }
 0x3b0   : > { %v9509_v36 = vld [vmem:[#allocation2 + $0x121] sm:$0xff]  ;;  %v9511_v54 = vld [vmem:[#allocation2 + $0x129] sm:$0xff]  ;;  %v9551_v22 = vld [vmem:[#allocation2 + $0x32] sm:$0xff] }
 0x3b1   : > { %2911 = vrot.lane.b32.xlu0 %v9445_v8, %s7295_s25  ;;  %v9517_v26 = vld [vmem:[#allocation2 + $0x139] sm:$0xff]  ;;  %v9519_v21 = vld [vmem:[#allocation2 + $0x141] sm:$0xff]  ;;  %v9569_v25 = vld [vmem:[#allocation2 + $0x6a] sm:$0xff] }
 0x3b2   : > { %2913 = vrot.lane.b32.xlu1 %v9447_v14, %s7295_s25  ;;  %v9525_v61 = vld [vmem:[#allocation2 + $0x151] sm:$0xff]  ;;  %v9527_v9 = vld [vmem:[#allocation2 + $0x159] sm:$0xff]  ;;  %v9567_v27 = vld [vmem:[#allocation2 + $0x62] sm:$0xff] }
 0x3b3   : > { %v9533_v28 = vld [vmem:[#allocation2 + $0x169] sm:$0xff]  ;;  %v9535_v31 = vld [vmem:[#allocation2 + $0x171] sm:$0xff]  ;;  %v9553_v38 = vld [vmem:[#allocation2 + $0x3a] sm:$0xff] }
 0x3b4   : > { %v9561_v20 = vld [vmem:[#allocation2 + $0x52] sm:$0xff]  ;;  %v9575_v13 = vld [vmem:[#allocation2 + $0x7a] sm:$0xff]  ;;  %v9577_v1 = vld [vmem:[#allocation2 + $0x82] sm:$0xff] }
 0x3b5   : > { %2915 = vrot.lane.b32.xlu0 %v9453_v41, %s7295_s25  ;;  %v9583_v5 = vld [vmem:[#allocation2 + $0x92] sm:$0xff]  ;;  %v9585_v51 = vld [vmem:[#allocation2 + $0x9a] sm:$0xff]  ;;  %v9591_v6 = vld [vmem:[#allocation2 + $0xaa] sm:$0xff] }
 0x3b6   : > { %2917 = vrot.lane.b32.xlu1 %v9455_v16, %s7295_s25  ;;  %v9593_v32 = vld [vmem:[#allocation2 + $0xb2] sm:$0xff]  ;;  %v9599_v55 = vld [vmem:[#allocation2 + $0xc2] sm:$0xff]  ;;  %v9601_v43 = vld [vmem:[#allocation2 + $0xca] sm:$0xff] }
 0x3b7   : > { %v9607_v24 = vld [vmem:[#allocation2 + $0xda] sm:$0xff]  ;;  %v9609_v44 = vld [vmem:[#allocation2 + $0xe2] sm:$0xff]  ;;  %v9615_v15 = vld [vmem:[#allocation2 + $0xf2] sm:$0xff] }
 0x3b8   : > { %v9617_v59 = vld [vmem:[#allocation2 + $0xfa] sm:$0xff]  ;;  %v9623_v23 = vld [vmem:[#allocation2 + $0x10a] sm:$0xff]  ;;  %v9625_v33 = vld [vmem:[#allocation2 + $0x112] sm:$0xff] }
 0x3b9   : > { %2919 = vrot.lane.b32.xlu0 %v9461_v47, %s7295_s25  ;;  %v9631_v45 = vld [vmem:[#allocation2 + $0x122] sm:$0xff]  ;;  %v9633_v2 = vld [vmem:[#allocation2 + $0x12a] sm:$0xff]  ;;  %v9643_v10 = vld [vmem:[#allocation2 + $0x13a] sm:$0xff] }
 0x3ba   : > { %2921 = vrot.lane.b32.xlu1 %v9463_v29, %s7295_s25  ;;  %12790 = vst [vmem:[#allocation8_spill] sm:$0xff] %v9643_v10  ;;  %v9645_v42 = vld [vmem:[#allocation2 + $0x142] sm:$0xff]  ;;  %v9667_v57 = vld [vmem:[#allocation2 + $0x16a] sm:$0xff]  ;;  %v9669_v0 = vld [vmem:[#allocation2 + $0x172] sm:$0xff] }
 0x3bb   : > { %12791 = vst [vmem:[#allocation10_spill] sm:$0xff] %v9645_v42  ;;  %12798 = vst [vmem:[#allocation17_spill] sm:$0xff] %v9667_v57 }
 0x3bc   : > { %12799 = vst [vmem:[#allocation71_spill] sm:$0xff] %v9669_v0 }
 0x3bd   : > { %2923 = vrot.lane.b32.xlu0 %v9469_v19, %s7295_s25 }
 0x3be   : > { %2925 = vrot.lane.b32.xlu1 %v9471_v7, %s7295_s25 }
 0x3c1   : > { %2927 = vrot.lane.b32.xlu0 %v9477_v18, %s7295_s25 }
 0x3c2   : > { %2929 = vrot.lane.b32.xlu1 %v9479_v58, %s7295_s25 }
 0x3c5   : > { %2931 = vrot.lane.b32.xlu0 %v9485_v46, %s7295_s25 }
 0x3c6   : > { %2933 = vrot.lane.b32.xlu1 %v9487_v30, %s7295_s25 }
 0x3c9   : > { %2935 = vrot.lane.b32.xlu0 %v9493_v11, %s7295_s25 }
 0x3ca   : > { %2937 = vrot.lane.b32.xlu1 %v9495_v56, %s7295_s25 }
 0x3cd   : > { %2939 = vrot.lane.b32.xlu0 %v9501_v12, %s7295_s25 }
 0x3ce   : > { %2941 = vrot.lane.b32.xlu1 %v9503_v37, %s7295_s25 }
 0x3d1   : > { %2943 = vrot.lane.b32.xlu0 %v9509_v36, %s7295_s25 }
 0x3d2   : > { %2945 = vrot.lane.b32.xlu1 %v9511_v54, %s7295_s25 }
 0x3d5   : > { %2947 = vrot.lane.b32.xlu0 %v9517_v26, %s7295_s25 }
 0x3d6   : > { %2949 = vrot.lane.b32.xlu1 %v9519_v21, %s7295_s25 }
 0x3d9   : > { %2951 = vrot.lane.b32.xlu0 %v9525_v61, %s7295_s25 }
 0x3da   : > { %2953 = vrot.lane.b32.xlu1 %v9527_v9, %s7295_s25 }
 0x3dd   : > { %2955 = vrot.lane.b32.xlu0 %v9533_v28, %s7295_s25 }
 0x3de   : > { %2957 = vrot.lane.b32.xlu1 %v9535_v31, %s7295_s25 }
 0x3e1   : > { %3023 = vrot.lane.b32.xlu0 %v2639_v17, %s7296_s26  ;;  %v9655_v17 = vld [vmem:[#allocation2 + $0x152] sm:$0xff] }
 0x3e2   : > { %3025 = vrot.lane.b32.xlu1 %v2640_v4, %s7296_s26  ;;  %12794 = vst [vmem:[#allocation14_spill] sm:$0xff] %v9655_v17  ;;  %v9657_v4 = vld [vmem:[#allocation2 + $0x15a] sm:$0xff] }
 0x3e3   : > { %12795 = vst [vmem:[#allocation69_spill] sm:$0xff] %v9657_v4 }
 0x3e5   : > { %3027 = vrot.lane.b32.xlu0 %v9543_v39, %s7296_s26 }
 0x3e6   : > { %3029 = vrot.lane.b32.xlu1 %v9545_v52, %s7296_s26 }
 0x3e9   : > { %3031 = vrot.lane.b32.xlu0 %v9551_v22, %s7296_s26 }
 0x3ea   : > { %3033 = vrot.lane.b32.xlu1 %v9553_v38, %s7296_s26 }
 0x3ed   : > { %3035 = vrot.lane.b32.xlu0 %v9559_v62, %s7296_s26 }
 0x3ee   : > { %3037 = vrot.lane.b32.xlu1 %v9561_v20, %s7296_s26 }
 0x3f1   : > { %3039 = vrot.lane.b32.xlu0 %v9567_v27, %s7296_s26 }
 0x3f2   : > { %3041 = vrot.lane.b32.xlu1 %v9569_v25, %s7296_s26 }
 0x3f5   : > { %3043 = vrot.lane.b32.xlu0 %v9575_v13, %s7296_s26 }
 0x3f6   : > { %3045 = vrot.lane.b32.xlu1 %v9577_v1, %s7296_s26 }
 0x3f9   : > { %3047 = vrot.lane.b32.xlu0 %v9583_v5, %s7296_s26 }
 0x3fa   : > { %3049 = vrot.lane.b32.xlu1 %v9585_v51, %s7296_s26 }
 0x3fd   : > { %3051 = vrot.lane.b32.xlu0 %v9591_v6, %s7296_s26 }
 0x3fe   : > { %3053 = vrot.lane.b32.xlu1 %v9593_v32, %s7296_s26 }
 0x401   : > { %3055 = vrot.lane.b32.xlu0 %v9599_v55, %s7296_s26 }
 0x402   : > { %3057 = vrot.lane.b32.xlu1 %v9601_v43, %s7296_s26 }
 0x405   : > { %3059 = vrot.lane.b32.xlu0 %v9607_v24, %s7296_s26 }
 0x406   : > { %3061 = vrot.lane.b32.xlu1 %v9609_v44, %s7296_s26 }
 0x409   : > { %3063 = vrot.lane.b32.xlu0 %v9615_v15, %s7296_s26 }
 0x40a   : > { %3065 = vrot.lane.b32.xlu1 %v9617_v59, %s7296_s26 }
 0x40d   : > { %3067 = vrot.lane.b32.xlu0 %v9623_v23, %s7296_s26 }
 0x40e   : > { %3069 = vrot.lane.b32.xlu1 %v9625_v33, %s7296_s26 }
 0x411   : > { %3071 = vrot.lane.b32.xlu0 %v9631_v45, %s7296_s26 }
 0x412   : > { %3073 = vrot.lane.b32.xlu1 %v9633_v2, %s7296_s26 }
 0x415   : > { %3075 = vrot.lane.b32.xlu0 %v9643_v10, %s7296_s26  ;;  %v2596_v10 = vld [vmem:[#allocation2 + $0xf8] sm:$0xff] }
 0x416   : > { %3077 = vrot.lane.b32.xlu1 %v9645_v42, %s7296_s26 }
 0x417   : > { %v9651_v63 = vpop.permute.xlu0 %2899 }
 0x418   : > { %12792 = vst [vmem:[#allocation11_spill] sm:$0xff] %v9651_v63  ;;  %v9653_v34 = vpop.permute.xlu1 %2901  ;;  %v9677_v63 = vld [vmem:[#allocation2 + $0x18] sm:$0xff] }
 0x419   : > { %12793 = vst [vmem:[#allocation13_spill] sm:$0xff] %v9653_v34  ;;  %3079 = vrot.lane.b32.xlu0 %v9655_v17, %s7296_s26  ;;  %12801 = vst [vmem:[#allocation19_spill] sm:$0xff] %v9677_v63 }
 0x41a   : > { %3081 = vrot.lane.b32.xlu1 %v9657_v4, %s7296_s26  ;;  %v9681_v4 = vld [vmem:[#allocation2 + $0x20] sm:$0xff] }
 0x41b   : > { %v9663_v60 = vpop.permute.xlu0 %2903  ;;  %12803 = vst [vmem:[#allocation72_spill] sm:$0xff] %v9681_v4 }
 0x41c   : > { %12796 = vst [vmem:[#allocation68_spill] sm:$0xff] %v9663_v60  ;;  %v9665_v49 = vpop.permute.xlu1 %2905  ;;  %v9689_v60 = vld [vmem:[#allocation2 + $0x30] sm:$0xff] }
 0x41d   : > { %12797 = vst [vmem:[#allocation16_spill] sm:$0xff] %v9665_v49  ;;  %3083 = vrot.lane.b32.xlu0 %v9667_v57, %s7296_s26  ;;  %12805 = vst [vmem:[#allocation25_spill] sm:$0xff] %v9689_v60 }
 0x41e   : > { %3085 = vrot.lane.b32.xlu1 %v9669_v0, %s7296_s26  ;;  %v9693_v0 = vld [vmem:[#allocation2 + $0x38] sm:$0xff] }
 0x41f   : > { %v9675_v34 = vpop.permute.xlu0 %2907  ;;  %12807 = vst [vmem:[#allocation52_spill] sm:$0xff] %v9693_v0 }
 0x420   : > { %12800 = vst [vmem:[#allocation70_spill] sm:$0xff] %v9675_v34  ;;  %v9679_v17 = vpop.permute.xlu1 %2909  ;;  %v9701_v34 = vld [vmem:[#allocation2 + $0x48] sm:$0xff] }
 0x421   : > { %12802 = vst [vmem:[#allocation21_spill] sm:$0xff] %v9679_v17  ;;  %3151 = vrot.lane.b32.xlu0 %v9677_v63, %s7297_s27  ;;  %12809 = vst [vmem:[#allocation74_spill] sm:$0xff] %v9701_v34 }
 0x422   : > { %3153 = vrot.lane.b32.xlu1 %v9681_v4, %s7297_s27  ;;  %v9705_v4 = vld [vmem:[#allocation2 + $0x50] sm:$0xff] }
 0x423   : > { %v9687_v49 = vpop.permute.xlu0 %2911  ;;  %12811 = vst [vmem:[#allocation130_spill] sm:$0xff] %v9705_v4 }
 0x424   : > { %12804 = vst [vmem:[#allocation23_spill] sm:$0xff] %v9687_v49  ;;  %v9691_v57 = vpop.permute.xlu1 %2913  ;;  %v9713_v49 = vld [vmem:[#allocation2 + $0x60] sm:$0xff] }
 0x425   : > { %12806 = vst [vmem:[#allocation27_spill] sm:$0xff] %v9691_v57  ;;  %3155 = vrot.lane.b32.xlu0 %v9689_v60, %s7297_s27  ;;  %12813 = vst [vmem:[#allocation95_spill] sm:$0xff] %v9713_v49 }
 0x426   : > { %3157 = vrot.lane.b32.xlu1 %v9693_v0, %s7297_s27  ;;  %v9717_v0 = vld [vmem:[#allocation2 + $0x68] sm:$0xff] }
 0x427   : > { %v9699_v17 = vpop.permute.xlu0 %2915  ;;  %12815 = vst [vmem:[#allocation153_spill] sm:$0xff] %v9717_v0 }
 0x428   : > { %12808 = vst [vmem:[#allocation29_spill] sm:$0xff] %v9699_v17  ;;  %v9703_v63 = vpop.permute.xlu1 %2917  ;;  %v9725_v17 = vld [vmem:[#allocation2 + $0x78] sm:$0xff] }
 0x429   : > { %12810 = vst [vmem:[#allocation50_spill] sm:$0xff] %v9703_v63  ;;  %3159 = vrot.lane.b32.xlu0 %v9701_v34, %s7297_s27  ;;  %12817 = vst [vmem:[#allocation7_spill] sm:$0xff] %v9725_v17 }
 0x42a   : > { %3161 = vrot.lane.b32.xlu1 %v9705_v4, %s7297_s27  ;;  %v9729_v4 = vld [vmem:[#allocation2 + $0x80] sm:$0xff] }
 0x42b   : > { %v9711_v57 = vpop.permute.xlu0 %2919  ;;  %12819 = vst [vmem:[#allocation31_spill] sm:$0xff] %v9729_v4 }
 0x42c   : > { %12812 = vst [vmem:[#allocation73_spill] sm:$0xff] %v9711_v57  ;;  %v9715_v60 = vpop.permute.xlu1 %2921  ;;  %v9737_v57 = vld [vmem:[#allocation2 + $0x90] sm:$0xff] }
 0x42d   : > { %12814 = vst [vmem:[#allocation129_spill] sm:$0xff] %v9715_v60  ;;  %3163 = vrot.lane.b32.xlu0 %v9713_v49, %s7297_s27  ;;  %12821 = vst [vmem:[#allocation56_spill] sm:$0xff] %v9737_v57 }
 0x42e   : > { %3165 = vrot.lane.b32.xlu1 %v9717_v0, %s7297_s27  ;;  %v9741_v0 = vld [vmem:[#allocation2 + $0x98] sm:$0xff] }
 0x42f   : > { %v9723_v63 = vpop.permute.xlu0 %2923  ;;  %12823 = vst [vmem:[#allocation76_spill] sm:$0xff] %v9741_v0 }
 0x430   : > { %12816 = vst [vmem:[#allocation94_spill] sm:$0xff] %v9723_v63  ;;  %v9727_v34 = vpop.permute.xlu1 %2925  ;;  %v9749_v63 = vld [vmem:[#allocation2 + $0xa8] sm:$0xff] }
 0x431   : > { %12818 = vst [vmem:[#allocation152_spill] sm:$0xff] %v9727_v34  ;;  %3167 = vrot.lane.b32.xlu0 %v9725_v17, %s7297_s27  ;;  %12825 = vst [vmem:[#allocation132_spill] sm:$0xff] %v9749_v63 }
 0x432   : > { %3169 = vrot.lane.b32.xlu1 %v9729_v4, %s7297_s27  ;;  %v9753_v4 = vld [vmem:[#allocation2 + $0xb0] sm:$0xff] }
 0x433   : > { %v9735_v60 = vpop.permute.xlu0 %2927  ;;  %12827 = vst [vmem:[#allocation97_spill] sm:$0xff] %v9753_v4 }
 0x434   : > { %12820 = vst [vmem:[#allocation5_spill] sm:$0xff] %v9735_v60  ;;  %v9739_v49 = vpop.permute.xlu1 %2929  ;;  %v9761_v60 = vld [vmem:[#allocation2 + $0xc0] sm:$0xff] }
 0x435   : > { %12822 = vst [vmem:[#allocation75_spill] sm:$0xff] %v9739_v49  ;;  %3171 = vrot.lane.b32.xlu0 %v9737_v57, %s7297_s27  ;;  %12829 = vst [vmem:[#allocation155_spill] sm:$0xff] %v9761_v60 }
 0x436   : > { %3173 = vrot.lane.b32.xlu1 %v9741_v0, %s7297_s27  ;;  %v9765_v0 = vld [vmem:[#allocation2 + $0xc8] sm:$0xff] }
 0x437   : > { %v9747_v34 = vpop.permute.xlu0 %2931  ;;  %12831 = vst [vmem:[#allocation12_spill] sm:$0xff] %v9765_v0 }
 0x438   : > { %12824 = vst [vmem:[#allocation54_spill] sm:$0xff] %v9747_v34  ;;  %v9751_v17 = vpop.permute.xlu1 %2933  ;;  %v2593_v34 = vld [vmem:[#allocation2 + $0xd8] sm:$0xff] }
 0x439   : > { %12826 = vst [vmem:[#allocation77_spill] sm:$0xff] %v9751_v17  ;;  %3175 = vrot.lane.b32.xlu0 %v9749_v63, %s7297_s27 }
 0x43a   : > { %3177 = vrot.lane.b32.xlu1 %v9753_v4, %s7297_s27  ;;  %v2594_v4 = vld [vmem:[#allocation2 + $0xe0] sm:$0xff] }
 0x43b   : > { %v9759_v49 = vpop.permute.xlu0 %2935 }
 0x43c   : > { %12828 = vst [vmem:[#allocation131_spill] sm:$0xff] %v9759_v49  ;;  %v9763_v57 = vpop.permute.xlu1 %2937 }
 0x43d   : > { %12830 = vst [vmem:[#allocation96_spill] sm:$0xff] %v9763_v57  ;;  %3179 = vrot.lane.b32.xlu0 %v9761_v60, %s7297_s27  ;;  %v2595_v57 = vld [vmem:[#allocation2 + $0xf0] sm:$0xff] }
 0x43e   : > { %3181 = vrot.lane.b32.xlu1 %v9765_v0, %s7297_s27 }
 0x43f   : > { %v9771_v17 = vpop.permute.xlu0 %2939 }
 0x440   : > { %12832 = vst [vmem:[#allocation154_spill] sm:$0xff] %v9771_v17  ;;  %v9773_v63 = vpop.permute.xlu1 %2941  ;;  %v2597_v17 = vld [vmem:[#allocation2 + $0x108] sm:$0xff] }
 0x441   : > { %12833 = vst [vmem:[#allocation98_spill] sm:$0xff] %v9773_v63  ;;  %3183 = vrot.lane.b32.xlu0 %v2593_v34, %s7297_s27  ;;  %v2598_v63 = vld [vmem:[#allocation2 + $0x110] sm:$0xff] }
 0x442   : > { %3185 = vrot.lane.b32.xlu1 %v2594_v4, %s7297_s27  ;;  %v2599_v4 = vld [vmem:[#allocation2 + $0x120] sm:$0xff] }
 0x443   : > { %v9777_v49 = vpop.permute.xlu0 %2943 }
 0x444   : > { %12834 = vst [vmem:[#allocation9_spill] sm:$0xff] %v9777_v49  ;;  %v9779_v42 = vpop.permute.xlu1 %2945 }
 0x445   : > { %12835 = vst [vmem:[#allocation60_spill] sm:$0xff] %v9779_v42  ;;  %3187 = vrot.lane.b32.xlu0 %v2595_v57, %s7297_s27  ;;  %v2600_v42 = vld [vmem:[#allocation2 + $0x128] sm:$0xff] }
 0x446   : > { %3189 = vrot.lane.b32.xlu1 %v2596_v10, %s7297_s27  ;;  %v2601_v10 = vld [vmem:[#allocation2 + $0x138] sm:$0xff] }
 0x447   : > { %v9783_v0 = vpop.permute.xlu0 %2947 }
 0x448   : > { %12836 = vst [vmem:[#allocation78_spill] sm:$0xff] %v9783_v0  ;;  %v9785_v60 = vpop.permute.xlu1 %2949 }
 0x449   : > { %12837 = vst [vmem:[#allocation15_spill] sm:$0xff] %v9785_v60  ;;  %3191 = vrot.lane.b32.xlu0 %v2597_v17, %s7297_s27  ;;  %v2602_v60 = vld [vmem:[#allocation2 + $0x140] sm:$0xff]  ;;  %v2603_v17 = vld [vmem:[#allocation2 + $0x150] sm:$0xff] }
 0x44a   : > { %3193 = vrot.lane.b32.xlu1 %v2598_v63, %s7297_s27 }
 0x44b   : > { %v9789_v34 = vpop.permute.xlu0 %2951 }
 0x44c   : > { %12838 = vst [vmem:[#allocation58_spill] sm:$0xff] %v9789_v34  ;;  %v9791_v49 = vpop.permute.xlu1 %2953 }
 0x44d   : > { %12839 = vst [vmem:[#allocation134_spill] sm:$0xff] %v9791_v49  ;;  %3195 = vrot.lane.b32.xlu0 %v2599_v4, %s7297_s27  ;;  %v2604_v49 = vld [vmem:[#allocation2 + $0x158] sm:$0xff]  ;;  %v2605_v4 = vld [vmem:[#allocation2 + $0x168] sm:$0xff] }
 0x44e   : > { %3197 = vrot.lane.b32.xlu1 %v2600_v42, %s7297_s27 }
 0x44f   : > { %v9795_v57 = vpop.permute.xlu0 %2955 }
 0x450   : > { %12840 = vst [vmem:[#allocation99_spill] sm:$0xff] %v9795_v57  ;;  %v9797_v0 = vpop.permute.xlu1 %2957 }
 0x451   : > { %12841 = vst [vmem:[#allocation62_spill] sm:$0xff] %v9797_v0  ;;  %3199 = vrot.lane.b32.xlu0 %v2601_v10, %s7297_s27  ;;  %v2606_v0 = vld [vmem:[#allocation2 + $0x170] sm:$0xff] }
 0x452   : > { %3201 = vrot.lane.b32.xlu1 %v2602_v60, %s7297_s27 }
 0x453   : > { %v9801_v63 = vpop.permute.xlu0 %3023 }
 0x454   : > { %12842 = vst [vmem:[#allocation133_spill] sm:$0xff] %v9801_v63  ;;  %v9803_v34 = vpop.permute.xlu1 %3025  ;;  %v2702_v63 = vld [vmem:[#allocation2 + $0x188] sm:$0xff] }
 0x455   : > { %12843 = vst [vmem:[#allocation157_spill] sm:$0xff] %v9803_v34  ;;  %3203 = vrot.lane.b32.xlu0 %v2603_v17, %s7297_s27  ;;  %v2701_v34 = vld [vmem:[#allocation2 + $0x180] sm:$0xff] }
 0x456   : > { %3205 = vrot.lane.b32.xlu1 %v2604_v49, %s7297_s27 }
 0x457   : > { %v9807_v42 = vpop.permute.xlu0 %3027 }
 0x458   : > { %v9809_v57 = vpop.permute.xlu1 %3029 }
 0x459   : > { %3207 = vrot.lane.b32.xlu0 %v2605_v4, %s7297_s27 }
 0x45a   : > { %3209 = vrot.lane.b32.xlu1 %v2606_v0, %s7297_s27 }
 0x45b   : > { %v9813_v60 = vpop.permute.xlu0 %3031 }
 0x45c   : > { %v9815_v10 = vpop.permute.xlu1 %3033 }
 0x45d   : > { %3211 = vrot.lane.b32.xlu0 %v2701_v34, %s7297_s27 }
 0x45e   : > { %3213 = vrot.lane.b32.xlu1 %v2702_v63, %s7297_s27 }
 0x45f   : > { %v9819_v49 = vpop.permute.xlu0 %3035 }
 0x460   : > { %v9821_v17 = vpop.permute.xlu1 %3037 }
 0x461   : > { %3279 = vrot.lane.b32.xlu0 %v9419_v53, %s7298_s28 }
 0x462   : > { %3281 = vrot.lane.b32.xlu1 %v9423_v50, %s7298_s28 }
 0x463   : > { %v9827_v0 = vpop.permute.xlu0 %3039 }
 0x464   : > { %v9829_v4 = vpop.permute.xlu1 %3041 }
 0x465   : > { %3283 = vrot.lane.b32.xlu0 %v9429_v3, %s7298_s28 }
 0x466   : > { %3285 = vrot.lane.b32.xlu1 %v9431_v35, %s7298_s28 }
 0x467   : > { %v9835_v34 = vpop.permute.xlu0 %3043 }
 0x468   : > { %v9837_v63 = vpop.permute.xlu1 %3045 }
 0x469   : > { %12844 = vst [vmem:[#allocation18_spill] sm:$0xff] %v9837_v63  ;;  %3287 = vrot.lane.b32.xlu0 %v9437_v40, %s7298_s28 }
 0x46a   : > { %3289 = vrot.lane.b32.xlu1 %v9439_v48, %s7298_s28 }
 0x46b   : > { %v9843_v53 = vpop.permute.xlu0 %3047 }
 0x46c   : > { %12845 = vst [vmem:[#allocation135_spill] sm:$0xff] %v9843_v53  ;;  %v9845_v50 = vpop.permute.xlu1 %3049  ;;  %v2844_v53 = vld [vmem:[#allocation2 + $0xca] sm:$0xff] }
 0x46d   : > { %12846 = vst [vmem:[#allocation156_spill] sm:$0xff] %v9845_v50  ;;  %3291 = vrot.lane.b32.xlu0 %v9445_v8, %s7298_s28  ;;  %v2843_v50 = vld [vmem:[#allocation2 + $0xc2] sm:$0xff] }
 0x46e   : > { %3293 = vrot.lane.b32.xlu1 %v9447_v14, %s7298_s28 }
 0x46f   : > { %v9851_v3 = vpop.permute.xlu0 %3051 }
 0x470   : > { %12847 = vst [vmem:[#allocation35_spill] sm:$0xff] %v9851_v3  ;;  %v9853_v35 = vpop.permute.xlu1 %3053  ;;  %v2842_v3 = vld [vmem:[#allocation2 + $0xb2] sm:$0xff] }
 0x471   : > { %12848 = vst [vmem:[#allocation64_spill] sm:$0xff] %v9853_v35  ;;  %3295 = vrot.lane.b32.xlu0 %v9453_v41, %s7298_s28  ;;  %v2841_v35 = vld [vmem:[#allocation2 + $0xaa] sm:$0xff] }
 0x472   : > { %3297 = vrot.lane.b32.xlu1 %v9455_v16, %s7298_s28 }
 0x473   : > { %v9859_v40 = vpop.permute.xlu0 %3055 }
 0x474   : > { %12849 = vst [vmem:[#allocation158_spill] sm:$0xff] %v9859_v40  ;;  %v9861_v48 = vpop.permute.xlu1 %3057  ;;  %v2804_v40 = vld [vmem:[#allocation2 + $0x69] sm:$0xff] }
 0x475   : > { %12850 = vst [vmem:[#allocation33_spill] sm:$0xff] %v9861_v48  ;;  %3299 = vrot.lane.b32.xlu0 %v9461_v47, %s7298_s28  ;;  %v12908_v48 = vld [vmem:[#allocation95_spill] sm:$0xff] }
 0x476   : > { %3301 = vrot.lane.b32.xlu1 %v9463_v29, %s7298_s28 }
 0x477   : > { %v9867_v8 = vpop.permute.xlu0 %3059 }
 0x478   : > { %12851 = vst [vmem:[#allocation80_spill] sm:$0xff] %v9867_v8  ;;  %v9869_v14 = vpop.permute.xlu1 %3061  ;;  %v2802_v8 = vld [vmem:[#allocation2 + $0x51] sm:$0xff] }
 0x479   : > { %12852 = vst [vmem:[#allocation136_spill] sm:$0xff] %v9869_v14  ;;  %3303 = vrot.lane.b32.xlu0 %v9469_v19, %s7298_s28  ;;  %v2801_v14 = vld [vmem:[#allocation2 + $0x49] sm:$0xff] }
 0x47a   : > { %3305 = vrot.lane.b32.xlu1 %v9471_v7, %s7298_s28 }
 0x47b   : > { %v9875_v41 = vpop.permute.xlu0 %3063 }
 0x47c   : > { %12853 = vst [vmem:[#allocation79_spill] sm:$0xff] %v9875_v41  ;;  %v9877_v16 = vpop.permute.xlu1 %3065 }
 0x47d   : > { %12854 = vst [vmem:[#allocation101_spill] sm:$0xff] %v9877_v16  ;;  %3307 = vrot.lane.b32.xlu0 %v9477_v18, %s7298_s28  ;;  %v2800_v16 = vld [vmem:[#allocation2 + $0x39] sm:$0xff] }
 0x47e   : > { %3309 = vrot.lane.b32.xlu1 %v9479_v58, %s7298_s28 }
 0x47f   : > { %v9883_v47 = vpop.permute.xlu0 %3067 }
 0x480   : > { %12855 = vst [vmem:[#allocation159_spill] sm:$0xff] %v9883_v47  ;;  %v9885_v29 = vpop.permute.xlu1 %3069  ;;  %v12897_v47 = vld [vmem:[#allocation130_spill] sm:$0xff] }
 0x481   : > { %12856 = vst [vmem:[#allocation100_spill] sm:$0xff] %v9885_v29  ;;  %3311 = vrot.lane.b32.xlu0 %v9485_v46, %s7298_s28 }
 0x482   : > { %3313 = vrot.lane.b32.xlu1 %v9487_v30, %s7298_s28 }
 0x483   : > { %v9891_v19 = vpop.permute.xlu0 %3071 }
 0x484   : > { %12857 = vst [vmem:[#allocation22_spill] sm:$0xff] %v9891_v19  ;;  %v9893_v7 = vpop.permute.xlu1 %3073  ;;  %v6817_v19 = vld [vmem:[%s12313_s1 + $0x28] sm:$0xff] }
 0x485   : > { %12858 = vst [vmem:[#allocation39_spill] sm:$0xff] %v9893_v7  ;;  %3315 = vrot.lane.b32.xlu0 %v9493_v11, %s7298_s28 }
 0x486   : > { %3317 = vrot.lane.b32.xlu1 %v9495_v56, %s7298_s28 }
 0x487   : > { %v9899_v18 = vpop.permute.xlu0 %3075 }
 0x488   : > { %12859 = vst [vmem:[#allocation20_spill] sm:$0xff] %v9899_v18  ;;  %v9901_v58 = vpop.permute.xlu1 %3077 }
 0x489   : > { %12860 = vst [vmem:[#allocation115_spill] sm:$0xff] %v9901_v58  ;;  %3319 = vrot.lane.b32.xlu0 %v9501_v12, %s7298_s28 }
 0x48a   : > { %3321 = vrot.lane.b32.xlu1 %v9503_v37, %s7298_s28 }
 0x48b   : > { %v9907_v46 = vpop.permute.xlu0 %3079 }
 0x48c   : > { %12861 = vst [vmem:[#allocation37_spill] sm:$0xff] %v9907_v46  ;;  %v9909_v30 = vpop.permute.xlu1 %3081 }
 0x48d   : > { %12862 = vst [vmem:[#allocation82_spill] sm:$0xff] %v9909_v30  ;;  %3323 = vrot.lane.b32.xlu0 %v9509_v36, %s7298_s28 }
 0x48e   : > { %3325 = vrot.lane.b32.xlu1 %v9511_v54, %s7298_s28 }
 0x48f   : > { %v9915_v11 = vpop.permute.xlu0 %3083 }
 0x490   : > { %12863 = vst [vmem:[#allocation67_spill] sm:$0xff] %v9915_v11  ;;  %v9917_v56 = vpop.permute.xlu1 %3085 }
 0x491   : > { %12864 = vst [vmem:[#allocation138_spill] sm:$0xff] %v9917_v56  ;;  %3327 = vrot.lane.b32.xlu0 %v9517_v26, %s7298_s28  ;;  %v9943_v56 = vld [vmem:[#allocation2 + $0x181] sm:$0xff] }
 0x492   : > { %3329 = vrot.lane.b32.xlu1 %v9519_v21, %s7298_s28 }
 0x493   : > { %v9923_v12 = vpop.permute.xlu0 %3151 }
 0x494   : > { %v9925_v37 = vpop.permute.xlu1 %3153 }
 0x495   : > { %3331 = vrot.lane.b32.xlu0 %v9525_v61, %s7298_s28  ;;  %v9945_v61 = vld [vmem:[#allocation2 + $0x189] sm:$0xff] }
 0x496   : > { %3333 = vrot.lane.b32.xlu1 %v9527_v9, %s7298_s28 }
 0x497   : > { %v9931_v36 = vpop.permute.xlu0 %3155 }
 0x498   : > { %v9933_v54 = vpop.permute.xlu1 %3157 }
 0x499   : > { %3335 = vrot.lane.b32.xlu0 %v9533_v28, %s7298_s28 }
 0x49a   : > { %3337 = vrot.lane.b32.xlu1 %v9535_v31, %s7298_s28 }
 0x49b   : > { %v9939_v26 = vpop.permute.xlu0 %3159 }
 0x49c   : > { %v9941_v21 = vpop.permute.xlu1 %3161 }
 0x49d   : > { %3339 = vrot.lane.b32.xlu0 %v9943_v56, %s7298_s28 }
 0x49e   : > { %3341 = vrot.lane.b32.xlu1 %v9945_v61, %s7298_s28 }
 0x49f   : > { %v9951_v9 = vpop.permute.xlu0 %3163 }
 0x4a0   : > { %v9953_v28 = vpop.permute.xlu1 %3165 }
 0x4a1   : > { %3407 = vrot.lane.b32.xlu0 %v9543_v39, %s7299_s29 }
 0x4a2   : > { %3409 = vrot.lane.b32.xlu1 %v9545_v52, %s7299_s29 }
 0x4a3   : > { %v9959_v31 = vpop.permute.xlu0 %3167 }
 0x4a4   : > { %v9961_v11 = vpop.permute.xlu1 %3169 }
 0x4a5   : > { %3411 = vrot.lane.b32.xlu0 %v9551_v22, %s7299_s29 }
 0x4a6   : > { %3413 = vrot.lane.b32.xlu1 %v9553_v38, %s7299_s29 }
 0x4a7   : > { %v9967_v30 = vpop.permute.xlu0 %3171 }
 0x4a8   : > { %12865 = vst [vmem:[#allocation81_spill] sm:$0xff] %v9967_v30  ;;  %v9969_v46 = vpop.permute.xlu1 %3173 }
 0x4a9   : > { %12866 = vst [vmem:[#allocation103_spill] sm:$0xff] %v9969_v46  ;;  %3415 = vrot.lane.b32.xlu0 %v9559_v62, %s7299_s29  ;;  %v12954_v46 = vld [vmem:[#allocation133_spill] sm:$0xff] }
 0x4aa   : > { %3417 = vrot.lane.b32.xlu1 %v9561_v20, %s7299_s29 }
 0x4ab   : > { %v9975_v39 = vpop.permute.xlu0 %3175 }
 0x4ac   : > { %12867 = vst [vmem:[#allocation137_spill] sm:$0xff] %v9975_v39  ;;  %v9977_v52 = vpop.permute.xlu1 %3177  ;;  %v2812_v39 = vld [vmem:[#allocation2 + $0xc9] sm:$0xff] }
 0x4ad   : > { %12868 = vst [vmem:[#allocation161_spill] sm:$0xff] %v9977_v52  ;;  %3419 = vrot.lane.b32.xlu0 %v9567_v27, %s7299_s29  ;;  %v2811_v52 = vld [vmem:[#allocation2 + $0xc1] sm:$0xff] }
 0x4ae   : > { %3421 = vrot.lane.b32.xlu1 %v9569_v25, %s7299_s29 }
 0x4af   : > { %v9983_v58 = vpop.permute.xlu0 %3179 }
 0x4b0   : > { %12869 = vst [vmem:[#allocation102_spill] sm:$0xff] %v9983_v58  ;;  %v9985_v18 = vpop.permute.xlu1 %3181  ;;  %v2810_v58 = vld [vmem:[#allocation2 + $0xb1] sm:$0xff] }
 0x4b1   : > { %12870 = vst [vmem:[#allocation26_spill] sm:$0xff] %v9985_v18  ;;  %3423 = vrot.lane.b32.xlu0 %v9575_v13, %s7299_s29  ;;  %v2809_v18 = vld [vmem:[#allocation2 + $0xa9] sm:$0xff] }
 0x4b2   : > { %3425 = vrot.lane.b32.xlu1 %v9577_v1, %s7299_s29 }
 0x4b3   : > { %v9991_v62 = vpop.permute.xlu0 %3183 }
 0x4b4   : > { %12871 = vst [vmem:[#allocation160_spill] sm:$0xff] %v9991_v62  ;;  %v9993_v20 = vpop.permute.xlu1 %3185  ;;  %v2834_v62 = vld [vmem:[#allocation2 + $0x52] sm:$0xff] }
 0x4b5   : > { %12872 = vst [vmem:[#allocation43_spill] sm:$0xff] %v9993_v20  ;;  %3427 = vrot.lane.b32.xlu0 %v9583_v5, %s7299_s29  ;;  %v2833_v20 = vld [vmem:[#allocation2 + $0x4a] sm:$0xff] }
 0x4b6   : > { %3429 = vrot.lane.b32.xlu1 %v9585_v51, %s7299_s29 }
 0x4b7   : > { %v9999_v27 = vpop.permute.xlu0 %3187 }
 0x4b8   : > { %12873 = vst [vmem:[#allocation24_spill] sm:$0xff] %v9999_v27  ;;  %v10001_v25 = vpop.permute.xlu1 %3189 }
 0x4b9   : > { %12874 = vst [vmem:[#allocation117_spill] sm:$0xff] %v10001_v25  ;;  %3431 = vrot.lane.b32.xlu0 %v9591_v6, %s7299_s29 }
 0x4ba   : > { %3433 = vrot.lane.b32.xlu1 %v9593_v32, %s7299_s29 }
 0x4bb   : > { %v10007_v13 = vpop.permute.xlu0 %3191 }
 0x4bc   : > { %12875 = vst [vmem:[#allocation41_spill] sm:$0xff] %v10007_v13  ;;  %v10009_v1 = vpop.permute.xlu1 %3193  ;;  %v2799_v13 = vld [vmem:[#allocation2 + $0x31] sm:$0xff] }
 0x4bd   : > { %12876 = vst [vmem:[#allocation84_spill] sm:$0xff] %v10009_v1  ;;  %3435 = vrot.lane.b32.xlu0 %v9599_v55, %s7299_s29 }
 0x4be   : > { %3437 = vrot.lane.b32.xlu1 %v9601_v43, %s7299_s29 }
 0x4bf   : > { %v10015_v5 = vpop.permute.xlu0 %3195 }
 0x4c0   : > { %12877 = vst [vmem:[#allocation116_spill] sm:$0xff] %v10015_v5  ;;  %v10017_v51 = vpop.permute.xlu1 %3197 }
 0x4c1   : > { %12878 = vst [vmem:[#allocation140_spill] sm:$0xff] %v10017_v51  ;;  %3439 = vrot.lane.b32.xlu0 %v9607_v24, %s7299_s29  ;;  %v12895_v51 = vld [vmem:[#allocation52_spill] sm:$0xff] }
 0x4c2   : > { %3441 = vrot.lane.b32.xlu1 %v9609_v44, %s7299_s29 }
 0x4c3   : > { %v10023_v6 = vpop.permute.xlu0 %3199 }
 0x4c4   : > { %12879 = vst [vmem:[#allocation83_spill] sm:$0xff] %v10023_v6  ;;  %v10025_v32 = vpop.permute.xlu1 %3201 }
 0x4c5   : > { %12880 = vst [vmem:[#allocation105_spill] sm:$0xff] %v10025_v32  ;;  %3443 = vrot.lane.b32.xlu0 %v9615_v15, %s7299_s29  ;;  %v10085_v32 = vld [vmem:[#allocation2 + $0x18a] sm:$0xff] }
 0x4c6   : > { %3445 = vrot.lane.b32.xlu1 %v9617_v59, %s7299_s29  ;;  %12893 = vst [vmem:[#allocation28_spill] sm:$0xff] %v10085_v32 }
 0x4c7   : > { %v10031_v55 = vpop.permute.xlu0 %3203 }
 0x4c8   : > { %12881 = vst [vmem:[#allocation139_spill] sm:$0xff] %v10031_v55  ;;  %v10033_v43 = vpop.permute.xlu1 %3205 }
 0x4c9   : > { %12882 = vst [vmem:[#allocation163_spill] sm:$0xff] %v10033_v43  ;;  %3447 = vrot.lane.b32.xlu0 %v9623_v23, %s7299_s29  ;;  %v12887_v43 = vld [vmem:[#allocation8_spill] sm:$0xff]  ;;  %v12888_v23 = vld [vmem:[#allocation10_spill] sm:$0xff] }
 0x4ca   : > { %3449 = vrot.lane.b32.xlu1 %v9625_v33, %s7299_s29 }
 0x4cb   : > { %v10039_v24 = vpop.permute.xlu0 %3207 }
 0x4cc   : > { %12883 = vst [vmem:[#allocation104_spill] sm:$0xff] %v10039_v24  ;;  %v10041_v44 = vpop.permute.xlu1 %3209 }
 0x4cd   : > { %12884 = vst [vmem:[#allocation30_spill] sm:$0xff] %v10041_v44  ;;  %3451 = vrot.lane.b32.xlu0 %v9631_v45, %s7299_s29  ;;  %v12889_v44 = vld [vmem:[#allocation14_spill] sm:$0xff]  ;;  %v12890_v45 = vld [vmem:[#allocation69_spill] sm:$0xff] }
 0x4ce   : > { %3453 = vrot.lane.b32.xlu1 %v9633_v2, %s7299_s29 }
 0x4cf   : > { %v10047_v15 = vpop.permute.xlu0 %3211 }
 0x4d0   : > { %12885 = vst [vmem:[#allocation162_spill] sm:$0xff] %v10047_v15  ;;  %v10049_v59 = vpop.permute.xlu1 %3213 }
 0x4d1   : > { %12886 = vst [vmem:[#allocation47_spill] sm:$0xff] %v10049_v59  ;;  %3455 = vrot.lane.b32.xlu0 %v12887_v43, %s7299_s29  ;;  %v12891_v59 = vld [vmem:[#allocation17_spill] sm:$0xff]  ;;  %v6821_v43 = vld [vmem:[%s12313_s1 + $0x48] sm:$0xf] }
 0x4d2   : > { %3457 = vrot.lane.b32.xlu1 %v12888_v23, %s7299_s29  ;;  %v12892_v23 = vld [vmem:[#allocation71_spill] sm:$0xff]  ;;  %7067 = vmatprep.subr.msk.mxu1 %vm2060_vm2, %v6821_v43 }
 0x4d3   : > { %v10055_v33 = vpop.permute.xlu0 %3279  ;;  %7068 = vmatpush3.msk.msra.mxu1 %vm2060_vm2, %v6821_v43  ;;  %v6818_v43 = vld [vmem:[%s12313_s1 + $0x30] sm:$0xff] }
 0x4d4   : > { %v10057_v24 = vpop.permute.xlu1 %3281 }
 0x4d5   : > { %3459 = vrot.lane.b32.xlu0 %v12889_v44, %s7299_s29  ;;  %v6820_v44 = vld [vmem:[%s12313_s1 + $0x40] sm:$0xff] }
 0x4d6   : > { %3461 = vrot.lane.b32.xlu1 %v12890_v45, %s7299_s29  ;;  %7069 = vmatprep.subr.mxu1 %v6820_v44 }
 0x4d7   : > { %v10063_v2 = vpop.permute.xlu0 %3283  ;;  %7070 = vmatpush3.msra.mxu1 %v6820_v44  ;;  %v12894_v44 = vld [vmem:[#allocation25_spill] sm:$0xff] }
 0x4d8   : > { %v10065_v15 = vpop.permute.xlu1 %3285 }
 0x4d9   : > { %3463 = vrot.lane.b32.xlu0 %v12891_v59, %s7299_s29  ;;  %v10083_v59 = vld [vmem:[#allocation2 + $0x182] sm:$0xff] }
 0x4da   : > { %3465 = vrot.lane.b32.xlu1 %v12892_v23, %s7299_s29  ;;  %v6819_v23 = vld [vmem:[%s12313_s1 + $0x38] sm:$0xff] }
 0x4db   : > { %v10078_v45 = vpop.permute.xlu0 %3287  ;;  %7071 = vmatprep.subr.mxu1 %v6819_v23 }
 0x4dc   : > { %v10081_v55 = vpop.permute.xlu1 %3289  ;;  %7072 = vmatpush3.msra.mxu1 %v6819_v23  ;;  %v12896_v23 = vld [vmem:[#allocation74_spill] sm:$0xff] }
 0x4dd   : > { %3467 = vrot.lane.b32.xlu0 %v10083_v59, %s7299_s29  ;;  %7073 = vmatprep.subr.mxu1 %v6818_v43 }
 0x4de   : > { %3469 = vrot.lane.b32.xlu1 %v10085_v32, %s7299_s29  ;;  %7074 = vmatpush3.msra.mxu1 %v6818_v43 }
 0x4df   : > { %v10097_v6 = vpop.permute.xlu0 %3291  ;;  %7075 = vmatprep.subr.mxu1 %v6817_v19 }
 0x4e0   : > { %v10099_v7 = vpop.permute.xlu1 %3293  ;;  %7076 = vmatpush3.msra.mxu1 %v6817_v19 }
 0x4e1   : > { %3535 = vrot.lane.b32.xlu0 %v12894_v44, %s7300_s30 }
 0x4e2   : > { %3537 = vrot.lane.b32.xlu1 %v12895_v51, %s7300_s30 }
 0x4e3   : > { %v10108_v5 = vpop.permute.xlu0 %3295 }
 0x4e4   : > { %v10110_v29 = vpop.permute.xlu1 %3297 }
 0x4e5   : > { %3539 = vrot.lane.b32.xlu0 %v12896_v23, %s7300_s30 }
 0x4e6   : > { %3541 = vrot.lane.b32.xlu1 %v12897_v47, %s7300_s30 }
 0x4e7   : > { %v10116_v43 = vpop.permute.xlu0 %3299 }
 0x4e8   : > { %12898 = vst [vmem:[#allocation119_spill] sm:$0xff] %v10116_v43  ;;  %v10118_v1 = vpop.permute.xlu1 %3301  ;;  %v2788_v43 = vld [vmem:[#allocation2 + $0x128] sm:$0xff] }
 0x4e9   : > { %12899 = vst [vmem:[#allocation45_spill] sm:$0xff] %v10118_v1  ;;  %3663 = vrot.lane.b32.xlu0 %v2799_v13, %s7301_s6 }
 0x4ea   : > { %3665 = vrot.lane.b32.xlu1 %v2800_v16, %s7301_s6 }
 0x4eb   : > { %v10122_v41 = vpop.permute.xlu0 %3303 }
 0x4ec   : > { %12900 = vst [vmem:[#allocation86_spill] sm:$0xff] %v10122_v41  ;;  %v10124_v19 = vpop.permute.xlu1 %3305 }
 0x4ed   : > { %12901 = vst [vmem:[#allocation118_spill] sm:$0xff] %v10124_v19  ;;  %3791 = vrot.lane.b32.xlu0 %v9551_v22, %s7302_s17  ;;  %v12930_v19 = vld [vmem:[#allocation155_spill] sm:$0xff] }
 0x4ee   : > { %3793 = vrot.lane.b32.xlu1 %v9553_v38, %s7302_s17 }
 0x4ef   : > { %v10130_v25 = vpop.permute.xlu0 %3307 }
 0x4f0   : > { %12902 = vst [vmem:[#allocation142_spill] sm:$0xff] %v10130_v25  ;;  %v10132_v27 = vpop.permute.xlu1 %3309 }
 0x4f1   : > { %12903 = vst [vmem:[#allocation85_spill] sm:$0xff] %v10132_v27  ;;  %3667 = vrot.lane.b32.xlu0 %v2801_v14, %s7301_s6  ;;  %v12909_v14 = vld [vmem:[#allocation153_spill] sm:$0xff]  ;;  %v12926_v27 = vld [vmem:[#allocation132_spill] sm:$0xff] }
 0x4f2   : > { %3669 = vrot.lane.b32.xlu1 %v2802_v8, %s7301_s6 }
 0x4f3   : > { %v10136_v16 = vpop.permute.xlu0 %3311 }
 0x4f4   : > { %12904 = vst [vmem:[#allocation107_spill] sm:$0xff] %v10136_v16  ;;  %v10138_v13 = vpop.permute.xlu1 %3313 }
 0x4f5   : > { %12905 = vst [vmem:[#allocation141_spill] sm:$0xff] %v10138_v13  ;;  %3795 = vrot.lane.b32.xlu0 %v2833_v20, %s7302_s17  ;;  %v2803_v13 = vld [vmem:[#allocation2 + $0x61] sm:$0xff] }
 0x4f6   : > { %3797 = vrot.lane.b32.xlu1 %v2834_v62, %s7302_s17 }
 0x4f7   : > { %v10142_v22 = vpop.permute.xlu0 %3315 }
 0x4f8   : > { %12906 = vst [vmem:[#allocation165_spill] sm:$0xff] %v10142_v22  ;;  %v10144_v38 = vpop.permute.xlu1 %3317  ;;  %v2836_v22 = vld [vmem:[#allocation2 + $0x6a] sm:$0xff] }
 0x4f9   : > { %12907 = vst [vmem:[#allocation106_spill] sm:$0xff] %v10144_v38  ;;  %3543 = vrot.lane.b32.xlu0 %v12908_v48, %s7300_s30  ;;  %v2835_v38 = vld [vmem:[#allocation2 + $0x62] sm:$0xff] }
 0x4fa   : > { %3545 = vrot.lane.b32.xlu1 %v12909_v14, %s7300_s30 }
 0x4fb   : > { %v10150_v8 = vpop.permute.xlu0 %3319 }
 0x4fc   : > { %12910 = vst [vmem:[#allocation34_spill] sm:$0xff] %v10150_v8  ;;  %v10152_v16 = vpop.permute.xlu1 %3321  ;;  %v2806_v8 = vld [vmem:[#allocation2 + $0x81] sm:$0xff] }
 0x4fd   : > { %12911 = vst [vmem:[#allocation164_spill] sm:$0xff] %v10152_v16  ;;  %3671 = vrot.lane.b32.xlu0 %v2803_v13, %s7301_s6  ;;  %v12916_v16 = vld [vmem:[#allocation7_spill] sm:$0xff] }
 0x4fe   : > { %3673 = vrot.lane.b32.xlu1 %v2804_v40, %s7301_s6  ;;  %v12917_v13 = vld [vmem:[#allocation31_spill] sm:$0xff] }
 0x4ff   : > { %v10156_v62 = vpop.permute.xlu0 %3323 }
 0x500   : > { %12912 = vst [vmem:[#allocation51_spill] sm:$0xff] %v10156_v62  ;;  %v10158_v20 = vpop.permute.xlu1 %3325 }
 0x501   : > { %12913 = vst [vmem:[#allocation32_spill] sm:$0xff] %v10158_v20  ;;  %3799 = vrot.lane.b32.xlu0 %v2835_v38, %s7302_s17  ;;  %v2805_v20 = vld [vmem:[#allocation2 + $0x79] sm:$0xff] }
 0x502   : > { %3801 = vrot.lane.b32.xlu1 %v2836_v22, %s7302_s17 }
 0x503   : > { %v10162_v48 = vpop.permute.xlu0 %3327 }
 0x504   : > { %12914 = vst [vmem:[#allocation121_spill] sm:$0xff] %v10162_v48  ;;  %v10164_v14 = vpop.permute.xlu1 %3329  ;;  %v2838_v48 = vld [vmem:[#allocation2 + $0x82] sm:$0xff] }
 0x505   : > { %12915 = vst [vmem:[#allocation49_spill] sm:$0xff] %v10164_v14  ;;  %3547 = vrot.lane.b32.xlu0 %v12916_v16, %s7300_s30  ;;  %v2837_v14 = vld [vmem:[#allocation2 + $0x7a] sm:$0xff] }
 0x506   : > { %3549 = vrot.lane.b32.xlu1 %v12917_v13, %s7300_s30 }
 0x507   : > { %v10170_v40 = vpop.permute.xlu0 %3331 }
 0x508   : > { %12918 = vst [vmem:[#allocation88_spill] sm:$0xff] %v10170_v40  ;;  %v10172_v62 = vpop.permute.xlu1 %3333  ;;  %v2808_v40 = vld [vmem:[#allocation2 + $0x99] sm:$0xff] }
 0x509   : > { %12919 = vst [vmem:[#allocation120_spill] sm:$0xff] %v10172_v62  ;;  %3675 = vrot.lane.b32.xlu0 %v2805_v20, %s7301_s6  ;;  %v12924_v62 = vld [vmem:[#allocation56_spill] sm:$0xff] }
 0x50a   : > { %3677 = vrot.lane.b32.xlu1 %v2806_v8, %s7301_s6  ;;  %v12925_v20 = vld [vmem:[#allocation76_spill] sm:$0xff] }
 0x50b   : > { %v10176_v22 = vpop.permute.xlu0 %3335 }
 0x50c   : > { %12920 = vst [vmem:[#allocation144_spill] sm:$0xff] %v10176_v22  ;;  %v10178_v38 = vpop.permute.xlu1 %3337 }
 0x50d   : > { %12921 = vst [vmem:[#allocation87_spill] sm:$0xff] %v10178_v38  ;;  %3803 = vrot.lane.b32.xlu0 %v2837_v14, %s7302_s17  ;;  %v2807_v38 = vld [vmem:[#allocation2 + $0x91] sm:$0xff] }
 0x50e   : > { %3805 = vrot.lane.b32.xlu1 %v2838_v48, %s7302_s17 }
 0x50f   : > { %v10182_v16 = vpop.permute.xlu0 %3339 }
 0x510   : > { %12922 = vst [vmem:[#allocation109_spill] sm:$0xff] %v10182_v16  ;;  %v10184_v13 = vpop.permute.xlu1 %3341  ;;  %v2840_v16 = vld [vmem:[#allocation2 + $0x9a] sm:$0xff] }
 0x511   : > { %12923 = vst [vmem:[#allocation143_spill] sm:$0xff] %v10184_v13  ;;  %3551 = vrot.lane.b32.xlu0 %v12924_v62, %s7300_s30  ;;  %v2839_v13 = vld [vmem:[#allocation2 + $0x92] sm:$0xff] }
 0x512   : > { %3553 = vrot.lane.b32.xlu1 %v12925_v20, %s7300_s30 }
 0x513   : > { %v10190_v8 = vpop.permute.xlu0 %3407 }
 0x514   : > { %v10192_v22 = vpop.permute.xlu1 %3409 }
 0x515   : > { %3679 = vrot.lane.b32.xlu0 %v2807_v38, %s7301_s6  ;;  %v12927_v38 = vld [vmem:[#allocation97_spill] sm:$0xff] }
 0x516   : > { %3681 = vrot.lane.b32.xlu1 %v2808_v40, %s7301_s6 }
 0x517   : > { %v10196_v48 = vpop.permute.xlu0 %3411 }
 0x518   : > { %v10198_v14 = vpop.permute.xlu1 %3413 }
 0x519   : > { %3807 = vrot.lane.b32.xlu0 %v2839_v13, %s7302_s17 }
 0x51a   : > { %3809 = vrot.lane.b32.xlu1 %v2840_v16, %s7302_s17 }
 0x51b   : > { %v10202_v62 = vpop.permute.xlu0 %3415 }
 0x51c   : > { %v10204_v20 = vpop.permute.xlu1 %3417 }
 0x51d   : > { %3555 = vrot.lane.b32.xlu0 %v12926_v27, %s7300_s30 }
 0x51e   : > { %3557 = vrot.lane.b32.xlu1 %v12927_v38, %s7300_s30 }
 0x51f   : > { %v10210_v40 = vpop.permute.xlu0 %3419 }
 0x520   : > { %v10212_v25 = vpop.permute.xlu1 %3421 }
 0x521   : > { %3683 = vrot.lane.b32.xlu0 %v2809_v18, %s7301_s6  ;;  %v12931_v18 = vld [vmem:[#allocation12_spill] sm:$0xff] }
 0x522   : > { %3685 = vrot.lane.b32.xlu1 %v2810_v58, %s7301_s6 }
 0x523   : > { %v10216_v16 = vpop.permute.xlu0 %3423 }
 0x524   : > { %v10218_v13 = vpop.permute.xlu1 %3425 }
 0x525   : > { %3811 = vrot.lane.b32.xlu0 %v2841_v35, %s7302_s17 }
 0x526   : > { %3813 = vrot.lane.b32.xlu1 %v2842_v3, %s7302_s17 }
 0x527   : > { %v10222_v27 = vpop.permute.xlu0 %3427 }
 0x528   : > { %12928 = vst [vmem:[#allocation167_spill] sm:$0xff] %v10222_v27  ;;  %v10224_v38 = vpop.permute.xlu1 %3429  ;;  %v2787_v27 = vld [vmem:[#allocation2 + $0x120] sm:$0xff] }
 0x529   : > { %12929 = vst [vmem:[#allocation108_spill] sm:$0xff] %v10224_v38  ;;  %3559 = vrot.lane.b32.xlu0 %v12930_v19, %s7300_s30  ;;  %v2575_v38 = vld [vmem:[#allocation2] sm:$0xff] }
 0x52a   : > { %3561 = vrot.lane.b32.xlu1 %v12931_v18, %s7300_s30 }
 0x52b   : > { %v10230_v58 = vpop.permute.xlu0 %3431 }
 0x52c   : > { %12932 = vst [vmem:[#allocation38_spill] sm:$0xff] %v10230_v58  ;;  %v10232_v41 = vpop.permute.xlu1 %3433  ;;  %v2782_v58 = vld [vmem:[#allocation2 + $0xe0] sm:$0xff] }
 0x52d   : > { %12933 = vst [vmem:[#allocation166_spill] sm:$0xff] %v10232_v41  ;;  %3687 = vrot.lane.b32.xlu0 %v2811_v52, %s7301_s6  ;;  %v2781_v41 = vld [vmem:[#allocation2 + $0xd8] sm:$0xff] }
 0x52e   : > { %3689 = vrot.lane.b32.xlu1 %v2812_v39, %s7301_s6 }
 0x52f   : > { %v10236_v3 = vpop.permute.xlu0 %3435 }
 0x530   : > { %12934 = vst [vmem:[#allocation55_spill] sm:$0xff] %v10236_v3  ;;  %v10238_v35 = vpop.permute.xlu1 %3437  ;;  %v2814_v3 = vld [vmem:[#allocation2 + $0xe1] sm:$0xff] }
 0x531   : > { %12935 = vst [vmem:[#allocation36_spill] sm:$0xff] %v10238_v35  ;;  %3815 = vrot.lane.b32.xlu0 %v2843_v50, %s7302_s17  ;;  %v2813_v35 = vld [vmem:[#allocation2 + $0xd9] sm:$0xff] }
 0x532   : > { %3817 = vrot.lane.b32.xlu1 %v2844_v53, %s7302_s17 }
 0x533   : > { %v10242_v19 = vpop.permute.xlu0 %3439 }
 0x534   : > { %12936 = vst [vmem:[#allocation123_spill] sm:$0xff] %v10242_v19  ;;  %v10244_v18 = vpop.permute.xlu1 %3441  ;;  %v2846_v19 = vld [vmem:[#allocation2 + $0xe2] sm:$0xff] }
 0x535   : > { %12937 = vst [vmem:[#allocation53_spill] sm:$0xff] %v10244_v18  ;;  %3563 = vrot.lane.b32.xlu0 %v2781_v41, %s7300_s30  ;;  %v2845_v18 = vld [vmem:[#allocation2 + $0xda] sm:$0xff] }
 0x536   : > { %3565 = vrot.lane.b32.xlu1 %v2782_v58, %s7300_s30 }
 0x537   : > { %v10248_v39 = vpop.permute.xlu0 %3443 }
 0x538   : > { %12938 = vst [vmem:[#allocation90_spill] sm:$0xff] %v10248_v39  ;;  %v10250_v52 = vpop.permute.xlu1 %3445  ;;  %v2784_v39 = vld [vmem:[#allocation2 + $0xf8] sm:$0xff] }
 0x539   : > { %12939 = vst [vmem:[#allocation122_spill] sm:$0xff] %v10250_v52  ;;  %3691 = vrot.lane.b32.xlu0 %v2813_v35, %s7301_s6  ;;  %v2783_v52 = vld [vmem:[#allocation2 + $0xf0] sm:$0xff] }
 0x53a   : > { %3693 = vrot.lane.b32.xlu1 %v2814_v3, %s7301_s6 }
 0x53b   : > { %v10254_v53 = vpop.permute.xlu0 %3447 }
 0x53c   : > { %12940 = vst [vmem:[#allocation146_spill] sm:$0xff] %v10254_v53  ;;  %v10256_v50 = vpop.permute.xlu1 %3449  ;;  %v2816_v53 = vld [vmem:[#allocation2 + $0xf9] sm:$0xff] }
 0x53d   : > { %12941 = vst [vmem:[#allocation89_spill] sm:$0xff] %v10256_v50  ;;  %3819 = vrot.lane.b32.xlu0 %v2845_v18, %s7302_s17  ;;  %v2815_v50 = vld [vmem:[#allocation2 + $0xf1] sm:$0xff] }
 0x53e   : > { %3821 = vrot.lane.b32.xlu1 %v2846_v19, %s7302_s17 }
 0x53f   : > { %v10260_v41 = vpop.permute.xlu0 %3451 }
 0x540   : > { %12942 = vst [vmem:[#allocation111_spill] sm:$0xff] %v10260_v41  ;;  %v10262_v58 = vpop.permute.xlu1 %3453  ;;  %v2848_v41 = vld [vmem:[#allocation2 + $0xfa] sm:$0xff] }
 0x541   : > { %12943 = vst [vmem:[#allocation145_spill] sm:$0xff] %v10262_v58  ;;  %3567 = vrot.lane.b32.xlu0 %v2783_v52, %s7300_s30  ;;  %v2847_v58 = vld [vmem:[#allocation2 + $0xf2] sm:$0xff] }
 0x542   : > { %3569 = vrot.lane.b32.xlu1 %v2784_v39, %s7300_s30 }
 0x543   : > { %v10266_v3 = vpop.permute.xlu0 %3455 }
 0x544   : > { %12944 = vst [vmem:[#allocation169_spill] sm:$0xff] %v10266_v3  ;;  %v10268_v35 = vpop.permute.xlu1 %3457  ;;  %v2786_v3 = vld [vmem:[#allocation2 + $0x110] sm:$0xff] }
 0x545   : > { %12945 = vst [vmem:[#allocation110_spill] sm:$0xff] %v10268_v35  ;;  %3695 = vrot.lane.b32.xlu0 %v2815_v50, %s7301_s6  ;;  %v2785_v35 = vld [vmem:[#allocation2 + $0x108] sm:$0xff] }
 0x546   : > { %3697 = vrot.lane.b32.xlu1 %v2816_v53, %s7301_s6 }
 0x547   : > { %v10272_v19 = vpop.permute.xlu0 %3459 }
 0x548   : > { %12946 = vst [vmem:[#allocation42_spill] sm:$0xff] %v10272_v19  ;;  %v10274_v18 = vpop.permute.xlu1 %3461  ;;  %v2818_v19 = vld [vmem:[#allocation2 + $0x111] sm:$0xff] }
 0x549   : > { %12947 = vst [vmem:[#allocation168_spill] sm:$0xff] %v10274_v18  ;;  %3823 = vrot.lane.b32.xlu0 %v2847_v58, %s7302_s17  ;;  %v2817_v18 = vld [vmem:[#allocation2 + $0x109] sm:$0xff] }
 0x54a   : > { %3825 = vrot.lane.b32.xlu1 %v2848_v41, %s7302_s17 }
 0x54b   : > { %v10278_v39 = vpop.permute.xlu0 %3463 }
 0x54c   : > { %12948 = vst [vmem:[#allocation59_spill] sm:$0xff] %v10278_v39  ;;  %v10280_v52 = vpop.permute.xlu1 %3465  ;;  %v2849_v39 = vld [vmem:[#allocation2 + $0x10a] sm:$0xff] }
 0x54d   : > { %12949 = vst [vmem:[#allocation40_spill] sm:$0xff] %v10280_v52  ;;  %3571 = vrot.lane.b32.xlu0 %v2785_v35, %s7300_s30  ;;  %v2850_v52 = vld [vmem:[#allocation2 + $0x112] sm:$0xff] }
 0x54e   : > { %3573 = vrot.lane.b32.xlu1 %v2786_v3, %s7300_s30  ;;  %v2576_v3 = vld [vmem:[#allocation2 + $0x8] sm:$0xff] }
 0x54f   : > { %v10284_v53 = vpop.permute.xlu0 %3467 }
 0x550   : > { %12950 = vst [vmem:[#allocation125_spill] sm:$0xff] %v10284_v53  ;;  %v10286_v50 = vpop.permute.xlu1 %3469 }
 0x551   : > { %12951 = vst [vmem:[#allocation57_spill] sm:$0xff] %v10286_v50  ;;  %3699 = vrot.lane.b32.xlu0 %v2817_v18, %s7301_s6  ;;  %v12952_v50 = vld [vmem:[#allocation66_spill] sm:$0xff] }
 0x552   : > { %3701 = vrot.lane.b32.xlu1 %v2818_v19, %s7301_s6  ;;  %v3887_v1 = vsel %vm261_vm0, %v2575_v38, %v12952_v50  ;;  %v12953_v19 = vld [vmem:[#allocation65_spill] sm:$0xff] }
 0x553   : > { %v3536_v41 = vpop.permute.xlu0 %3535  ;;  %v3888_v18 = vsel %vm261_vm0, %v2576_v3, %v12953_v19  ;;  %v3919_v30 = vsel %vm1727_vm3, %v3887_v1, %v12954_v46  ;;  %v2819_v3 = vld [vmem:[#allocation2 + $0x121] sm:$0xff] }
 0x554   : > { %v3538_v58 = vpop.permute.xlu1 %3537  ;;  %v3951_v63 = vsel %vm1760_vm4, %v3919_v30, %v9923_v12 }
 0x555   : > { %3827 = vrot.lane.b32.xlu0 %v2849_v39, %s7302_s17  ;;  %v12955_v39 = vld [vmem:[#allocation157_spill] sm:$0xff] }
 0x556   : > { %3829 = vrot.lane.b32.xlu1 %v2850_v52, %s7302_s17  ;;  %v3920_v52 = vsel %vm1727_vm3, %v3888_v18, %v12955_v39  ;;  %v2851_v18 = vld [vmem:[#allocation2 + $0x122] sm:$0xff]  ;;  %v12956_v39 = vld [vmem:[#allocation11_spill] sm:$0xff] }
 0x557   : > { %v3540_v35 = vpop.permute.xlu0 %3539  ;;  %v3952_v38 = vsel %vm1760_vm4, %v3920_v52, %v9925_v37  ;;  %v12957_v52 = vld [vmem:[#allocation19_spill] sm:$0xff] }
 0x558   : > { %v3542_v53 = vpop.permute.xlu1 %3541  ;;  %v3984_v46 = vsel %vm1793_vm5, %v3952_v38, %v10057_v24  ;;  %v3889_v38 = vsel %vm261_vm0, %v12957_v52, %v12956_v39  ;;  %v2822_v39 = vld [vmem:[#allocation2 + $0x141] sm:$0xff]  ;;  %v12960_v52 = vld [vmem:[#allocation68_spill] sm:$0xff] }
 0x559   : > { %3575 = vrot.lane.b32.xlu0 %v2787_v27, %s7300_s30  ;;  %v3983_v27 = vsel %vm1793_vm5, %v3951_v63, %v10055_v33  ;;  %v4016_v30 = vsel %vm1826_vm6, %v3984_v46, %v10192_v22 }
 0x55a   : > { %3577 = vrot.lane.b32.xlu1 %v2788_v43, %s7300_s30  ;;  %v4015_v1 = vsel %vm1826_vm6, %v3983_v27, %v10190_v8  ;;  %v2820_v43 = vld [vmem:[#allocation2 + $0x129] sm:$0xff]  ;;  %v4048_v63 = vsel %vm1859_vm7, %v4016_v30, %v3538_v58  ;;  %v12958_v58 = vld [vmem:[#allocation13_spill] sm:$0xff] }
 0x55b   : > { %v3664_v32 = vpop.permute.xlu0 %3663  ;;  %v4047_v12 = vsel %vm1859_vm7, %v4015_v1, %v3536_v41  ;;  %v2852_v41 = vld [vmem:[#allocation2 + $0x12a] sm:$0xff] }
 0x55c   : > { %v3666_v50 = vpop.permute.xlu1 %3665  ;;  %v4079_v37 = vsel %vm1892_vm8, %v4047_v12, %v3664_v32  ;;  %v12959_v32 = vld [vmem:[#allocation72_spill] sm:$0xff] }
 0x55d   : > { %3703 = vrot.lane.b32.xlu0 %v2819_v3, %s7301_s6  ;;  %v4080_v24 = vsel %vm1892_vm8, %v4048_v63, %v3666_v50  ;;  %v3890_v27 = vsel %vm261_vm0, %v12959_v32, %v12958_v58  ;;  %v3921_v50 = vsel %vm1727_vm3, %v3889_v38, %v9807_v42  ;;  %v2789_v63 = vld [vmem:[#allocation2 + $0x138] sm:$0xff]  ;;  %v3891_v38 = vsel %vm261_vm0, %v12894_v44, %v12960_v52  ;;  %v2794_v52 = vld [vmem:[#allocation2 + $0x170] sm:$0xff] }
 0x55e   : > { %3705 = vrot.lane.b32.xlu1 %v2820_v43, %s7301_s6  ;;  %v3922_v3 = vsel %vm1727_vm3, %v3890_v27, %v9809_v57  ;;  %v3953_v46 = vsel %vm1760_vm4, %v3921_v50, %v9931_v36  ;;  %v3923_v32 = vsel %vm1727_vm3, %v3891_v38, %v9813_v60 }
 0x55f   : > { %v3792_v33 = vpop.permute.xlu0 %3791  ;;  %v3954_v43 = vsel %vm1760_vm4, %v3922_v3, %v9933_v54  ;;  %v3985_v30 = vsel %vm1793_vm5, %v3953_v46, %v10063_v2  ;;  %v3955_v50 = vsel %vm1760_vm4, %v3923_v32, %v9939_v26  ;;  %v2826_v32 = vld [vmem:[#allocation2 + $0x171] sm:$0xff] }
 0x560   : > { %v3794_v19 = vpop.permute.xlu1 %3793  ;;  %v4111_v8 = vsel %vm1925_vm9, %v4079_v37, %v3792_v33  ;;  %v3986_v42 = vsel %vm1793_vm5, %v3954_v43, %v10065_v15  ;;  %v4017_v37 = vsel %vm1826_vm6, %v3985_v30, %v10196_v48  ;;  %v2790_v33 = vld [vmem:[#allocation2 + $0x140] sm:$0xff]  ;;  %v3987_v46 = vsel %vm1793_vm5, %v3955_v50, %v10078_v45  ;;  %v2792_v30 = vld [vmem:[#allocation2 + $0x158] sm:$0xff]  ;;  %v2857_v50 = vld [vmem:[#allocation2 + $0x16a] sm:$0xff] }
 0x561   : > { %v4112_v22 = vsel %vm1925_vm9, %v4080_v24, %v3794_v19  ;;  %3831 = vrot.lane.b32.xlu0 %v2851_v18, %s7302_s17  ;;  %7077 = vmatprep.mubr.msk.f32.mxu1 %vm1963_vm10, %v4111_v8  ;;  %v4018_v57 = vsel %vm1826_vm6, %v3986_v42, %v10198_v14  ;;  %v4049_v36 = vsel %vm1859_vm7, %v4017_v37, %v3540_v35  ;;  %v2821_v8 = vld [vmem:[#allocation2 + $0x139] sm:$0xff]  ;;  %v2823_v42 = vld [vmem:[#allocation2 + $0x151] sm:$0xff] }
 0x562   : > { %3833 = vrot.lane.b32.xlu1 %v2852_v41, %s7302_s17  ;;  %7078 = vmatmul.mubr.msk.f32.vlgmr.msra.gmra.mxu1 %vm1963_vm10, %v4112_v22  ;;  %v4050_v54 = vsel %vm1859_vm7, %v4018_v57, %v3542_v53  ;;  %v2853_v35 = vld [vmem:[#allocation2 + $0x13a] sm:$0xff]  ;;  %v2854_v22 = vld [vmem:[#allocation2 + $0x142] sm:$0xff]  ;;  %v4019_v43 = vsel %vm1826_vm6, %v3987_v46, %v10202_v62 }
 0x563   : > { %v3668_v1 = vpop.permute.xlu0 %3667  ;;  %v12961_v41 = vld [vmem:[#allocation16_spill] sm:$0xff] }
 0x564   : > { %v3670_v12 = vpop.permute.xlu1 %3669  ;;  %v4081_v2 = vsel %vm1892_vm8, %v4049_v36, %v3668_v1  ;;  %v3892_v58 = vsel %vm261_vm0, %v12895_v51, %v12961_v41  ;;  %v2791_v51 = vld [vmem:[#allocation2 + $0x150] sm:$0xff] }
 0x565   : > { %3579 = vrot.lane.b32.xlu0 %v2789_v63, %s7300_s30  ;;  %v4082_v15 = vsel %vm1892_vm8, %v4050_v54, %v3670_v12  ;;  %v3924_v27 = vsel %vm1727_vm3, %v3892_v58, %v9815_v10  ;;  %v2855_v36 = vld [vmem:[#allocation2 + $0x152] sm:$0xff]  ;;  %v12962_v54 = vld [vmem:[#allocation70_spill] sm:$0xff] }
 0x566   : > { %3581 = vrot.lane.b32.xlu1 %v2790_v33, %s7300_s30  ;;  %v3956_v44 = vsel %vm1760_vm4, %v3924_v27, %v9941_v21  ;;  %v2824_v33 = vld [vmem:[#allocation2 + $0x159] sm:$0xff]  ;;  %v2825_v41 = vld [vmem:[#allocation2 + $0x169] sm:$0xff] }
 0x567   : > { %v3796_v24 = vpop.permute.xlu0 %3795  ;;  %v3988_v60 = vsel %vm1793_vm5, %v3956_v44, %v10081_v55  ;;  %v12964_v44 = vld [vmem:[#allocation23_spill] sm:$0xff] }
 0x568   : > { %v3798_v19 = vpop.permute.xlu1 %3797  ;;  %v4113_v48 = vsel %vm1925_vm9, %v4081_v2, %v3796_v24  ;;  %v4020_v10 = vsel %vm1826_vm6, %v3988_v60, %v10204_v20  ;;  %v3893_v2 = vsel %vm261_vm0, %v12896_v23, %v12962_v54  ;;  %v2856_v24 = vld [vmem:[#allocation2 + $0x15a] sm:$0xff]  ;;  %v12965_v60 = vld [vmem:[#allocation27_spill] sm:$0xff] }
 0x569   : > { %v4114_v18 = vsel %vm1925_vm9, %v4082_v15, %v3798_v19  ;;  %3707 = vrot.lane.b32.xlu0 %v2821_v8, %s7301_s6  ;;  %7080 = vmatprep.mubr.msk.f32.mxu1 %vm1963_vm10, %v4113_v48  ;;  %v12963_v15 = vld [vmem:[#allocation21_spill] sm:$0xff]  ;;  %v3925_v48 = vsel %vm1727_vm3, %v3893_v2, %v9819_v49 }
 0x56a   : > { %3709 = vrot.lane.b32.xlu1 %v2822_v39, %s7301_s6  ;;  %7081 = vmatmul.mubr.msk.f32.gmra.mxu1 %vm1963_vm10, %v4114_v18  ;;  %v3894_v19 = vsel %vm261_vm0, %v12897_v47, %v12963_v15  ;;  %v3957_v18 = vsel %vm1760_vm4, %v3925_v48, %v9951_v9  ;;  %v2793_v47 = vld [vmem:[#allocation2 + $0x168] sm:$0xff]  ;;  %v12966_v54 = vld [vmem:[#allocation29_spill] sm:$0xff]  ;;  %v2797_v48 = vld [vmem:[#allocation2 + $0x198] sm:$0xff] }
 0x56b   : > { %v3544_v14 = vpop.permute.xlu0 %3543  ;;  %v3926_v8 = vsel %vm1727_vm3, %v3894_v19, %v9821_v17  ;;  %v12967_v15 = vld [vmem:[#allocation50_spill] sm:$0xff] }
 0x56c   : > { %v3546_v53 = vpop.permute.xlu1 %3545  ;;  %v4051_v26 = vsel %vm1859_vm7, %v4019_v43, %v3544_v14  ;;  %v3958_v23 = vsel %vm1760_vm4, %v3926_v8, %v9953_v28  ;;  %v3989_v14 = vsel %vm1793_vm5, %v3957_v18, %v10097_v6  ;;  %v12969_v8 = vld [vmem:[#allocation18_spill] sm:$0xff] }
 0x56d   : > { %3835 = vrot.lane.b32.xlu0 %v2853_v35, %s7302_s17  ;;  %v4052_v21 = vsel %vm1859_vm7, %v4020_v10, %v3546_v53  ;;  %v3990_v49 = vsel %vm1793_vm5, %v3958_v23, %v10099_v7  ;;  %v4021_v35 = vsel %vm1826_vm6, %v3989_v14, %v10210_v40 }
 0x56e   : > { %3837 = vrot.lane.b32.xlu1 %v2854_v22, %s7302_s17  ;;  %v4022_v17 = vsel %vm1826_vm6, %v3990_v49, %v10212_v25  ;;  %v12972_v49 = vld [vmem:[#allocation119_spill] sm:$0xff] }
 0x56f   : > { %v3672_v3 = vpop.permute.xlu0 %3671 }
 0x570   : > { %v3674_v1 = vpop.permute.xlu1 %3673  ;;  %v4083_v45 = vsel %vm1892_vm8, %v4051_v26, %v3672_v3  ;;  %v7244_v3 = vld [vmem:[#allocation2 + $0x60] sm:$0xff] }
 0x571   : > { %3583 = vrot.lane.b32.xlu0 %v2791_v51, %s7300_s30  ;;  %v4084_v55 = vsel %vm1892_vm8, %v4052_v21, %v3674_v1  ;;  %v3895_v46 = vsel %vm261_vm0, %v7244_v3, %v12964_v44  ;;  %v2858_v1 = vld [vmem:[#allocation2 + $0x172] sm:$0xff]  ;;  %v7245_v51 = vld [vmem:[#allocation2 + $0x68] sm:$0xff]  ;;  %v2861_v44 = vld [vmem:[#allocation2 + $0x19a] sm:$0xff] }
 0x572   : > { %3585 = vrot.lane.b32.xlu1 %v2792_v30, %s7300_s30  ;;  %v3896_v43 = vsel %vm261_vm0, %v7245_v51, %v12965_v60  ;;  %v3927_v30 = vsel %vm1727_vm3, %v3895_v46, %v9827_v0  ;;  %v7248_v60 = vld [vmem:[#allocation2 + $0x90] sm:$0xff] }
 0x573   : > { %v3800_v12 = vpop.permute.xlu0 %3799  ;;  %v3928_v10 = vsel %vm1727_vm3, %v3896_v43, %v9829_v4  ;;  %v3959_v26 = vsel %vm1760_vm4, %v3927_v30, %v9959_v31  ;;  %v12976_v43 = vld [vmem:[#allocation73_spill] sm:$0xff] }
 0x574   : > { %v3802_v63 = vpop.permute.xlu1 %3801  ;;  %v4115_v62 = vsel %vm1925_vm9, %v4083_v45, %v3800_v12  ;;  %v3960_v45 = vsel %vm1760_vm4, %v3928_v10, %v9961_v11  ;;  %v3991_v12 = vsel %vm1793_vm5, %v3959_v26, %v10108_v5  ;;  %v3899_v30 = vsel %vm261_vm0, %v7248_v60, %v12976_v43  ;;  %v7249_v10 = vld [vmem:[#allocation2 + $0x98] sm:$0xff]  ;;  %v12977_v26 = vld [vmem:[#allocation129_spill] sm:$0xff] }
 0x575   : > { %v4116_v37 = vsel %vm1925_vm9, %v4084_v55, %v3802_v63  ;;  %3711 = vrot.lane.b32.xlu0 %v2823_v42, %s7301_s6  ;;  %7083 = vmatprep.mubr.msk.f32.mxu1 %vm1963_vm10, %v4115_v62  ;;  %v2795_v63 = vld [vmem:[#allocation2 + $0x180] sm:$0xff]  ;;  %v3992_v0 = vsel %vm1793_vm5, %v3960_v45, %v10110_v29  ;;  %v4023_v62 = vsel %vm1826_vm6, %v3991_v12, %v10216_v16  ;;  %v2796_v42 = vld [vmem:[#allocation2 + $0x188] sm:$0xff]  ;;  %v12978_v45 = vld [vmem:[#allocation135_spill] sm:$0xff] }
 0x576   : > { %3713 = vrot.lane.b32.xlu1 %v2824_v33, %s7301_s6  ;;  %7084 = vmatmul.mubr.msk.f32.gmra.mxu1 %vm1963_vm10, %v4116_v37  ;;  %v4024_v4 = vsel %vm1826_vm6, %v3992_v0, %v10218_v13  ;;  %v3931_v12 = vsel %vm1727_vm3, %v3899_v30, %v12978_v45  ;;  %v12980_v0 = vld [vmem:[#allocation137_spill] sm:$0xff] }
 0x577   : > { %v3548_v20 = vpop.permute.xlu0 %3547 }
 0x578   : > { %v3550_v57 = vpop.permute.xlu1 %3549  ;;  %v4053_v9 = vsel %vm1859_vm7, %v4021_v35, %v3548_v20 }
 0x579   : > { %3839 = vrot.lane.b32.xlu0 %v2855_v36, %s7302_s17  ;;  %v4054_v28 = vsel %vm1859_vm7, %v4022_v17, %v3550_v57  ;;  %v7246_v36 = vld [vmem:[#allocation2 + $0x78] sm:$0xff] }
 0x57a   : > { %3841 = vrot.lane.b32.xlu1 %v2856_v24, %s7302_s17  ;;  %v3897_v2 = vsel %vm261_vm0, %v7246_v36, %v12966_v54  ;;  %v7247_v24 = vld [vmem:[#allocation2 + $0x80] sm:$0xff] }
 0x57b   : > { %v3676_v39 = vpop.permute.xlu0 %3675  ;;  %v3929_v19 = vsel %vm1727_vm3, %v3897_v2, %v9835_v34  ;;  %v12973_v34 = vld [vmem:[#allocation45_spill] sm:$0xff] }
 0x57c   : > { %v3678_v53 = vpop.permute.xlu1 %3677  ;;  %v4085_v6 = vsel %vm1892_vm8, %v4053_v9, %v3676_v39  ;;  %v12970_v39 = vld [vmem:[#allocation81_spill] sm:$0xff]  ;;  %v12974_v9 = vld [vmem:[#allocation167_spill] sm:$0xff] }
 0x57d   : > { %3587 = vrot.lane.b32.xlu0 %v2793_v47, %s7300_s30  ;;  %v4086_v7 = vsel %vm1892_vm8, %v4054_v28, %v3678_v53  ;;  %v3961_v23 = vsel %vm1760_vm4, %v3929_v19, %v12970_v39  ;;  %v2798_v53 = vld [vmem:[#allocation2 + $0x1a0] sm:$0xff]  ;;  %v12986_v39 = vld [vmem:[#allocation94_spill] sm:$0xff] }
 0x57e   : > { %3589 = vrot.lane.b32.xlu1 %v2794_v52, %s7300_s30  ;;  %v3993_v35 = vsel %vm1793_vm5, %v3961_v23, %v12972_v49 }
 0x57f   : > { %v3804_v38 = vpop.permute.xlu0 %3803  ;;  %v4025_v28 = vsel %vm1826_vm6, %v3993_v35, %v12974_v9  ;;  %v12989_v35 = vld [vmem:[#allocation64_spill] sm:$0xff] }
 0x580   : > { %v3806_v22 = vpop.permute.xlu1 %3805  ;;  %v4117_v40 = vsel %vm1925_vm9, %v4085_v6, %v3804_v38  ;;  %v12975_v6 = vld [vmem:[#allocation108_spill] sm:$0xff] }
 0x581   : > { %v4118_v58 = vsel %vm1925_vm9, %v4086_v7, %v3806_v22  ;;  %3715 = vrot.lane.b32.xlu0 %v2825_v41, %s7301_s6  ;;  %7086 = vmatprep.mubr.msk.f32.mxu1 %vm1963_vm10, %v4117_v40  ;;  %v2829_v22 = vld [vmem:[#allocation2 + $0x199] sm:$0xff] }
 0x582   : > { %3717 = vrot.lane.b32.xlu1 %v2826_v32, %s7301_s6  ;;  %7087 = vmatmul.mubr.msk.f32.gmra.mxu1 %vm1963_vm10, %v4118_v58  ;;  %v2830_v32 = vld [vmem:[#allocation2 + $0x1a1] sm:$0xff] }
 0x583   : > { %v3552_v25 = vpop.permute.xlu0 %3551 }
 0x584   : > { %v3554_v27 = vpop.permute.xlu1 %3553  ;;  %v4055_v31 = vsel %vm1859_vm7, %v4023_v62, %v3552_v25  ;;  %v3963_v62 = vsel %vm1760_vm4, %v3931_v12, %v12980_v0  ;;  %v7253_v12 = vld [vmem:[#allocation2 + $0xc8] sm:$0xff] }
 0x585   : > { %3843 = vrot.lane.b32.xlu0 %v2857_v50, %s7302_s17  ;;  %v4056_v11 = vsel %vm1859_vm7, %v4024_v4, %v3554_v27  ;;  %v12981_v4 = vld [vmem:[#allocation161_spill] sm:$0xff]  ;;  %v12998_v0 = vld [vmem:[#allocation158_spill] sm:$0xff] }
 0x586   : > { %3845 = vrot.lane.b32.xlu1 %v2858_v1, %s7302_s17  ;;  %v2862_v1 = vld [vmem:[#allocation2 + $0x1a2] sm:$0xff] }
 0x587   : > { %v3680_v21 = vpop.permute.xlu0 %3679 }
 0x588   : > { %v3682_v55 = vpop.permute.xlu1 %3681  ;;  %v4087_v5 = vsel %vm1892_vm8, %v4055_v31, %v3680_v21  ;;  %v3900_v21 = vsel %vm261_vm0, %v7249_v10, %v12977_v26  ;;  %v7252_v26 = vld [vmem:[#allocation2 + $0xc0] sm:$0xff] }
 0x589   : > { %3591 = vrot.lane.b32.xlu0 %v2795_v63, %s7300_s30  ;;  %v4088_v29 = vsel %vm1892_vm8, %v4056_v11, %v3682_v55  ;;  %v12979_v55 = vld [vmem:[#allocation156_spill] sm:$0xff]  ;;  %v12982_v11 = vld [vmem:[#allocation86_spill] sm:$0xff] }
 0x58a   : > { %3593 = vrot.lane.b32.xlu1 %v2796_v42, %s7300_s30  ;;  %v3932_v63 = vsel %vm1727_vm3, %v3900_v21, %v12979_v55  ;;  %v12996_v21 = vld [vmem:[#allocation5_spill] sm:$0xff]  ;;  %v12997_v55 = vld [vmem:[#allocation75_spill] sm:$0xff] }
 0x58b   : > { %v3808_v37 = vpop.permute.xlu0 %3807  ;;  %v3964_v31 = vsel %vm1760_vm4, %v3932_v63, %v12981_v4  ;;  %v3903_v45 = vsel %vm261_vm0, %v7252_v26, %v12996_v21  ;;  %v3904_v63 = vsel %vm261_vm0, %v7253_v12, %v12997_v55  ;;  %v7256_v55 = vld [vmem:[#allocation2 + $0xf0] sm:$0xff] }
 0x58c   : > { %v3810_v33 = vpop.permute.xlu1 %3809  ;;  %v4119_v16 = vsel %vm1925_vm9, %v4087_v5, %v3808_v37  ;;  %v3995_v5 = vsel %vm1793_vm5, %v3963_v62, %v12982_v11  ;;  %v3935_v62 = vsel %vm1727_vm3, %v3903_v45, %v12998_v0 }
 0x58d   : > { %v4120_v20 = vsel %vm1925_vm9, %v4088_v29, %v3810_v33  ;;  %3719 = vrot.lane.b32.xlu0 %v9943_v56, %s7301_s6  ;;  %7089 = vmatprep.mubr.msk.f32.mxu1 %vm1963_vm10, %v4119_v16  ;;  %v3898_v56 = vsel %vm261_vm0, %v7247_v24, %v12967_v15  ;;  %v12983_v29 = vld [vmem:[#allocation118_spill] sm:$0xff] }
 0x58e   : > { %3721 = vrot.lane.b32.xlu1 %v9945_v61, %s7301_s6  ;;  %7090 = vmatmul.mubr.msk.f32.gmra.mxu1 %vm1963_vm10, %v4120_v20  ;;  %v12968_v61 = vld [vmem:[#allocation28_spill] sm:$0xff]  ;;  %v3930_v18 = vsel %vm1727_vm3, %v3898_v56, %v12969_v8  ;;  %v3996_v33 = vsel %vm1793_vm5, %v3964_v31, %v12983_v29  ;;  %v12984_v16 = vld [vmem:[#allocation38_spill] sm:$0xff] }
 0x58f   : > { %v3556_v13 = vpop.permute.xlu0 %3555  ;;  %v4027_v20 = vsel %vm1826_vm6, %v3995_v5, %v12984_v16  ;;  %v13000_v31 = vld [vmem:[#allocation160_spill] sm:$0xff] }
 0x590   : > { %v3558_v57 = vpop.permute.xlu1 %3557  ;;  %v4057_v7 = vsel %vm1859_vm7, %v4025_v28, %v3556_v13  ;;  %v12985_v13 = vld [vmem:[#allocation166_spill] sm:$0xff]  ;;  %v3967_v11 = vsel %vm1760_vm4, %v3935_v62, %v13000_v31  ;;  %v7257_v62 = vld [vmem:[#allocation2 + $0xf8] sm:$0xff]  ;;  %v13018_v31 = vld [vmem:[#allocation79_spill] sm:$0xff] }
 0x591   : > { %3847 = vrot.lane.b32.xlu0 %v10083_v59, %s7302_s17  ;;  %v12971_v59 = vld [vmem:[#allocation103_spill] sm:$0xff]  ;;  %v12991_v28 = vld [vmem:[#allocation26_spill] sm:$0xff] }
 0x592   : > { %3849 = vrot.lane.b32.xlu1 %v12968_v61, %s7302_s17  ;;  %v3962_v47 = vsel %vm1760_vm4, %v3930_v18, %v12971_v59  ;;  %v7250_v18 = vld [vmem:[#allocation2 + $0xa8] sm:$0xff] }
 0x593   : > { %v3684_v14 = vpop.permute.xlu0 %3683  ;;  %v3994_v17 = vsel %vm1793_vm5, %v3962_v47, %v12973_v34  ;;  %v3901_v23 = vsel %vm261_vm0, %v7250_v18, %v12986_v39  ;;  %v12988_v47 = vld [vmem:[#allocation35_spill] sm:$0xff]  ;;  %v12990_v34 = vld [vmem:[#allocation102_spill] sm:$0xff] }
 0x594   : > { %v3686_v52 = vpop.permute.xlu1 %3685  ;;  %v4026_v38 = vsel %vm1826_vm6, %v3994_v17, %v12975_v6  ;;  %v4089_v41 = vsel %vm1892_vm8, %v4057_v7, %v3684_v14  ;;  %v7251_v14 = vld [vmem:[#allocation2 + $0xb0] sm:$0xff]  ;;  %v3933_v49 = vsel %vm1727_vm3, %v3901_v23, %v12988_v47 }
 0x595   : > { %3595 = vrot.lane.b32.xlu0 %v2797_v48, %s7300_s30  ;;  %v4058_v40 = vsel %vm1859_vm7, %v4026_v38, %v3558_v57  ;;  %v4028_v57 = vsel %vm1826_vm6, %v3996_v33, %v12985_v13  ;;  %v3965_v17 = vsel %vm1760_vm4, %v3933_v49, %v12990_v34  ;;  %v12992_v38 = vld [vmem:[#allocation142_spill] sm:$0xff]  ;;  %v13002_v33 = vld [vmem:[#allocation107_spill] sm:$0xff]  ;;  %v13003_v13 = vld [vmem:[#allocation141_spill] sm:$0xff] }
 0x596   : > { %3597 = vrot.lane.b32.xlu1 %v2798_v53, %s7300_s30  ;;  %v4090_v25 = vsel %vm1892_vm8, %v4058_v40, %v3686_v52  ;;  %v12987_v53 = vld [vmem:[#allocation152_spill] sm:$0xff]  ;;  %v3997_v7 = vsel %vm1793_vm5, %v3965_v17, %v12992_v38  ;;  %v12993_v40 = vld [vmem:[#allocation85_spill] sm:$0xff]  ;;  %v3999_v16 = vsel %vm1793_vm5, %v3967_v11, %v13002_v33 }
 0x597   : > { %v3812_v58 = vpop.permute.xlu0 %3811  ;;  %v3902_v59 = vsel %vm261_vm0, %v7251_v14, %v12987_v53  ;;  %v7254_v53 = vld [vmem:[#allocation2 + $0xd8] sm:$0xff]  ;;  %v7255_v49 = vld [vmem:[#allocation2 + $0xe0] sm:$0xff] }
 0x598   : > { %v3814_v27 = vpop.permute.xlu1 %3813  ;;  %v4121_v50 = vsel %vm1925_vm9, %v4089_v41, %v3812_v58  ;;  %v3934_v52 = vsel %vm1727_vm3, %v3902_v59, %v12989_v35  ;;  %v12994_v58 = vld [vmem:[#allocation55_spill] sm:$0xff]  ;;  %v13006_v59 = vld [vmem:[#allocation54_spill] sm:$0xff]  ;;  %v13007_v35 = vld [vmem:[#allocation77_spill] sm:$0xff] }
 0x599   : > { %v4122_v3 = vsel %vm1925_vm9, %v4090_v25, %v3814_v27  ;;  %3723 = vrot.lane.b32.xlu0 %v2829_v22, %s7301_s6  ;;  %7092 = vmatprep.mubr.msk.f32.mxu1 %vm1963_vm10, %v4121_v50  ;;  %v3966_v6 = vsel %vm1760_vm4, %v3934_v52, %v12991_v28  ;;  %v12995_v25 = vld [vmem:[#allocation36_spill] sm:$0xff]  ;;  %v3905_v47 = vsel %vm261_vm0, %v7254_v53, %v13006_v59 }
 0x59a   : > { %3725 = vrot.lane.b32.xlu1 %v2830_v32, %s7301_s6  ;;  %7093 = vmatmul.mubr.msk.f32.gmra.mxu1 %vm1963_vm10, %v4122_v3  ;;  %v3998_v41 = vsel %vm1793_vm5, %v3966_v6, %v12993_v40  ;;  %v4029_v32 = vsel %vm1826_vm6, %v3997_v7, %v12994_v58  ;;  %v3906_v52 = vsel %vm261_vm0, %v7255_v49, %v13007_v35  ;;  %v13008_v34 = vld [vmem:[#allocation80_spill] sm:$0xff]  ;;  %v7258_v35 = vld [vmem:[#allocation2 + $0x108] sm:$0xff] }
 0x59b   : > { %v3560_v46 = vpop.permute.xlu0 %3559  ;;  %v4030_v27 = vsel %vm1826_vm6, %v3998_v41, %v12995_v25  ;;  %v3937_v17 = vsel %vm1727_vm3, %v3905_v47, %v13008_v34  ;;  %v13010_v6 = vld [vmem:[#allocation24_spill] sm:$0xff]  ;;  %v13012_v41 = vld [vmem:[#allocation165_spill] sm:$0xff]  ;;  %v13013_v25 = vld [vmem:[#allocation106_spill] sm:$0xff] }
 0x59c   : > { %v3562_v51 = vpop.permute.xlu1 %3561  ;;  %v4059_v36 = vsel %vm1859_vm7, %v4027_v20, %v3560_v46  ;;  %v3969_v38 = vsel %vm1760_vm4, %v3937_v17, %v13010_v6  ;;  %v7259_v17 = vld [vmem:[#allocation2 + $0x110] sm:$0xff] }
 0x59d   : > { %3851 = vrot.lane.b32.xlu0 %v2861_v44, %s7302_s17  ;;  %v4060_v54 = vsel %vm1859_vm7, %v4028_v57, %v3562_v51  ;;  %v4001_v58 = vsel %vm1793_vm5, %v3969_v38, %v13012_v41  ;;  %v13028_v6 = vld [vmem:[#allocation159_spill] sm:$0xff] }
 0x59e   : > { %3853 = vrot.lane.b32.xlu1 %v2862_v1, %s7302_s17 }
 0x59f   : > { %v3688_v42 = vpop.permute.xlu0 %3687 }
 0x5a0   : > { %v3690_v37 = vpop.permute.xlu1 %3689  ;;  %v4091_v2 = vsel %vm1892_vm8, %v4059_v36, %v3688_v42  ;;  %v12999_v42 = vld [vmem:[#allocation33_spill] sm:$0xff]  ;;  %v13004_v36 = vld [vmem:[#allocation123_spill] sm:$0xff] }
 0x5a1   : > { %v4092_v15 = vsel %vm1892_vm8, %v4060_v54, %v3690_v37  ;;  %v3936_v4 = vsel %vm1727_vm3, %v3904_v63, %v12999_v42  ;;  %v13001_v37 = vld [vmem:[#allocation43_spill] sm:$0xff]  ;;  %v4031_v54 = vsel %vm1826_vm6, %v3999_v16, %v13004_v36  ;;  %v13017_v42 = vld [vmem:[#allocation96_spill] sm:$0xff] }
 0x5a2   : > { %v3968_v29 = vsel %vm1760_vm4, %v3936_v4, %v13001_v37  ;;  %v13016_v63 = vld [vmem:[#allocation131_spill] sm:$0xff]  ;;  %v3908_v4 = vsel %vm261_vm0, %v7257_v62, %v13017_v42  ;;  %v7260_v42 = vld [vmem:[#allocation2 + $0x120] sm:$0xff] }
 0x5a3   : > { %v3816_v24 = vpop.permute.xlu0 %3815  ;;  %v4000_v57 = vsel %vm1793_vm5, %v3968_v29, %v13003_v13  ;;  %v3907_v0 = vsel %vm261_vm0, %v7256_v55, %v13016_v63  ;;  %v13020_v29 = vld [vmem:[#allocation41_spill] sm:$0xff] }
 0x5a4   : > { %v3818_v56 = vpop.permute.xlu1 %3817  ;;  %v4123_v19 = vsel %vm1925_vm9, %v4091_v2, %v3816_v24  ;;  %v13005_v2 = vld [vmem:[#allocation53_spill] sm:$0xff]  ;;  %v3939_v11 = vsel %vm1727_vm3, %v3907_v0, %v13018_v31 }
 0x5a5   : > { %v4124_v61 = vsel %vm1925_vm9, %v4092_v15, %v3818_v56  ;;  %7095 = vmatprep.mubr.msk.f32.mxu1 %vm1963_vm10, %v4123_v19  ;;  %v4032_v24 = vsel %vm1826_vm6, %v4000_v57, %v13005_v2  ;;  %v3971_v33 = vsel %vm1760_vm4, %v3939_v11, %v13020_v29  ;;  %v13022_v57 = vld [vmem:[#allocation34_spill] sm:$0xff]  ;;  %v13023_v2 = vld [vmem:[#allocation164_spill] sm:$0xff] }
 0x5a6   : > { %7096 = vmatmul.mubr.msk.f32.gmra.mxu1 %vm1963_vm10, %v4124_v61  ;;  %v4003_v36 = vsel %vm1793_vm5, %v3971_v33, %v13022_v57  ;;  %v7261_v11 = vld [vmem:[#allocation2 + $0x128] sm:$0xff] }
 0x5a7   : > { %v3564_v48 = vpop.permute.xlu0 %3563  ;;  %v13038_v29 = vld [vmem:[#allocation22_spill] sm:$0xff] }
 0x5a8   : > { %v3566_v8 = vpop.permute.xlu1 %3565  ;;  %v4061_v50 = vsel %vm1859_vm7, %v4029_v32, %v3564_v48 }
 0x5a9   : > { %v4062_v3 = vsel %vm1859_vm7, %v4030_v27, %v3566_v8 }
 0x5ab   : > { %v3692_v9 = vpop.permute.xlu0 %3691 }
 0x5ac   : > { %v3694_v22 = vpop.permute.xlu1 %3693  ;;  %v4093_v44 = vsel %vm1892_vm8, %v4061_v50, %v3692_v9  ;;  %v13009_v9 = vld [vmem:[#allocation136_spill] sm:$0xff]  ;;  %v13014_v50 = vld [vmem:[#allocation90_spill] sm:$0xff] }
 0x5ad   : > { %v4094_v1 = vsel %vm1892_vm8, %v4062_v3, %v3694_v22  ;;  %v3938_v28 = vsel %vm1727_vm3, %v3906_v52, %v13009_v9  ;;  %v13011_v22 = vld [vmem:[#allocation117_spill] sm:$0xff]  ;;  %v4033_v3 = vsel %vm1826_vm6, %v4001_v58, %v13014_v50  ;;  %v13026_v52 = vld [vmem:[#allocation154_spill] sm:$0xff] }
 0x5ae   : > { %v3970_v40 = vsel %vm1760_vm4, %v3938_v28, %v13011_v22  ;;  %v3909_v34 = vsel %vm261_vm0, %v7258_v35, %v13026_v52  ;;  %v13027_v9 = vld [vmem:[#allocation98_spill] sm:$0xff] }
 0x5af   : > { %v3820_v46 = vpop.permute.xlu0 %3819  ;;  %v4002_v27 = vsel %vm1793_vm5, %v3970_v40, %v13013_v25  ;;  %v3910_v28 = vsel %vm261_vm0, %v7259_v17, %v13027_v9  ;;  %v3941_v38 = vsel %vm1727_vm3, %v3909_v34, %v13028_v6  ;;  %v13030_v40 = vld [vmem:[#allocation116_spill] sm:$0xff] }
 0x5b0   : > { %v3822_v51 = vpop.permute.xlu1 %3821  ;;  %v4125_v60 = vsel %vm1925_vm9, %v4093_v44, %v3820_v46  ;;  %v13015_v44 = vld [vmem:[#allocation122_spill] sm:$0xff]  ;;  %v3973_v41 = vsel %vm1760_vm4, %v3941_v38, %v13030_v40  ;;  %v7262_v9 = vld [vmem:[#allocation2 + $0x138] sm:$0xff]  ;;  %v7263_v38 = vld [vmem:[#allocation2 + $0x140] sm:$0xff] }
 0x5b1   : > { %v4126_v43 = vsel %vm1925_vm9, %v4094_v1, %v3822_v51  ;;  %7098 = vmatprep.mubr.msk.f32.mxu1 %vm1963_vm10, %v4125_v60  ;;  %v4034_v46 = vsel %vm1826_vm6, %v4002_v27, %v13015_v44  ;;  %v13032_v27 = vld [vmem:[#allocation51_spill] sm:$0xff]  ;;  %v13033_v44 = vld [vmem:[#allocation32_spill] sm:$0xff] }
 0x5b2   : > { %7099 = vmatmul.mubr.msk.f32.gmra.mxu1 %vm1963_vm10, %v4126_v43  ;;  %v4005_v50 = vsel %vm1793_vm5, %v3973_v41, %v13032_v27  ;;  %v13048_v40 = vld [vmem:[#allocation20_spill] sm:$0xff] }
 0x5b3   : > { %v3568_v30 = vpop.permute.xlu0 %3567 }
 0x5b4   : > { %v3570_v10 = vpop.permute.xlu1 %3569  ;;  %v4063_v15 = vsel %vm1859_vm7, %v4031_v54, %v3568_v30 }
 0x5b5   : > { %v4064_v56 = vsel %vm1859_vm7, %v4032_v24, %v3570_v10 }
 0x5b7   : > { %v3696_v5 = vpop.permute.xlu0 %3695 }
 0x5b8   : > { %v3698_v20 = vpop.permute.xlu1 %3697  ;;  %v4095_v19 = vsel %vm1892_vm8, %v4063_v15, %v3696_v5  ;;  %v13019_v5 = vld [vmem:[#allocation101_spill] sm:$0xff]  ;;  %v13024_v15 = vld [vmem:[#allocation146_spill] sm:$0xff] }
 0x5b9   : > { %v4096_v48 = vsel %vm1892_vm8, %v4064_v56, %v3698_v20  ;;  %v3940_v37 = vsel %vm1727_vm3, %v3908_v4, %v13019_v5  ;;  %v13021_v20 = vld [vmem:[#allocation84_spill] sm:$0xff]  ;;  %v4035_v56 = vsel %vm1826_vm6, %v4003_v36, %v13024_v15  ;;  %v13036_v4 = vld [vmem:[#allocation9_spill] sm:$0xff] }
 0x5ba   : > { %v3972_v13 = vsel %vm1760_vm4, %v3940_v37, %v13021_v20  ;;  %v3911_v31 = vsel %vm261_vm0, %v7260_v42, %v13036_v4  ;;  %v13037_v5 = vld [vmem:[#allocation60_spill] sm:$0xff] }
 0x5bb   : > { %v3824_v61 = vpop.permute.xlu0 %3823  ;;  %v4004_v24 = vsel %vm1793_vm5, %v3972_v13, %v13023_v2  ;;  %v3912_v37 = vsel %vm261_vm0, %v7261_v11, %v13037_v5  ;;  %v3943_v33 = vsel %vm1727_vm3, %v3911_v31, %v13038_v29  ;;  %v13040_v13 = vld [vmem:[#allocation83_spill] sm:$0xff] }
 0x5bc   : > { %v3826_v8 = vpop.permute.xlu1 %3825  ;;  %v4127_v18 = vsel %vm1925_vm9, %v4095_v19, %v3824_v61  ;;  %v13025_v19 = vld [vmem:[#allocation89_spill] sm:$0xff]  ;;  %v3975_v57 = vsel %vm1760_vm4, %v3943_v33, %v13040_v13  ;;  %v7264_v5 = vld [vmem:[#allocation2 + $0x150] sm:$0xff]  ;;  %v7265_v33 = vld [vmem:[#allocation2 + $0x158] sm:$0xff] }
 0x5bd   : > { %v4128_v39 = vsel %vm1925_vm9, %v4096_v48, %v3826_v8  ;;  %7101 = vmatprep.mubr.msk.f32.mxu1 %vm1963_vm10, %v4127_v18  ;;  %v4036_v61 = vsel %vm1826_vm6, %v4004_v24, %v13025_v19  ;;  %v13042_v24 = vld [vmem:[#allocation121_spill] sm:$0xff] }
 0x5be   : > { %7102 = vmatmul.mubr.msk.f32.gmra.mxu1 %vm1963_vm10, %v4128_v39  ;;  %v4007_v15 = vsel %vm1793_vm5, %v3975_v57, %v13042_v24  ;;  %v13043_v19 = vld [vmem:[#allocation49_spill] sm:$0xff] }
 0x5bf   : > { %v3572_v23 = vpop.permute.xlu0 %3571  ;;  %v13058_v13 = vld [vmem:[#allocation37_spill] sm:$0xff] }
 0x5c0   : > { %v3574_v14 = vpop.permute.xlu1 %3573  ;;  %v4065_v1 = vsel %vm1859_vm7, %v4033_v3, %v3572_v23 }
 0x5c1   : > { %v4066_v51 = vsel %vm1859_vm7, %v4034_v46, %v3574_v14 }
 0x5c3   : > { %v3700_v7 = vpop.permute.xlu0 %3699 }
 0x5c4   : > { %v3702_v32 = vpop.permute.xlu1 %3701  ;;  %v4097_v60 = vsel %vm1892_vm8, %v4065_v1, %v3700_v7  ;;  %v13029_v7 = vld [vmem:[#allocation100_spill] sm:$0xff]  ;;  %v13034_v1 = vld [vmem:[#allocation111_spill] sm:$0xff] }
 0x5c5   : > { %v4098_v30 = vsel %vm1892_vm8, %v4066_v51, %v3702_v32  ;;  %v3942_v22 = vsel %vm1727_vm3, %v3910_v28, %v13029_v7  ;;  %v13031_v32 = vld [vmem:[#allocation140_spill] sm:$0xff]  ;;  %v4037_v51 = vsel %vm1826_vm6, %v4005_v50, %v13034_v1  ;;  %v13046_v28 = vld [vmem:[#allocation78_spill] sm:$0xff]  ;;  %v13047_v7 = vld [vmem:[#allocation15_spill] sm:$0xff] }
 0x5c6   : > { %v3974_v25 = vsel %vm1760_vm4, %v3942_v22, %v13031_v32  ;;  %v3913_v6 = vsel %vm261_vm0, %v7262_v9, %v13046_v28  ;;  %v3914_v22 = vsel %vm261_vm0, %v7263_v38, %v13047_v7  ;;  %v7266_v7 = vld [vmem:[#allocation2 + $0x168] sm:$0xff] }
 0x5c7   : > { %v3828_v43 = vpop.permute.xlu0 %3827  ;;  %v4006_v46 = vsel %vm1793_vm5, %v3974_v25, %v13033_v44  ;;  %v3945_v41 = vsel %vm1727_vm3, %v3913_v6, %v13048_v40  ;;  %v13050_v25 = vld [vmem:[#allocation139_spill] sm:$0xff] }
 0x5c8   : > { %v3830_v10 = vpop.permute.xlu1 %3829  ;;  %v4129_v26 = vsel %vm1925_vm9, %v4097_v60, %v3828_v43  ;;  %v13035_v60 = vld [vmem:[#allocation145_spill] sm:$0xff]  ;;  %v3977_v27 = vsel %vm1760_vm4, %v3945_v41, %v13050_v25  ;;  %v7267_v41 = vld [vmem:[#allocation2 + $0x170] sm:$0xff] }
 0x5c9   : > { %v4130_v21 = vsel %vm1925_vm9, %v4098_v30, %v3830_v10  ;;  %7104 = vmatprep.mubr.msk.f32.mxu1 %vm1963_vm10, %v4129_v26  ;;  %v4038_v43 = vsel %vm1826_vm6, %v4006_v46, %v13035_v60  ;;  %v13052_v46 = vld [vmem:[#allocation88_spill] sm:$0xff]  ;;  %v13068_v25 = vld [vmem:[#allocation67_spill] sm:$0xff] }
 0x5ca   : > { %7105 = vmatmul.mubr.msk.f32.gmra.mxu1 %vm1963_vm10, %v4130_v21  ;;  %v4009_v1 = vsel %vm1793_vm5, %v3977_v27, %v13052_v46  ;;  %v13053_v60 = vld [vmem:[#allocation120_spill] sm:$0xff] }
 0x5cb   : > { %v3576_v45 = vpop.permute.xlu0 %3575 }
 0x5cc   : > { %v3578_v12 = vpop.permute.xlu1 %3577  ;;  %v4067_v48 = vsel %vm1859_vm7, %v4035_v56, %v3576_v45 }
 0x5cd   : > { %v4068_v8 = vsel %vm1859_vm7, %v4036_v61, %v3578_v12 }
 0x5cf   : > { %v3704_v16 = vpop.permute.xlu0 %3703 }
 0x5d0   : > { %v3706_v54 = vpop.permute.xlu1 %3705  ;;  %v4099_v18 = vsel %vm1892_vm8, %v4067_v48, %v3704_v16  ;;  %v13039_v16 = vld [vmem:[#allocation39_spill] sm:$0xff]  ;;  %v13044_v48 = vld [vmem:[#allocation169_spill] sm:$0xff] }
 0x5d1   : > { %v4100_v23 = vsel %vm1892_vm8, %v4068_v8, %v3706_v54  ;;  %v3944_v20 = vsel %vm1727_vm3, %v3912_v37, %v13039_v16  ;;  %v13041_v54 = vld [vmem:[#allocation105_spill] sm:$0xff]  ;;  %v4039_v8 = vsel %vm1826_vm6, %v4007_v15, %v13044_v48  ;;  %v13056_v37 = vld [vmem:[#allocation58_spill] sm:$0xff] }
 0x5d2   : > { %v3976_v2 = vsel %vm1760_vm4, %v3944_v20, %v13041_v54  ;;  %v3915_v29 = vsel %vm261_vm0, %v7264_v5, %v13056_v37  ;;  %v13057_v16 = vld [vmem:[#allocation134_spill] sm:$0xff] }
 0x5d3   : > { %v3832_v39 = vpop.permute.xlu0 %3831  ;;  %v4008_v61 = vsel %vm1793_vm5, %v3976_v2, %v13043_v19  ;;  %v3916_v20 = vsel %vm261_vm0, %v7265_v33, %v13057_v16  ;;  %v3947_v57 = vsel %vm1727_vm3, %v3915_v29, %v13058_v13  ;;  %v13060_v2 = vld [vmem:[#allocation104_spill] sm:$0xff] }
 0x5d4   : > { %v3834_v14 = vpop.permute.xlu1 %3833  ;;  %v4131_v53 = vsel %vm1925_vm9, %v4099_v18, %v3832_v39  ;;  %v13045_v18 = vld [vmem:[#allocation110_spill] sm:$0xff]  ;;  %v3979_v24 = vsel %vm1760_vm4, %v3947_v57, %v13060_v2 }
 0x5d5   : > { %v4132_v59 = vsel %vm1925_vm9, %v4100_v23, %v3834_v14  ;;  %7107 = vmatprep.mubr.msk.f32.mxu1 %vm1963_vm10, %v4131_v53  ;;  %v4040_v39 = vsel %vm1826_vm6, %v4008_v61, %v13045_v18  ;;  %v13062_v61 = vld [vmem:[#allocation144_spill] sm:$0xff]  ;;  %v13063_v18 = vld [vmem:[#allocation87_spill] sm:$0xff] }
 0x5d6   : > { %7108 = vmatmul.mubr.msk.f32.gmra.mxu1 %vm1963_vm10, %v4132_v59  ;;  %v4011_v48 = vsel %vm1793_vm5, %v3979_v24, %v13062_v61 }
 0x5d7   : > { %v3580_v47 = vpop.permute.xlu0 %3579 }
 0x5d8   : > { %v3582_v49 = vpop.permute.xlu1 %3581  ;;  %v4069_v30 = vsel %vm1859_vm7, %v4037_v51, %v3580_v47 }
 0x5d9   : > { %v4070_v10 = vsel %vm1859_vm7, %v4038_v43, %v3582_v49 }
 0x5db   : > { %v3708_v58 = vpop.permute.xlu0 %3707 }
 0x5dc   : > { %v3710_v3 = vpop.permute.xlu1 %3709  ;;  %v4101_v26 = vsel %vm1892_vm8, %v4069_v30, %v3708_v58  ;;  %v13049_v58 = vld [vmem:[#allocation115_spill] sm:$0xff]  ;;  %v13054_v30 = vld [vmem:[#allocation42_spill] sm:$0xff] }
 0x5dd   : > { %v4102_v45 = vsel %vm1892_vm8, %v4070_v10, %v3710_v3  ;;  %v3946_v32 = vsel %vm1727_vm3, %v3914_v22, %v13049_v58  ;;  %v13051_v3 = vld [vmem:[#allocation163_spill] sm:$0xff]  ;;  %v4041_v10 = vsel %vm1826_vm6, %v4009_v1, %v13054_v30  ;;  %v13067_v58 = vld [vmem:[#allocation62_spill] sm:$0xff] }
 0x5de   : > { %v3978_v44 = vsel %vm1760_vm4, %v3946_v32, %v13051_v3  ;;  %v13066_v22 = vld [vmem:[#allocation99_spill] sm:$0xff]  ;;  %v3918_v32 = vsel %vm261_vm0, %v7267_v41, %v13067_v58 }
 0x5df   : > { %v3836_v21 = vpop.permute.xlu0 %3835  ;;  %v4010_v43 = vsel %vm1793_vm5, %v3978_v44, %v13053_v60  ;;  %v3917_v40 = vsel %vm261_vm0, %v7266_v7, %v13066_v22  ;;  %v13070_v44 = vld [vmem:[#allocation162_spill] sm:$0xff] }
 0x5e0   : > { %v3838_v12 = vpop.permute.xlu1 %3837  ;;  %v4133_v55 = vsel %vm1925_vm9, %v4101_v26, %v3836_v21  ;;  %v13055_v26 = vld [vmem:[#allocation168_spill] sm:$0xff]  ;;  %v3949_v27 = vsel %vm1727_vm3, %v3917_v40, %v13068_v25  ;;  %v4790_v40 = vld [vmem:[#allocation2 + $0x9] sm:$0xff] }
 0x5e1   : > { %v4134_v63 = vsel %vm1925_vm9, %v4102_v45, %v3838_v12  ;;  %7110 = vmatprep.mubr.msk.f32.mxu1 %vm1963_vm10, %v4133_v55  ;;  %v4042_v21 = vsel %vm1826_vm6, %v4010_v43, %v13055_v26  ;;  %v3981_v46 = vsel %vm1760_vm4, %v3949_v27, %v13070_v44  ;;  %v13072_v43 = vld [vmem:[#allocation109_spill] sm:$0xff]  ;;  %v13073_v26 = vld [vmem:[#allocation143_spill] sm:$0xff]  ;;  %5079 = vrot.lane.b32.xlu1 %v4790_v40, %s7295_s25 }
 0x5e2   : > { %7111 = vmatmul.mubr.msk.f32.gmra.mxu1 %vm1963_vm10, %v4134_v63  ;;  %v4013_v30 = vsel %vm1793_vm5, %v3981_v46, %v13072_v43 }
 0x5e3   : > { %v3584_v0 = vpop.permute.xlu0 %3583 }
 0x5e4   : > { %v3586_v62 = vpop.permute.xlu1 %3585  ;;  %v4071_v23 = vsel %vm1859_vm7, %v4039_v8, %v3584_v0 }
 0x5e5   : > { %v4072_v14 = vsel %vm1859_vm7, %v4040_v39, %v3586_v62 }
 0x5e7   : > { %v3712_v36 = vpop.permute.xlu0 %3711 }
 0x5e8   : > { %v3714_v56 = vpop.permute.xlu1 %3713  ;;  %v4103_v53 = vsel %vm1892_vm8, %v4071_v23, %v3712_v36  ;;  %v13059_v36 = vld [vmem:[#allocation82_spill] sm:$0xff]  ;;  %v13064_v23 = vld [vmem:[#allocation59_spill] sm:$0xff] }
 0x5e9   : > { %v4104_v47 = vsel %vm1892_vm8, %v4072_v14, %v3714_v56  ;;  %v3948_v54 = vsel %vm1727_vm3, %v3916_v20, %v13059_v36  ;;  %v13061_v56 = vld [vmem:[#allocation30_spill] sm:$0xff]  ;;  %v4043_v14 = vsel %vm1826_vm6, %v4011_v48, %v13064_v23 }
 0x5ea   : > { %v3980_v19 = vsel %vm1760_vm4, %v3948_v54, %v13061_v56 }
 0x5eb   : > { %v3840_v59 = vpop.permute.xlu0 %3839  ;;  %v4012_v39 = vsel %vm1793_vm5, %v3980_v19, %v13063_v18 }
 0x5ec   : > { %v3842_v49 = vpop.permute.xlu1 %3841  ;;  %v4135_v35 = vsel %vm1925_vm9, %v4103_v53, %v3840_v59  ;;  %v13065_v53 = vld [vmem:[#allocation40_spill] sm:$0xff] }
 0x5ed   : > { %v4136_v52 = vsel %vm1925_vm9, %v4104_v47, %v3842_v49  ;;  %7113 = vmatprep.mubr.msk.f32.mxu1 %vm1963_vm10, %v4135_v35  ;;  %v4044_v59 = vsel %vm1826_vm6, %v4012_v39, %v13065_v53 }
 0x5ee   : > { %7114 = vmatmul.mubr.msk.f32.gmra.mxu1 %vm1963_vm10, %v4136_v52 }
 0x5ef   : > { %v3588_v34 = vpop.permute.xlu0 %3587 }
 0x5f0   : > { %v3590_v17 = vpop.permute.xlu1 %3589  ;;  %v4073_v45 = vsel %vm1859_vm7, %v4041_v10, %v3588_v34 }
 0x5f1   : > { %v4074_v12 = vsel %vm1859_vm7, %v4042_v21, %v3590_v17 }
 0x5f3   : > { %v3716_v50 = vpop.permute.xlu0 %3715 }
 0x5f4   : > { %v3718_v51 = vpop.permute.xlu1 %3717  ;;  %v4105_v55 = vsel %vm1892_vm8, %v4073_v45, %v3716_v50  ;;  %v13069_v50 = vld [vmem:[#allocation138_spill] sm:$0xff]  ;;  %v13074_v45 = vld [vmem:[#allocation125_spill] sm:$0xff] }
 0x5f5   : > { %v4106_v0 = vsel %vm1892_vm8, %v4074_v12, %v3718_v51  ;;  %v3950_v3 = vsel %vm1727_vm3, %v3918_v32, %v13069_v50  ;;  %v13071_v51 = vld [vmem:[#allocation47_spill] sm:$0xff]  ;;  %v4045_v12 = vsel %vm1826_vm6, %v4013_v30, %v13074_v45 }
 0x5f6   : > { %v3982_v60 = vsel %vm1760_vm4, %v3950_v3, %v13071_v51 }
 0x5f7   : > { %v3844_v63 = vpop.permute.xlu0 %3843  ;;  %v4014_v21 = vsel %vm1793_vm5, %v3982_v60, %v13073_v26 }
 0x5f8   : > { %v3846_v62 = vpop.permute.xlu1 %3845  ;;  %v4137_v42 = vsel %vm1925_vm9, %v4105_v55, %v3844_v63  ;;  %v13075_v55 = vld [vmem:[#allocation57_spill] sm:$0xff] }
 0x5f9   : > { %v4138_v4 = vsel %vm1925_vm9, %v4106_v0, %v3846_v62  ;;  %7116 = vmatprep.mubr.msk.f32.mxu1 %vm1963_vm10, %v4137_v42  ;;  %v4046_v63 = vsel %vm1826_vm6, %v4014_v21, %v13075_v55  ;;  %v4789_v21 = vld [vmem:[#allocation2 + $0x1] sm:$0xff] }
 0x5fa   : > { %7117 = vmatmul.mubr.msk.f32.gmra.mxu1 %vm1963_vm10, %v4138_v4  ;;  %5077 = vrot.lane.b32.xlu0 %v4789_v21, %s7295_s25 }
 0x5fb   : > { %v3592_v31 = vpop.permute.xlu0 %3591 }
 0x5fc   : > { %v3594_v11 = vpop.permute.xlu1 %3593  ;;  %v4075_v47 = vsel %vm1859_vm7, %v4043_v14, %v3592_v31 }
 0x5fd   : > { %v4076_v49 = vsel %vm1859_vm7, %v4044_v59, %v3594_v11 }
 0x5ff   : > { %v3720_v15 = vpop.permute.xlu0 %3719 }
 0x600   : > { %v3722_v8 = vpop.permute.xlu1 %3721  ;;  %v4107_v35 = vsel %vm1892_vm8, %v4075_v47, %v3720_v15 }
 0x601   : > { %v4108_v34 = vsel %vm1892_vm8, %v4076_v49, %v3722_v8 }
 0x603   : > { %v3848_v52 = vpop.permute.xlu0 %3847 }
 0x604   : > { %v3850_v17 = vpop.permute.xlu1 %3849  ;;  %v4139_v9 = vsel %vm1925_vm9, %v4107_v35, %v3848_v52 }
 0x605   : > { %v4140_v28 = vsel %vm1925_vm9, %v4108_v34, %v3850_v17  ;;  %7119 = vmatprep.mubr.msk.f32.mxu1 %vm1963_vm10, %v4139_v9 }
 0x606   : > { %7120 = vmatmul.mubr.msk.f32.gmra.mxu1 %vm1963_vm10, %v4140_v28 }
 0x607   : > { %v3596_v6 = vpop.permute.xlu0 %3595 }
 0x608   : > { %v3598_v38 = vpop.permute.xlu1 %3597  ;;  %v4077_v0 = vsel %vm1859_vm7, %v4045_v12, %v3596_v6 }
 0x609   : > { %v4078_v62 = vsel %vm1859_vm7, %v4046_v63, %v3598_v38 }
 0x60b   : > { %v3724_v1 = vpop.permute.xlu0 %3723 }
 0x60c   : > { %v3726_v10 = vpop.permute.xlu1 %3725  ;;  %v4109_v42 = vsel %vm1892_vm8, %v4077_v0, %v3724_v1 }
 0x60d   : > { %v4110_v31 = vsel %vm1892_vm8, %v4078_v62, %v3726_v10 }
 0x60f   : > { %v3852_v4 = vpop.permute.xlu0 %3851 }
 0x610   : > { %v3854_v11 = vpop.permute.xlu1 %3853  ;;  %v4141_v5 = vsel %vm1925_vm9, %v4109_v42, %v3852_v4 }
 0x611   : > { %v4142_v37 = vsel %vm1925_vm9, %v4110_v31, %v3854_v11  ;;  %7122 = vmatprep.mubr.msk.f32.mxu1 %vm1963_vm10, %v4141_v5 }
 0x612   : > { %7123 = vmatmul.mubr.msk.f32.gmra.mxu1 %vm1963_vm10, %v4142_v37 }
 0x622   : > { %v10786_v29 = vpop.f32.mrf.mxu1 }
 0x623   : > { %v4544_v36 = vmul.f32 %v10786_v29, %v10786_v29  ;;  %v4474_v24 = vsel %vm261_vm0, %v10786_v29, 0.0 }
 0x624   : > { %v10788_v33 = vpop.f32.mrf.mxu1 }
 0x625   : > { %v4543_v13 = vmul.f32 %v10788_v33, %v10788_v33  ;;  %v4473_v54 = vsel %vm261_vm0, %v10788_v33, 0.0  ;;  %v4576_v48 = vsel %vm261_vm0, %v4544_v36, 0.0 }
 0x626   : > { %v4475_v19 = vadd.f32 %v4474_v24, %v4473_v54 }
 0x627   : > { %v4575_v15 = vsel %vm261_vm0, %v4543_v13, 0.0 }
 0x628   : > { %v4577_v18 = vadd.f32 %v4576_v48, %v4575_v15 }
 0x62a   : > { %v10790_v16 = vpop.f32.mrf.mxu1 }
 0x62b   : > { %v4546_v14 = vmul.f32 %v10790_v16, %v10790_v16  ;;  %v4478_v47 = vsel %vm261_vm0, %v10790_v16, 0.0 }
 0x62c   : > { %v10792_v20 = vpop.f32.mrf.mxu1 }
 0x62d   : > { %v4545_v2 = vmul.f32 %v10792_v20, %v10792_v20  ;;  %v4476_v56 = vsel %vm261_vm0, %v10792_v20, 0.0  ;;  %v4580_v34 = vsel %vm261_vm0, %v4546_v14, 0.0 }
 0x62e   : > { %v4477_v39 = vadd.f32 %v4476_v56, %v4475_v19 }
 0x62f   : > { %v4578_v8 = vsel %vm261_vm0, %v4545_v2, 0.0 }
 0x630   : > { %v4579_v59 = vadd.f32 %v4578_v8, %v4577_v18  ;;  %v4479_v35 = vadd.f32 %v4478_v47, %v4477_v39 }
 0x632   : > { %v4581_v28 = vadd.f32 %v4580_v34, %v4579_v59 }
 0x636   : > { %v10796_v57 = vpop.f32.mrf.mxu1 }
 0x637   : > { %v4548_v38 = vmul.f32 %v10796_v57, %v10796_v57  ;;  %v4482_v41 = vsel %vm261_vm0, %v10796_v57, 0.0 }
 0x638   : > { %v10809_v61 = vpop.f32.mrf.mxu1 }
 0x639   : > { %v4547_v53 = vmul.f32 %v10809_v61, %v10809_v61  ;;  %v4480_v49 = vsel %vm261_vm0, %v10809_v61, 0.0  ;;  %v4584_v27 = vsel %vm261_vm0, %v4548_v38, 0.0 }
 0x63a   : > { %v4481_v9 = vadd.f32 %v4480_v49, %v4479_v35 }
 0x63b   : > { %v4582_v17 = vsel %vm261_vm0, %v4547_v53, 0.0 }
 0x63c   : > { %v4583_v22 = vadd.f32 %v4582_v17, %v4581_v28  ;;  %v4483_v32 = vadd.f32 %v4482_v41, %v4481_v9 }
 0x63e   : > { %v4585_v44 = vadd.f32 %v4584_v27, %v4583_v22 }
 0x642   : > { %v10813_v23 = vpop.f32.mrf.mxu1 }
 0x643   : > { %v4550_v1 = vmul.f32 %v10813_v23, %v10813_v23  ;;  %v4486_v43 = vsel %vm261_vm0, %v10813_v23, 0.0 }
 0x644   : > { %v10823_v52 = vpop.f32.mrf.mxu1 }
 0x645   : > { %v4549_v7 = vmul.f32 %v10823_v52, %v10823_v52  ;;  %v4484_v58 = vsel %vm261_vm0, %v10823_v52, 0.0  ;;  %v4588_v45 = vsel %vm261_vm0, %v4550_v1, 0.0 }
 0x646   : > { %v4485_v3 = vadd.f32 %v4484_v58, %v4483_v32 }
 0x647   : > { %v4586_v50 = vsel %vm261_vm0, %v4549_v7, 0.0 }
 0x648   : > { %v4587_v60 = vadd.f32 %v4586_v50, %v4585_v44  ;;  %v4487_v10 = vadd.f32 %v4486_v43, %v4485_v3 }
 0x64a   : > { %v4589_v63 = vadd.f32 %v4588_v45, %v4587_v60 }
 0x64e   : > { %v10827_v6 = vpop.f32.mrf.mxu1 }
 0x64f   : > { %v4552_v62 = vmul.f32 %v10827_v6, %v10827_v6  ;;  %v4490_v31 = vsel %vm261_vm0, %v10827_v6, 0.0 }
 0x650   : > { %v10838_v25 = vpop.f32.mrf.mxu1 }
 0x651   : > { %v4551_v51 = vmul.f32 %v10838_v25, %v10838_v25  ;;  %v4488_v30 = vsel %vm261_vm0, %v10838_v25, 0.0  ;;  %v4592_v13 = vsel %vm261_vm0, %v4552_v62, 0.0 }
 0x652   : > { %v4489_v55 = vadd.f32 %v4488_v30, %v4487_v10 }
 0x653   : > { %v4590_v12 = vsel %vm261_vm0, %v4551_v51, 0.0 }
 0x654   : > { %v4591_v4 = vadd.f32 %v4590_v12, %v4589_v63  ;;  %v4491_v5 = vadd.f32 %v4490_v31, %v4489_v55 }
 0x656   : > { %v4593_v2 = vadd.f32 %v4592_v13, %v4591_v4 }
 0x65a   : > { %v10842_v46 = vpop.f32.mrf.mxu1 }
 0x65b   : > { %v4554_v15 = vmul.f32 %v10842_v46, %v10842_v46  ;;  %v4494_v48 = vsel %vm261_vm0, %v10842_v46, 0.0 }
 0x65c   : > { %v10852_v26 = vpop.f32.mrf.mxu1 }
 0x65d   : > { %v4553_v42 = vmul.f32 %v10852_v26, %v10852_v26  ;;  %v4492_v11 = vsel %vm261_vm0, %v10852_v26, 0.0  ;;  %v4596_v14 = vsel %vm261_vm0, %v4554_v15, 0.0 }
 0x65e   : > { %v4493_v54 = vadd.f32 %v4492_v11, %v4491_v5 }
 0x65f   : > { %v4594_v36 = vsel %vm261_vm0, %v4553_v42, 0.0 }
 0x660   : > { %v4595_v19 = vadd.f32 %v4594_v36, %v4593_v2  ;;  %v4495_v18 = vadd.f32 %v4494_v48, %v4493_v54 }
 0x662   : > { %v4597_v47 = vadd.f32 %v4596_v14, %v4595_v19 }
 0x666   : > { %v10857_v0 = vpop.f32.mrf.mxu1 }
 0x667   : > { %v4556_v35 = vmul.f32 %v10857_v0, %v10857_v0  ;;  %v4498_v9 = vsel %vm261_vm0, %v10857_v0, 0.0 }
 0x668   : > { %v10867_v37 = vpop.f32.mrf.mxu1 }
 0x669   : > { %v4555_v56 = vmul.f32 %v10867_v37, %v10867_v37  ;;  %v4496_v8 = vsel %vm261_vm0, %v10867_v37, 0.0  ;;  %v4600_v22 = vsel %vm261_vm0, %v4556_v35, 0.0 }
 0x66a   : > { %v4497_v59 = vadd.f32 %v4496_v8, %v4495_v18 }
 0x66b   : > { %v4598_v53 = vsel %vm261_vm0, %v4555_v56, 0.0 }
 0x66c   : > { %v4599_v17 = vadd.f32 %v4598_v53, %v4597_v47  ;;  %v4499_v38 = vadd.f32 %v4498_v9, %v4497_v59 }
 0x66e   : > { %v4601_v58 = vadd.f32 %v4600_v22, %v4599_v17 }
 0x672   : > { %v10871_v24 = vpop.f32.mrf.mxu1 }
 0x673   : > { %v4558_v27 = vmul.f32 %v10871_v24, %v10871_v24  ;;  %v4502_v44 = vsel %vm261_vm0, %v10871_v24, 0.0 }
 0x674   : > { %v10881_v39 = vpop.f32.mrf.mxu1 }
 0x675   : > { %v4557_v34 = vmul.f32 %v10881_v39, %v10881_v39  ;;  %v4500_v28 = vsel %vm261_vm0, %v10881_v39, 0.0  ;;  %v4604_v43 = vsel %vm261_vm0, %v4558_v27, 0.0 }
 0x676   : > { %v4501_v41 = vadd.f32 %v4500_v28, %v4499_v38 }
 0x677   : > { %v4602_v40 = vsel %vm261_vm0, %v4557_v34, 0.0 }
 0x678   : > { %v4603_v3 = vadd.f32 %v4602_v40, %v4601_v58  ;;  %v4503_v51 = vadd.f32 %v4502_v44, %v4501_v41 }
 0x67a   : > { %v4605_v21 = vadd.f32 %v4604_v43, %v4603_v3 }
 0x67e   : > { %v10885_v49 = vpop.f32.mrf.mxu1 }
 0x67f   : > { %v4560_v12 = vmul.f32 %v10885_v49, %v10885_v49  ;;  %v4506_v62 = vsel %vm261_vm0, %v10885_v49, 0.0 }
 0x680   : > { %v10895_v7 = vpop.f32.mrf.mxu1 }
 0x681   : > { %v4559_v50 = vmul.f32 %v10895_v7, %v10895_v7  ;;  %v4504_v1 = vsel %vm261_vm0, %v10895_v7, 0.0  ;;  %v4608_v11 = vsel %vm261_vm0, %v4560_v12, 0.0 }
 0x682   : > { %v4505_v10 = vadd.f32 %v4504_v1, %v4503_v51 }
 0x683   : > { %v4606_v30 = vsel %vm261_vm0, %v4559_v50, 0.0 }
 0x684   : > { %v4607_v63 = vadd.f32 %v4606_v30, %v4605_v21  ;;  %v4507_v4 = vadd.f32 %v4506_v62, %v4505_v10 }
 0x686   : > { %v4609_v36 = vadd.f32 %v4608_v11, %v4607_v63 }
 0x68a   : > { %v10899_v32 = vpop.f32.mrf.mxu1 }
 0x68b   : > { %v4562_v2 = vmul.f32 %v10899_v32, %v10899_v32  ;;  %v4510_v19 = vsel %vm261_vm0, %v10899_v32, 0.0 }
 0x68c   : > { %v10909_v60 = vpop.f32.mrf.mxu1 }
 0x68d   : > { %v4561_v55 = vmul.f32 %v10909_v60, %v10909_v60  ;;  %v4508_v42 = vsel %vm261_vm0, %v10909_v60, 0.0  ;;  %v4612_v14 = vsel %vm261_vm0, %v4562_v2, 0.0 }
 0x68e   : > { %v4509_v13 = vadd.f32 %v4508_v42, %v4507_v4 }
 0x68f   : > { %v4610_v5 = vsel %vm261_vm0, %v4561_v55, 0.0 }
 0x690   : > { %v4611_v56 = vadd.f32 %v4610_v5, %v4609_v36  ;;  %v4511_v8 = vadd.f32 %v4510_v19, %v4509_v13 }
 0x692   : > { %v4613_v47 = vadd.f32 %v4612_v14, %v4611_v56 }
 0x696   : > { %v10913_v45 = vpop.f32.mrf.mxu1 }
 0x697   : > { %v4564_v34 = vmul.f32 %v10913_v45, %v10913_v45  ;;  %v4514_v28 = vsel %vm261_vm0, %v10913_v45, 0.0 }
 0x698   : > { %v10923_v31 = vpop.f32.mrf.mxu1 }
 0x699   : > { %v4563_v15 = vmul.f32 %v10923_v31, %v10923_v31  ;;  %v4512_v48 = vsel %vm261_vm0, %v10923_v31, 0.0  ;;  %v4616_v41 = vsel %vm261_vm0, %v4564_v34, 0.0 }
 0x69a   : > { %v4513_v59 = vadd.f32 %v4512_v48, %v4511_v8 }
 0x69b   : > { %v4614_v53 = vsel %vm261_vm0, %v4563_v15, 0.0 }
 0x69c   : > { %v4615_v9 = vadd.f32 %v4614_v53, %v4613_v47  ;;  %v4515_v22 = vadd.f32 %v4514_v28, %v4513_v59 }
 0x69e   : > { %v4617_v50 = vadd.f32 %v4616_v41, %v4615_v9 }
 0x6a2   : > { %v10927_v54 = vpop.f32.mrf.mxu1 }
 0x6a3   : > { %v4566_v44 = vmul.f32 %v10927_v54, %v10927_v54  ;;  %v4518_v43 = vsel %vm261_vm0, %v10927_v54, 0.0 }
 0x6a4   : > { %v10937_v18 = vpop.f32.mrf.mxu1 }
 0x6a5   : > { %v4565_v17 = vmul.f32 %v10937_v18, %v10937_v18  ;;  %v4516_v38 = vsel %vm261_vm0, %v10937_v18, 0.0  ;;  %v4620_v12 = vsel %vm261_vm0, %v4566_v44, 0.0 }
 0x6a6   : > { %v4517_v27 = vadd.f32 %v4516_v38, %v4515_v22 }
 0x6a7   : > { %v4618_v58 = vsel %vm261_vm0, %v4565_v17, 0.0 }
 0x6a8   : > { %v4619_v51 = vadd.f32 %v4618_v58, %v4617_v50  ;;  %v4519_v10 = vadd.f32 %v4518_v43, %v4517_v27 }
 0x6aa   : > { %v4621_v62 = vadd.f32 %v4620_v12, %v4619_v51 }
 0x6ae   : > { %v10941_v35 = vpop.f32.mrf.mxu1 }
 0x6af   : > { %v4568_v42 = vmul.f32 %v10941_v35, %v10941_v35  ;;  %v4522_v13 = vsel %vm261_vm0, %v10941_v35, 0.0 }
 0x6b0   : > { %v10951_v40 = vpop.f32.mrf.mxu1 }
 0x6b1   : > { %v4567_v1 = vmul.f32 %v10951_v40, %v10951_v40  ;;  %v4520_v30 = vsel %vm261_vm0, %v10951_v40, 0.0  ;;  %v4624_v56 = vsel %vm261_vm0, %v4568_v42, 0.0 }
 0x6b2   : > { %v4521_v63 = vadd.f32 %v4520_v30, %v4519_v10 }
 0x6b3   : > { %v4622_v55 = vsel %vm261_vm0, %v4567_v1, 0.0 }
 0x6b4   : > { %v4623_v11 = vadd.f32 %v4622_v55, %v4621_v62  ;;  %v4523_v2 = vadd.f32 %v4522_v13, %v4521_v63 }
 0x6b6   : > { %v4625_v8 = vadd.f32 %v4624_v56, %v4623_v11 }
 0x6ba   : > { %v10955_v3 = vpop.f32.mrf.mxu1 }
 0x6bb   : > { %v4570_v14 = vmul.f32 %v10955_v3, %v10955_v3  ;;  %v4526_v47 = vsel %vm261_vm0, %v10955_v3, 0.0 }
 0x6bc   : > { %v10965_v21 = vpop.f32.mrf.mxu1 }
 0x6bd   : > { %v4569_v4 = vmul.f32 %v10965_v21, %v10965_v21  ;;  %v4524_v36 = vsel %vm261_vm0, %v10965_v21, 0.0  ;;  %v4628_v9 = vsel %vm261_vm0, %v4570_v14, 0.0 }
 0x6be   : > { %v4525_v48 = vadd.f32 %v4524_v36, %v4523_v2 }
 0x6bf   : > { %v4626_v19 = vsel %vm261_vm0, %v4569_v4, 0.0 }
 0x6c0   : > { %v4627_v59 = vadd.f32 %v4626_v19, %v4625_v8  ;;  %v4527_v17 = vadd.f32 %v4526_v47, %v4525_v48 }
 0x6c2   : > { %v4629_v22 = vadd.f32 %v4628_v9, %v4627_v59 }
 0x6c6   : > { %v10973_v5 = vpop.f32.mrf.mxu1 }
 0x6c7   : > { %v4572_v41 = vmul.f32 %v10973_v5, %v10973_v5  ;;  %v4530_v50 = vsel %vm261_vm0, %v10973_v5, 0.0 }
 0x6c8   : > { %v10979_v15 = vpop.f32.mrf.mxu1 }
 0x6c9   : > { %v4571_v53 = vmul.f32 %v10979_v15, %v10979_v15  ;;  %v4528_v34 = vsel %vm261_vm0, %v10979_v15, 0.0  ;;  %v4632_v51 = vsel %vm261_vm0, %v4572_v41, 0.0 }
 0x6ca   : > { %v4529_v38 = vadd.f32 %v4528_v34, %v4527_v17 }
 0x6cb   : > { %v4630_v28 = vsel %vm261_vm0, %v4571_v53, 0.0 }
 0x6cc   : > { %v4631_v58 = vadd.f32 %v4630_v28, %v4629_v22  ;;  %v4531_v1 = vadd.f32 %v4530_v50, %v4529_v38  ;;  %v13076_v50 = vld [vmem:[#allocation4_spill] sm:$0xff] }
 0x6ce   : > { %v4633_v55 = vadd.f32 %v4632_v51, %v4631_v58 }
 0x6d2   : > { %v10995_v27 = vpop.f32.mrf.mxu1 }
 0x6d3   : > { %v4574_v43 = vmul.f32 %v10995_v27, %v10995_v27  ;;  %v4534_v63 = vsel %vm261_vm0, %v10995_v27, 0.0 }
 0x6d4   : > { %v4464_v44 = vpop.f32.mrf.mxu1 }
 0x6d5   : > { %v4532_v30 = vsel %vm261_vm0, %v4464_v44, 0.0  ;;  %v4573_v10 = vmul.f32 %v4464_v44, %v4464_v44  ;;  %v4636_v11 = vsel %vm261_vm0, %v4574_v43, 0.0  ;;  %v13077_v43 = vld [vmem:[#allocation6_spill] sm:$0xff] }
 0x6d6   : > { %v4533_v12 = vadd.f32 %v4532_v30, %v4531_v1  ;;  %v4655_v1 = vsub.s32 1, %v13076_v50 }
 0x6d7   : > { %v4634_v62 = vsel %vm261_vm0, %v4573_v10, 0.0 }
 0x6d8   : > { %v4535_v42 = vadd.f32 %v4534_v63, %v4533_v12  ;;  %v4635_v4 = vadd.f32 %v4634_v62, %v4633_v55  ;;  %v7268_v55 = vld [vmem:[%s9319_s9] sm:$0x3] }
 0x6da   : > { %v4536_v13 = vrot.slane %v4535_v42, 4  ;;  %v4637_v36 = vadd.f32 %v4636_v11, %v4635_v4 }
 0x6dc   : > { %v4537_v2 = vadd.f32 %v4536_v13, %v4535_v42  ;;  %v4638_v56 = vrot.slane %v4637_v36, 4 }
 0x6de   : > { %v4538_v19 = vrot.slane %v4537_v2, 2  ;;  %v4639_v48 = vadd.f32 %v4638_v56, %v4637_v36 }
 0x6e0   : > { %v4539_v8 = vadd.f32 %v4538_v19, %v4537_v2  ;;  %v4640_v14 = vrot.slane %v4639_v48, 2 }
 0x6e2   : > { %v4540_v53 = vrot.slane %v4539_v8, 1  ;;  %v4641_v59 = vadd.f32 %v4640_v14, %v4639_v48 }
 0x6e4   : > { %v4541_v47 = vadd.f32 %v4540_v53, %v4539_v8  ;;  %v4642_v34 = vrot.slane %v4641_v59, 1 }
 0x6e6   : > { %v4542_v17 = vmul.f32 0.00390625, %v4541_v47  ;;  %v4643_v9 = vadd.f32 %v4642_v34, %v4641_v59 }
 0x6e8   : > { %v4644_v28 = vmul.f32 0.00390625, %v4643_v9  ;;  %v4645_v38 = vmul.f32 %v4542_v17, %v4542_v17 }
 0x6ea   : > { %v4646_v22 = vsub.f32 %v4644_v28, %v4645_v38 }
 0x6ec   : > { %v4647_v41 = vmax.f32 %v4646_v22, 0.0 }
 0x6ee   : > { %v4648_v58 = vadd.f32 1e-05, %v4647_v41 }
 0x6f0   : > { %7212 = vrsqrt.f32 %v4648_v58 }
 0x6fd   : > { %v7213_v51 = vpop.eup %7212 }
 0x6fe   : > { %v4650_v30 = vmul.f32 %v7213_v51, %v13077_v43 }
 0x700   : > { %v4651_v10 = vmul.f32 %v4650_v30, %v4542_v17  ;;  %v4656_v12 = vrot.slane %v4650_v30, %v4655_v1 }
 0x702   : > { %v4652_v63 = vsub.f32 %v7268_v55, %v4651_v10  ;;  %v4687_v62 = vmul.f32 %v4656_v12, %v4464_v44  ;;  %v4657_v42 = vmul.f32 %v4656_v12, %v10788_v33  ;;  %v4658_v4 = vmul.f32 %v10786_v29, %v4656_v12 }
 0x703   : > { %v4659_v11 = vmul.f32 %v4656_v12, %v10792_v20  ;;  %v4660_v13 = vmul.f32 %v10790_v16, %v4656_v12  ;;  %v4661_v36 = vmul.f32 %v4656_v12, %v10809_v61  ;;  %v4662_v2 = vmul.f32 %v10796_v57, %v4656_v12 }
 0x704   : > { %v11016_v56 = vrot.slane %v4652_v63, %v4655_v1  ;;  %v4663_v19 = vmul.f32 %v4656_v12, %v10823_v52  ;;  %v4664_v48 = vmul.f32 %v10813_v23, %v4656_v12  ;;  %v4665_v44 = vmul.f32 %v4656_v12, %v10838_v25 }
 0x705   : > { %v4666_v33 = vmul.f32 %v10827_v6, %v4656_v12  ;;  %v4667_v29 = vmul.f32 %v4656_v12, %v10852_v26  ;;  %v4668_v20 = vmul.f32 %v10842_v46, %v4656_v12  ;;  %v4669_v16 = vmul.f32 %v4656_v12, %v10867_v37 }
 0x706   : > { %v4723_v61 = vadd.f32 %v11016_v56, %v4687_v62  ;;  %v4670_v57 = vmul.f32 %v10857_v0, %v4656_v12  ;;  %v4671_v8 = vmul.f32 %v4656_v12, %v10881_v39  ;;  %v4672_v52 = vmul.f32 %v10871_v24, %v4656_v12 }
 0x707   : > { %v4673_v23 = vmul.f32 %v4656_v12, %v10895_v7  ;;  %v4674_v25 = vmul.f32 %v10885_v49, %v4656_v12  ;;  %v4675_v6 = vmul.f32 %v4656_v12, %v10909_v60  ;;  %v4676_v26 = vmul.f32 %v10899_v32, %v4656_v12 }
 0x708   : > { %v4677_v46 = vmul.f32 %v4656_v12, %v10923_v31  ;;  %v4678_v37 = vmul.f32 %v10913_v45, %v4656_v12  ;;  %v4679_v14 = vmul.f32 %v4656_v12, %v10937_v18  ;;  %v4680_v0 = vmul.f32 %v10927_v54, %v4656_v12  ;;  %4755 = vst.msk [vmem:[#allocation2 + $0x181] sm:$0xff] %vm261_vm0, %v4723_v61 }
 0x709   : > { %v4681_v24 = vmul.f32 %v4656_v12, %v10951_v40  ;;  %v4682_v39 = vmul.f32 %v10941_v35, %v4656_v12  ;;  %v4683_v49 = vmul.f32 %v4656_v12, %v10965_v21  ;;  %v4684_v7 = vmul.f32 %v10955_v3, %v4656_v12 }
 0x70a   : > { %v4685_v32 = vmul.f32 %v4656_v12, %v10979_v15  ;;  %v4686_v60 = vmul.f32 %v10973_v5, %v4656_v12  ;;  %v4688_v45 = vmul.f32 %v10995_v27, %v4656_v12  ;;  %v4693_v31 = vadd.f32 %v11016_v56, %v4657_v42 }
 0x70b   : > { %v4694_v54 = vadd.f32 %v11016_v56, %v4658_v4  ;;  %v4695_v18 = vadd.f32 %v11016_v56, %v4659_v11  ;;  %v4696_v40 = vadd.f32 %v11016_v56, %v4660_v13  ;;  %v4697_v35 = vadd.f32 %v11016_v56, %v4661_v36 }
 0x70c   : > { %v4698_v21 = vadd.f32 %v11016_v56, %v4662_v2  ;;  %v4699_v3 = vadd.f32 %v11016_v56, %v4663_v19  ;;  %v4700_v15 = vadd.f32 %v11016_v56, %v4664_v48  ;;  %v4701_v5 = vadd.f32 %v11016_v56, %v4665_v44  ;;  %4725 = vst.msk [vmem:[#allocation2 + $0x19] sm:$0xff] %vm261_vm0, %v4693_v31 }
 0x70d   : > { %v4702_v27 = vadd.f32 %v11016_v56, %v4666_v33  ;;  %v4703_v53 = vadd.f32 %v11016_v56, %v4667_v29  ;;  %v4704_v59 = vadd.f32 %v11016_v56, %v4668_v20  ;;  %v4705_v47 = vadd.f32 %v11016_v56, %v4669_v16  ;;  %4726 = vst.msk [vmem:[#allocation2 + $0x21] sm:$0xff] %vm261_vm0, %v4694_v54 }
 0x70e   : > { %4727 = vst.msk [vmem:[#allocation2 + $0x31] sm:$0xff] %vm261_vm0, %v4695_v18  ;;  %4728 = vst.msk [vmem:[#allocation2 + $0x39] sm:$0xff] %vm261_vm0, %v4696_v40  ;;  %v4706_v34 = vadd.f32 %v11016_v56, %v4670_v57  ;;  %v4707_v17 = vadd.f32 %v11016_v56, %v4671_v8  ;;  %v4708_v9 = vadd.f32 %v11016_v56, %v4672_v52 }
 0x70f   : > { %4729 = vst.msk [vmem:[#allocation2 + $0x49] sm:$0xff] %vm261_vm0, %v4697_v35  ;;  %v4709_v28 = vadd.f32 %v11016_v56, %v4673_v23  ;;  %4730 = vst.msk [vmem:[#allocation2 + $0x51] sm:$0xff] %vm261_vm0, %v4698_v21  ;;  %v4710_v38 = vadd.f32 %v11016_v56, %v4674_v25  ;;  %v4711_v22 = vadd.f32 %v11016_v56, %v4675_v6 }
 0x710   : > { %4731 = vst.msk [vmem:[#allocation2 + $0x61] sm:$0xff] %vm261_vm0, %v4699_v3  ;;  %4732 = vst.msk [vmem:[#allocation2 + $0x69] sm:$0xff] %vm261_vm0, %v4700_v15  ;;  %v4712_v41 = vadd.f32 %v11016_v56, %v4676_v26  ;;  %v4713_v58 = vadd.f32 %v11016_v56, %v4677_v46  ;;  %v4714_v50 = vadd.f32 %v11016_v56, %v4678_v37 }
 0x711   : > { %4733 = vst.msk [vmem:[#allocation2 + $0x79] sm:$0xff] %vm261_vm0, %v4701_v5  ;;  %4734 = vst.msk [vmem:[#allocation2 + $0x81] sm:$0xff] %vm261_vm0, %v4702_v27  ;;  %v4715_v1 = vadd.f32 %v11016_v56, %v4679_v14  ;;  %v4716_v51 = vadd.f32 %v11016_v56, %v4680_v0  ;;  %v4717_v43 = vadd.f32 %v11016_v56, %v4681_v24 }
 0x712   : > { %4735 = vst.msk [vmem:[#allocation2 + $0x91] sm:$0xff] %vm261_vm0, %v4703_v53  ;;  %4736 = vst.msk [vmem:[#allocation2 + $0x99] sm:$0xff] %vm261_vm0, %v4704_v59  ;;  %v4718_v30 = vadd.f32 %v11016_v56, %v4682_v39  ;;  %v4719_v10 = vadd.f32 %v11016_v56, %v4683_v49  ;;  %v4720_v12 = vadd.f32 %v11016_v56, %v4684_v7 }
 0x713   : > { %4737 = vst.msk [vmem:[#allocation2 + $0xa9] sm:$0xff] %vm261_vm0, %v4705_v47  ;;  %4738 = vst.msk [vmem:[#allocation2 + $0xb1] sm:$0xff] %vm261_vm0, %v4706_v34  ;;  %v4721_v55 = vadd.f32 %v11016_v56, %v4685_v32  ;;  %v4722_v63 = vadd.f32 %v11016_v56, %v4686_v60  ;;  %v4724_v62 = vadd.f32 %v11016_v56, %v4688_v45  ;;  %v11105_v42 = vld [vmem:[#allocation2 + $0x19] sm:$0xff]  ;;  %v4821_v32 = vld [vmem:[#allocation2 + $0x2] sm:$0xff] }
 0x714   : > { %4739 = vst.msk [vmem:[#allocation2 + $0xc1] sm:$0xff] %vm261_vm0, %v4707_v17  ;;  %4740 = vst.msk [vmem:[#allocation2 + $0xc9] sm:$0xff] %vm261_vm0, %v4708_v9  ;;  %v11109_v4 = vld [vmem:[#allocation2 + $0x21] sm:$0xff]  ;;  %5081 = vrot.lane.b32.xlu0 %v11105_v42, %s7295_s25  ;;  %v4822_v60 = vld [vmem:[#allocation2 + $0xa] sm:$0xff] }
 0x715   : > { %4741 = vst.msk [vmem:[#allocation2 + $0xd9] sm:$0xff] %vm261_vm0, %v4709_v28  ;;  %4742 = vst.msk [vmem:[#allocation2 + $0xe1] sm:$0xff] %vm261_vm0, %v4710_v38  ;;  %5083 = vrot.lane.b32.xlu1 %v11109_v4, %s7295_s25  ;;  %v11115_v11 = vld [vmem:[#allocation2 + $0x31] sm:$0xff]  ;;  %v11117_v13 = vld [vmem:[#allocation2 + $0x39] sm:$0xff] }
 0x716   : > { %4743 = vst.msk [vmem:[#allocation2 + $0xf1] sm:$0xff] %vm261_vm0, %v4711_v22  ;;  %4744 = vst.msk [vmem:[#allocation2 + $0xf9] sm:$0xff] %vm261_vm0, %v4712_v41  ;;  %v11123_v36 = vld [vmem:[#allocation2 + $0x49] sm:$0xff]  ;;  %v11125_v2 = vld [vmem:[#allocation2 + $0x51] sm:$0xff] }
 0x717   : > { %4745 = vst.msk [vmem:[#allocation2 + $0x109] sm:$0xff] %vm261_vm0, %v4713_v58  ;;  %4746 = vst.msk [vmem:[#allocation2 + $0x111] sm:$0xff] %vm261_vm0, %v4714_v50  ;;  %v11131_v56 = vld [vmem:[#allocation2 + $0x61] sm:$0xff]  ;;  %v11133_v19 = vld [vmem:[#allocation2 + $0x69] sm:$0xff] }
 0x718   : > { %4747 = vst.msk [vmem:[#allocation2 + $0x121] sm:$0xff] %vm261_vm0, %v4715_v1  ;;  %4748 = vst.msk [vmem:[#allocation2 + $0x129] sm:$0xff] %vm261_vm0, %v4716_v51  ;;  %5085 = vrot.lane.b32.xlu0 %v11115_v11, %s7295_s25  ;;  %v11139_v48 = vld [vmem:[#allocation2 + $0x79] sm:$0xff]  ;;  %v11141_v44 = vld [vmem:[#allocation2 + $0x81] sm:$0xff]  ;;  %v11249_v51 = vpop.permute.xlu0 %5077 }
 0x719   : > { %4749 = vst.msk [vmem:[#allocation2 + $0x139] sm:$0xff] %vm261_vm0, %v4717_v43  ;;  %4750 = vst.msk [vmem:[#allocation2 + $0x141] sm:$0xff] %vm261_vm0, %v4718_v30  ;;  %5087 = vrot.lane.b32.xlu1 %v11117_v13, %s7295_s25  ;;  %v11147_v33 = vld [vmem:[#allocation2 + $0x91] sm:$0xff]  ;;  %v11149_v29 = vld [vmem:[#allocation2 + $0x99] sm:$0xff]  ;;  %v11252_v43 = vpop.permute.xlu1 %5079 }
 0x71a   : > { %4751 = vst.msk [vmem:[#allocation2 + $0x151] sm:$0xff] %vm261_vm0, %v4719_v10  ;;  %4752 = vst.msk [vmem:[#allocation2 + $0x159] sm:$0xff] %vm261_vm0, %v4720_v12  ;;  %v11155_v20 = vld [vmem:[#allocation2 + $0xa9] sm:$0xff]  ;;  %v11157_v16 = vld [vmem:[#allocation2 + $0xb1] sm:$0xff] }
 0x71b   : > { %4753 = vst.msk [vmem:[#allocation2 + $0x169] sm:$0xff] %vm261_vm0, %v4721_v55  ;;  %4754 = vst.msk [vmem:[#allocation2 + $0x171] sm:$0xff] %vm261_vm0, %v4722_v63  ;;  %v4805_v61 = vld [vmem:[#allocation2 + $0xc1] sm:$0xff]  ;;  %v4806_v57 = vld [vmem:[#allocation2 + $0xc9] sm:$0xff] }
 0x71c   : > { %4756 = vst.msk [vmem:[#allocation2 + $0x189] sm:$0xff] %vm261_vm0, %v4724_v62  ;;  %5089 = vrot.lane.b32.xlu0 %v11123_v36, %s7295_s25  ;;  %v4807_v8 = vld [vmem:[#allocation2 + $0xd9] sm:$0xff]  ;;  %v4808_v52 = vld [vmem:[#allocation2 + $0xe1] sm:$0xff]  ;;  %v11197_v40 = vld [vmem:[#allocation2 + $0x4a] sm:$0xff] }
 0x71d   : > { %5091 = vrot.lane.b32.xlu1 %v11125_v2, %s7295_s25  ;;  %v4809_v23 = vld [vmem:[#allocation2 + $0xf1] sm:$0xff]  ;;  %v4810_v25 = vld [vmem:[#allocation2 + $0xf9] sm:$0xff]  ;;  %v11183_v31 = vld [vmem:[#allocation2 + $0x22] sm:$0xff] }
 0x71e   : > { %v4811_v6 = vld [vmem:[#allocation2 + $0x109] sm:$0xff]  ;;  %v4812_v26 = vld [vmem:[#allocation2 + $0x111] sm:$0xff]  ;;  %v11181_v45 = vld [vmem:[#allocation2 + $0x1a] sm:$0xff] }
 0x71f   : > { %v4813_v46 = vld [vmem:[#allocation2 + $0x121] sm:$0xff]  ;;  %v4814_v37 = vld [vmem:[#allocation2 + $0x129] sm:$0xff]  ;;  %v11189_v54 = vld [vmem:[#allocation2 + $0x32] sm:$0xff] }
 0x720   : > { %5093 = vrot.lane.b32.xlu0 %v11131_v56, %s7295_s25  ;;  %v4815_v14 = vld [vmem:[#allocation2 + $0x139] sm:$0xff]  ;;  %v4816_v0 = vld [vmem:[#allocation2 + $0x141] sm:$0xff]  ;;  %v11207_v3 = vld [vmem:[#allocation2 + $0x6a] sm:$0xff] }
 0x721   : > { %5095 = vrot.lane.b32.xlu1 %v11133_v19, %s7295_s25  ;;  %v4817_v24 = vld [vmem:[#allocation2 + $0x151] sm:$0xff]  ;;  %v4818_v39 = vld [vmem:[#allocation2 + $0x159] sm:$0xff]  ;;  %v11205_v21 = vld [vmem:[#allocation2 + $0x62] sm:$0xff] }
 0x722   : > { %v4819_v49 = vld [vmem:[#allocation2 + $0x169] sm:$0xff]  ;;  %v4820_v7 = vld [vmem:[#allocation2 + $0x171] sm:$0xff]  ;;  %v11191_v18 = vld [vmem:[#allocation2 + $0x3a] sm:$0xff] }
 0x723   : > { %v11199_v35 = vld [vmem:[#allocation2 + $0x52] sm:$0xff]  ;;  %v11213_v15 = vld [vmem:[#allocation2 + $0x7a] sm:$0xff]  ;;  %v11215_v5 = vld [vmem:[#allocation2 + $0x82] sm:$0xff] }
 0x724   : > { %5097 = vrot.lane.b32.xlu0 %v11139_v48, %s7295_s25  ;;  %v11221_v27 = vld [vmem:[#allocation2 + $0x92] sm:$0xff]  ;;  %v11223_v53 = vld [vmem:[#allocation2 + $0x9a] sm:$0xff]  ;;  %v11229_v59 = vld [vmem:[#allocation2 + $0xaa] sm:$0xff] }
 0x725   : > { %5099 = vrot.lane.b32.xlu1 %v11141_v44, %s7295_s25  ;;  %v11231_v47 = vld [vmem:[#allocation2 + $0xb2] sm:$0xff]  ;;  %v11237_v34 = vld [vmem:[#allocation2 + $0xc2] sm:$0xff]  ;;  %v4838_v17 = vld [vmem:[#allocation2 + $0xca] sm:$0xff] }
 0x726   : > { %v4839_v9 = vld [vmem:[#allocation2 + $0xda] sm:$0xff]  ;;  %v4840_v28 = vld [vmem:[#allocation2 + $0xe2] sm:$0xff]  ;;  %v4841_v38 = vld [vmem:[#allocation2 + $0xf2] sm:$0xff] }
 0x727   : > { %v4842_v22 = vld [vmem:[#allocation2 + $0xfa] sm:$0xff]  ;;  %v4843_v41 = vld [vmem:[#allocation2 + $0x10a] sm:$0xff]  ;;  %v4844_v58 = vld [vmem:[#allocation2 + $0x112] sm:$0xff] }
 0x728   : > { %5101 = vrot.lane.b32.xlu0 %v11147_v33, %s7295_s25  ;;  %v4845_v50 = vld [vmem:[#allocation2 + $0x122] sm:$0xff]  ;;  %v4846_v1 = vld [vmem:[#allocation2 + $0x12a] sm:$0xff]  ;;  %v4847_v30 = vld [vmem:[#allocation2 + $0x13a] sm:$0xff] }
 0x729   : > { %5103 = vrot.lane.b32.xlu1 %v11149_v29, %s7295_s25  ;;  %v4848_v10 = vld [vmem:[#allocation2 + $0x142] sm:$0xff]  ;;  %v4849_v63 = vld [vmem:[#allocation2 + $0x152] sm:$0xff]  ;;  %v4850_v62 = vld [vmem:[#allocation2 + $0x15a] sm:$0xff] }
 0x72c   : > { %5105 = vrot.lane.b32.xlu0 %v11155_v20, %s7295_s25 }
 0x72d   : > { %5107 = vrot.lane.b32.xlu1 %v11157_v16, %s7295_s25 }
 0x730   : > { %5109 = vrot.lane.b32.xlu0 %v4805_v61, %s7295_s25 }
 0x731   : > { %5111 = vrot.lane.b32.xlu1 %v4806_v57, %s7295_s25 }
 0x734   : > { %5113 = vrot.lane.b32.xlu0 %v4807_v8, %s7295_s25  ;;  %v4851_v8 = vld [vmem:[#allocation2 + $0x16a] sm:$0xff] }
 0x735   : > { %5115 = vrot.lane.b32.xlu1 %v4808_v52, %s7295_s25  ;;  %v4852_v52 = vld [vmem:[#allocation2 + $0x172] sm:$0xff] }
 0x738   : > { %5117 = vrot.lane.b32.xlu0 %v4809_v23, %s7295_s25 }
 0x739   : > { %5119 = vrot.lane.b32.xlu1 %v4810_v25, %s7295_s25  ;;  %v11270_v25 = vld [vmem:[#allocation2 + $0x18] sm:$0xff] }
 0x73c   : > { %5121 = vrot.lane.b32.xlu0 %v4811_v6, %s7295_s25 }
 0x73d   : > { %5123 = vrot.lane.b32.xlu1 %v4812_v26, %s7295_s25  ;;  %v11274_v26 = vld [vmem:[#allocation2 + $0x20] sm:$0xff] }
 0x740   : > { %5125 = vrot.lane.b32.xlu0 %v4813_v46, %s7295_s25 }
 0x741   : > { %5127 = vrot.lane.b32.xlu1 %v4814_v37, %s7295_s25  ;;  %v11282_v37 = vld [vmem:[#allocation2 + $0x30] sm:$0xff] }
 0x744   : > { %5129 = vrot.lane.b32.xlu0 %v4815_v14, %s7295_s25 }
 0x745   : > { %5131 = vrot.lane.b32.xlu1 %v4816_v0, %s7295_s25  ;;  %v11286_v0 = vld [vmem:[#allocation2 + $0x38] sm:$0xff] }
 0x748   : > { %5133 = vrot.lane.b32.xlu0 %v4817_v24, %s7295_s25 }
 0x749   : > { %5135 = vrot.lane.b32.xlu1 %v4818_v39, %s7295_s25  ;;  %v11294_v39 = vld [vmem:[#allocation2 + $0x48] sm:$0xff] }
 0x74c   : > { %5137 = vrot.lane.b32.xlu0 %v4819_v49, %s7295_s25 }
 0x74d   : > { %5139 = vrot.lane.b32.xlu1 %v4820_v7, %s7295_s25  ;;  %v11298_v7 = vld [vmem:[#allocation2 + $0x50] sm:$0xff] }
 0x750   : > { %5205 = vrot.lane.b32.xlu0 %v4821_v32, %s7296_s26 }
 0x751   : > { %5207 = vrot.lane.b32.xlu1 %v4822_v60, %s7296_s26  ;;  %v11306_v60 = vld [vmem:[#allocation2 + $0x60] sm:$0xff] }
 0x754   : > { %5209 = vrot.lane.b32.xlu0 %v11181_v45, %s7296_s26 }
 0x755   : > { %5211 = vrot.lane.b32.xlu1 %v11183_v31, %s7296_s26 }
 0x758   : > { %5213 = vrot.lane.b32.xlu0 %v11189_v54, %s7296_s26 }
 0x759   : > { %5215 = vrot.lane.b32.xlu1 %v11191_v18, %s7296_s26 }
 0x75c   : > { %5217 = vrot.lane.b32.xlu0 %v11197_v40, %s7296_s26 }
 0x75d   : > { %5219 = vrot.lane.b32.xlu1 %v11199_v35, %s7296_s26 }
 0x760   : > { %5221 = vrot.lane.b32.xlu0 %v11205_v21, %s7296_s26 }
 0x761   : > { %5223 = vrot.lane.b32.xlu1 %v11207_v3, %s7296_s26 }
 0x764   : > { %5225 = vrot.lane.b32.xlu0 %v11213_v15, %s7296_s26 }
 0x765   : > { %5227 = vrot.lane.b32.xlu1 %v11215_v5, %s7296_s26 }
 0x768   : > { %5229 = vrot.lane.b32.xlu0 %v11221_v27, %s7296_s26 }
 0x769   : > { %5231 = vrot.lane.b32.xlu1 %v11223_v53, %s7296_s26 }
 0x76c   : > { %5233 = vrot.lane.b32.xlu0 %v11229_v59, %s7296_s26 }
 0x76d   : > { %5235 = vrot.lane.b32.xlu1 %v11231_v47, %s7296_s26 }
 0x770   : > { %5237 = vrot.lane.b32.xlu0 %v11237_v34, %s7296_s26 }
 0x771   : > { %5239 = vrot.lane.b32.xlu1 %v4838_v17, %s7296_s26 }
 0x774   : > { %5241 = vrot.lane.b32.xlu0 %v4839_v9, %s7296_s26  ;;  %v11310_v9 = vld [vmem:[#allocation2 + $0x68] sm:$0xff] }
 0x775   : > { %5243 = vrot.lane.b32.xlu1 %v4840_v28, %s7296_s26 }
 0x778   : > { %5245 = vrot.lane.b32.xlu0 %v4841_v38, %s7296_s26  ;;  %v11318_v38 = vld [vmem:[#allocation2 + $0x78] sm:$0xff] }
 0x779   : > { %5247 = vrot.lane.b32.xlu1 %v4842_v22, %s7296_s26 }
 0x77c   : > { %5249 = vrot.lane.b32.xlu0 %v4843_v41, %s7296_s26  ;;  %v11322_v41 = vld [vmem:[#allocation2 + $0x80] sm:$0xff] }
 0x77d   : > { %5251 = vrot.lane.b32.xlu1 %v4844_v58, %s7296_s26 }
 0x780   : > { %5253 = vrot.lane.b32.xlu0 %v4845_v50, %s7296_s26  ;;  %v11330_v50 = vld [vmem:[#allocation2 + $0x90] sm:$0xff] }
 0x781   : > { %5255 = vrot.lane.b32.xlu1 %v4846_v1, %s7296_s26 }
 0x784   : > { %5257 = vrot.lane.b32.xlu0 %v4847_v30, %s7296_s26  ;;  %v11334_v30 = vld [vmem:[#allocation2 + $0x98] sm:$0xff] }
 0x785   : > { %5259 = vrot.lane.b32.xlu1 %v4848_v10, %s7296_s26 }
 0x786   : > { %v11256_v12 = vpop.permute.xlu0 %5081 }
 0x787   : > { %v11258_v55 = vpop.permute.xlu1 %5083 }
 0x788   : > { %5261 = vrot.lane.b32.xlu0 %v4849_v63, %s7296_s26  ;;  %v11342_v63 = vld [vmem:[#allocation2 + $0xa8] sm:$0xff] }
 0x789   : > { %5263 = vrot.lane.b32.xlu1 %v4850_v62, %s7296_s26 }
 0x78a   : > { %v11262_v61 = vpop.permute.xlu0 %5085 }
 0x78b   : > { %v11264_v57 = vpop.permute.xlu1 %5087 }
 0x78c   : > { %13078 = vst [vmem:[#allocation92_spill] sm:$0xff] %v11264_v57  ;;  %5265 = vrot.lane.b32.xlu0 %v4851_v8, %s7296_s26  ;;  %v11346_v8 = vld [vmem:[#allocation2 + $0xb0] sm:$0xff]  ;;  %v4786_v57 = vld [vmem:[#allocation2 + $0x158] sm:$0xff] }
 0x78d   : > { %5267 = vrot.lane.b32.xlu1 %v4852_v52, %s7296_s26 }
 0x78e   : > { %v11268_v23 = vpop.permute.xlu0 %5089 }
 0x78f   : > { %13079 = vst [vmem:[#allocation124_spill] sm:$0xff] %v11268_v23  ;;  %v11272_v6 = vpop.permute.xlu1 %5091 }
 0x790   : > { %13080 = vst [vmem:[#allocation148_spill] sm:$0xff] %v11272_v6  ;;  %5333 = vrot.lane.b32.xlu0 %v11270_v25, %s7297_s27  ;;  %v11406_v6 = vld [vmem:[#allocation2 + $0x128] sm:$0xff] }
 0x791   : > { %5335 = vrot.lane.b32.xlu1 %v11274_v26, %s7297_s27  ;;  %13108 = vst [vmem:[#allocation52_spill] sm:$0xff] %v11406_v6 }
 0x792   : > { %v11280_v46 = vpop.permute.xlu0 %5093 }
 0x793   : > { %13081 = vst [vmem:[#allocation91_spill] sm:$0xff] %v11280_v46  ;;  %v11284_v14 = vpop.permute.xlu1 %5095 }
 0x794   : > { %13082 = vst [vmem:[#allocation113_spill] sm:$0xff] %v11284_v14  ;;  %5337 = vrot.lane.b32.xlu0 %v11282_v37, %s7297_s27  ;;  %v11394_v14 = vld [vmem:[#allocation2 + $0x110] sm:$0xff] }
 0x795   : > { %5339 = vrot.lane.b32.xlu1 %v11286_v0, %s7297_s27  ;;  %13104 = vst [vmem:[#allocation69_spill] sm:$0xff] %v11394_v14 }
 0x796   : > { %v11292_v24 = vpop.permute.xlu0 %5097 }
 0x797   : > { %13083 = vst [vmem:[#allocation147_spill] sm:$0xff] %v11292_v24  ;;  %v11296_v49 = vpop.permute.xlu1 %5099 }
 0x798   : > { %13084 = vst [vmem:[#allocation3_spill] sm:$0xff] %v11296_v49  ;;  %5341 = vrot.lane.b32.xlu0 %v11294_v39, %s7297_s27  ;;  %v11382_v49 = vld [vmem:[#allocation2 + $0xf8] sm:$0xff] }
 0x799   : > { %5343 = vrot.lane.b32.xlu1 %v11298_v7, %s7297_s27  ;;  %13100 = vst [vmem:[#allocation151_spill] sm:$0xff] %v11382_v49 }
 0x79a   : > { %v11304_v32 = vpop.permute.xlu0 %5101 }
 0x79b   : > { %13085 = vst [vmem:[#allocation112_spill] sm:$0xff] %v11304_v32  ;;  %v11308_v17 = vpop.permute.xlu1 %5103 }
 0x79c   : > { %13086 = vst [vmem:[#allocation46_spill] sm:$0xff] %v11308_v17  ;;  %5345 = vrot.lane.b32.xlu0 %v11306_v60, %s7297_s27  ;;  %v11370_v17 = vld [vmem:[#allocation2 + $0xe0] sm:$0xff] }
 0x79d   : > { %5347 = vrot.lane.b32.xlu1 %v11310_v9, %s7297_s27 }
 0x79e   : > { %v11316_v28 = vpop.permute.xlu0 %5105 }
 0x79f   : > { %13087 = vst [vmem:[#allocation170_spill] sm:$0xff] %v11316_v28  ;;  %v11320_v22 = vpop.permute.xlu1 %5107 }
 0x7a0   : > { %13088 = vst [vmem:[#allocation63_spill] sm:$0xff] %v11320_v22  ;;  %5349 = vrot.lane.b32.xlu0 %v11318_v38, %s7297_s27  ;;  %v11358_v22 = vld [vmem:[#allocation2 + $0xc8] sm:$0xff] }
 0x7a1   : > { %5351 = vrot.lane.b32.xlu1 %v11322_v41, %s7297_s27 }
 0x7a2   : > { %v11328_v58 = vpop.permute.xlu0 %5109 }
 0x7a3   : > { %13089 = vst [vmem:[#allocation44_spill] sm:$0xff] %v11328_v58  ;;  %v11332_v1 = vpop.permute.xlu1 %5111 }
 0x7a4   : > { %13090 = vst [vmem:[#allocation127_spill] sm:$0xff] %v11332_v1  ;;  %5353 = vrot.lane.b32.xlu0 %v11330_v50, %s7297_s27  ;;  %v11354_v1 = vld [vmem:[#allocation2 + $0xc0] sm:$0xff] }
 0x7a5   : > { %5355 = vrot.lane.b32.xlu1 %v11334_v30, %s7297_s27 }
 0x7a6   : > { %v11340_v10 = vpop.permute.xlu0 %5113 }
 0x7a7   : > { %13091 = vst [vmem:[#allocation93_spill] sm:$0xff] %v11340_v10  ;;  %v11344_v62 = vpop.permute.xlu1 %5115  ;;  %v11366_v10 = vld [vmem:[#allocation2 + $0xd8] sm:$0xff] }
 0x7a8   : > { %13092 = vst [vmem:[#allocation126_spill] sm:$0xff] %v11344_v62  ;;  %5357 = vrot.lane.b32.xlu0 %v11342_v63, %s7297_s27 }
 0x7a9   : > { %5359 = vrot.lane.b32.xlu1 %v11346_v8, %s7297_s27 }
 0x7aa   : > { %v11352_v52 = vpop.permute.xlu0 %5117 }
 0x7ab   : > { %13093 = vst [vmem:[#allocation150_spill] sm:$0xff] %v11352_v52  ;;  %v11356_v58 = vpop.permute.xlu1 %5119  ;;  %v11378_v52 = vld [vmem:[#allocation2 + $0xf0] sm:$0xff] }
 0x7ac   : > { %13094 = vst [vmem:[#allocation114_spill] sm:$0xff] %v11356_v58  ;;  %5361 = vrot.lane.b32.xlu0 %v11354_v1, %s7297_s27  ;;  %13098 = vst [vmem:[#allocation61_spill] sm:$0xff] %v11378_v52 }
 0x7ad   : > { %5363 = vrot.lane.b32.xlu1 %v11358_v22, %s7297_s27 }
 0x7ae   : > { %v11364_v62 = vpop.permute.xlu0 %5121 }
 0x7af   : > { %13095 = vst [vmem:[#allocation149_spill] sm:$0xff] %v11364_v62  ;;  %v11368_v28 = vpop.permute.xlu1 %5123  ;;  %v11390_v62 = vld [vmem:[#allocation2 + $0x108] sm:$0xff] }
 0x7b0   : > { %13096 = vst [vmem:[#allocation171_spill] sm:$0xff] %v11368_v28  ;;  %5365 = vrot.lane.b32.xlu0 %v11366_v10, %s7297_s27  ;;  %13102 = vst [vmem:[#allocation10_spill] sm:$0xff] %v11390_v62 }
 0x7b1   : > { %5367 = vrot.lane.b32.xlu1 %v11370_v17, %s7297_s27 }
 0x7b2   : > { %v11376_v58 = vpop.permute.xlu0 %5125 }
 0x7b3   : > { %13097 = vst [vmem:[#allocation48_spill] sm:$0xff] %v11376_v58  ;;  %v11380_v32 = vpop.permute.xlu1 %5127  ;;  %v11402_v58 = vld [vmem:[#allocation2 + $0x120] sm:$0xff] }
 0x7b4   : > { %13099 = vst [vmem:[#allocation128_spill] sm:$0xff] %v11380_v32  ;;  %5369 = vrot.lane.b32.xlu0 %v11378_v52, %s7297_s27  ;;  %13106 = vst [vmem:[#allocation71_spill] sm:$0xff] %v11402_v58  ;;  %v4884_v52 = vld [vmem:[#allocation2 + $0x188] sm:$0xff] }
 0x7b5   : > { %5371 = vrot.lane.b32.xlu1 %v11382_v49, %s7297_s27  ;;  %v4883_v49 = vld [vmem:[#allocation2 + $0x180] sm:$0xff] }
 0x7b6   : > { %v11388_v28 = vpop.permute.xlu0 %5129 }
 0x7b7   : > { %13101 = vst [vmem:[#allocation8_spill] sm:$0xff] %v11388_v28  ;;  %v11392_v24 = vpop.permute.xlu1 %5131  ;;  %v4783_v28 = vld [vmem:[#allocation2 + $0x138] sm:$0xff] }
 0x7b8   : > { %13103 = vst [vmem:[#allocation14_spill] sm:$0xff] %v11392_v24  ;;  %5373 = vrot.lane.b32.xlu0 %v11390_v62, %s7297_s27 }
 0x7b9   : > { %5375 = vrot.lane.b32.xlu1 %v11394_v14, %s7297_s27  ;;  %v4784_v14 = vld [vmem:[#allocation2 + $0x140] sm:$0xff] }
 0x7ba   : > { %v11400_v32 = vpop.permute.xlu0 %5133 }
 0x7bb   : > { %13105 = vst [vmem:[#allocation17_spill] sm:$0xff] %v11400_v32  ;;  %v11404_v46 = vpop.permute.xlu1 %5135 }
 0x7bc   : > { %13107 = vst [vmem:[#allocation25_spill] sm:$0xff] %v11404_v46  ;;  %5377 = vrot.lane.b32.xlu0 %v11402_v58, %s7297_s27  ;;  %v4785_v46 = vld [vmem:[#allocation2 + $0x150] sm:$0xff] }
 0x7bd   : > { %5379 = vrot.lane.b32.xlu1 %v11406_v6, %s7297_s27 }
 0x7be   : > { %v11412_v24 = vpop.permute.xlu0 %5137 }
 0x7bf   : > { %13109 = vst [vmem:[#allocation74_spill] sm:$0xff] %v11412_v24  ;;  %v11414_v62 = vpop.permute.xlu1 %5139  ;;  %v4787_v24 = vld [vmem:[#allocation2 + $0x168] sm:$0xff] }
 0x7c0   : > { %13110 = vst [vmem:[#allocation130_spill] sm:$0xff] %v11414_v62  ;;  %5381 = vrot.lane.b32.xlu0 %v4783_v28, %s7297_s27  ;;  %v4788_v62 = vld [vmem:[#allocation2 + $0x170] sm:$0xff] }
 0x7c1   : > { %5383 = vrot.lane.b32.xlu1 %v4784_v14, %s7297_s27 }
 0x7c2   : > { %v11418_v32 = vpop.permute.xlu0 %5205 }
 0x7c3   : > { %v11420_v23 = vpop.permute.xlu1 %5207 }
 0x7c4   : > { %5385 = vrot.lane.b32.xlu0 %v4785_v46, %s7297_s27 }
 0x7c5   : > { %5387 = vrot.lane.b32.xlu1 %v4786_v57, %s7297_s27 }
 0x7c6   : > { %v11424_v6 = vpop.permute.xlu0 %5209 }
 0x7c7   : > { %v11426_v58 = vpop.permute.xlu1 %5211 }
 0x7c8   : > { %5389 = vrot.lane.b32.xlu0 %v4787_v24, %s7297_s27  ;;  %v6859_v24 = vld [vmem:[%s12313_s1 + $0x70] sm:$0xf] }
 0x7c9   : > { %5391 = vrot.lane.b32.xlu1 %v4788_v62, %s7297_s27  ;;  %7125 = vmatprep.subr.msk.mxu0 %vm2060_vm2, %v6859_v24 }
 0x7ca   : > { %v11430_v14 = vpop.permute.xlu0 %5213  ;;  %7126 = vmatpush3.msk.msra.mxu0 %vm2060_vm2, %v6859_v24 }
 0x7cb   : > { %v11432_v28 = vpop.permute.xlu1 %5215 }
 0x7cc   : > { %5393 = vrot.lane.b32.xlu0 %v4883_v49, %s7297_s27 }
 0x7cd   : > { %5395 = vrot.lane.b32.xlu1 %v4884_v52, %s7297_s27 }
 0x7ce   : > { %v11436_v57 = vpop.permute.xlu0 %5217 }
 0x7cf   : > { %v11438_v46 = vpop.permute.xlu1 %5219 }
 0x7d0   : > { %5461 = vrot.lane.b32.xlu0 %v11105_v42, %s7298_s28  ;;  %v6858_v42 = vld [vmem:[%s12313_s1 + $0x68] sm:$0xff] }
 0x7d1   : > { %5463 = vrot.lane.b32.xlu1 %v11109_v4, %s7298_s28  ;;  %7127 = vmatprep.subr.mxu0 %v6858_v42  ;;  %v6857_v4 = vld [vmem:[%s12313_s1 + $0x60] sm:$0xff] }
 0x7d2   : > { %v11447_v62 = vpop.permute.xlu0 %5221  ;;  %7128 = vmatpush3.msra.mxu0 %v6858_v42 }
 0x7d3   : > { %v11450_v49 = vpop.permute.xlu1 %5223  ;;  %7129 = vmatprep.subr.mxu0 %v6857_v4 }
 0x7d4   : > { %13111 = vst [vmem:[#allocation95_spill] sm:$0xff] %v11450_v49  ;;  %5589 = vrot.lane.b32.xlu0 %v11181_v45, %s7299_s29  ;;  %7130 = vmatpush3.msra.mxu0 %v6857_v4  ;;  %v6856_v45 = vld [vmem:[%s12313_s1 + $0x58] sm:$0xff] }
 0x7d5   : > { %5591 = vrot.lane.b32.xlu1 %v11183_v31, %s7299_s29  ;;  %7131 = vmatprep.subr.mxu0 %v6856_v45  ;;  %v6855_v31 = vld [vmem:[%s12313_s1 + $0x50] sm:$0xff] }
 0x7d6   : > { %v11463_v52 = vpop.permute.xlu0 %5225  ;;  %7132 = vmatpush3.msra.mxu0 %v6856_v45 }
 0x7d7   : > { %v11465_v49 = vpop.permute.xlu1 %5227  ;;  %7133 = vmatprep.subr.mxu0 %v6855_v31 }
 0x7d8   : > { %13112 = vst [vmem:[#allocation153_spill] sm:$0xff] %v11465_v49  ;;  %5717 = vrot.lane.b32.xlu0 %v11282_v37, %s7300_s30  ;;  %7134 = vmatpush3.msra.mxu0 %v6855_v31 }
 0x7d9   : > { %5719 = vrot.lane.b32.xlu1 %v11286_v0, %s7300_s30 }
 0x7da   : > { %v11477_v24 = vpop.permute.xlu0 %5229 }
 0x7db   : > { %v11479_v42 = vpop.permute.xlu1 %5231 }
 0x7dc   : > { %13113 = vst [vmem:[#allocation7_spill] sm:$0xff] %v11479_v42  ;;  %5845 = vrot.lane.b32.xlu0 %v11115_v11, %s7301_s6 }
 0x7dd   : > { %5465 = vrot.lane.b32.xlu1 %v11115_v11, %s7298_s28 }
 0x7de   : > { %v11485_v4 = vpop.permute.xlu0 %5233 }
 0x7df   : > { %13114 = vst [vmem:[#allocation31_spill] sm:$0xff] %v11485_v4  ;;  %v11487_v49 = vpop.permute.xlu1 %5235 }
 0x7e0   : > { %13115 = vst [vmem:[#allocation56_spill] sm:$0xff] %v11487_v49  ;;  %5847 = vrot.lane.b32.xlu0 %v11117_v13, %s7301_s6 }
 0x7e1   : > { %5973 = vrot.lane.b32.xlu1 %v11189_v54, %s7302_s17 }
 0x7e2   : > { %v11493_v45 = vpop.permute.xlu0 %5237 }
 0x7e3   : > { %13116 = vst [vmem:[#allocation76_spill] sm:$0xff] %v11493_v45  ;;  %v11495_v42 = vpop.permute.xlu1 %5239 }
 0x7e4   : > { %13117 = vst [vmem:[#allocation132_spill] sm:$0xff] %v11495_v42  ;;  %5467 = vrot.lane.b32.xlu0 %v11117_v13, %s7298_s28 }
 0x7e5   : > { %5593 = vrot.lane.b32.xlu1 %v11189_v54, %s7299_s29 }
 0x7e6   : > { %v11501_v11 = vpop.permute.xlu0 %5241 }
 0x7e7   : > { %13118 = vst [vmem:[#allocation97_spill] sm:$0xff] %v11501_v11  ;;  %v11503_v31 = vpop.permute.xlu1 %5243 }
 0x7e8   : > { %13119 = vst [vmem:[#allocation155_spill] sm:$0xff] %v11503_v31  ;;  %5975 = vrot.lane.b32.xlu0 %v11191_v18, %s7302_s17 }
 0x7e9   : > { %5595 = vrot.lane.b32.xlu1 %v11191_v18, %s7299_s29 }
 0x7ea   : > { %v11509_v49 = vpop.permute.xlu0 %5245 }
 0x7eb   : > { %13120 = vst [vmem:[#allocation12_spill] sm:$0xff] %v11509_v49  ;;  %v11511_v45 = vpop.permute.xlu1 %5247 }
 0x7ec   : > { %13121 = vst [vmem:[#allocation66_spill] sm:$0xff] %v11511_v45  ;;  %5721 = vrot.lane.b32.xlu0 %v11294_v39, %s7300_s30 }
 0x7ed   : > { %5723 = vrot.lane.b32.xlu1 %v11298_v7, %s7300_s30 }
 0x7ee   : > { %v11517_v13 = vpop.permute.xlu0 %5249 }
 0x7ef   : > { %13122 = vst [vmem:[#allocation65_spill] sm:$0xff] %v11517_v13  ;;  %v11519_v54 = vpop.permute.xlu1 %5251 }
 0x7f0   : > { %13123 = vst [vmem:[#allocation133_spill] sm:$0xff] %v11519_v54  ;;  %5849 = vrot.lane.b32.xlu0 %v11123_v36, %s7301_s6 }
 0x7f1   : > { %5469 = vrot.lane.b32.xlu1 %v11123_v36, %s7298_s28 }
 0x7f2   : > { %v11525_v18 = vpop.permute.xlu0 %5253 }
 0x7f3   : > { %13124 = vst [vmem:[#allocation157_spill] sm:$0xff] %v11525_v18  ;;  %v11527_v49 = vpop.permute.xlu1 %5255 }
 0x7f4   : > { %13125 = vst [vmem:[#allocation11_spill] sm:$0xff] %v11527_v49  ;;  %5851 = vrot.lane.b32.xlu0 %v11125_v2, %s7301_s6 }
 0x7f5   : > { %5977 = vrot.lane.b32.xlu1 %v11197_v40, %s7302_s17 }
 0x7f6   : > { %v11533_v45 = vpop.permute.xlu0 %5257 }
 0x7f7   : > { %13126 = vst [vmem:[#allocation19_spill] sm:$0xff] %v11533_v45  ;;  %v11535_v13 = vpop.permute.xlu1 %5259 }
 0x7f8   : > { %13127 = vst [vmem:[#allocation13_spill] sm:$0xff] %v11535_v13  ;;  %5471 = vrot.lane.b32.xlu0 %v11125_v2, %s7298_s28 }
 0x7f9   : > { %5597 = vrot.lane.b32.xlu1 %v11197_v40, %s7299_s29 }
 0x7fa   : > { %v11541_v36 = vpop.permute.xlu0 %5261 }
 0x7fb   : > { %13128 = vst [vmem:[#allocation72_spill] sm:$0xff] %v11541_v36  ;;  %v11543_v18 = vpop.permute.xlu1 %5263 }
 0x7fc   : > { %13129 = vst [vmem:[#allocation68_spill] sm:$0xff] %v11543_v18  ;;  %5979 = vrot.lane.b32.xlu0 %v11199_v35, %s7302_s17 }
 0x7fd   : > { %5599 = vrot.lane.b32.xlu1 %v11199_v35, %s7299_s29 }
 0x7fe   : > { %v11549_v49 = vpop.permute.xlu0 %5265 }
 0x7ff   : > { %13130 = vst [vmem:[#allocation16_spill] sm:$0xff] %v11549_v49  ;;  %v11551_v45 = vpop.permute.xlu1 %5267 }
 0x800   : > { %13131 = vst [vmem:[#allocation70_spill] sm:$0xff] %v11551_v45  ;;  %5725 = vrot.lane.b32.xlu0 %v11306_v60, %s7300_s30 }
 0x801   : > { %5727 = vrot.lane.b32.xlu1 %v11310_v9, %s7300_s30 }
 0x802   : > { %v11557_v2 = vpop.permute.xlu0 %5333 }
 0x803   : > { %v11559_v40 = vpop.permute.xlu1 %5335 }
 0x804   : > { %5853 = vrot.lane.b32.xlu0 %v11131_v56, %s7301_s6 }
 0x805   : > { %5473 = vrot.lane.b32.xlu1 %v11131_v56, %s7298_s28 }
 0x806   : > { %v11565_v35 = vpop.permute.xlu0 %5337 }
 0x807   : > { %v11567_v49 = vpop.permute.xlu1 %5339 }
 0x808   : > { %5855 = vrot.lane.b32.xlu0 %v11133_v19, %s7301_s6 }
 0x809   : > { %5981 = vrot.lane.b32.xlu1 %v11205_v21, %s7302_s17 }
 0x80a   : > { %v11573_v45 = vpop.permute.xlu0 %5341 }
 0x80b   : > { %v11575_v18 = vpop.permute.xlu1 %5343 }
 0x80c   : > { %5475 = vrot.lane.b32.xlu0 %v11133_v19, %s7298_s28 }
 0x80d   : > { %5601 = vrot.lane.b32.xlu1 %v11205_v21, %s7299_s29 }
 0x80e   : > { %v11581_v56 = vpop.permute.xlu0 %5345 }
 0x80f   : > { %v11583_v36 = vpop.permute.xlu1 %5347 }
 0x810   : > { %5983 = vrot.lane.b32.xlu0 %v11207_v3, %s7302_s17 }
 0x811   : > { %5603 = vrot.lane.b32.xlu1 %v11207_v3, %s7299_s29 }
 0x812   : > { %v11589_v13 = vpop.permute.xlu0 %5349 }
 0x813   : > { %v11591_v54 = vpop.permute.xlu1 %5351 }
 0x814   : > { %5729 = vrot.lane.b32.xlu0 %v11318_v38, %s7300_s30 }
 0x815   : > { %5731 = vrot.lane.b32.xlu1 %v11322_v41, %s7300_s30 }
 0x816   : > { %v11597_v19 = vpop.permute.xlu0 %5353 }
 0x817   : > { %v11599_v21 = vpop.permute.xlu1 %5355 }
 0x818   : > { %5857 = vrot.lane.b32.xlu0 %v11139_v48, %s7301_s6 }
 0x819   : > { %5477 = vrot.lane.b32.xlu1 %v11139_v48, %s7298_s28 }
 0x81a   : > { %v11605_v3 = vpop.permute.xlu0 %5357 }
 0x81b   : > { %v11607_v31 = vpop.permute.xlu1 %5359 }
 0x81c   : > { %13132 = vst [vmem:[#allocation21_spill] sm:$0xff] %v11607_v31  ;;  %5859 = vrot.lane.b32.xlu0 %v11141_v44, %s7301_s6 }
 0x81d   : > { %5985 = vrot.lane.b32.xlu1 %v11213_v15, %s7302_s17 }
 0x81e   : > { %v11613_v11 = vpop.permute.xlu0 %5361 }
 0x81f   : > { %13133 = vst [vmem:[#allocation23_spill] sm:$0xff] %v11613_v11  ;;  %v11615_v42 = vpop.permute.xlu1 %5363 }
 0x820   : > { %5479 = vrot.lane.b32.xlu0 %v11141_v44, %s7298_s28 }
 0x821   : > { %5605 = vrot.lane.b32.xlu1 %v11213_v15, %s7299_s29 }
 0x822   : > { %v11621_v48 = vpop.permute.xlu0 %5365 }
 0x823   : > { %13134 = vst [vmem:[#allocation27_spill] sm:$0xff] %v11621_v48  ;;  %v11623_v4 = vpop.permute.xlu1 %5367 }
 0x824   : > { %13135 = vst [vmem:[#allocation29_spill] sm:$0xff] %v11623_v4  ;;  %5987 = vrot.lane.b32.xlu0 %v11215_v5, %s7302_s17  ;;  %v4758_v4 = vld [vmem:[#allocation2 + $0x8] sm:$0xff] }
 0x825   : > { %5607 = vrot.lane.b32.xlu1 %v11215_v5, %s7299_s29 }
 0x826   : > { %v11629_v31 = vpop.permute.xlu0 %5369 }
 0x827   : > { %13136 = vst [vmem:[#allocation50_spill] sm:$0xff] %v11629_v31  ;;  %v11631_v11 = vpop.permute.xlu1 %5371 }
 0x828   : > { %13137 = vst [vmem:[#allocation28_spill] sm:$0xff] %v11631_v11  ;;  %5733 = vrot.lane.b32.xlu0 %v11330_v50, %s7300_s30 }
 0x829   : > { %5735 = vrot.lane.b32.xlu1 %v11334_v30, %s7300_s30 }
 0x82a   : > { %v11637_v44 = vpop.permute.xlu0 %5373 }
 0x82b   : > { %13138 = vst [vmem:[#allocation18_spill] sm:$0xff] %v11637_v44  ;;  %v11639_v15 = vpop.permute.xlu1 %5375 }
 0x82c   : > { %13139 = vst [vmem:[#allocation81_spill] sm:$0xff] %v11639_v15  ;;  %5861 = vrot.lane.b32.xlu0 %v11147_v33, %s7301_s6 }
 0x82d   : > { %5481 = vrot.lane.b32.xlu1 %v11147_v33, %s7298_s28 }
 0x82e   : > { %v11645_v5 = vpop.permute.xlu0 %5377 }
 0x82f   : > { %13140 = vst [vmem:[#allocation103_spill] sm:$0xff] %v11645_v5  ;;  %v11647_v31 = vpop.permute.xlu1 %5379 }
 0x830   : > { %13141 = vst [vmem:[#allocation119_spill] sm:$0xff] %v11647_v31  ;;  %5863 = vrot.lane.b32.xlu0 %v11149_v29, %s7301_s6 }
 0x831   : > { %5989 = vrot.lane.b32.xlu1 %v11221_v27, %s7302_s17 }
 0x832   : > { %v11653_v11 = vpop.permute.xlu0 %5381 }
 0x833   : > { %13142 = vst [vmem:[#allocation45_spill] sm:$0xff] %v11653_v11  ;;  %v11655_v44 = vpop.permute.xlu1 %5383 }
 0x834   : > { %13143 = vst [vmem:[#allocation167_spill] sm:$0xff] %v11655_v44  ;;  %5483 = vrot.lane.b32.xlu0 %v11149_v29, %s7298_s28 }
 0x835   : > { %5609 = vrot.lane.b32.xlu1 %v11221_v27, %s7299_s29 }
 0x836   : > { %v11661_v33 = vpop.permute.xlu0 %5385 }
 0x837   : > { %13144 = vst [vmem:[#allocation108_spill] sm:$0xff] %v11661_v33  ;;  %v11663_v5 = vpop.permute.xlu1 %5387 }
 0x838   : > { %13145 = vst [vmem:[#allocation73_spill] sm:$0xff] %v11663_v5  ;;  %5991 = vrot.lane.b32.xlu0 %v11223_v53, %s7302_s17  ;;  %v4898_v5 = vld [vmem:[#allocation2 + $0xb1] sm:$0xff] }
 0x839   : > { %5611 = vrot.lane.b32.xlu1 %v11223_v53, %s7299_s29 }
 0x83a   : > { %v11669_v31 = vpop.permute.xlu0 %5389 }
 0x83b   : > { %13146 = vst [vmem:[#allocation129_spill] sm:$0xff] %v11669_v31  ;;  %v11671_v11 = vpop.permute.xlu1 %5391 }
 0x83c   : > { %13147 = vst [vmem:[#allocation135_spill] sm:$0xff] %v11671_v11  ;;  %5737 = vrot.lane.b32.xlu0 %v11342_v63, %s7300_s30 }
 0x83d   : > { %5739 = vrot.lane.b32.xlu1 %v11346_v8, %s7300_s30 }
 0x83e   : > { %v11677_v29 = vpop.permute.xlu0 %5393 }
 0x83f   : > { %13148 = vst [vmem:[#allocation156_spill] sm:$0xff] %v11677_v29  ;;  %v11679_v27 = vpop.permute.xlu1 %5395 }
 0x840   : > { %13149 = vst [vmem:[#allocation137_spill] sm:$0xff] %v11679_v27  ;;  %5865 = vrot.lane.b32.xlu0 %v11155_v20, %s7301_s6  ;;  %v4757_v27 = vld [vmem:[#allocation2] sm:$0xff] }
 0x841   : > { %5485 = vrot.lane.b32.xlu1 %v11155_v20, %s7298_s28  ;;  %v6069_v20 = vsel %vm261_vm0, %v4757_v27, %v11249_v51 }
 0x842   : > { %v5462_v53 = vpop.permute.xlu0 %5461 }
 0x843   : > { %v5464_v31 = vpop.permute.xlu1 %5463 }
 0x844   : > { %5867 = vrot.lane.b32.xlu0 %v11157_v16, %s7301_s6  ;;  %v6101_v16 = vsel %vm1727_vm3, %v6069_v20, %v11418_v32  ;;  %v4899_v20 = vld [vmem:[#allocation2 + $0xc1] sm:$0xff] }
 0x845   : > { %5993 = vrot.lane.b32.xlu1 %v11229_v59, %s7302_s17 }
 0x846   : > { %v5590_v11 = vpop.permute.xlu0 %5589 }
 0x847   : > { %v5592_v8 = vpop.permute.xlu1 %5591 }
 0x848   : > { %5487 = vrot.lane.b32.xlu0 %v4898_v5, %s7298_s28  ;;  %v6133_v5 = vsel %vm1760_vm4, %v6101_v16, %v11557_v2  ;;  %v6070_v2 = vsel %vm261_vm0, %v4758_v4, %v11252_v43 }
 0x849   : > { %5613 = vrot.lane.b32.xlu1 %v11229_v59, %s7299_s29  ;;  %v6165_v15 = vsel %vm1793_vm5, %v6133_v5, %v5462_v53  ;;  %v4932_v5 = vld [vmem:[#allocation2 + $0xca] sm:$0xff] }
 0x84a   : > { %v5718_v29 = vpop.permute.xlu0 %5717  ;;  %v6197_v48 = vsel %vm1826_vm6, %v6165_v15, %v5590_v11  ;;  %v4994_v15 = vld [vmem:[#allocation2 + $0xc9] sm:$0xff] }
 0x84b   : > { %v5720_v33 = vpop.permute.xlu1 %5719 }
 0x84c   : > { %5995 = vrot.lane.b32.xlu0 %v11231_v47, %s7302_s17 }
 0x84d   : > { %5615 = vrot.lane.b32.xlu1 %v11231_v47, %s7299_s29  ;;  %v6229_v47 = vsel %vm1859_vm7, %v6197_v48, %v5718_v29 }
 0x84e   : > { %v5846_v44 = vpop.permute.xlu0 %5845 }
 0x84f   : > { %v5466_v59 = vpop.permute.xlu1 %5465  ;;  %v6261_v32 = vsel %vm1892_vm8, %v6229_v47, %v5846_v44 }
 0x850   : > { %5741 = vrot.lane.b32.xlu0 %v11354_v1, %s7300_s30  ;;  %v6102_v1 = vsel %vm1727_vm3, %v6070_v2, %v11420_v23 }
 0x851   : > { %5743 = vrot.lane.b32.xlu1 %v11358_v22, %s7300_s30  ;;  %v6134_v22 = vsel %vm1760_vm4, %v6102_v1, %v11559_v40 }
 0x852   : > { %v5848_v51 = vpop.permute.xlu0 %5847  ;;  %v6166_v48 = vsel %vm1793_vm5, %v6134_v22, %v5464_v31 }
 0x853   : > { %v5974_v27 = vpop.permute.xlu1 %5973  ;;  %v6198_v43 = vsel %vm1826_vm6, %v6166_v48, %v5592_v8 }
 0x854   : > { %v6293_v53 = vsel %vm1925_vm9, %v6261_v32, %v5974_v27  ;;  %5869 = vrot.lane.b32.xlu0 %v4899_v20, %s7301_s6  ;;  %v6230_v4 = vsel %vm1859_vm7, %v6198_v43, %v5720_v33  ;;  %v6071_v33 = vsel %vm261_vm0, %v11270_v25, %v11256_v12 }
 0x855   : > { %5489 = vrot.lane.b32.xlu1 %v4899_v20, %s7298_s28  ;;  %7135 = vmatprep.mubr.msk.f32.mxu0 %vm1963_vm10, %v6293_v53  ;;  %v6262_v23 = vsel %vm1892_vm8, %v6230_v4, %v5848_v51  ;;  %v6103_v47 = vsel %vm1727_vm3, %v6071_v33, %v11424_v6  ;;  %v4901_v53 = vld [vmem:[#allocation2 + $0xd9] sm:$0xff] }
 0x856   : > { %v5468_v11 = vpop.permute.xlu0 %5467  ;;  %v6135_v32 = vsel %vm1760_vm4, %v6103_v47, %v11565_v35  ;;  %v6072_v35 = vsel %vm261_vm0, %v11274_v26, %v11258_v55  ;;  %v5027_v26 = vld [vmem:[#allocation2 + $0xda] sm:$0xff] }
 0x857   : > { %v5594_v44 = vpop.permute.xlu1 %5593  ;;  %v13150_v47 = vld [vmem:[#allocation61_spill] sm:$0xff] }
 0x858   : > { %5871 = vrot.lane.b32.xlu0 %v4994_v15, %s7301_s6 }
 0x859   : > { %5997 = vrot.lane.b32.xlu1 %v11237_v34, %s7302_s17 }
 0x85a   : > { %v5976_v29 = vpop.permute.xlu0 %5975 }
 0x85b   : > { %v5596_v16 = vpop.permute.xlu1 %5595  ;;  %v6294_v40 = vsel %vm1925_vm9, %v6262_v23, %v5976_v29  ;;  %v4934_v29 = vld [vmem:[#allocation2 + $0xe2] sm:$0xff] }
 0x85c   : > { %5491 = vrot.lane.b32.xlu0 %v4994_v15, %s7298_s28  ;;  %7136 = vmatmul.mubr.msk.f32.vlgmr.msra.gmra.mxu0 %vm1963_vm10, %v6294_v40 }
 0x85d   : > { %5617 = vrot.lane.b32.xlu1 %v11237_v34, %s7299_s29  ;;  %v6167_v34 = vsel %vm1793_vm5, %v6135_v32, %v5466_v59  ;;  %v13151_v32 = vld [vmem:[#allocation151_spill] sm:$0xff] }
 0x85e   : > { %v5722_v31 = vpop.permute.xlu0 %5721  ;;  %v6199_v20 = vsel %vm1826_vm6, %v6167_v34, %v5594_v44  ;;  %v4996_v44 = vld [vmem:[#allocation2 + $0xe1] sm:$0xff] }
 0x85f   : > { %v5724_v8 = vpop.permute.xlu1 %5723  ;;  %v6231_v12 = vsel %vm1859_vm7, %v6199_v20, %v5722_v31  ;;  %v4903_v20 = vld [vmem:[#allocation2 + $0xf1] sm:$0xff] }
 0x860   : > { %5999 = vrot.lane.b32.xlu0 %v4932_v5, %s7302_s17 }
 0x861   : > { %5619 = vrot.lane.b32.xlu1 %v4932_v5, %s7299_s29 }
 0x862   : > { %v5850_v51 = vpop.permute.xlu0 %5849 }
 0x863   : > { %v5470_v27 = vpop.permute.xlu1 %5469  ;;  %v6263_v6 = vsel %vm1892_vm8, %v6231_v12, %v5850_v51  ;;  %v13152_v12 = vld [vmem:[#allocation92_spill] sm:$0xff] }
 0x864   : > { %5745 = vrot.lane.b32.xlu0 %v11366_v10, %s7300_s30  ;;  %v6104_v10 = vsel %vm1727_vm3, %v6072_v35, %v11426_v58 }
 0x865   : > { %5747 = vrot.lane.b32.xlu1 %v11370_v17, %s7300_s30  ;;  %v6136_v17 = vsel %vm1760_vm4, %v6104_v10, %v11567_v49  ;;  %v5029_v10 = vld [vmem:[#allocation2 + $0xf2] sm:$0xff] }
 0x866   : > { %v5852_v25 = vpop.permute.xlu0 %5851  ;;  %v6168_v22 = vsel %vm1793_vm5, %v6136_v17, %v5468_v11 }
 0x867   : > { %v5978_v2 = vpop.permute.xlu1 %5977  ;;  %v6200_v55 = vsel %vm1826_vm6, %v6168_v22, %v5596_v16  ;;  %v6073_v16 = vsel %vm261_vm0, %v11282_v37, %v11262_v61 }
 0x868   : > { %v6295_v59 = vsel %vm1925_vm9, %v6263_v6, %v5978_v2  ;;  %5873 = vrot.lane.b32.xlu0 %v4901_v53, %s7301_s6  ;;  %v6232_v15 = vsel %vm1859_vm7, %v6200_v55, %v5724_v8  ;;  %v6105_v40 = vsel %vm1727_vm3, %v6073_v16, %v11430_v14  ;;  %v4936_v55 = vld [vmem:[#allocation2 + $0xfa] sm:$0xff] }
 0x869   : > { %5493 = vrot.lane.b32.xlu1 %v4901_v53, %s7298_s28  ;;  %7138 = vmatprep.mubr.msk.f32.mxu0 %vm1963_vm10, %v6295_v59  ;;  %v6264_v58 = vsel %vm1892_vm8, %v6232_v15, %v5852_v25  ;;  %v6137_v8 = vsel %vm1760_vm4, %v6105_v40, %v11573_v45  ;;  %v6074_v45 = vsel %vm261_vm0, %v11286_v0, %v13152_v12  ;;  %v4998_v59 = vld [vmem:[#allocation2 + $0xf9] sm:$0xff] }
 0x86a   : > { %v5472_v1 = vpop.permute.xlu0 %5471  ;;  %v6169_v33 = vsel %vm1793_vm5, %v6137_v8, %v5470_v27  ;;  %v6106_v25 = vsel %vm1727_vm3, %v6074_v45, %v11432_v28  ;;  %v13155_v16 = vld [vmem:[#allocation69_spill] sm:$0xff]  ;;  %v4905_v8 = vld [vmem:[#allocation2 + $0x109] sm:$0xff] }
 0x86b   : > { %v5598_v48 = vpop.permute.xlu1 %5597  ;;  %v6138_v6 = vsel %vm1760_vm4, %v6106_v25, %v11575_v18 }
 0x86c   : > { %5875 = vrot.lane.b32.xlu0 %v4996_v44, %s7301_s6  ;;  %v6201_v51 = vsel %vm1826_vm6, %v6169_v33, %v5598_v48  ;;  %v6170_v53 = vsel %vm1793_vm5, %v6138_v6, %v5472_v1  ;;  %v13156_v33 = vld [vmem:[#allocation148_spill] sm:$0xff] }
 0x86d   : > { %6001 = vrot.lane.b32.xlu1 %v5027_v26, %s7302_s17  ;;  %v4938_v6 = vld [vmem:[#allocation2 + $0x112] sm:$0xff] }
 0x86e   : > { %v5980_v43 = vpop.permute.xlu0 %5979 }
 0x86f   : > { %v5600_v4 = vpop.permute.xlu1 %5599  ;;  %v6296_v49 = vsel %vm1925_vm9, %v6264_v58, %v5980_v43 }
 0x870   : > { %5495 = vrot.lane.b32.xlu0 %v4996_v44, %s7298_s28  ;;  %7139 = vmatmul.mubr.msk.f32.gmra.mxu0 %vm1963_vm10, %v6296_v49  ;;  %v6202_v0 = vsel %vm1826_vm6, %v6170_v53, %v5600_v4 }
 0x871   : > { %5621 = vrot.lane.b32.xlu1 %v5027_v26, %s7299_s29  ;;  %v13153_v26 = vld [vmem:[#allocation124_spill] sm:$0xff] }
 0x872   : > { %v5726_v11 = vpop.permute.xlu0 %5725  ;;  %v6075_v15 = vsel %vm261_vm0, %v11294_v39, %v13153_v26 }
 0x873   : > { %v5728_v23 = vpop.permute.xlu1 %5727  ;;  %v6233_v61 = vsel %vm1859_vm7, %v6201_v51, %v5726_v11  ;;  %v6107_v58 = vsel %vm1727_vm3, %v6075_v15, %v11436_v57  ;;  %v13161_v15 = vld [vmem:[#allocation95_spill] sm:$0xff] }
 0x874   : > { %6003 = vrot.lane.b32.xlu0 %v4934_v29, %s7302_s17  ;;  %v6234_v17 = vsel %vm1859_vm7, %v6202_v0, %v5728_v23  ;;  %v6139_v4 = vsel %vm1760_vm4, %v6107_v58, %v11581_v56  ;;  %v13154_v23 = vld [vmem:[#allocation10_spill] sm:$0xff]  ;;  %v6076_v56 = vsel %vm261_vm0, %v11298_v7, %v13156_v33 }
 0x875   : > { %5623 = vrot.lane.b32.xlu1 %v4934_v29, %s7299_s29  ;;  %v4940_v33 = vld [vmem:[#allocation2 + $0x12a] sm:$0xff] }
 0x876   : > { %v5854_v31 = vpop.permute.xlu0 %5853 }
 0x877   : > { %v5474_v5 = vpop.permute.xlu1 %5473  ;;  %v6265_v14 = vsel %vm1892_vm8, %v6233_v61, %v5854_v31 }
 0x878   : > { %5749 = vrot.lane.b32.xlu0 %v13150_v47, %s7300_s30  ;;  %v6171_v11 = vsel %vm1793_vm5, %v6139_v4, %v5474_v5  ;;  %v6108_v47 = vsel %vm1727_vm3, %v6076_v56, %v11438_v46  ;;  %v13162_v56 = vld [vmem:[#allocation147_spill] sm:$0xff] }
 0x879   : > { %5751 = vrot.lane.b32.xlu1 %v13151_v32, %s7300_s30  ;;  %v6140_v51 = vsel %vm1760_vm4, %v6108_v47, %v11583_v36 }
 0x87a   : > { %v5856_v37 = vpop.permute.xlu0 %5855 }
 0x87b   : > { %v5982_v34 = vpop.permute.xlu1 %5981  ;;  %v6266_v28 = vsel %vm1892_vm8, %v6234_v17, %v5856_v37 }
 0x87c   : > { %v6297_v27 = vsel %vm1925_vm9, %v6265_v14, %v5982_v34  ;;  %5877 = vrot.lane.b32.xlu0 %v4903_v20, %s7301_s6  ;;  %v5000_v14 = vld [vmem:[#allocation2 + $0x111] sm:$0xff] }
 0x87d   : > { %5497 = vrot.lane.b32.xlu1 %v4903_v20, %s7298_s28  ;;  %7141 = vmatprep.mubr.msk.f32.mxu0 %vm1963_vm10, %v6297_v27  ;;  %v5031_v34 = vld [vmem:[#allocation2 + $0x10a] sm:$0xff] }
 0x87e   : > { %v5476_v2 = vpop.permute.xlu0 %5475 }
 0x87f   : > { %v5602_v35 = vpop.permute.xlu1 %5601  ;;  %v6172_v61 = vsel %vm1793_vm5, %v6140_v51, %v5476_v2  ;;  %v13157_v2 = vld [vmem:[#allocation91_spill] sm:$0xff] }
 0x880   : > { %5879 = vrot.lane.b32.xlu0 %v4998_v59, %s7301_s6  ;;  %v6203_v29 = vsel %vm1826_vm6, %v6171_v11, %v5602_v35  ;;  %v6077_v53 = vsel %vm261_vm0, %v11306_v60, %v13157_v2 }
 0x881   : > { %6005 = vrot.lane.b32.xlu1 %v5029_v10, %s7302_s17  ;;  %v6109_v35 = vsel %vm1727_vm3, %v6077_v53, %v11447_v62 }
 0x882   : > { %v5984_v22 = vpop.permute.xlu0 %5983  ;;  %v6141_v0 = vsel %vm1760_vm4, %v6109_v35, %v11589_v13 }
 0x883   : > { %v5604_v48 = vpop.permute.xlu1 %5603  ;;  %v6298_v18 = vsel %vm1925_vm9, %v6266_v28, %v5984_v22  ;;  %v13158_v28 = vld [vmem:[#allocation71_spill] sm:$0xff] }
 0x884   : > { %5499 = vrot.lane.b32.xlu0 %v4998_v59, %s7298_s28  ;;  %7142 = vmatmul.mubr.msk.f32.gmra.mxu0 %vm1963_vm10, %v6298_v18  ;;  %v6204_v7 = vsel %vm1826_vm6, %v6172_v61, %v5604_v48  ;;  %v13159_v48 = vld [vmem:[#allocation52_spill] sm:$0xff] }
 0x885   : > { %5625 = vrot.lane.b32.xlu1 %v5029_v10, %s7299_s29 }
 0x886   : > { %v5730_v1 = vpop.permute.xlu0 %5729 }
 0x887   : > { %v5732_v44 = vpop.permute.xlu1 %5731  ;;  %v6235_v39 = vsel %vm1859_vm7, %v6203_v29, %v5730_v1  ;;  %v5033_v29 = vld [vmem:[#allocation2 + $0x122] sm:$0xff] }
 0x888   : > { %6007 = vrot.lane.b32.xlu0 %v4936_v55, %s7302_s17  ;;  %v6236_v20 = vsel %vm1859_vm7, %v6204_v7, %v5732_v44  ;;  %v4907_v44 = vld [vmem:[#allocation2 + $0x121] sm:$0xff] }
 0x889   : > { %5627 = vrot.lane.b32.xlu1 %v4936_v55, %s7299_s29  ;;  %v13160_v55 = vld [vmem:[#allocation113_spill] sm:$0xff] }
 0x88a   : > { %v5858_v43 = vpop.permute.xlu0 %5857  ;;  %v6078_v13 = vsel %vm261_vm0, %v11310_v9, %v13160_v55  ;;  %v4972_v7 = vld [vmem:[#allocation2 + $0x140] sm:$0xff] }
 0x88b   : > { %v5478_v49 = vpop.permute.xlu1 %5477  ;;  %v6267_v57 = vsel %vm1892_vm8, %v6235_v39, %v5858_v43  ;;  %v6110_v58 = vsel %vm1727_vm3, %v6078_v13, %v13161_v15  ;;  %v4973_v15 = vld [vmem:[#allocation2 + $0x150] sm:$0xff] }
 0x88c   : > { %5753 = vrot.lane.b32.xlu0 %v13154_v23, %s7300_s30  ;;  %v6173_v17 = vsel %vm1793_vm5, %v6141_v0, %v5478_v49  ;;  %v6142_v43 = vsel %vm1760_vm4, %v6110_v58, %v11591_v54  ;;  %v5002_v23 = vld [vmem:[#allocation2 + $0x129] sm:$0xff]  ;;  %v5035_v0 = vld [vmem:[#allocation2 + $0x13a] sm:$0xff] }
 0x88d   : > { %5755 = vrot.lane.b32.xlu1 %v13155_v16, %s7300_s30 }
 0x88e   : > { %v5860_v40 = vpop.permute.xlu0 %5859 }
 0x88f   : > { %v5986_v31 = vpop.permute.xlu1 %5985  ;;  %v6268_v46 = vsel %vm1892_vm8, %v6236_v20, %v5860_v40 }
 0x890   : > { %v6299_v5 = vsel %vm1925_vm9, %v6267_v57, %v5986_v31  ;;  %5881 = vrot.lane.b32.xlu0 %v4905_v8, %s7301_s6 }
 0x891   : > { %5501 = vrot.lane.b32.xlu1 %v4905_v8, %s7298_s28  ;;  %7144 = vmatprep.mubr.msk.f32.mxu0 %vm1963_vm10, %v6299_v5  ;;  %v6079_v5 = vsel %vm261_vm0, %v11318_v38, %v13162_v56  ;;  %v5037_v56 = vld [vmem:[#allocation2 + $0x152] sm:$0xff] }
 0x892   : > { %v5480_v32 = vpop.permute.xlu0 %5479  ;;  %v6111_v47 = vsel %vm1727_vm3, %v6079_v5, %v11463_v52 }
 0x893   : > { %v5606_v37 = vpop.permute.xlu1 %5605  ;;  %v6174_v49 = vsel %vm1793_vm5, %v6142_v43, %v5480_v32  ;;  %v6143_v32 = vsel %vm1760_vm4, %v6111_v47, %v11597_v19  ;;  %v4974_v43 = vld [vmem:[#allocation2 + $0x158] sm:$0xff] }
 0x894   : > { %5883 = vrot.lane.b32.xlu0 %v5000_v14, %s7301_s6  ;;  %v6205_v22 = vsel %vm1826_vm6, %v6173_v17, %v5606_v37  ;;  %v4971_v37 = vld [vmem:[#allocation2 + $0x138] sm:$0xff] }
 0x895   : > { %6009 = vrot.lane.b32.xlu1 %v5031_v34, %s7302_s17 }
 0x896   : > { %v5988_v12 = vpop.permute.xlu0 %5987 }
 0x897   : > { %v5608_v45 = vpop.permute.xlu1 %5607  ;;  %v6300_v36 = vsel %vm1925_vm9, %v6268_v46, %v5988_v12  ;;  %v4909_v12 = vld [vmem:[#allocation2 + $0x139] sm:$0xff] }
 0x898   : > { %5503 = vrot.lane.b32.xlu0 %v5000_v14, %s7298_s28  ;;  %7145 = vmatmul.mubr.msk.f32.gmra.mxu0 %vm1963_vm10, %v6300_v36  ;;  %v6206_v9 = vsel %vm1826_vm6, %v6174_v49, %v5608_v45  ;;  %v13163_v45 = vld [vmem:[#allocation3_spill] sm:$0xff] }
 0x899   : > { %5629 = vrot.lane.b32.xlu1 %v5031_v34, %s7299_s29  ;;  %v6080_v19 = vsel %vm261_vm0, %v11322_v41, %v13163_v45 }
 0x89a   : > { %v5734_v27 = vpop.permute.xlu0 %5733 }
 0x89b   : > { %v5736_v25 = vpop.permute.xlu1 %5735  ;;  %v6237_v60 = vsel %vm1859_vm7, %v6205_v22, %v5734_v27  ;;  %v13164_v27 = vld [vmem:[#allocation153_spill] sm:$0xff] }
 0x89c   : > { %6011 = vrot.lane.b32.xlu0 %v4938_v6, %s7302_s17  ;;  %v6238_v16 = vsel %vm1859_vm7, %v6206_v9, %v5736_v25  ;;  %v6112_v25 = vsel %vm1727_vm3, %v6080_v19, %v13164_v27  ;;  %v13166_v9 = vld [vmem:[#allocation46_spill] sm:$0xff] }
 0x89d   : > { %5631 = vrot.lane.b32.xlu1 %v4938_v6, %s7299_s29  ;;  %v6144_v6 = vsel %vm1760_vm4, %v6112_v25, %v11599_v21  ;;  %v4976_v25 = vld [vmem:[#allocation2 + $0x170] sm:$0xff] }
 0x89e   : > { %v5862_v59 = vpop.permute.xlu0 %5861 }
 0x89f   : > { %v5482_v10 = vpop.permute.xlu1 %5481  ;;  %v6269_v62 = vsel %vm1892_vm8, %v6237_v60, %v5862_v59  ;;  %v5004_v59 = vld [vmem:[#allocation2 + $0x141] sm:$0xff] }
 0x8a0   : > { %5757 = vrot.lane.b32.xlu0 %v13158_v28, %s7300_s30  ;;  %v6175_v14 = vsel %vm1793_vm5, %v6143_v32, %v5482_v10 }
 0x8a1   : > { %5759 = vrot.lane.b32.xlu1 %v13159_v48, %s7300_s30 }
 0x8a2   : > { %v5864_v18 = vpop.permute.xlu0 %5863 }
 0x8a3   : > { %v5990_v1 = vpop.permute.xlu1 %5989  ;;  %v6270_v39 = vsel %vm1892_vm8, %v6238_v16, %v5864_v18  ;;  %v4942_v18 = vld [vmem:[#allocation2 + $0x142] sm:$0xff]  ;;  %v13167_v16 = vld [vmem:[#allocation7_spill] sm:$0xff] }
 0x8a4   : > { %v6301_v26 = vsel %vm1925_vm9, %v6269_v62, %v5990_v1  ;;  %5885 = vrot.lane.b32.xlu0 %v4907_v44, %s7301_s6  ;;  %v13165_v62 = vld [vmem:[#allocation112_spill] sm:$0xff] }
 0x8a5   : > { %5505 = vrot.lane.b32.xlu1 %v4907_v44, %s7298_s28  ;;  %7147 = vmatprep.mubr.msk.f32.mxu0 %vm1963_vm10, %v6301_v26  ;;  %v6081_v1 = vsel %vm261_vm0, %v11330_v50, %v13165_v62  ;;  %v5008_v62 = vld [vmem:[#allocation2 + $0x171] sm:$0xff] }
 0x8a6   : > { %v5484_v4 = vpop.permute.xlu0 %5483  ;;  %v6113_v44 = vsel %vm1727_vm3, %v6081_v1, %v11477_v24 }
 0x8a7   : > { %v5610_v11 = vpop.permute.xlu1 %5609  ;;  %v6176_v53 = vsel %vm1793_vm5, %v6144_v6, %v5484_v4  ;;  %v6145_v13 = vsel %vm1760_vm4, %v6113_v44, %v11605_v3  ;;  %v6082_v3 = vsel %vm261_vm0, %v11334_v30, %v13166_v9  ;;  %v5039_v44 = vld [vmem:[#allocation2 + $0x16a] sm:$0xff] }
 0x8a8   : > { %5887 = vrot.lane.b32.xlu0 %v5002_v23, %s7301_s6  ;;  %v6207_v34 = vsel %vm1826_vm6, %v6175_v14, %v5610_v11 }
 0x8a9   : > { %6013 = vrot.lane.b32.xlu1 %v5033_v29, %s7302_s17 }
 0x8aa   : > { %v5992_v40 = vpop.permute.xlu0 %5991 }
 0x8ab   : > { %v5612_v57 = vpop.permute.xlu1 %5611  ;;  %v6302_v54 = vsel %vm1925_vm9, %v6270_v39, %v5992_v40  ;;  %v6114_v39 = vsel %vm1727_vm3, %v6082_v3, %v13167_v16  ;;  %v13168_v40 = vld [vmem:[#allocation21_spill] sm:$0xff]  ;;  %v13176_v3 = vld [vmem:[#allocation27_spill] sm:$0xff] }
 0x8ac   : > { %5507 = vrot.lane.b32.xlu0 %v5002_v23, %s7298_s28  ;;  %7148 = vmatmul.mubr.msk.f32.gmra.mxu0 %vm1963_vm10, %v6302_v54  ;;  %v6208_v41 = vsel %vm1826_vm6, %v6176_v53, %v5612_v57  ;;  %v4911_v23 = vld [vmem:[#allocation2 + $0x151] sm:$0xff]  ;;  %v6146_v57 = vsel %vm1760_vm4, %v6114_v39, %v13168_v40  ;;  %v4977_v39 = vld [vmem:[#allocation2 + $0x180] sm:$0xff] }
 0x8ad   : > { %5633 = vrot.lane.b32.xlu1 %v5033_v29, %s7299_s29 }
 0x8ae   : > { %v5738_v31 = vpop.permute.xlu0 %5737 }
 0x8af   : > { %v5740_v8 = vpop.permute.xlu1 %5739  ;;  %v6239_v38 = vsel %vm1859_vm7, %v6207_v34, %v5738_v31  ;;  %v13169_v34 = vld [vmem:[#allocation170_spill] sm:$0xff] }
 0x8b0   : > { %6015 = vrot.lane.b32.xlu0 %v4940_v33, %s7302_s17  ;;  %v6240_v10 = vsel %vm1859_vm7, %v6208_v41, %v5740_v8  ;;  %v7269_v41 = vld [vmem:[#allocation2 + $0xb0] sm:$0xff] }
 0x8b1   : > { %5635 = vrot.lane.b32.xlu1 %v4940_v33, %s7299_s29  ;;  %v5006_v33 = vld [vmem:[#allocation2 + $0x159] sm:$0xff] }
 0x8b2   : > { %v5866_v51 = vpop.permute.xlu0 %5865 }
 0x8b3   : > { %v5486_v61 = vpop.permute.xlu1 %5485  ;;  %v6271_v52 = vsel %vm1892_vm8, %v6239_v38, %v5866_v51  ;;  %v6083_v38 = vsel %vm261_vm0, %v11342_v63, %v13169_v34 }
 0x8b4   : > { %5761 = vrot.lane.b32.xlu0 %v4971_v37, %s7300_s30  ;;  %v6177_v58 = vsel %vm1793_vm5, %v6145_v13, %v5486_v61 }
 0x8b5   : > { %5763 = vrot.lane.b32.xlu1 %v4972_v7, %s7300_s30  ;;  %v4944_v7 = vld [vmem:[#allocation2 + $0x15a] sm:$0xff] }
 0x8b6   : > { %v5868_v20 = vpop.permute.xlu0 %5867 }
 0x8b7   : > { %v5994_v46 = vpop.permute.xlu1 %5993  ;;  %v6272_v17 = vsel %vm1892_vm8, %v6240_v10, %v5868_v20  ;;  %v13170_v20 = vld [vmem:[#allocation31_spill] sm:$0xff] }
 0x8b8   : > { %v6303_v36 = vsel %vm1925_vm9, %v6271_v52, %v5994_v46  ;;  %5889 = vrot.lane.b32.xlu0 %v4909_v12, %s7301_s6  ;;  %v6115_v52 = vsel %vm1727_vm3, %v6083_v38, %v13170_v20 }
 0x8b9   : > { %5509 = vrot.lane.b32.xlu1 %v4909_v12, %s7298_s28  ;;  %7150 = vmatprep.mubr.msk.f32.mxu0 %vm1963_vm10, %v6303_v36  ;;  %v13171_v12 = vld [vmem:[#allocation23_spill] sm:$0xff]  ;;  %v4975_v36 = vld [vmem:[#allocation2 + $0x168] sm:$0xff] }
 0x8ba   : > { %v5488_v2 = vpop.permute.xlu0 %5487  ;;  %v6147_v45 = vsel %vm1760_vm4, %v6115_v52, %v13171_v12  ;;  %v5010_v52 = vld [vmem:[#allocation2 + $0x189] sm:$0xff] }
 0x8bb   : > { %v5614_v35 = vpop.permute.xlu1 %5613  ;;  %v6178_v31 = vsel %vm1793_vm5, %v6146_v57, %v5488_v2  ;;  %v4978_v57 = vld [vmem:[#allocation2 + $0x188] sm:$0xff] }
 0x8bc   : > { %5891 = vrot.lane.b32.xlu0 %v5004_v59, %s7301_s6  ;;  %v6209_v4 = vsel %vm1826_vm6, %v6177_v58, %v5614_v35  ;;  %v5041_v12 = vld [vmem:[#allocation2 + $0x182] sm:$0xff] }
 0x8bd   : > { %6017 = vrot.lane.b32.xlu1 %v5035_v0, %s7302_s17 }
 0x8be   : > { %v5996_v28 = vpop.permute.xlu0 %5995 }
 0x8bf   : > { %v5616_v22 = vpop.permute.xlu1 %5615  ;;  %v6304_v21 = vsel %vm1925_vm9, %v6272_v17, %v5996_v28  ;;  %v13173_v28 = vld [vmem:[#allocation56_spill] sm:$0xff] }
 0x8c0   : > { %5511 = vrot.lane.b32.xlu0 %v5004_v59, %s7298_s28  ;;  %7151 = vmatmul.mubr.msk.f32.gmra.mxu0 %vm1963_vm10, %v6304_v21  ;;  %v6210_v30 = vsel %vm1826_vm6, %v6178_v31, %v5616_v22  ;;  %v4913_v59 = vld [vmem:[#allocation2 + $0x169] sm:$0xff] }
 0x8c1   : > { %5637 = vrot.lane.b32.xlu1 %v5035_v0, %s7299_s29  ;;  %v13172_v0 = vld [vmem:[#allocation63_spill] sm:$0xff] }
 0x8c2   : > { %v5742_v48 = vpop.permute.xlu0 %5741  ;;  %v6084_v10 = vsel %vm261_vm0, %v7269_v41, %v13172_v0  ;;  %v4979_v41 = vld [vmem:[#allocation2 + $0x198] sm:$0xff]  ;;  %v13181_v0 = vld [vmem:[#allocation97_spill] sm:$0xff] }
 0x8c3   : > { %v5744_v60 = vpop.permute.xlu1 %5743  ;;  %v6241_v50 = vsel %vm1859_vm7, %v6209_v4, %v5742_v48  ;;  %v6116_v22 = vsel %vm1727_vm3, %v6084_v10, %v13173_v28  ;;  %v4946_v4 = vld [vmem:[#allocation2 + $0x172] sm:$0xff]  ;;  %v4980_v28 = vld [vmem:[#allocation2 + $0x1a0] sm:$0xff] }
 0x8c4   : > { %6019 = vrot.lane.b32.xlu0 %v4942_v18, %s7302_s17  ;;  %v6242_v5 = vsel %vm1859_vm7, %v6210_v30, %v5744_v60  ;;  %v6148_v21 = vsel %vm1760_vm4, %v6116_v22, %v11615_v42  ;;  %v13182_v22 = vld [vmem:[#allocation50_spill] sm:$0xff] }
 0x8c5   : > { %5639 = vrot.lane.b32.xlu1 %v4942_v18, %s7299_s29 }
 0x8c6   : > { %v5870_v55 = vpop.permute.xlu0 %5869 }
 0x8c7   : > { %v5490_v26 = vpop.permute.xlu1 %5489  ;;  %v6273_v24 = vsel %vm1892_vm8, %v6241_v50, %v5870_v55  ;;  %v7270_v50 = vld [vmem:[#allocation2 + $0xc0] sm:$0xff] }
 0x8c8   : > { %5765 = vrot.lane.b32.xlu0 %v4973_v15, %s7300_s30  ;;  %v6179_v27 = vsel %vm1793_vm5, %v6147_v45, %v5490_v26 }
 0x8c9   : > { %5767 = vrot.lane.b32.xlu1 %v4974_v43, %s7300_s30 }
 0x8ca   : > { %v5872_v49 = vpop.permute.xlu0 %5871 }
 0x8cb   : > { %v5998_v11 = vpop.permute.xlu1 %5997  ;;  %v6274_v47 = vsel %vm1892_vm8, %v6242_v5, %v5872_v49  ;;  %v13174_v49 = vld [vmem:[#allocation44_spill] sm:$0xff]  ;;  %v7271_v5 = vld [vmem:[#allocation2 + $0xc8] sm:$0xff] }
 0x8cc   : > { %v6305_v29 = vsel %vm1925_vm9, %v6273_v24, %v5998_v11  ;;  %5893 = vrot.lane.b32.xlu0 %v4911_v23, %s7301_s6  ;;  %v6085_v24 = vsel %vm261_vm0, %v7270_v50, %v13174_v49  ;;  %v13175_v11 = vld [vmem:[#allocation76_spill] sm:$0xff] }
 0x8cd   : > { %5513 = vrot.lane.b32.xlu1 %v4911_v23, %s7298_s28  ;;  %7153 = vmatprep.mubr.msk.f32.mxu0 %vm1963_vm10, %v6305_v29  ;;  %v6117_v23 = vsel %vm1727_vm3, %v6085_v24, %v13175_v11  ;;  %v5043_v49 = vld [vmem:[#allocation2 + $0x19a] sm:$0xff] }
 0x8ce   : > { %v5492_v54 = vpop.permute.xlu0 %5491  ;;  %v6149_v29 = vsel %vm1760_vm4, %v6117_v23, %v13176_v3  ;;  %v13185_v24 = vld [vmem:[#allocation28_spill] sm:$0xff] }
 0x8cf   : > { %v5618_v8 = vpop.permute.xlu1 %5617  ;;  %v6180_v60 = vsel %vm1793_vm5, %v6148_v21, %v5492_v54 }
 0x8d0   : > { %5895 = vrot.lane.b32.xlu0 %v5006_v33, %s7301_s6  ;;  %v6211_v6 = vsel %vm1826_vm6, %v6179_v27, %v5618_v8 }
 0x8d1   : > { %6021 = vrot.lane.b32.xlu1 %v5037_v56, %s7302_s17 }
 0x8d2   : > { %v6000_v51 = vpop.permute.xlu0 %5999 }
 0x8d3   : > { %v5620_v32 = vpop.permute.xlu1 %5619  ;;  %v6306_v61 = vsel %vm1925_vm9, %v6274_v47, %v6000_v51  ;;  %v13177_v47 = vld [vmem:[#allocation127_spill] sm:$0xff] }
 0x8d4   : > { %5515 = vrot.lane.b32.xlu0 %v5006_v33, %s7298_s28  ;;  %7154 = vmatmul.mubr.msk.f32.gmra.mxu0 %vm1963_vm10, %v6306_v61  ;;  %v6212_v1 = vsel %vm1826_vm6, %v6180_v60, %v5620_v32  ;;  %v6086_v51 = vsel %vm261_vm0, %v7271_v5, %v13177_v47  ;;  %v13178_v61 = vld [vmem:[#allocation132_spill] sm:$0xff] }
 0x8d5   : > { %5641 = vrot.lane.b32.xlu1 %v5037_v56, %s7299_s29  ;;  %v4915_v56 = vld [vmem:[#allocation2 + $0x181] sm:$0xff]  ;;  %v13187_v47 = vld [vmem:[#allocation12_spill] sm:$0xff] }
 0x8d6   : > { %v5746_v37 = vpop.permute.xlu0 %5745 }
 0x8d7   : > { %v5748_v14 = vpop.permute.xlu1 %5747  ;;  %v6243_v63 = vsel %vm1859_vm7, %v6211_v6, %v5746_v37  ;;  %v6118_v37 = vsel %vm1727_vm3, %v6086_v51, %v13178_v61  ;;  %v13188_v61 = vld [vmem:[#allocation18_spill] sm:$0xff] }
 0x8d8   : > { %6023 = vrot.lane.b32.xlu0 %v4944_v7, %s7302_s17  ;;  %v6244_v55 = vsel %vm1859_vm7, %v6212_v1, %v5748_v14  ;;  %v13179_v14 = vld [vmem:[#allocation29_spill] sm:$0xff] }
 0x8d9   : > { %5643 = vrot.lane.b32.xlu1 %v4944_v7, %s7299_s29  ;;  %v6150_v7 = vsel %vm1760_vm4, %v6118_v37, %v13179_v14 }
 0x8da   : > { %v5874_v46 = vpop.permute.xlu0 %5873 }
 0x8db   : > { %v5494_v19 = vpop.permute.xlu1 %5493  ;;  %v6275_v53 = vsel %vm1892_vm8, %v6243_v63, %v5874_v46 }
 0x8dc   : > { %5769 = vrot.lane.b32.xlu0 %v4975_v36, %s7300_s30  ;;  %v6181_v40 = vsel %vm1793_vm5, %v6149_v29, %v5494_v19 }
 0x8dd   : > { %5771 = vrot.lane.b32.xlu1 %v4976_v25, %s7300_s30 }
 0x8de   : > { %v5876_v2 = vpop.permute.xlu0 %5875 }
 0x8df   : > { %v6002_v35 = vpop.permute.xlu1 %6001  ;;  %v6276_v13 = vsel %vm1892_vm8, %v6244_v55, %v5876_v2  ;;  %v4948_v2 = vld [vmem:[#allocation2 + $0x18a] sm:$0xff]  ;;  %v5012_v55 = vld [vmem:[#allocation2 + $0x1a1] sm:$0xff] }
 0x8e0   : > { %v6307_v17 = vsel %vm1925_vm9, %v6275_v53, %v6002_v35  ;;  %5897 = vrot.lane.b32.xlu0 %v4913_v59, %s7301_s6  ;;  %v7272_v53 = vld [vmem:[#allocation2 + $0xd8] sm:$0xff]  ;;  %v13180_v35 = vld [vmem:[#allocation93_spill] sm:$0xff] }
 0x8e1   : > { %5517 = vrot.lane.b32.xlu1 %v4913_v59, %s7298_s28  ;;  %7156 = vmatprep.mubr.msk.f32.mxu0 %vm1963_vm10, %v6307_v17  ;;  %v6087_v59 = vsel %vm261_vm0, %v7272_v53, %v13180_v35  ;;  %v13191_v53 = vld [vmem:[#allocation81_spill] sm:$0xff] }
 0x8e2   : > { %v5496_v48 = vpop.permute.xlu0 %5495  ;;  %v6119_v10 = vsel %vm1727_vm3, %v6087_v59, %v13181_v0 }
 0x8e3   : > { %v5622_v18 = vpop.permute.xlu1 %5621  ;;  %v6182_v38 = vsel %vm1793_vm5, %v6150_v7, %v5496_v48  ;;  %v6151_v21 = vsel %vm1760_vm4, %v6119_v10, %v13182_v22 }
 0x8e4   : > { %5899 = vrot.lane.b32.xlu0 %v5008_v62, %s7301_s6  ;;  %v6213_v54 = vsel %vm1826_vm6, %v6181_v40, %v5622_v18 }
 0x8e5   : > { %6025 = vrot.lane.b32.xlu1 %v5039_v44, %s7302_s17 }
 0x8e6   : > { %v6004_v26 = vpop.permute.xlu0 %6003 }
 0x8e7   : > { %v5624_v15 = vpop.permute.xlu1 %5623  ;;  %v6308_v42 = vsel %vm1925_vm9, %v6276_v13, %v6004_v26 }
 0x8e8   : > { %5519 = vrot.lane.b32.xlu0 %v5008_v62, %s7298_s28  ;;  %7157 = vmatmul.mubr.msk.f32.gmra.mxu0 %vm1963_vm10, %v6308_v42  ;;  %v6214_v46 = vsel %vm1826_vm6, %v6182_v38, %v5624_v15  ;;  %v5011_v62 = vld [vmem:[#allocation2 + $0x199] sm:$0xff]  ;;  %v13183_v42 = vld [vmem:[#allocation126_spill] sm:$0xff] }
 0x8e9   : > { %5645 = vrot.lane.b32.xlu1 %v5039_v44, %s7299_s29  ;;  %v7273_v15 = vld [vmem:[#allocation2 + $0xe0] sm:$0xff] }
 0x8ea   : > { %v5750_v58 = vpop.permute.xlu0 %5749 }
 0x8eb   : > { %v5752_v43 = vpop.permute.xlu1 %5751  ;;  %v6245_v31 = vsel %vm1859_vm7, %v6213_v54, %v5750_v58  ;;  %v6088_v58 = vsel %vm261_vm0, %v7273_v15, %v13183_v42 }
 0x8ec   : > { %6027 = vrot.lane.b32.xlu0 %v4946_v4, %s7302_s17  ;;  %v6246_v45 = vsel %vm1859_vm7, %v6214_v46, %v5752_v43 }
 0x8ed   : > { %5647 = vrot.lane.b32.xlu1 %v4946_v4, %s7299_s29  ;;  %v13184_v4 = vld [vmem:[#allocation155_spill] sm:$0xff] }
 0x8ee   : > { %v5878_v9 = vpop.permute.xlu0 %5877  ;;  %v6120_v50 = vsel %vm1727_vm3, %v6088_v58, %v13184_v4  ;;  %v13194_v58 = vld [vmem:[#allocation103_spill] sm:$0xff] }
 0x8ef   : > { %v5498_v16 = vpop.permute.xlu1 %5497  ;;  %v6277_v33 = vsel %vm1892_vm8, %v6245_v31, %v5878_v9  ;;  %v6152_v11 = vsel %vm1760_vm4, %v6120_v50, %v13185_v24  ;;  %v5044_v9 = vld [vmem:[#allocation2 + $0x1a2] sm:$0xff] }
 0x8f0   : > { %5773 = vrot.lane.b32.xlu0 %v4977_v39, %s7300_s30  ;;  %v6183_v60 = vsel %vm1793_vm5, %v6151_v21, %v5498_v16 }
 0x8f1   : > { %5775 = vrot.lane.b32.xlu1 %v4978_v57, %s7300_s30 }
 0x8f2   : > { %v5880_v8 = vpop.permute.xlu0 %5879 }
 0x8f3   : > { %v6006_v30 = vpop.permute.xlu1 %6005  ;;  %v6278_v19 = vsel %vm1892_vm8, %v6246_v45, %v5880_v8  ;;  %v7275_v45 = vld [vmem:[#allocation2 + $0xf8] sm:$0xff] }
 0x8f4   : > { %v6309_v32 = vsel %vm1925_vm9, %v6277_v33, %v6006_v30  ;;  %5901 = vrot.lane.b32.xlu0 %v4915_v56, %s7301_s6  ;;  %v7274_v30 = vld [vmem:[#allocation2 + $0xf0] sm:$0xff] }
 0x8f5   : > { %5521 = vrot.lane.b32.xlu1 %v4915_v56, %s7298_s28  ;;  %7159 = vmatprep.mubr.msk.f32.mxu0 %vm1963_vm10, %v6309_v32  ;;  %v13186_v56 = vld [vmem:[#allocation150_spill] sm:$0xff] }
 0x8f6   : > { %v5500_v34 = vpop.permute.xlu0 %5499  ;;  %v6089_v5 = vsel %vm261_vm0, %v7274_v30, %v13186_v56 }
 0x8f7   : > { %v5626_v20 = vpop.permute.xlu1 %5625  ;;  %v6184_v3 = vsel %vm1793_vm5, %v6152_v11, %v5500_v34  ;;  %v6121_v51 = vsel %vm1727_vm3, %v6089_v5, %v13187_v47 }
 0x8f8   : > { %5903 = vrot.lane.b32.xlu0 %v5010_v52, %s7301_s6  ;;  %v6215_v18 = vsel %vm1826_vm6, %v6183_v60, %v5626_v20  ;;  %v6153_v37 = vsel %vm1760_vm4, %v6121_v51, %v13188_v61 }
 0x8f9   : > { %6029 = vrot.lane.b32.xlu1 %v5041_v12, %s7302_s17 }
 0x8fa   : > { %v6008_v36 = vpop.permute.xlu0 %6007 }
 0x8fb   : > { %v5628_v27 = vpop.permute.xlu1 %5627  ;;  %v6310_v25 = vsel %vm1925_vm9, %v6278_v19, %v6008_v36  ;;  %v13189_v19 = vld [vmem:[#allocation114_spill] sm:$0xff] }
 0x8fc   : > { %5523 = vrot.lane.b32.xlu0 %v5010_v52, %s7298_s28  ;;  %7160 = vmatmul.mubr.msk.f32.gmra.mxu0 %vm1963_vm10, %v6310_v25  ;;  %v6216_v16 = vsel %vm1826_vm6, %v6184_v3, %v5628_v27  ;;  %v12069_v52 = vld [vmem:[%s12314_s2] ss:$0 sm:$0xff]  ;;  %v6090_v36 = vsel %vm261_vm0, %v7275_v45, %v13189_v19  ;;  %v7277_v3 = vld [vmem:[#allocation2 + $0x110] sm:$0xff] }
 0x8fd   : > { %5649 = vrot.lane.b32.xlu1 %v5041_v12, %s7299_s29  ;;  %v13199_v19 = vld [vmem:[#allocation157_spill] sm:$0xff] }
 0x8fe   : > { %v5754_v6 = vpop.permute.xlu0 %5753 }
 0x8ff   : > { %v5756_v63 = vpop.permute.xlu1 %5755  ;;  %v6247_v1 = vsel %vm1859_vm7, %v6215_v18, %v5754_v6  ;;  %v13190_v6 = vld [vmem:[#allocation66_spill] sm:$0xff] }
 0x900   : > { %6031 = vrot.lane.b32.xlu0 %v4948_v2, %s7302_s17  ;;  %v6248_v39 = vsel %vm1859_vm7, %v6216_v16, %v5756_v63  ;;  %v6122_v63 = vsel %vm1727_vm3, %v6090_v36, %v13190_v6 }
 0x901   : > { %5651 = vrot.lane.b32.xlu1 %v4948_v2, %s7299_s29  ;;  %v6154_v35 = vsel %vm1760_vm4, %v6122_v63, %v13191_v53 }
 0x902   : > { %v5882_v17 = vpop.permute.xlu0 %5881 }
 0x903   : > { %v5502_v48 = vpop.permute.xlu1 %5501  ;;  %v6279_v13 = vsel %vm1892_vm8, %v6247_v1, %v5882_v17 }
 0x904   : > { %5777 = vrot.lane.b32.xlu0 %v4979_v41, %s7300_s30  ;;  %v6185_v7 = vsel %vm1793_vm5, %v6153_v37, %v5502_v48 }
 0x905   : > { %5779 = vrot.lane.b32.xlu1 %v4980_v28, %s7300_s30 }
 0x906   : > { %v5884_v44 = vpop.permute.xlu0 %5883 }
 0x907   : > { %v6010_v26 = vpop.permute.xlu1 %6009  ;;  %v6280_v40 = vsel %vm1892_vm8, %v6248_v39, %v5884_v44  ;;  %v7276_v44 = vld [vmem:[#allocation2 + $0x108] sm:$0xff] }
 0x908   : > { %v6311_v43 = vsel %vm1925_vm9, %v6279_v13, %v6010_v26  ;;  %5905 = vrot.lane.b32.xlu0 %v5011_v62, %s7301_s6  ;;  %v13193_v26 = vld [vmem:[#allocation65_spill] sm:$0xff] }
 0x909   : > { %5907 = vrot.lane.b32.xlu1 %v5012_v55, %s7301_s6  ;;  %7162 = vmatprep.mubr.msk.f32.mxu0 %vm1963_vm10, %v6311_v43  ;;  %v13192_v55 = vld [vmem:[#allocation149_spill] sm:$0xff] }
 0x90a   : > { %v5504_v23 = vpop.permute.xlu0 %5503  ;;  %v6091_v13 = vsel %vm261_vm0, %v7276_v44, %v13192_v55 }
 0x90b   : > { %v5630_v29 = vpop.permute.xlu1 %5629  ;;  %v6186_v0 = vsel %vm1793_vm5, %v6154_v35, %v5504_v23  ;;  %v6123_v15 = vsel %vm1727_vm3, %v6091_v13, %v13193_v26 }
 0x90c   : > { %6033 = vrot.lane.b32.xlu0 %v5043_v49, %s7302_s17  ;;  %v6217_v34 = vsel %vm1826_vm6, %v6185_v7, %v5630_v29  ;;  %v6155_v43 = vsel %vm1760_vm4, %v6123_v15, %v13194_v58  ;;  %v13195_v29 = vld [vmem:[#allocation171_spill] sm:$0xff] }
 0x90d   : > { %6035 = vrot.lane.b32.xlu1 %v5044_v9, %s7302_s17  ;;  %s12080_s17 = scalar_lea.vmem %s12317_s5, %s6896_s21  ;;  %v6092_v16 = vsel %vm261_vm0, %v7277_v3, %v13195_v29  ;;  %v13205_v29 = vld [vmem:[#allocation19_spill] sm:$0xff] }
 0x90e   : > { %v6012_v57 = vpop.permute.xlu0 %6011 }
 0x90f   : > { %v5632_v54 = vpop.permute.xlu1 %5631  ;;  %v6312_v31 = vsel %vm1925_vm9, %v6280_v40, %v6012_v57  ;;  %v13196_v57 = vld [vmem:[#allocation133_spill] sm:$0xff] }
 0x910   : > { %7163 = vmatmul.mubr.msk.f32.gmra.mxu0 %vm1963_vm10, %v6312_v31  ;;  %v6218_v28 = vsel %vm1826_vm6, %v6186_v0, %v5632_v54  ;;  %v6124_v54 = vsel %vm1727_vm3, %v6092_v16, %v13196_v57 }
 0x912   : > { %v5758_v8 = vpop.permute.xlu0 %5757 }
 0x913   : > { %v5760_v33 = vpop.permute.xlu1 %5759  ;;  %v6249_v38 = vsel %vm1859_vm7, %v6217_v34, %v5758_v8  ;;  %v13197_v8 = vld [vmem:[#allocation119_spill] sm:$0xff] }
 0x914   : > { %v6250_v22 = vsel %vm1859_vm7, %v6218_v28, %v5760_v33  ;;  %v6156_v33 = vsel %vm1760_vm4, %v6124_v54, %v13197_v8 }
 0x916   : > { %v5886_v32 = vpop.permute.xlu0 %5885 }
 0x917   : > { %v5506_v14 = vpop.permute.xlu1 %5505  ;;  %v6281_v46 = vsel %vm1892_vm8, %v6249_v38, %v5886_v32 }
 0x918   : > { %v6187_v50 = vsel %vm1793_vm5, %v6155_v43, %v5506_v14 }
 0x91a   : > { %v5888_v20 = vpop.permute.xlu0 %5887 }
 0x91b   : > { %v6014_v12 = vpop.permute.xlu1 %6013  ;;  %v6282_v21 = vsel %vm1892_vm8, %v6250_v22, %v5888_v20 }
 0x91c   : > { %v6313_v27 = vsel %vm1925_vm9, %v6281_v46, %v6014_v12  ;;  %v7137_v25 = vpop.f32.mrf.mxu0  ;;  %v7278_v46 = vld [vmem:[#allocation2 + $0x120] sm:$0xff]  ;;  %v13198_v12 = vld [vmem:[#allocation48_spill] sm:$0xff] }
 0x91d   : > { %v6509_v2 = vadd.f32 %v7137_v25, %v12069_v52  ;;  %7165 = vmatprep.mubr.msk.f32.mxu0 %vm1963_vm10, %v6313_v27  ;;  %v6093_v45 = vsel %vm261_vm0, %v7278_v46, %v13198_v12  ;;  %v13200_v25 = vld [vmem:[#allocation45_spill] sm:$0xff] }
 0x91e   : > { %v6503_v59 = vpop.f32.mrf.mxu0  ;;  %v5508_v41 = vpop.permute.xlu0 %5507  ;;  %v6125_v36 = vsel %vm1727_vm3, %v6093_v45, %v13199_v19 }
 0x91f   : > { %6663 = vst.msk [vmem:[%s12080_s17 + $0x8] sm:$0xff] %vm261_vm0, %v6509_v2  ;;  %v5634_v10 = vpop.permute.xlu1 %5633  ;;  %v6504_v17 = vadd.f32 %v12069_v52, %v6503_v59  ;;  %v6188_v5 = vsel %vm1793_vm5, %v6156_v33, %v5508_v41  ;;  %v6157_v6 = vsel %vm1760_vm4, %v6125_v36, %v13200_v25 }
 0x920   : > { %v6219_v49 = vsel %vm1826_vm6, %v6187_v50, %v5634_v10  ;;  %v7279_v10 = vld [vmem:[#allocation2 + $0x128] sm:$0xff] }
 0x921   : > { %6662 = vst.msk [vmem:[%s12080_s17] sm:$0xff] %vm261_vm0, %v6504_v17  ;;  %v13201_v17 = vld [vmem:[#allocation128_spill] sm:$0xff] }
 0x922   : > { %v6016_v48 = vpop.permute.xlu0 %6015  ;;  %v6094_v28 = vsel %vm261_vm0, %v7279_v10, %v13201_v17  ;;  %v13211_v17 = vld [vmem:[#allocation72_spill] sm:$0xff] }
 0x923   : > { %v5636_v60 = vpop.permute.xlu1 %5635  ;;  %v6314_v18 = vsel %vm1925_vm9, %v6282_v21, %v6016_v48  ;;  %v13202_v48 = vld [vmem:[#allocation11_spill] sm:$0xff] }
 0x924   : > { %7166 = vmatmul.mubr.msk.f32.gmra.mxu0 %vm1963_vm10, %v6314_v18  ;;  %v6220_v32 = vsel %vm1826_vm6, %v6188_v5, %v5636_v60  ;;  %v6126_v60 = vsel %vm1727_vm3, %v6094_v28, %v13202_v48 }
 0x926   : > { %v5762_v62 = vpop.permute.xlu0 %5761 }
 0x927   : > { %v5764_v1 = vpop.permute.xlu1 %5763  ;;  %v6251_v24 = vsel %vm1859_vm7, %v6219_v49, %v5762_v62  ;;  %v13203_v62 = vld [vmem:[#allocation167_spill] sm:$0xff] }
 0x928   : > { %v6252_v61 = vsel %vm1859_vm7, %v6220_v32, %v5764_v1  ;;  %v6158_v1 = vsel %vm1760_vm4, %v6126_v60, %v13203_v62 }
 0x92a   : > { %v5890_v42 = vpop.permute.xlu0 %5889 }
 0x92b   : > { %v5510_v4 = vpop.permute.xlu1 %5509  ;;  %v6283_v23 = vsel %vm1892_vm8, %v6251_v24, %v5890_v42 }
 0x92c   : > { %v6189_v2 = vsel %vm1793_vm5, %v6157_v6, %v5510_v4 }
 0x92e   : > { %v5892_v11 = vpop.permute.xlu0 %5891 }
 0x92f   : > { %v6018_v9 = vpop.permute.xlu1 %6017  ;;  %v6284_v37 = vsel %vm1892_vm8, %v6252_v61, %v5892_v11 }
 0x930   : > { %v6315_v39 = vsel %vm1925_vm9, %v6283_v23, %v6018_v9  ;;  %v7140_v40 = vpop.f32.mrf.mxu0  ;;  %v7280_v23 = vld [vmem:[#allocation2 + $0x138] sm:$0xff] }
 0x931   : > { %v6519_v31 = vadd.f32 %v7140_v40, %v12069_v52  ;;  %7168 = vmatprep.mubr.msk.f32.mxu0 %vm1963_vm10, %v6315_v39  ;;  %v13204_v9 = vld [vmem:[#allocation8_spill] sm:$0xff] }
 0x932   : > { %v5512_v30 = vpop.permute.xlu0 %5511  ;;  %v6513_v56 = vpop.f32.mrf.mxu0  ;;  %v6095_v3 = vsel %vm261_vm0, %v7280_v23, %v13204_v9  ;;  %v13206_v40 = vld [vmem:[#allocation108_spill] sm:$0xff] }
 0x933   : > { %6665 = vst.msk [vmem:[%s12080_s17 + $0x18] sm:$0xff] %vm261_vm0, %v6519_v31  ;;  %v5638_v47 = vpop.permute.xlu1 %5637  ;;  %v6514_v51 = vadd.f32 %v12069_v52, %v6513_v56  ;;  %v6190_v13 = vsel %vm1793_vm5, %v6158_v1, %v5512_v30  ;;  %v6127_v16 = vsel %vm1727_vm3, %v6095_v3, %v13205_v29 }
 0x934   : > { %v6221_v53 = vsel %vm1826_vm6, %v6189_v2, %v5638_v47  ;;  %v6159_v57 = vsel %vm1760_vm4, %v6127_v16, %v13206_v40  ;;  %v7281_v47 = vld [vmem:[#allocation2 + $0x140] sm:$0xff] }
 0x935   : > { %6664 = vst.msk [vmem:[%s12080_s17 + $0x10] sm:$0xff] %vm261_vm0, %v6514_v51  ;;  %v13207_v51 = vld [vmem:[#allocation14_spill] sm:$0xff] }
 0x936   : > { %v6020_v14 = vpop.permute.xlu0 %6019  ;;  %v6096_v32 = vsel %vm261_vm0, %v7281_v47, %v13207_v51  ;;  %v7285_v51 = vld [vmem:[#allocation2 + $0x170] sm:$0xff] }
 0x937   : > { %v5640_v7 = vpop.permute.xlu1 %5639  ;;  %v6316_v34 = vsel %vm1925_vm9, %v6284_v37, %v6020_v14  ;;  %v13208_v14 = vld [vmem:[#allocation13_spill] sm:$0xff] }
 0x938   : > { %7169 = vmatmul.mubr.msk.f32.gmra.mxu0 %vm1963_vm10, %v6316_v34  ;;  %v6222_v42 = vsel %vm1826_vm6, %v6190_v13, %v5640_v7  ;;  %v6128_v7 = vsel %vm1727_vm3, %v6096_v32, %v13208_v14  ;;  %v13217_v32 = vld [vmem:[#allocation130_spill] sm:$0xff] }
 0x93a   : > { %v5766_v38 = vpop.permute.xlu0 %5765 }
 0x93b   : > { %v5768_v20 = vpop.permute.xlu1 %5767  ;;  %v6253_v35 = vsel %vm1859_vm7, %v6221_v53, %v5766_v38  ;;  %v13209_v38 = vld [vmem:[#allocation73_spill] sm:$0xff] }
 0x93c   : > { %v6254_v58 = vsel %vm1859_vm7, %v6222_v42, %v5768_v20  ;;  %v6160_v20 = vsel %vm1760_vm4, %v6128_v7, %v13209_v38  ;;  %v13219_v7 = vld [vmem:[#allocation70_spill] sm:$0xff]  ;;  %v13220_v38 = vld [vmem:[#allocation156_spill] sm:$0xff] }
 0x93e   : > { %v5894_v27 = vpop.permute.xlu0 %5893 }
 0x93f   : > { %v5514_v63 = vpop.permute.xlu1 %5513  ;;  %v6285_v41 = vsel %vm1892_vm8, %v6253_v35, %v5894_v27 }
 0x940   : > { %v6191_v31 = vsel %vm1793_vm5, %v6159_v57, %v5514_v63 }
 0x942   : > { %v5896_v59 = vpop.permute.xlu0 %5895 }
 0x943   : > { %v6022_v0 = vpop.permute.xlu1 %6021  ;;  %v6286_v43 = vsel %vm1892_vm8, %v6254_v58, %v5896_v59 }
 0x944   : > { %v6317_v22 = vsel %vm1925_vm9, %v6285_v41, %v6022_v0  ;;  %v7143_v21 = vpop.f32.mrf.mxu0  ;;  %v7282_v41 = vld [vmem:[#allocation2 + $0x150] sm:$0xff]  ;;  %v13210_v0 = vld [vmem:[#allocation17_spill] sm:$0xff] }
 0x945   : > { %v6529_v18 = vadd.f32 %v7143_v21, %v12069_v52  ;;  %7171 = vmatprep.mubr.msk.f32.mxu0 %vm1963_vm10, %v6317_v22  ;;  %v6097_v10 = vsel %vm261_vm0, %v7282_v41, %v13210_v0  ;;  %v13212_v21 = vld [vmem:[#allocation129_spill] sm:$0xff] }
 0x946   : > { %v5516_v44 = vpop.permute.xlu0 %5515  ;;  %v6523_v55 = vpop.f32.mrf.mxu0  ;;  %v6129_v28 = vsel %vm1727_vm3, %v6097_v10, %v13211_v17 }
 0x947   : > { %6667 = vst.msk [vmem:[%s12080_s17 + $0x28] sm:$0xff] %vm261_vm0, %v6529_v18  ;;  %v5642_v26 = vpop.permute.xlu1 %5641  ;;  %v6524_v15 = vadd.f32 %v12069_v52, %v6523_v55  ;;  %v6192_v45 = vsel %vm1793_vm5, %v6160_v20, %v5516_v44  ;;  %v6161_v48 = vsel %vm1760_vm4, %v6129_v28, %v13212_v21 }
 0x948   : > { %v6223_v8 = vsel %vm1826_vm6, %v6191_v31, %v5642_v26  ;;  %v7283_v26 = vld [vmem:[#allocation2 + $0x158] sm:$0xff] }
 0x949   : > { %6666 = vst.msk [vmem:[%s12080_s17 + $0x20] sm:$0xff] %vm261_vm0, %v6524_v15  ;;  %v13213_v15 = vld [vmem:[#allocation25_spill] sm:$0xff] }
 0x94a   : > { %v6024_v4 = vpop.permute.xlu0 %6023  ;;  %v6098_v42 = vsel %vm261_vm0, %v7283_v26, %v13213_v15 }
 0x94b   : > { %v5644_v50 = vpop.permute.xlu1 %5643  ;;  %v6318_v49 = vsel %vm1925_vm9, %v6286_v43, %v6024_v4  ;;  %v13214_v4 = vld [vmem:[#allocation68_spill] sm:$0xff] }
 0x94c   : > { %7172 = vmatmul.mubr.msk.f32.gmra.mxu0 %vm1963_vm10, %v6318_v49  ;;  %v6224_v27 = vsel %vm1826_vm6, %v6192_v45, %v5644_v50  ;;  %v6130_v50 = vsel %vm1727_vm3, %v6098_v42, %v13214_v4 }
 0x94e   : > { %v5770_v24 = vpop.permute.xlu0 %5769 }
 0x94f   : > { %v5772_v11 = vpop.permute.xlu1 %5771  ;;  %v6255_v33 = vsel %vm1859_vm7, %v6223_v8, %v5770_v24  ;;  %v13215_v24 = vld [vmem:[#allocation135_spill] sm:$0xff] }
 0x950   : > { %v6256_v25 = vsel %vm1859_vm7, %v6224_v27, %v5772_v11  ;;  %v6162_v11 = vsel %vm1760_vm4, %v6130_v50, %v13215_v24 }
 0x952   : > { %v5898_v39 = vpop.permute.xlu0 %5897 }
 0x953   : > { %v5518_v54 = vpop.permute.xlu1 %5517  ;;  %v6287_v56 = vsel %vm1892_vm8, %v6255_v33, %v5898_v39 }
 0x954   : > { %v6193_v18 = vsel %vm1793_vm5, %v6161_v48, %v5518_v54 }
 0x956   : > { %v5900_v30 = vpop.permute.xlu0 %5899 }
 0x957   : > { %v6026_v5 = vpop.permute.xlu1 %6025  ;;  %v6288_v6 = vsel %vm1892_vm8, %v6256_v25, %v5900_v30 }
 0x958   : > { %v6319_v61 = vsel %vm1925_vm9, %v6287_v56, %v6026_v5  ;;  %v7146_v37 = vpop.f32.mrf.mxu0  ;;  %v7284_v56 = vld [vmem:[#allocation2 + $0x168] sm:$0xff] }
 0x959   : > { %v6539_v34 = vadd.f32 %v7146_v37, %v12069_v52  ;;  %7174 = vmatprep.mubr.msk.f32.mxu0 %vm1963_vm10, %v6319_v61  ;;  %v13216_v5 = vld [vmem:[#allocation74_spill] sm:$0xff]  ;;  %v6100_v61 = vsel %vm261_vm0, %v7285_v51, %v13217_v32  ;;  %v13218_v37 = vld [vmem:[#allocation16_spill] sm:$0xff] }
 0x95a   : > { %v5520_v46 = vpop.permute.xlu0 %5519  ;;  %v6533_v12 = vpop.f32.mrf.mxu0  ;;  %v6099_v47 = vsel %vm261_vm0, %v7284_v56, %v13216_v5 }
 0x95b   : > { %6669 = vst.msk [vmem:[%s12080_s17 + $0x38] sm:$0xff] %vm261_vm0, %v6539_v34  ;;  %v5646_v19 = vpop.permute.xlu1 %5645  ;;  %v6534_v36 = vadd.f32 %v12069_v52, %v6533_v12  ;;  %v6194_v3 = vsel %vm1793_vm5, %v6162_v11, %v5520_v46  ;;  %v6131_v14 = vsel %vm1727_vm3, %v6099_v47, %v13218_v37  ;;  %v6132_v34 = vsel %vm1727_vm3, %v6100_v61, %v13219_v7  ;;  %v13221_v12 = vld [vmem:[#allocation137_spill] sm:$0xff] }
 0x95c   : > { %v6225_v62 = vsel %vm1826_vm6, %v6193_v18, %v5646_v19  ;;  %v6163_v20 = vsel %vm1760_vm4, %v6131_v14, %v13220_v38  ;;  %v6164_v45 = vsel %vm1760_vm4, %v6132_v34, %v13221_v12 }
 0x95d   : > { %6668 = vst.msk [vmem:[%s12080_s17 + $0x30] sm:$0xff] %vm261_vm0, %v6534_v36 }
 0x95e   : > { %v6028_v63 = vpop.permute.xlu0 %6027 }
 0x95f   : > { %v5648_v2 = vpop.permute.xlu1 %5647  ;;  %v6320_v53 = vsel %vm1925_vm9, %v6288_v6, %v6028_v63 }
 0x960   : > { %7175 = vmatmul.mubr.msk.f32.gmra.mxu0 %vm1963_vm10, %v6320_v53  ;;  %v6226_v39 = vsel %vm1826_vm6, %v6194_v3, %v5648_v2 }
 0x962   : > { %v5774_v35 = vpop.permute.xlu0 %5773 }
 0x963   : > { %v5776_v59 = vpop.permute.xlu1 %5775  ;;  %v6257_v1 = vsel %vm1859_vm7, %v6225_v62, %v5774_v35 }
 0x964   : > { %v6258_v40 = vsel %vm1859_vm7, %v6226_v39, %v5776_v59 }
 0x966   : > { %v5902_v22 = vpop.permute.xlu0 %5901 }
 0x967   : > { %v5522_v60 = vpop.permute.xlu1 %5521  ;;  %v6289_v55 = vsel %vm1892_vm8, %v6257_v1, %v5902_v22 }
 0x968   : > { %v6195_v19 = vsel %vm1793_vm5, %v6163_v20, %v5522_v60 }
 0x96a   : > { %v5904_v44 = vpop.permute.xlu0 %5903 }
 0x96b   : > { %v6030_v13 = vpop.permute.xlu1 %6029  ;;  %v6290_v57 = vsel %vm1892_vm8, %v6258_v40, %v5904_v44 }
 0x96c   : > { %v6321_v58 = vsel %vm1925_vm9, %v6289_v55, %v6030_v13  ;;  %v7149_v43 = vpop.f32.mrf.mxu0 }
 0x96d   : > { %v6549_v49 = vadd.f32 %v7149_v43, %v12069_v52  ;;  %7177 = vmatprep.mubr.msk.f32.mxu0 %vm1963_vm10, %v6321_v58 }
 0x96e   : > { %v5524_v23 = vpop.permute.xlu0 %5523  ;;  %v6543_v9 = vpop.f32.mrf.mxu0 }
 0x96f   : > { %6671 = vst.msk [vmem:[%s12080_s17 + $0x48] sm:$0xff] %vm261_vm0, %v6549_v49  ;;  %v5650_v29 = vpop.permute.xlu1 %5649  ;;  %v6544_v16 = vadd.f32 %v12069_v52, %v6543_v9  ;;  %v6196_v25 = vsel %vm1793_vm5, %v6164_v45, %v5524_v23 }
 0x970   : > { %v6227_v27 = vsel %vm1826_vm6, %v6195_v19, %v5650_v29 }
 0x971   : > { %6670 = vst.msk [vmem:[%s12080_s17 + $0x40] sm:$0xff] %vm261_vm0, %v6544_v16 }
 0x972   : > { %v6032_v54 = vpop.permute.xlu0 %6031 }
 0x973   : > { %v5652_v31 = vpop.permute.xlu1 %5651  ;;  %v6322_v8 = vsel %vm1925_vm9, %v6290_v57, %v6032_v54 }
 0x974   : > { %7178 = vmatmul.mubr.msk.f32.gmra.mxu0 %vm1963_vm10, %v6322_v8  ;;  %v6228_v6 = vsel %vm1826_vm6, %v6196_v25, %v5652_v31 }
 0x976   : > { %v5778_v33 = vpop.permute.xlu0 %5777 }
 0x977   : > { %v5780_v30 = vpop.permute.xlu1 %5779  ;;  %v6259_v63 = vsel %vm1859_vm7, %v6227_v27, %v5778_v33 }
 0x978   : > { %v6260_v2 = vsel %vm1859_vm7, %v6228_v6, %v5780_v30 }
 0x97a   : > { %v5906_v46 = vpop.permute.xlu0 %5905 }
 0x97b   : > { %v5908_v36 = vpop.permute.xlu1 %5907  ;;  %v6291_v53 = vsel %vm1892_vm8, %v6259_v63, %v5906_v46 }
 0x97c   : > { %v6292_v59 = vsel %vm1892_vm8, %v6260_v2, %v5908_v36 }
 0x97e   : > { %v6034_v35 = vpop.permute.xlu0 %6033 }
 0x97f   : > { %v6036_v41 = vpop.permute.xlu1 %6035  ;;  %v6323_v0 = vsel %vm1925_vm9, %v6291_v53, %v6034_v35 }
 0x980   : > { %v6324_v10 = vsel %vm1925_vm9, %v6292_v59, %v6036_v41  ;;  %v7152_v17 = vpop.f32.mrf.mxu0  ;;  %7180 = vmatprep.mubr.msk.f32.mxu0 %vm1963_vm10, %v6323_v0 }
 0x981   : > { %v6559_v28 = vadd.f32 %v7152_v17, %v12069_v52  ;;  %7181 = vmatmul.mubr.msk.f32.gmra.mxu0 %vm1963_vm10, %v6324_v10 }
 0x982   : > { %v6553_v22 = vpop.f32.mrf.mxu0 }
 0x983   : > { %6673 = vst.msk [vmem:[%s12080_s17 + $0x58] sm:$0xff] %vm261_vm0, %v6559_v28  ;;  %v6554_v21 = vadd.f32 %v12069_v52, %v6553_v22 }
 0x985   : > { %6672 = vst.msk [vmem:[%s12080_s17 + $0x50] sm:$0xff] %vm261_vm0, %v6554_v21 }
 0x994   : > { %v7155_v48 = vpop.f32.mrf.mxu0 }
 0x995   : > { %v6569_v60 = vadd.f32 %v7155_v48, %v12069_v52 }
 0x996   : > { %v6563_v18 = vpop.f32.mrf.mxu0 }
 0x997   : > { %6675 = vst.msk [vmem:[%s12080_s17 + $0x68] sm:$0xff] %vm261_vm0, %v6569_v60  ;;  %v6564_v62 = vadd.f32 %v12069_v52, %v6563_v18 }
 0x999   : > { %6674 = vst.msk [vmem:[%s12080_s17 + $0x60] sm:$0xff] %vm261_vm0, %v6564_v62 }
 0x9a8   : > { %v7158_v1 = vpop.f32.mrf.mxu0 }
 0x9a9   : > { %v6579_v44 = vadd.f32 %v7158_v1, %v12069_v52 }
 0x9aa   : > { %v6573_v55 = vpop.f32.mrf.mxu0 }
 0x9ab   : > { %6677 = vst.msk [vmem:[%s12080_s17 + $0x78] sm:$0xff] %vm261_vm0, %v6579_v44  ;;  %v6574_v13 = vadd.f32 %v12069_v52, %v6573_v55 }
 0x9ad   : > { %6676 = vst.msk [vmem:[%s12080_s17 + $0x70] sm:$0xff] %vm261_vm0, %v6574_v13 }
 0x9bc   : > { %v7161_v26 = vpop.f32.mrf.mxu0 }
 0x9bd   : > { %v6589_v15 = vadd.f32 %v7161_v26, %v12069_v52 }
 0x9be   : > { %v6583_v42 = vpop.f32.mrf.mxu0 }
 0x9bf   : > { %6679 = vst.msk [vmem:[%s12080_s17 + $0x88] sm:$0xff] %vm261_vm0, %v6589_v15  ;;  %v6584_v58 = vadd.f32 %v12069_v52, %v6583_v42 }
 0x9c1   : > { %6678 = vst.msk [vmem:[%s12080_s17 + $0x80] sm:$0xff] %vm261_vm0, %v6584_v58 }
 0x9d0   : > { %v7164_v43 = vpop.f32.mrf.mxu0 }
 0x9d1   : > { %v6599_v4 = vadd.f32 %v7164_v43, %v12069_v52 }
 0x9d2   : > { %v6593_v50 = vpop.f32.mrf.mxu0 }
 0x9d3   : > { %6681 = vst.msk [vmem:[%s12080_s17 + $0x98] sm:$0xff] %vm261_vm0, %v6599_v4  ;;  %v6594_v49 = vadd.f32 %v12069_v52, %v6593_v50 }
 0x9d5   : > { %6680 = vst.msk [vmem:[%s12080_s17 + $0x90] sm:$0xff] %vm261_vm0, %v6594_v49 }
 0x9e4   : > { %v7167_v24 = vpop.f32.mrf.mxu0 }
 0x9e5   : > { %v6609_v11 = vadd.f32 %v7167_v24, %v12069_v52 }
 0x9e6   : > { %v6603_v23 = vpop.f32.mrf.mxu0 }
 0x9e7   : > { %6683 = vst.msk [vmem:[%s12080_s17 + $0xa8] sm:$0xff] %vm261_vm0, %v6609_v11  ;;  %v6604_v9 = vadd.f32 %v12069_v52, %v6603_v23 }
 0x9e9   : > { %6682 = vst.msk [vmem:[%s12080_s17 + $0xa0] sm:$0xff] %vm261_vm0, %v6604_v9 }
 0x9f8   : > { %v7170_v3 = vpop.f32.mrf.mxu0 }
 0x9f9   : > { %v6619_v29 = vadd.f32 %v7170_v3, %v12069_v52 }
 0x9fa   : > { %v6613_v16 = vpop.f32.mrf.mxu0 }
 0x9fb   : > { %6685 = vst.msk [vmem:[%s12080_s17 + $0xb8] sm:$0xff] %vm261_vm0, %v6619_v29  ;;  %v6614_v39 = vadd.f32 %v12069_v52, %v6613_v16 }
 0x9fd   : > { %6684 = vst.msk [vmem:[%s12080_s17 + $0xb0] sm:$0xff] %vm261_vm0, %v6614_v39 }
 0xa0c   : > { %v7173_v40 = vpop.f32.mrf.mxu0 }
 0xa0d   : > { %v6629_v57 = vadd.f32 %v7173_v40, %v12069_v52 }
 0xa0e   : > { %v6623_v54 = vpop.f32.mrf.mxu0 }
 0xa0f   : > { %6687 = vst.msk [vmem:[%s12080_s17 + $0xc8] sm:$0xff] %vm261_vm0, %v6629_v57  ;;  %v6624_v31 = vadd.f32 %v12069_v52, %v6623_v54 }
 0xa11   : > { %6686 = vst.msk [vmem:[%s12080_s17 + $0xc0] sm:$0xff] %vm261_vm0, %v6624_v31 }
 0xa20   : > { %v7176_v8 = vpop.f32.mrf.mxu0 }
 0xa21   : > { %v6639_v33 = vadd.f32 %v7176_v8, %v12069_v52 }
 0xa22   : > { %v6633_v30 = vpop.f32.mrf.mxu0 }
 0xa23   : > { %6689 = vst.msk [vmem:[%s12080_s17 + $0xd8] sm:$0xff] %vm261_vm0, %v6639_v33  ;;  %v6634_v56 = vadd.f32 %v12069_v52, %v6633_v30 }
 0xa25   : > { %6688 = vst.msk [vmem:[%s12080_s17 + $0xd0] sm:$0xff] %vm261_vm0, %v6634_v56 }
 0xa34   : > { %v7179_v5 = vpop.f32.mrf.mxu0 }
 0xa35   : > { %v6649_v47 = vadd.f32 %v7179_v5, %v12069_v52 }
 0xa36   : > { %v6643_v51 = vpop.f32.mrf.mxu0 }
 0xa37   : > { %6691 = vst.msk [vmem:[%s12080_s17 + $0xe8] sm:$0xff] %vm261_vm0, %v6649_v47  ;;  %v6644_v32 = vadd.f32 %v12069_v52, %v6643_v51 }
 0xa39   : > { %6690 = vst.msk [vmem:[%s12080_s17 + $0xe0] sm:$0xff] %vm261_vm0, %v6644_v32 }
 0xa41   : > { %v7182_v61 = vpop.f32.mrf.mxu0 }
 0xa42   : > { %v6659_v37 = vadd.f32 %v7182_v61, %v12069_v52 }
 0xa43   : > { %v6653_v14 = vpop.f32.mrf.mxu0 }
 0xa44   : > { %6693 = vst.msk [vmem:[%s12080_s17 + $0xf8] sm:$0xff] %vm261_vm0, %v6659_v37  ;;  %v6654_v7 = vadd.f32 %v12069_v52, %v6653_v14 }
 0xa46   : > { %6692 = vst.msk [vmem:[%s12080_s17 + $0xf0] sm:$0xff] %vm261_vm0, %v6654_v7 }
 0xa47 PF: > { %s15_s18 = sadd.s32 1, %s7292_s18  }
 0xa48   : > { %p12_p4 = scmp.ge.s32.totalorder %s15_s18, 4  }
 0xa4a   :  { %14 = sbr.rel (!%p12_p4) target bundleno = 1 (0x1), region = 80 }

</bundles_post_ra>
